<compile_context>
chip_gen: v7x
topology: tpu7x:2x2x1
jax: 0.10.0
libtpu: 0.0.40
codegen_flags: <defaults>
</compile_context>

<pallas_src>
import jax
import jax.numpy as jnp
from jax.experimental import pallas as pl
from jax.experimental.pallas import tpu as pltpu

# ----------------------------- model config ---------------------------------
EMBED_DIM = 384          # ViT-S
DEPTH = 12
NUM_HEADS = 6
HEAD_DIM = EMBED_DIM // NUM_HEADS      # 64 (half a lane)
MLP_DIM = 4 * EMBED_DIM                # 1536
PATCH = 14
IN_CHANS = 3
IMG = 28                               # 2x2 patches -> 5 tokens per image
LN_EPS = 1e-6
K_RAW = IN_CHANS * PATCH * PATCH       # 588 im2col width
K_PAD = 640                            # lane-aligned im2col width (zero rows)

# rows of the per-layer small-vector slab: f32 (DEPTH, VEC_ROWS, MLP_DIM)
(R_LN1W, R_LN1B, R_QKVB, R_SQKV, R_PROJB, R_SO, R_G1,
 R_LN2W, R_LN2B, R_FC1B, R_SFC1, R_FC2B, R_SFC2, R_G2) = range(14)
VEC_ROWS = 16


def _ln(x, w, b):
    """LayerNorm over the last axis (eps=1e-6, as in DINOv2); f32 math."""
    mu = jnp.mean(x, axis=-1, keepdims=True)
    var = jnp.mean(jnp.square(x - mu), axis=-1, keepdims=True)
    return (x - mu) * jax.lax.rsqrt(var + LN_EPS) * w + b


# --------------------- the whole forward as one kernel ----------------------
def vit_kernel(patches_ref, pw_ref, pb_ref, cls_ref, pos_ref,
               wqkv_ref, wo_ref, w1_ref, w2_ref, vec_ref,
               nw_ref, nb_ref, hw1_ref, hb1_ref, hw2_ref, hb2_ref,
               logits_ref, tok_ref):
    layer = pl.program_id(0)
    n_tok = pos_ref.shape[0]
    n_patch = n_tok - 1
    batch = logits_ref.shape[0]
    bt, D = tok_ref.shape
    hd = D // NUM_HEADS

    # ---- grid step 0: patch embed + CLS prepend + positional add (fused) ----
    @pl.when(layer == 0)
    def _():
        logits_ref[...] = jnp.zeros_like(logits_ref)
        emb = (jnp.dot(patches_ref[...], pw_ref[...],
                       preferred_element_type=jnp.float32) + pb_ref[...])
        cls_row = cls_ref[...] + pos_ref[pl.ds(0, 1), :]
        pos_patch = pos_ref[pl.ds(1, n_patch), :]
        for bi in range(batch):                       # static, tiny batch
            tok_ref[pl.ds(bi * n_tok, 1), :] = cls_row
            tok_ref[pl.ds(bi * n_tok + 1, n_patch), :] = (
                emb[bi * n_patch:(bi + 1) * n_patch, :] + pos_patch)

    x = tok_ref[...]                                  # (bt, D) f32 residual

    # ---- per-layer small-vector slab: one DMA instead of ~14 ----------------
    vec = vec_ref[0]                                  # (VEC_ROWS, MLP_DIM) f32

    def row(r, width):
        return vec[r:r + 1, :width]

    ln1_w, ln1_b = row(R_LN1W, D), row(R_LN1B, D)
    qkv_b, s_qkv = row(R_QKVB, 3 * D), row(R_SQKV, 3 * D)
    proj_b, s_o = row(R_PROJB, D), row(R_SO, D)
    g1 = row(R_G1, D)
    ln2_w, ln2_b = row(R_LN2W, D), row(R_LN2B, D)
    fc1_b, s_fc1 = row(R_FC1B, MLP_DIM), row(R_SFC1, MLP_DIM)
    fc2_b, s_fc2 = row(R_FC2B, D), row(R_SFC2, D)
    g2 = row(R_G2, D)

    def dequant(w_ref):
        # int8 -> bf16 through i32/f32 (each hop is a plain supported convert);
        # per-output-channel scale is applied AFTER the f32 accumulation.
        return w_ref[0].astype(jnp.int32).astype(jnp.float32).astype(jnp.bfloat16)

    # ---- block-diagonal attention mask, built in-kernel ---------------------
    r_id = jax.lax.broadcasted_iota(jnp.int32, (bt, bt), 0)
    c_id = jax.lax.broadcasted_iota(jnp.int32, (bt, bt), 1)
    same = None
    for bi in range(batch):
        lo, hi = bi * n_tok, (bi + 1) * n_tok
        blk = (r_id >= lo) & (r_id < hi) & (c_id >= lo) & (c_id < hi)
        same = blk if same is None else (same | blk)

    # ---- multi-head self-attention (pre-norm, LayerScale) -------------------
    h = _ln(x, ln1_w, ln1_b).astype(jnp.bfloat16)
    qkv = (jnp.dot(h, dequant(wqkv_ref),              # single lane-dense matmul
                   preferred_element_type=jnp.float32) * s_qkv + qkv_b)

    # head_dim = 64 is half a lane: walk heads in lane-aligned PAIRS (128-wide
    # slices at 128-multiples) and isolate each head with a half-lane mask.
    lane = jax.lax.broadcasted_iota(jnp.int32, (1, 2 * hd), 1)
    half_masks = (jnp.where(lane < hd, 1.0, 0.0),
                  jnp.where(lane >= hd, 1.0, 0.0))
    ctx_pairs = []
    for pr in range(NUM_HEADS // 2):
        q_pr = qkv[:, pr * 2 * hd:(pr + 1) * 2 * hd]              # (bt, 128)
        k_pr = qkv[:, D + pr * 2 * hd:D + (pr + 1) * 2 * hd]
        v_pr = qkv[:, 2 * D + pr * 2 * hd:2 * D + (pr + 1) * 2 * hd]

        def one_head(hmask):
            s = jax.lax.dot_general(q_pr * hmask, k_pr,
                                    (((1,), (1,)), ((), ())),
                                    preferred_element_type=jnp.float32)
            s = jnp.where(same, s, -1e30)
            p = jax.nn.softmax(s, axis=-1)            # f32 softmax
            return jnp.dot(p, v_pr * hmask, preferred_element_type=jnp.float32)

        ctx_pairs.append(one_head(half_masks[0]) + one_head(half_masks[1]))
    ctx = jnp.concatenate(ctx_pairs, axis=1)          # (bt, D), lane-aligned

    attn = (jnp.dot(ctx.astype(jnp.bfloat16), dequant(wo_ref),  # single K=384 proj
                    preferred_element_type=jnp.float32) * s_o + proj_b)
    x = x + g1 * attn                                 # LayerScale + residual

    # ---- MLP (pre-norm, LayerScale) ------------------------------------------
    h2 = _ln(x, ln2_w, ln2_b).astype(jnp.bfloat16)
    m = (jnp.dot(h2, dequant(w1_ref),
                 preferred_element_type=jnp.float32) * s_fc1 + fc1_b)
    # TODO(synk): PyTorch nn.GELU() is the exact erf form; the tanh
    # approximation is used here for a Mosaic-safe lowering (~1e-3 difference).
    m = jax.nn.gelu(m, approximate=True)
    m = (jnp.dot(m.astype(jnp.bfloat16), dequant(w2_ref),
                 preferred_element_type=jnp.float32) * s_fc2 + fc2_b)
    x = x + g2 * m                                    # LayerScale + residual

    tok_ref[...] = x

    # ---- last grid step: final norm (applied twice, per the module) + head --
    @pl.when(layer == pl.num_programs(0) - 1)
    def _():
        # B is tiny & static; static 1-row slices of the in-register tokens.
        cls_tok = jnp.concatenate(
            [x[bi * n_tok:bi * n_tok + 1, :] for bi in range(batch)], axis=0)
        y = _ln(cls_tok, nw_ref[...], nb_ref[...])    # transformer final norm
        y = _ln(y, nw_ref[...], nb_ref[...])          # module re-applies it
        z = (jnp.dot(y, hw1_ref[...], preferred_element_type=jnp.float32)
             + hb1_ref[...])
        z = jnp.maximum(z, 0.0)                       # ReLU
        logits_ref[...] = (jnp.dot(z, hw2_ref[...],
                                   preferred_element_type=jnp.float32)
                           + hb2_ref[...])


# -------------------------------- forward -----------------------------------
def forward(x, w):
    B, C, H, W = x.shape
    gh, gw = H // PATCH, W // PATCH
    n_patch = gh * gw
    n_tok = n_patch + 1
    depth = w['w_qkv'].shape[0]

    # im2col glue (== Conv2d(k=14, s=14)); zero-pad K 588 -> 640 (exact)
    patches = x.reshape(B, C, gh, PATCH, gw, PATCH).transpose(0, 2, 4, 1, 3, 5)
    patches = patches.reshape(B * n_patch, C * PATCH * PATCH)
    patches = jnp.pad(patches, ((0, 0), (0, K_PAD - C * PATCH * PATCH)))
    patches = patches.astype(jnp.bfloat16)

    def const_spec(a):                      # resident input: fetched once
        zeros = (0,) * a.ndim
        return pl.BlockSpec(a.shape, lambda l, _z=zeros: _z)

    def layer_spec(a):                      # stream layer l's slice only
        tail = (0,) * (a.ndim - 1)
        return pl.BlockSpec((1,) + a.shape[1:], lambda l, _t=tail: (l,) + _t)

    const_in = [patches, w['patch_w'], w['patch_b'], w['cls'], w['pos']]
    layer_in = [w['w_qkv'], w['w_o'], w['fc1_w'], w['fc2_w'], w['vec']]
    head_in = [w['norm_w'], w['norm_b'],
               w['head_w1'], w['head_b1'], w['head_w2'], w['head_b2']]
    inputs = const_in + layer_in + head_in
    in_specs = ([const_spec(a) for a in const_in]
                + [layer_spec(a) for a in layer_in]
                + [const_spec(a) for a in head_in])

    return pl.pallas_call(
        vit_kernel,
        out_shape=jax.ShapeDtypeStruct((B, 2), jnp.float32),
        grid=(depth,),
        in_specs=in_specs,
        out_specs=pl.BlockSpec((B, 2), lambda l: (0, 0)),
        scratch_shapes=[pltpu.VMEM((B * n_tok, EMBED_DIM), jnp.float32)],
        compiler_params=pltpu.CompilerParams(
            dimension_semantics=("arbitrary",),       # layers are sequential
            vmem_limit_bytes=32 << 20),
    )(*inputs)


# ------------------------------ parameters ----------------------------------
def init_params(key):
    gh = gw = IMG // PATCH
    num_tokens = gh * gw + 1
    ks = jax.random.split(key, 8 + DEPTH)

    def norm(k, shape, scale=0.02):
        return scale * jax.random.normal(k, shape, jnp.float32)

    params = {
        'patch_w': norm(ks[0], (K_RAW, EMBED_DIM)),
        'patch_b': jnp.zeros((1, EMBED_DIM), jnp.float32),
        'cls': norm(ks[1], (1, EMBED_DIM)),
        'pos': norm(ks[2], (num_tokens, EMBED_DIM)),
        'norm_w': jnp.ones((1, EMBED_DIM), jnp.float32),
        'norm_b': jnp.zeros((1, EMBED_DIM), jnp.float32),
        'head_w1': norm(ks[3], (EMBED_DIM, 256)),
        'head_b1': jnp.zeros((1, 256), jnp.float32),
        'head_w2': norm(ks[4], (256, 2)),
        'head_b2': jnp.zeros((1, 2), jnp.float32),
    }
    blocks = []
    for i in range(DEPTH):
        bk = jax.random.split(ks[8 + i], 4)
        blocks.append({
            'ln1_w': jnp.ones((1, EMBED_DIM), jnp.float32),
            'ln1_b': jnp.zeros((1, EMBED_DIM), jnp.float32),
            # NOTE: (in, out) orientation; real nn.Linear checkpoints (out, in)
            # would need a transpose here.
            'qkv_w': norm(bk[0], (EMBED_DIM, 3 * EMBED_DIM)),
            'qkv_b': jnp.zeros((3 * EMBED_DIM,), jnp.float32),
            'proj_w': norm(bk[1], (EMBED_DIM, EMBED_DIM)),
            'proj_b': jnp.zeros((1, EMBED_DIM), jnp.float32),
            'gamma1': jnp.full((1, EMBED_DIM), 1e-5, jnp.float32),
            'ln2_w': jnp.ones((1, EMBED_DIM), jnp.float32),
            'ln2_b': jnp.zeros((1, EMBED_DIM), jnp.float32),
            'fc1_w': norm(bk[2], (EMBED_DIM, MLP_DIM)),
            'fc1_b': jnp.zeros((1, MLP_DIM), jnp.float32),
            'fc2_w': norm(bk[3], (MLP_DIM, EMBED_DIM)),
            'fc2_b': jnp.zeros((1, EMBED_DIM), jnp.float32),
            'gamma2': jnp.full((1, EMBED_DIM), 1e-5, jnp.float32),
        })
    params['blocks'] = blocks
    return params


def _quant_colwise_int8(w):
    """Symmetric per-output-channel int8 weight quantization."""
    amax = jnp.max(jnp.abs(w), axis=0)
    scale = jnp.maximum(amax, 1e-8) / 127.0
    q = jnp.clip(jnp.round(w / scale[None, :]), -127.0, 127.0).astype(jnp.int8)
    return q, scale.astype(jnp.float32)


def _pack_block(bp):
    """Fused QKV weight + int8 quantization + the per-layer small-vector slab.
    1/sqrt(head_dim) is folded into the Q third of W_qkv / qkv_b."""
    att_scale = jnp.concatenate(
        [jnp.full((EMBED_DIM,), HEAD_DIM ** -0.5, jnp.float32),
         jnp.ones((2 * EMBED_DIM,), jnp.float32)])
    q_qkv, s_qkv = _quant_colwise_int8(bp['qkv_w'] * att_scale[None, :])
    q_o, s_o = _quant_colwise_int8(bp['proj_w'])
    q_f1, s_f1 = _quant_colwise_int8(bp['fc1_w'])
    q_f2, s_f2 = _quant_colwise_int8(bp['fc2_w'])

    slab = jnp.zeros((VEC_ROWS, MLP_DIM), jnp.float32)

    def put(s, r, v):
        v = jnp.asarray(v, jnp.float32).reshape(-1)
        return s.at[r, :v.shape[0]].set(v)

    slab = put(slab, R_LN1W, bp['ln1_w'])
    slab = put(slab, R_LN1B, bp['ln1_b'])
    slab = put(slab, R_QKVB, bp['qkv_b'] * att_scale)
    slab = put(slab, R_SQKV, s_qkv)
    slab = put(slab, R_PROJB, bp['proj_b'])
    slab = put(slab, R_SO, s_o)
    slab = put(slab, R_G1, bp['gamma1'])
    slab = put(slab, R_LN2W, bp['ln2_w'])
    slab = put(slab, R_LN2B, bp['ln2_b'])
    slab = put(slab, R_FC1B, bp['fc1_b'])
    slab = put(slab, R_SFC1, s_f1)
    slab = put(slab, R_FC2B, bp['fc2_b'])
    slab = put(slab, R_SFC2, s_f2)
    slab = put(slab, R_G2, bp['gamma2'])
    return q_qkv, q_o, q_f1, q_f2, slab


def pack_params(p):
    """Host-side repack: DEPTH-stacked int8 weights + f32 vector slab."""
    per_layer = [_pack_block(bp) for bp in p['blocks']]
    return {
        # patch embedding: zero-pad im2col K 588 -> 640 (lane aligned, exact)
        'patch_w': jnp.pad(p['patch_w'],
                           ((0, K_PAD - K_RAW), (0, 0))).astype(jnp.bfloat16),
        'patch_b': p['patch_b'],
        'cls': p['cls'],
        'pos': p['pos'],
        'norm_w': p['norm_w'], 'norm_b': p['norm_b'],
        'head_w1': p['head_w1'], 'head_b1': p['head_b1'],
        'head_w2': p['head_w2'], 'head_b2': p['head_b2'],
        # per-layer stacks (leading axis = DEPTH), streamed layer-by-layer
        'w_qkv': jnp.stack([t[0] for t in per_layer]),   # (12, 384, 1152) int8
        'w_o':   jnp.stack([t[1] for t in per_layer]),   # (12, 384,  384) int8
        'fc1_w': jnp.stack([t[2] for t in per_layer]),   # (12, 384, 1536) int8
        'fc2_w': jnp.stack([t[3] for t in per_layer]),   # (12, 1536, 384) int8
        'vec':   jnp.stack([t[4] for t in per_layer]),   # (12, 16, 1536) f32
    }


# --------------------------------- main --------------------------------------
if __name__ == "__main__":
    key = jax.random.PRNGKey(0)
    pkey, xkey = jax.random.split(key)
    params = pack_params(init_params(pkey))

    x = jax.random.normal(xkey, (2, IN_CHANS, IMG, IMG), jnp.float32)

    out = jax.block_until_ready(jax.jit(forward)(x, params))

    assert out.shape == (2, 2), out.shape
    assert out.dtype == jnp.float32
    print("KERNEL_OK")
</pallas_src>

<mosaic_0001>
module attributes {stable_mosaic.version = 11 : i64} {
  func.func @vit_kernel(%arg0: i32, %arg1: memref<8x640xbf16, #tpu.memory_space<vmem>>, %arg2: memref<640x384xbf16, #tpu.memory_space<vmem>>, %arg3: memref<1x384xf32, #tpu.memory_space<vmem>>, %arg4: memref<1x384xf32, #tpu.memory_space<vmem>>, %arg5: memref<5x384xf32, #tpu.memory_space<vmem>>, %arg6: memref<1x384x1152xi8, #tpu.memory_space<vmem>>, %arg7: memref<1x384x384xi8, #tpu.memory_space<vmem>>, %arg8: memref<1x384x1536xi8, #tpu.memory_space<vmem>>, %arg9: memref<1x1536x384xi8, #tpu.memory_space<vmem>>, %arg10: memref<1x16x1536xf32, #tpu.memory_space<vmem>>, %arg11: memref<1x384xf32, #tpu.memory_space<vmem>>, %arg12: memref<1x384xf32, #tpu.memory_space<vmem>>, %arg13: memref<384x256xf32, #tpu.memory_space<vmem>>, %arg14: memref<1x256xf32, #tpu.memory_space<vmem>>, %arg15: memref<256x2xf32, #tpu.memory_space<vmem>>, %arg16: memref<1x2xf32, #tpu.memory_space<vmem>>, %arg17: memref<2x2xf32, #tpu.memory_space<vmem>>, %arg18: memref<10x384xf32, #tpu.memory_space<vmem>>) attributes {dimension_semantics = [#tpu.dimension_semantics<arbitrary>], iteration_bounds = array<i64: 12>, scalar_prefetch = 0 : i64, scratch_operands = 1 : i64, tpu.core_type = #tpu.core_type<tc>, window_params = [{pipeline_mode = #tpu.pipeline_mode<synchronous>, transform_indices = @transform_0, window_bounds = array<i64: 8, 640>}, {pipeline_mode = #tpu.pipeline_mode<synchronous>, transform_indices = @transform_1, window_bounds = array<i64: 640, 384>}, {pipeline_mode = #tpu.pipeline_mode<synchronous>, transform_indices = @transform_2, window_bounds = array<i64: 1, 384>}, {pipeline_mode = #tpu.pipeline_mode<synchronous>, transform_indices = @transform_3, window_bounds = array<i64: 1, 384>}, {pipeline_mode = #tpu.pipeline_mode<synchronous>, transform_indices = @transform_4, window_bounds = array<i64: 5, 384>}, {transform_indices = @transform_5, window_bounds = array<i64: 1, 384, 1152>}, {transform_indices = @transform_6, window_bounds = array<i64: 1, 384, 384>}, {transform_indices = @transform_7, window_bounds = array<i64: 1, 384, 1536>}, {transform_indices = @transform_8, window_bounds = array<i64: 1, 1536, 384>}, {transform_indices = @transform_9, window_bounds = array<i64: 1, 16, 1536>}, {pipeline_mode = #tpu.pipeline_mode<synchronous>, transform_indices = @transform_10, window_bounds = array<i64: 1, 384>}, {pipeline_mode = #tpu.pipeline_mode<synchronous>, transform_indices = @transform_11, window_bounds = array<i64: 1, 384>}, {pipeline_mode = #tpu.pipeline_mode<synchronous>, transform_indices = @transform_12, window_bounds = array<i64: 384, 256>}, {pipeline_mode = #tpu.pipeline_mode<synchronous>, transform_indices = @transform_13, window_bounds = array<i64: 1, 256>}, {pipeline_mode = #tpu.pipeline_mode<synchronous>, transform_indices = @transform_14, window_bounds = array<i64: 256, 2>}, {pipeline_mode = #tpu.pipeline_mode<synchronous>, transform_indices = @transform_15, window_bounds = array<i64: 1, 2>}, {pipeline_mode = #tpu.pipeline_mode<synchronous>, transform_indices = @transform_16, window_bounds = array<i64: 2, 2>}]} {
    %c0_i32 = arith.constant 0 : i32
    %0 = arith.cmpi eq, %arg0, %c0_i32 : i32
    %1 = arith.extui %0 : i1 to i32
    %c0_i32_0 = arith.constant 0 : i32
    %2 = arith.cmpi ne, %1, %c0_i32_0 : i32
    scf.if %2 {
      %cst_84 = arith.constant 0.000000e+00 : f32
      %294 = vector.broadcast %cst_84 : f32 to vector<2x2xf32>
      %c0_85 = arith.constant 0 : index
      %c0_86 = arith.constant 0 : index
      %295 = vector.load %arg17[%c0_85, %c0_86] : memref<2x2xf32, #tpu.memory_space<vmem>>, vector<2x2xf32>
      tpu.vector_store %arg17[%c0_85, %c0_86], %294 {strides = array<i32>} : memref<2x2xf32, #tpu.memory_space<vmem>>, vector<2x2xf32>,
      %c0_87 = arith.constant 0 : index
      %c0_88 = arith.constant 0 : index
      %296 = vector.load %arg1[%c0_87, %c0_88] : memref<8x640xbf16, #tpu.memory_space<vmem>>, vector<8x640xbf16>
      %c0_89 = arith.constant 0 : index
      %c0_90 = arith.constant 0 : index
      %297 = vector.load %arg2[%c0_89, %c0_90] : memref<640x384xbf16, #tpu.memory_space<vmem>>, vector<640x384xbf16>
      %cst_91 = arith.constant dense<0.000000e+00> : vector<8x384xf32>
      %298 = tpu.matmul %296, %297, %cst_91 {dimension_numbers = #tpu.dot_dimension_numbers<[1], [0], [0], [1], [0, 0, 1, 1], [], []>} : vector<8x640xbf16>, vector<640x384xbf16>, vector<8x384xf32> -> vector<8x384xf32>
      %c0_92 = arith.constant 0 : index
      %c0_93 = arith.constant 0 : index
      %299 = vector.load %arg3[%c0_92, %c0_93] : memref<1x384xf32, #tpu.memory_space<vmem>>, vector<1x384xf32>
      %300 = vector.broadcast %299 : vector<1x384xf32> to vector<8x384xf32>
      %301 = arith.addf %298, %300 : vector<8x384xf32>
      %c0_94 = arith.constant 0 : index
      %c0_95 = arith.constant 0 : index
      %302 = vector.load %arg4[%c0_94, %c0_95] : memref<1x384xf32, #tpu.memory_space<vmem>>, vector<1x384xf32>
      %c0_96 = arith.constant 0 : index
      %c0_97 = arith.constant 0 : index
      %303 = vector.load %arg5[%c0_96, %c0_97] : memref<5x384xf32, #tpu.memory_space<vmem>>, vector<1x384xf32>
      %304 = arith.addf %302, %303 : vector<1x384xf32>
      %c1 = arith.constant 1 : index
      %c0_98 = arith.constant 0 : index
      %305 = vector.load %arg5[%c1, %c0_98] : memref<5x384xf32, #tpu.memory_space<vmem>>, vector<4x384xf32>
      %c0_99 = arith.constant 0 : index
      %c0_100 = arith.constant 0 : index
      %306 = vector.load %arg18[%c0_99, %c0_100] : memref<10x384xf32, #tpu.memory_space<vmem>>, vector<1x384xf32>
      tpu.vector_store %arg18[%c0_99, %c0_100], %304 {strides = array<i32>} : memref<10x384xf32, #tpu.memory_space<vmem>>, vector<1x384xf32>,
      %307 = vector.extract_strided_slice %301 {offsets = [0, 0], sizes = [4, 384], strides = [1, 1]} : vector<8x384xf32> to vector<4x384xf32>
      %308 = arith.addf %307, %305 : vector<4x384xf32>
      %c1_101 = arith.constant 1 : index
      %c0_102 = arith.constant 0 : index
      %309 = vector.load %arg18[%c1_101, %c0_102] : memref<10x384xf32, #tpu.memory_space<vmem>>, vector<4x384xf32>
      tpu.vector_store %arg18[%c1_101, %c0_102], %308 {strides = array<i32>} : memref<10x384xf32, #tpu.memory_space<vmem>>, vector<4x384xf32>,
      %c5 = arith.constant 5 : index
      %c0_103 = arith.constant 0 : index
      %310 = vector.load %arg18[%c5, %c0_103] : memref<10x384xf32, #tpu.memory_space<vmem>>, vector<1x384xf32>
      tpu.vector_store %arg18[%c5, %c0_103], %304 {strides = array<i32>} : memref<10x384xf32, #tpu.memory_space<vmem>>, vector<1x384xf32>,
      %311 = vector.extract_strided_slice %301 {offsets = [4, 0], sizes = [4, 384], strides = [1, 1]} : vector<8x384xf32> to vector<4x384xf32>
      %312 = arith.addf %311, %305 : vector<4x384xf32>
      %c6 = arith.constant 6 : index
      %c0_104 = arith.constant 0 : index
      %313 = vector.load %arg18[%c6, %c0_104] : memref<10x384xf32, #tpu.memory_space<vmem>>, vector<4x384xf32>
      tpu.vector_store %arg18[%c6, %c0_104], %312 {strides = array<i32>} : memref<10x384xf32, #tpu.memory_space<vmem>>, vector<4x384xf32>,
    } else {
    }
    %c0 = arith.constant 0 : index
    %c0_1 = arith.constant 0 : index
    %3 = vector.load %arg18[%c0, %c0_1] : memref<10x384xf32, #tpu.memory_space<vmem>>, vector<10x384xf32>
    %c0_2 = arith.constant 0 : index
    %c0_3 = arith.constant 0 : index
    %c0_4 = arith.constant 0 : index
    %4 = vector.load %arg10[%c0_2, %c0_3, %c0_4] : memref<1x16x1536xf32, #tpu.memory_space<vmem>>, vector<1x16x1536xf32>
    %5 = vector.shape_cast %4 : vector<1x16x1536xf32> to vector<16x1536xf32>
    %6 = vector.extract_strided_slice %5 {offsets = [0, 0], sizes = [1, 384], strides = [1, 1]} : vector<16x1536xf32> to vector<1x384xf32>
    %7 = vector.extract_strided_slice %5 {offsets = [1, 0], sizes = [1, 384], strides = [1, 1]} : vector<16x1536xf32> to vector<1x384xf32>
    %8 = vector.extract_strided_slice %5 {offsets = [2, 0], sizes = [1, 1152], strides = [1, 1]} : vector<16x1536xf32> to vector<1x1152xf32>
    %9 = vector.extract_strided_slice %5 {offsets = [3, 0], sizes = [1, 1152], strides = [1, 1]} : vector<16x1536xf32> to vector<1x1152xf32>
    %10 = vector.extract_strided_slice %5 {offsets = [4, 0], sizes = [1, 384], strides = [1, 1]} : vector<16x1536xf32> to vector<1x384xf32>
    %11 = vector.extract_strided_slice %5 {offsets = [5, 0], sizes = [1, 384], strides = [1, 1]} : vector<16x1536xf32> to vector<1x384xf32>
    %12 = vector.extract_strided_slice %5 {offsets = [6, 0], sizes = [1, 384], strides = [1, 1]} : vector<16x1536xf32> to vector<1x384xf32>
    %13 = vector.extract_strided_slice %5 {offsets = [7, 0], sizes = [1, 384], strides = [1, 1]} : vector<16x1536xf32> to vector<1x384xf32>
    %14 = vector.extract_strided_slice %5 {offsets = [8, 0], sizes = [1, 384], strides = [1, 1]} : vector<16x1536xf32> to vector<1x384xf32>
    %15 = vector.extract_strided_slice %5 {offsets = [9, 0], sizes = [1, 1536], strides = [1, 1]} : vector<16x1536xf32> to vector<1x1536xf32>
    %16 = vector.extract_strided_slice %5 {offsets = [10, 0], sizes = [1, 1536], strides = [1, 1]} : vector<16x1536xf32> to vector<1x1536xf32>
    %17 = vector.extract_strided_slice %5 {offsets = [11, 0], sizes = [1, 384], strides = [1, 1]} : vector<16x1536xf32> to vector<1x384xf32>
    %18 = vector.extract_strided_slice %5 {offsets = [12, 0], sizes = [1, 384], strides = [1, 1]} : vector<16x1536xf32> to vector<1x384xf32>
    %19 = vector.extract_strided_slice %5 {offsets = [13, 0], sizes = [1, 384], strides = [1, 1]} : vector<16x1536xf32> to vector<1x384xf32>
    %20 = tpu.iota {dimensions = array<i32: 0>} : vector<10x10xi32>
    %21 = tpu.iota {dimensions = array<i32: 1>} : vector<10x10xi32>
    %c0_i32_5 = arith.constant 0 : i32
    %22 = vector.broadcast %c0_i32_5 : i32 to vector<10x10xi32>
    %23 = arith.cmpi sge, %20, %22 : vector<10x10xi32>
    %c5_i32 = arith.constant 5 : i32
    %24 = vector.broadcast %c5_i32 : i32 to vector<10x10xi32>
    %25 = arith.cmpi slt, %20, %24 : vector<10x10xi32>
    %26 = arith.andi %23, %25 : vector<10x10xi1>
    %c0_i32_6 = arith.constant 0 : i32
    %27 = vector.broadcast %c0_i32_6 : i32 to vector<10x10xi32>
    %28 = arith.cmpi sge, %21, %27 : vector<10x10xi32>
    %29 = arith.andi %26, %28 : vector<10x10xi1>
    %c5_i32_7 = arith.constant 5 : i32
    %30 = vector.broadcast %c5_i32_7 : i32 to vector<10x10xi32>
    %31 = arith.cmpi slt, %21, %30 : vector<10x10xi32>
    %32 = arith.andi %29, %31 : vector<10x10xi1>
    %c5_i32_8 = arith.constant 5 : i32
    %33 = vector.broadcast %c5_i32_8 : i32 to vector<10x10xi32>
    %34 = arith.cmpi sge, %20, %33 : vector<10x10xi32>
    %c10_i32 = arith.constant 10 : i32
    %35 = vector.broadcast %c10_i32 : i32 to vector<10x10xi32>
    %36 = arith.cmpi slt, %20, %35 : vector<10x10xi32>
    %37 = arith.andi %34, %36 : vector<10x10xi1>
    %c5_i32_9 = arith.constant 5 : i32
    %38 = vector.broadcast %c5_i32_9 : i32 to vector<10x10xi32>
    %39 = arith.cmpi sge, %21, %38 : vector<10x10xi32>
    %40 = arith.andi %37, %39 : vector<10x10xi1>
    %c10_i32_10 = arith.constant 10 : i32
    %41 = vector.broadcast %c10_i32_10 : i32 to vector<10x10xi32>
    %42 = arith.cmpi slt, %21, %41 : vector<10x10xi32>
    %43 = arith.andi %40, %42 : vector<10x10xi1>
    %44 = arith.ori %32, %43 : vector<10x10xi1>
    %cst = arith.constant dense<0.000000e+00> : vector<10xf32>
    %45 = vector.multi_reduction <add>, %3, %cst [1] : vector<10x384xf32> to vector<10xf32>
    %46 = vector.shape_cast %45 : vector<10xf32> to vector<10x1xf32>
    %cst_11 = arith.constant 3.840000e+02 : f32
    %47 = vector.broadcast %cst_11 : f32 to vector<10x1xf32>
    %48 = arith.divf %46, %47 : vector<10x1xf32>
    %49 = vector.broadcast %48 : vector<10x1xf32> to vector<10x384xf32>
    %50 = arith.subf %3, %49 : vector<10x384xf32>
    %51 = arith.mulf %50, %50 : vector<10x384xf32>
    %cst_12 = arith.constant dense<0.000000e+00> : vector<10xf32>
    %52 = vector.multi_reduction <add>, %51, %cst_12 [1] : vector<10x384xf32> to vector<10xf32>
    %53 = vector.shape_cast %52 : vector<10xf32> to vector<10x1xf32>
    %cst_13 = arith.constant 3.840000e+02 : f32
    %54 = vector.broadcast %cst_13 : f32 to vector<10x1xf32>
    %55 = arith.divf %53, %54 : vector<10x1xf32>
    %56 = vector.broadcast %48 : vector<10x1xf32> to vector<10x384xf32>
    %57 = arith.subf %3, %56 : vector<10x384xf32>
    %cst_14 = arith.constant 9.99999997E-7 : f32
    %58 = vector.broadcast %cst_14 : f32 to vector<10x1xf32>
    %59 = arith.addf %55, %58 : vector<10x1xf32>
    %60 = math.rsqrt %59 : vector<10x1xf32>
    %61 = vector.broadcast %60 : vector<10x1xf32> to vector<10x384xf32>
    %62 = arith.mulf %57, %61 : vector<10x384xf32>
    %63 = vector.broadcast %6 : vector<1x384xf32> to vector<10x384xf32>
    %64 = arith.mulf %62, %63 : vector<10x384xf32>
    %65 = vector.broadcast %7 : vector<1x384xf32> to vector<10x384xf32>
    %66 = arith.addf %64, %65 : vector<10x384xf32>
    %67 = arith.truncf %66 : vector<10x384xf32> to vector<10x384xbf16>
    %c0_15 = arith.constant 0 : index
    %c0_16 = arith.constant 0 : index
    %c0_17 = arith.constant 0 : index
    %68 = vector.load %arg6[%c0_15, %c0_16, %c0_17] : memref<1x384x1152xi8, #tpu.memory_space<vmem>>, vector<1x384x1152xi8>
    %69 = vector.shape_cast %68 : vector<1x384x1152xi8> to vector<384x1152xi8>
    %70 = arith.extsi %69 : vector<384x1152xi8> to vector<384x1152xi32>
    %71 = arith.sitofp %70 : vector<384x1152xi32> to vector<384x1152xf32>
    %72 = arith.truncf %71 : vector<384x1152xf32> to vector<384x1152xbf16>
    %cst_18 = arith.constant dense<0.000000e+00> : vector<10x1152xf32>
    %73 = tpu.matmul %67, %72, %cst_18 {dimension_numbers = #tpu.dot_dimension_numbers<[1], [0], [0], [1], [0, 0, 1, 1], [], []>} : vector<10x384xbf16>, vector<384x1152xbf16>, vector<10x1152xf32> -> vector<10x1152xf32>
    %74 = vector.broadcast %9 : vector<1x1152xf32> to vector<10x1152xf32>
    %75 = arith.mulf %73, %74 : vector<10x1152xf32>
    %76 = vector.broadcast %8 : vector<1x1152xf32> to vector<10x1152xf32>
    %77 = arith.addf %75, %76 : vector<10x1152xf32>
    %78 = tpu.iota {dimensions = array<i32: 1>} : vector<1x128xi32>
    %c64_i32 = arith.constant 64 : i32
    %79 = vector.broadcast %c64_i32 : i32 to vector<1x128xi32>
    %80 = arith.cmpi slt, %78, %79 : vector<1x128xi32>
    %cst_19 = arith.constant 1.000000e+00 : f32
    %cst_20 = arith.constant 0.000000e+00 : f32
    %81 = vector.broadcast %cst_19 : f32 to vector<1x128xf32>
    %82 = vector.broadcast %cst_20 : f32 to vector<1x128xf32>
    %83 = arith.select %80, %81, %82 : vector<1x128xi1>, vector<1x128xf32>
    %c64_i32_21 = arith.constant 64 : i32
    %84 = vector.broadcast %c64_i32_21 : i32 to vector<1x128xi32>
    %85 = arith.cmpi sge, %78, %84 : vector<1x128xi32>
    %cst_22 = arith.constant 1.000000e+00 : f32
    %cst_23 = arith.constant 0.000000e+00 : f32
    %86 = vector.broadcast %cst_22 : f32 to vector<1x128xf32>
    %87 = vector.broadcast %cst_23 : f32 to vector<1x128xf32>
    %88 = arith.select %85, %86, %87 : vector<1x128xi1>, vector<1x128xf32>
    %89 = vector.extract_strided_slice %77 {offsets = [0, 0], sizes = [10, 128], strides = [1, 1]} : vector<10x1152xf32> to vector<10x128xf32>
    %90 = vector.extract_strided_slice %77 {offsets = [0, 384], sizes = [10, 128], strides = [1, 1]} : vector<10x1152xf32> to vector<10x128xf32>
    %91 = vector.extract_strided_slice %77 {offsets = [0, 768], sizes = [10, 128], strides = [1, 1]} : vector<10x1152xf32> to vector<10x128xf32>
    %92 = vector.broadcast %83 : vector<1x128xf32> to vector<10x128xf32>
    %93 = arith.mulf %89, %92 : vector<10x128xf32>
    %cst_24 = arith.constant dense<0.000000e+00> : vector<10x10xf32>
    %94 = tpu.matmul %93, %90, %cst_24 {dimension_numbers = #tpu.dot_dimension_numbers<[1], [1], [0], [0], [0, 0, 1, 0], [], []>} : vector<10x128xf32>, vector<10x128xf32>, vector<10x10xf32> -> vector<10x10xf32>
    %cst_25 = arith.constant -1.000000e+30 : f32
    %95 = vector.broadcast %cst_25 : f32 to vector<10x10xf32>
    %96 = arith.select %44, %94, %95 : vector<10x10xi1>, vector<10x10xf32>
    %cst_26 = arith.constant dense<0xFF800000> : vector<10xf32>
    %97 = vector.multi_reduction <maximumf>, %96, %cst_26 [1] : vector<10x10xf32> to vector<10xf32>
    %cst_27 = arith.constant 0xFF800000 : f32
    %98 = vector.broadcast %cst_27 : f32 to vector<10xf32>
    %99 = arith.maximumf %98, %97 : vector<10xf32>
    %100 = vector.shape_cast %99 : vector<10xf32> to vector<10x1xf32>
    %101 = vector.broadcast %100 : vector<10x1xf32> to vector<10x10xf32>
    %102 = arith.subf %96, %101 : vector<10x10xf32>
    %103 = math.exp %102 : vector<10x10xf32>
    %cst_28 = arith.constant dense<0.000000e+00> : vector<10xf32>
    %104 = vector.multi_reduction <add>, %103, %cst_28 [1] : vector<10x10xf32> to vector<10xf32>
    %105 = vector.shape_cast %104 : vector<10xf32> to vector<10x1xf32>
    %106 = vector.broadcast %105 : vector<10x1xf32> to vector<10x10xf32>
    %107 = arith.divf %103, %106 : vector<10x10xf32>
    %108 = vector.broadcast %83 : vector<1x128xf32> to vector<10x128xf32>
    %109 = arith.mulf %91, %108 : vector<10x128xf32>
    %cst_29 = arith.constant dense<0.000000e+00> : vector<10x128xf32>
    %110 = tpu.matmul %107, %109, %cst_29 {dimension_numbers = #tpu.dot_dimension_numbers<[1], [0], [0], [1], [0, 0, 1, 1], [], []>} : vector<10x10xf32>, vector<10x128xf32>, vector<10x128xf32> -> vector<10x128xf32>
    %111 = vector.broadcast %88 : vector<1x128xf32> to vector<10x128xf32>
    %112 = arith.mulf %89, %111 : vector<10x128xf32>
    %cst_30 = arith.constant dense<0.000000e+00> : vector<10x10xf32>
    %113 = tpu.matmul %112, %90, %cst_30 {dimension_numbers = #tpu.dot_dimension_numbers<[1], [1], [0], [0], [0, 0, 1, 0], [], []>} : vector<10x128xf32>, vector<10x128xf32>, vector<10x10xf32> -> vector<10x10xf32>
    %cst_31 = arith.constant -1.000000e+30 : f32
    %114 = vector.broadcast %cst_31 : f32 to vector<10x10xf32>
    %115 = arith.select %44, %113, %114 : vector<10x10xi1>, vector<10x10xf32>
    %cst_32 = arith.constant dense<0xFF800000> : vector<10xf32>
    %116 = vector.multi_reduction <maximumf>, %115, %cst_32 [1] : vector<10x10xf32> to vector<10xf32>
    %cst_33 = arith.constant 0xFF800000 : f32
    %117 = vector.broadcast %cst_33 : f32 to vector<10xf32>
    %118 = arith.maximumf %117, %116 : vector<10xf32>
    %119 = vector.shape_cast %118 : vector<10xf32> to vector<10x1xf32>
    %120 = vector.broadcast %119 : vector<10x1xf32> to vector<10x10xf32>
    %121 = arith.subf %115, %120 : vector<10x10xf32>
    %122 = math.exp %121 : vector<10x10xf32>
    %cst_34 = arith.constant dense<0.000000e+00> : vector<10xf32>
    %123 = vector.multi_reduction <add>, %122, %cst_34 [1] : vector<10x10xf32> to vector<10xf32>
    %124 = vector.shape_cast %123 : vector<10xf32> to vector<10x1xf32>
    %125 = vector.broadcast %124 : vector<10x1xf32> to vector<10x10xf32>
    %126 = arith.divf %122, %125 : vector<10x10xf32>
    %127 = vector.broadcast %88 : vector<1x128xf32> to vector<10x128xf32>
    %128 = arith.mulf %91, %127 : vector<10x128xf32>
    %cst_35 = arith.constant dense<0.000000e+00> : vector<10x128xf32>
    %129 = tpu.matmul %126, %128, %cst_35 {dimension_numbers = #tpu.dot_dimension_numbers<[1], [0], [0], [1], [0, 0, 1, 1], [], []>} : vector<10x10xf32>, vector<10x128xf32>, vector<10x128xf32> -> vector<10x128xf32>
    %130 = arith.addf %110, %129 : vector<10x128xf32>
    %131 = vector.extract_strided_slice %77 {offsets = [0, 128], sizes = [10, 128], strides = [1, 1]} : vector<10x1152xf32> to vector<10x128xf32>
    %132 = vector.extract_strided_slice %77 {offsets = [0, 512], sizes = [10, 128], strides = [1, 1]} : vector<10x1152xf32> to vector<10x128xf32>
    %133 = vector.extract_strided_slice %77 {offsets = [0, 896], sizes = [10, 128], strides = [1, 1]} : vector<10x1152xf32> to vector<10x128xf32>
    %134 = vector.broadcast %83 : vector<1x128xf32> to vector<10x128xf32>
    %135 = arith.mulf %131, %134 : vector<10x128xf32>
    %cst_36 = arith.constant dense<0.000000e+00> : vector<10x10xf32>
    %136 = tpu.matmul %135, %132, %cst_36 {dimension_numbers = #tpu.dot_dimension_numbers<[1], [1], [0], [0], [0, 0, 1, 0], [], []>} : vector<10x128xf32>, vector<10x128xf32>, vector<10x10xf32> -> vector<10x10xf32>
    %cst_37 = arith.constant -1.000000e+30 : f32
    %137 = vector.broadcast %cst_37 : f32 to vector<10x10xf32>
    %138 = arith.select %44, %136, %137 : vector<10x10xi1>, vector<10x10xf32>
    %cst_38 = arith.constant dense<0xFF800000> : vector<10xf32>
    %139 = vector.multi_reduction <maximumf>, %138, %cst_38 [1] : vector<10x10xf32> to vector<10xf32>
    %cst_39 = arith.constant 0xFF800000 : f32
    %140 = vector.broadcast %cst_39 : f32 to vector<10xf32>
    %141 = arith.maximumf %140, %139 : vector<10xf32>
    %142 = vector.shape_cast %141 : vector<10xf32> to vector<10x1xf32>
    %143 = vector.broadcast %142 : vector<10x1xf32> to vector<10x10xf32>
    %144 = arith.subf %138, %143 : vector<10x10xf32>
    %145 = math.exp %144 : vector<10x10xf32>
    %cst_40 = arith.constant dense<0.000000e+00> : vector<10xf32>
    %146 = vector.multi_reduction <add>, %145, %cst_40 [1] : vector<10x10xf32> to vector<10xf32>
    %147 = vector.shape_cast %146 : vector<10xf32> to vector<10x1xf32>
    %148 = vector.broadcast %147 : vector<10x1xf32> to vector<10x10xf32>
    %149 = arith.divf %145, %148 : vector<10x10xf32>
    %150 = vector.broadcast %83 : vector<1x128xf32> to vector<10x128xf32>
    %151 = arith.mulf %133, %150 : vector<10x128xf32>
    %cst_41 = arith.constant dense<0.000000e+00> : vector<10x128xf32>
    %152 = tpu.matmul %149, %151, %cst_41 {dimension_numbers = #tpu.dot_dimension_numbers<[1], [0], [0], [1], [0, 0, 1, 1], [], []>} : vector<10x10xf32>, vector<10x128xf32>, vector<10x128xf32> -> vector<10x128xf32>
    %153 = vector.broadcast %88 : vector<1x128xf32> to vector<10x128xf32>
    %154 = arith.mulf %131, %153 : vector<10x128xf32>
    %cst_42 = arith.constant dense<0.000000e+00> : vector<10x10xf32>
    %155 = tpu.matmul %154, %132, %cst_42 {dimension_numbers = #tpu.dot_dimension_numbers<[1], [1], [0], [0], [0, 0, 1, 0], [], []>} : vector<10x128xf32>, vector<10x128xf32>, vector<10x10xf32> -> vector<10x10xf32>
    %cst_43 = arith.constant -1.000000e+30 : f32
    %156 = vector.broadcast %cst_43 : f32 to vector<10x10xf32>
    %157 = arith.select %44, %155, %156 : vector<10x10xi1>, vector<10x10xf32>
    %cst_44 = arith.constant dense<0xFF800000> : vector<10xf32>
    %158 = vector.multi_reduction <maximumf>, %157, %cst_44 [1] : vector<10x10xf32> to vector<10xf32>
    %cst_45 = arith.constant 0xFF800000 : f32
    %159 = vector.broadcast %cst_45 : f32 to vector<10xf32>
    %160 = arith.maximumf %159, %158 : vector<10xf32>
    %161 = vector.shape_cast %160 : vector<10xf32> to vector<10x1xf32>
    %162 = vector.broadcast %161 : vector<10x1xf32> to vector<10x10xf32>
    %163 = arith.subf %157, %162 : vector<10x10xf32>
    %164 = math.exp %163 : vector<10x10xf32>
    %cst_46 = arith.constant dense<0.000000e+00> : vector<10xf32>
    %165 = vector.multi_reduction <add>, %164, %cst_46 [1] : vector<10x10xf32> to vector<10xf32>
    %166 = vector.shape_cast %165 : vector<10xf32> to vector<10x1xf32>
    %167 = vector.broadcast %166 : vector<10x1xf32> to vector<10x10xf32>
    %168 = arith.divf %164, %167 : vector<10x10xf32>
    %169 = vector.broadcast %88 : vector<1x128xf32> to vector<10x128xf32>
    %170 = arith.mulf %133, %169 : vector<10x128xf32>
    %cst_47 = arith.constant dense<0.000000e+00> : vector<10x128xf32>
    %171 = tpu.matmul %168, %170, %cst_47 {dimension_numbers = #tpu.dot_dimension_numbers<[1], [0], [0], [1], [0, 0, 1, 1], [], []>} : vector<10x10xf32>, vector<10x128xf32>, vector<10x128xf32> -> vector<10x128xf32>
    %172 = arith.addf %152, %171 : vector<10x128xf32>
    %173 = vector.extract_strided_slice %77 {offsets = [0, 256], sizes = [10, 128], strides = [1, 1]} : vector<10x1152xf32> to vector<10x128xf32>
    %174 = vector.extract_strided_slice %77 {offsets = [0, 640], sizes = [10, 128], strides = [1, 1]} : vector<10x1152xf32> to vector<10x128xf32>
    %175 = vector.extract_strided_slice %77 {offsets = [0, 1024], sizes = [10, 128], strides = [1, 1]} : vector<10x1152xf32> to vector<10x128xf32>
    %176 = vector.broadcast %83 : vector<1x128xf32> to vector<10x128xf32>
    %177 = arith.mulf %173, %176 : vector<10x128xf32>
    %cst_48 = arith.constant dense<0.000000e+00> : vector<10x10xf32>
    %178 = tpu.matmul %177, %174, %cst_48 {dimension_numbers = #tpu.dot_dimension_numbers<[1], [1], [0], [0], [0, 0, 1, 0], [], []>} : vector<10x128xf32>, vector<10x128xf32>, vector<10x10xf32> -> vector<10x10xf32>
    %cst_49 = arith.constant -1.000000e+30 : f32
    %179 = vector.broadcast %cst_49 : f32 to vector<10x10xf32>
    %180 = arith.select %44, %178, %179 : vector<10x10xi1>, vector<10x10xf32>
    %cst_50 = arith.constant dense<0xFF800000> : vector<10xf32>
    %181 = vector.multi_reduction <maximumf>, %180, %cst_50 [1] : vector<10x10xf32> to vector<10xf32>
    %cst_51 = arith.constant 0xFF800000 : f32
    %182 = vector.broadcast %cst_51 : f32 to vector<10xf32>
    %183 = arith.maximumf %182, %181 : vector<10xf32>
    %184 = vector.shape_cast %183 : vector<10xf32> to vector<10x1xf32>
    %185 = vector.broadcast %184 : vector<10x1xf32> to vector<10x10xf32>
    %186 = arith.subf %180, %185 : vector<10x10xf32>
    %187 = math.exp %186 : vector<10x10xf32>
    %cst_52 = arith.constant dense<0.000000e+00> : vector<10xf32>
    %188 = vector.multi_reduction <add>, %187, %cst_52 [1] : vector<10x10xf32> to vector<10xf32>
    %189 = vector.shape_cast %188 : vector<10xf32> to vector<10x1xf32>
    %190 = vector.broadcast %189 : vector<10x1xf32> to vector<10x10xf32>
    %191 = arith.divf %187, %190 : vector<10x10xf32>
    %192 = vector.broadcast %83 : vector<1x128xf32> to vector<10x128xf32>
    %193 = arith.mulf %175, %192 : vector<10x128xf32>
    %cst_53 = arith.constant dense<0.000000e+00> : vector<10x128xf32>
    %194 = tpu.matmul %191, %193, %cst_53 {dimension_numbers = #tpu.dot_dimension_numbers<[1], [0], [0], [1], [0, 0, 1, 1], [], []>} : vector<10x10xf32>, vector<10x128xf32>, vector<10x128xf32> -> vector<10x128xf32>
    %195 = vector.broadcast %88 : vector<1x128xf32> to vector<10x128xf32>
    %196 = arith.mulf %173, %195 : vector<10x128xf32>
    %cst_54 = arith.constant dense<0.000000e+00> : vector<10x10xf32>
    %197 = tpu.matmul %196, %174, %cst_54 {dimension_numbers = #tpu.dot_dimension_numbers<[1], [1], [0], [0], [0, 0, 1, 0], [], []>} : vector<10x128xf32>, vector<10x128xf32>, vector<10x10xf32> -> vector<10x10xf32>
    %cst_55 = arith.constant -1.000000e+30 : f32
    %198 = vector.broadcast %cst_55 : f32 to vector<10x10xf32>
    %199 = arith.select %44, %197, %198 : vector<10x10xi1>, vector<10x10xf32>
    %cst_56 = arith.constant dense<0xFF800000> : vector<10xf32>
    %200 = vector.multi_reduction <maximumf>, %199, %cst_56 [1] : vector<10x10xf32> to vector<10xf32>
    %cst_57 = arith.constant 0xFF800000 : f32
    %201 = vector.broadcast %cst_57 : f32 to vector<10xf32>
    %202 = arith.maximumf %201, %200 : vector<10xf32>
    %203 = vector.shape_cast %202 : vector<10xf32> to vector<10x1xf32>
    %204 = vector.broadcast %203 : vector<10x1xf32> to vector<10x10xf32>
    %205 = arith.subf %199, %204 : vector<10x10xf32>
    %206 = math.exp %205 : vector<10x10xf32>
    %cst_58 = arith.constant dense<0.000000e+00> : vector<10xf32>
    %207 = vector.multi_reduction <add>, %206, %cst_58 [1] : vector<10x10xf32> to vector<10xf32>
    %208 = vector.shape_cast %207 : vector<10xf32> to vector<10x1xf32>
    %209 = vector.broadcast %208 : vector<10x1xf32> to vector<10x10xf32>
    %210 = arith.divf %206, %209 : vector<10x10xf32>
    %211 = vector.broadcast %88 : vector<1x128xf32> to vector<10x128xf32>
    %212 = arith.mulf %175, %211 : vector<10x128xf32>
    %cst_59 = arith.constant dense<0.000000e+00> : vector<10x128xf32>
    %213 = tpu.matmul %210, %212, %cst_59 {dimension_numbers = #tpu.dot_dimension_numbers<[1], [0], [0], [1], [0, 0, 1, 1], [], []>} : vector<10x10xf32>, vector<10x128xf32>, vector<10x128xf32> -> vector<10x128xf32>
    %214 = arith.addf %194, %213 : vector<10x128xf32>
    %215 = tpu.concatenate %130, %172, %214 in 1 : vector<10x128xf32>, vector<10x128xf32>, vector<10x128xf32> -> vector<10x384xf32>
    %216 = arith.truncf %215 : vector<10x384xf32> to vector<10x384xbf16>
    %c0_60 = arith.constant 0 : index
    %c0_61 = arith.constant 0 : index
    %c0_62 = arith.constant 0 : index
    %217 = vector.load %arg7[%c0_60, %c0_61, %c0_62] : memref<1x384x384xi8, #tpu.memory_space<vmem>>, vector<1x384x384xi8>
    %218 = vector.shape_cast %217 : vector<1x384x384xi8> to vector<384x384xi8>
    %219 = arith.extsi %218 : vector<384x384xi8> to vector<384x384xi32>
    %220 = arith.sitofp %219 : vector<384x384xi32> to vector<384x384xf32>
    %221 = arith.truncf %220 : vector<384x384xf32> to vector<384x384xbf16>
    %cst_63 = arith.constant dense<0.000000e+00> : vector<10x384xf32>
    %222 = tpu.matmul %216, %221, %cst_63 {dimension_numbers = #tpu.dot_dimension_numbers<[1], [0], [0], [1], [0, 0, 1, 1], [], []>} : vector<10x384xbf16>, vector<384x384xbf16>, vector<10x384xf32> -> vector<10x384xf32>
    %223 = vector.broadcast %11 : vector<1x384xf32> to vector<10x384xf32>
    %224 = arith.mulf %222, %223 : vector<10x384xf32>
    %225 = vector.broadcast %10 : vector<1x384xf32> to vector<10x384xf32>
    %226 = arith.addf %224, %225 : vector<10x384xf32>
    %227 = vector.broadcast %12 : vector<1x384xf32> to vector<10x384xf32>
    %228 = arith.mulf %227, %226 : vector<10x384xf32>
    %229 = arith.addf %3, %228 : vector<10x384xf32>
    %cst_64 = arith.constant dense<0.000000e+00> : vector<10xf32>
    %230 = vector.multi_reduction <add>, %229, %cst_64 [1] : vector<10x384xf32> to vector<10xf32>
    %231 = vector.shape_cast %230 : vector<10xf32> to vector<10x1xf32>
    %cst_65 = arith.constant 3.840000e+02 : f32
    %232 = vector.broadcast %cst_65 : f32 to vector<10x1xf32>
    %233 = arith.divf %231, %232 : vector<10x1xf32>
    %234 = vector.broadcast %233 : vector<10x1xf32> to vector<10x384xf32>
    %235 = arith.subf %229, %234 : vector<10x384xf32>
    %236 = arith.mulf %235, %235 : vector<10x384xf32>
    %cst_66 = arith.constant dense<0.000000e+00> : vector<10xf32>
    %237 = vector.multi_reduction <add>, %236, %cst_66 [1] : vector<10x384xf32> to vector<10xf32>
    %238 = vector.shape_cast %237 : vector<10xf32> to vector<10x1xf32>
    %cst_67 = arith.constant 3.840000e+02 : f32
    %239 = vector.broadcast %cst_67 : f32 to vector<10x1xf32>
    %240 = arith.divf %238, %239 : vector<10x1xf32>
    %241 = vector.broadcast %233 : vector<10x1xf32> to vector<10x384xf32>
    %242 = arith.subf %229, %241 : vector<10x384xf32>
    %cst_68 = arith.constant 9.99999997E-7 : f32
    %243 = vector.broadcast %cst_68 : f32 to vector<10x1xf32>
    %244 = arith.addf %240, %243 : vector<10x1xf32>
    %245 = math.rsqrt %244 : vector<10x1xf32>
    %246 = vector.broadcast %245 : vector<10x1xf32> to vector<10x384xf32>
    %247 = arith.mulf %242, %246 : vector<10x384xf32>
    %248 = vector.broadcast %13 : vector<1x384xf32> to vector<10x384xf32>
    %249 = arith.mulf %247, %248 : vector<10x384xf32>
    %250 = vector.broadcast %14 : vector<1x384xf32> to vector<10x384xf32>
    %251 = arith.addf %249, %250 : vector<10x384xf32>
    %252 = arith.truncf %251 : vector<10x384xf32> to vector<10x384xbf16>
    %c0_69 = arith.constant 0 : index
    %c0_70 = arith.constant 0 : index
    %c0_71 = arith.constant 0 : index
    %253 = vector.load %arg8[%c0_69, %c0_70, %c0_71] : memref<1x384x1536xi8, #tpu.memory_space<vmem>>, vector<1x384x1536xi8>
    %254 = vector.shape_cast %253 : vector<1x384x1536xi8> to vector<384x1536xi8>
    %255 = arith.extsi %254 : vector<384x1536xi8> to vector<384x1536xi32>
    %256 = arith.sitofp %255 : vector<384x1536xi32> to vector<384x1536xf32>
    %257 = arith.truncf %256 : vector<384x1536xf32> to vector<384x1536xbf16>
    %cst_72 = arith.constant dense<0.000000e+00> : vector<10x1536xf32>
    %258 = tpu.matmul %252, %257, %cst_72 {dimension_numbers = #tpu.dot_dimension_numbers<[1], [0], [0], [1], [0, 0, 1, 1], [], []>} : vector<10x384xbf16>, vector<384x1536xbf16>, vector<10x1536xf32> -> vector<10x1536xf32>
    %259 = vector.broadcast %16 : vector<1x1536xf32> to vector<10x1536xf32>
    %260 = arith.mulf %258, %259 : vector<10x1536xf32>
    %261 = vector.broadcast %15 : vector<1x1536xf32> to vector<10x1536xf32>
    %262 = arith.addf %260, %261 : vector<10x1536xf32>
    %263 = arith.mulf %262, %262 : vector<10x1536xf32>
    %264 = arith.mulf %262, %263 : vector<10x1536xf32>
    %cst_73 = arith.constant 4.471500e-02 : f32
    %265 = vector.broadcast %cst_73 : f32 to vector<10x1536xf32>
    %266 = arith.mulf %265, %264 : vector<10x1536xf32>
    %267 = arith.addf %262, %266 : vector<10x1536xf32>
    %cst_74 = arith.constant 0.797884583 : f32
    %268 = vector.broadcast %cst_74 : f32 to vector<10x1536xf32>
    %269 = arith.mulf %268, %267 : vector<10x1536xf32>
    %270 = math.tanh %269 : vector<10x1536xf32>
    %cst_75 = arith.constant 1.000000e+00 : f32
    %271 = vector.broadcast %cst_75 : f32 to vector<10x1536xf32>
    %272 = arith.addf %271, %270 : vector<10x1536xf32>
    %cst_76 = arith.constant 5.000000e-01 : f32
    %273 = vector.broadcast %cst_76 : f32 to vector<10x1536xf32>
    %274 = arith.mulf %273, %272 : vector<10x1536xf32>
    %275 = arith.mulf %262, %274 : vector<10x1536xf32>
    %276 = arith.truncf %275 : vector<10x1536xf32> to vector<10x1536xbf16>
    %c0_77 = arith.constant 0 : index
    %c0_78 = arith.constant 0 : index
    %c0_79 = arith.constant 0 : index
    %277 = vector.load %arg9[%c0_77, %c0_78, %c0_79] : memref<1x1536x384xi8, #tpu.memory_space<vmem>>, vector<1x1536x384xi8>
    %278 = vector.shape_cast %277 : vector<1x1536x384xi8> to vector<1536x384xi8>
    %279 = arith.extsi %278 : vector<1536x384xi8> to vector<1536x384xi32>
    %280 = arith.sitofp %279 : vector<1536x384xi32> to vector<1536x384xf32>
    %281 = arith.truncf %280 : vector<1536x384xf32> to vector<1536x384xbf16>
    %cst_80 = arith.constant dense<0.000000e+00> : vector<10x384xf32>
    %282 = tpu.matmul %276, %281, %cst_80 {dimension_numbers = #tpu.dot_dimension_numbers<[1], [0], [0], [1], [0, 0, 1, 1], [], []>} : vector<10x1536xbf16>, vector<1536x384xbf16>, vector<10x384xf32> -> vector<10x384xf32>
    %283 = vector.broadcast %18 : vector<1x384xf32> to vector<10x384xf32>
    %284 = arith.mulf %282, %283 : vector<10x384xf32>
    %285 = vector.broadcast %17 : vector<1x384xf32> to vector<10x384xf32>
    %286 = arith.addf %284, %285 : vector<10x384xf32>
    %287 = vector.broadcast %19 : vector<1x384xf32> to vector<10x384xf32>
    %288 = arith.mulf %287, %286 : vector<10x384xf32>
    %289 = arith.addf %229, %288 : vector<10x384xf32>
    %c0_81 = arith.constant 0 : index
    %c0_82 = arith.constant 0 : index
    %290 = vector.load %arg18[%c0_81, %c0_82] : memref<10x384xf32, #tpu.memory_space<vmem>>, vector<10x384xf32>
    tpu.vector_store %arg18[%c0_81, %c0_82], %289 {strides = array<i32>} : memref<10x384xf32, #tpu.memory_space<vmem>>, vector<10x384xf32>,
    %c11_i32 = arith.constant 11 : i32
    %291 = arith.cmpi eq, %arg0, %c11_i32 : i32
    %292 = arith.extui %291 : i1 to i32
    %c0_i32_83 = arith.constant 0 : i32
    %293 = arith.cmpi ne, %292, %c0_i32_83 : i32
    scf.if %293 {
      %294 = vector.extract_strided_slice %289 {offsets = [0, 0], sizes = [1, 384], strides = [1, 1]} : vector<10x384xf32> to vector<1x384xf32>
      %295 = vector.extract_strided_slice %289 {offsets = [5, 0], sizes = [1, 384], strides = [1, 1]} : vector<10x384xf32> to vector<1x384xf32>
      %296 = tpu.concatenate %294, %295 in 0 : vector<1x384xf32>, vector<1x384xf32> -> vector<2x384xf32>
      %c0_84 = arith.constant 0 : index
      %c0_85 = arith.constant 0 : index
      %297 = vector.load %arg11[%c0_84, %c0_85] : memref<1x384xf32, #tpu.memory_space<vmem>>, vector<1x384xf32>
      %c0_86 = arith.constant 0 : index
      %c0_87 = arith.constant 0 : index
      %298 = vector.load %arg12[%c0_86, %c0_87] : memref<1x384xf32, #tpu.memory_space<vmem>>, vector<1x384xf32>
      %cst_88 = arith.constant dense<0.000000e+00> : vector<2xf32>
      %299 = vector.multi_reduction <add>, %296, %cst_88 [1] : vector<2x384xf32> to vector<2xf32>
      %300 = vector.shape_cast %299 : vector<2xf32> to vector<2x1xf32>
      %cst_89 = arith.constant 3.840000e+02 : f32
      %301 = vector.broadcast %cst_89 : f32 to vector<2x1xf32>
      %302 = arith.divf %300, %301 : vector<2x1xf32>
      %303 = vector.broadcast %302 : vector<2x1xf32> to vector<2x384xf32>
      %304 = arith.subf %296, %303 : vector<2x384xf32>
      %305 = arith.mulf %304, %304 : vector<2x384xf32>
      %cst_90 = arith.constant dense<0.000000e+00> : vector<2xf32>
      %306 = vector.multi_reduction <add>, %305, %cst_90 [1] : vector<2x384xf32> to vector<2xf32>
      %307 = vector.shape_cast %306 : vector<2xf32> to vector<2x1xf32>
      %cst_91 = arith.constant 3.840000e+02 : f32
      %308 = vector.broadcast %cst_91 : f32 to vector<2x1xf32>
      %309 = arith.divf %307, %308 : vector<2x1xf32>
      %310 = vector.broadcast %302 : vector<2x1xf32> to vector<2x384xf32>
      %311 = arith.subf %296, %310 : vector<2x384xf32>
      %cst_92 = arith.constant 9.99999997E-7 : f32
      %312 = vector.broadcast %cst_92 : f32 to vector<2x1xf32>
      %313 = arith.addf %309, %312 : vector<2x1xf32>
      %314 = math.rsqrt %313 : vector<2x1xf32>
      %315 = vector.broadcast %314 : vector<2x1xf32> to vector<2x384xf32>
      %316 = arith.mulf %311, %315 : vector<2x384xf32>
      %317 = vector.broadcast %297 : vector<1x384xf32> to vector<2x384xf32>
      %318 = arith.mulf %316, %317 : vector<2x384xf32>
      %319 = vector.broadcast %298 : vector<1x384xf32> to vector<2x384xf32>
      %320 = arith.addf %318, %319 : vector<2x384xf32>
      %c0_93 = arith.constant 0 : index
      %c0_94 = arith.constant 0 : index
      %321 = vector.load %arg11[%c0_93, %c0_94] : memref<1x384xf32, #tpu.memory_space<vmem>>, vector<1x384xf32>
      %c0_95 = arith.constant 0 : index
      %c0_96 = arith.constant 0 : index
      %322 = vector.load %arg12[%c0_95, %c0_96] : memref<1x384xf32, #tpu.memory_space<vmem>>, vector<1x384xf32>
      %cst_97 = arith.constant dense<0.000000e+00> : vector<2xf32>
      %323 = vector.multi_reduction <add>, %320, %cst_97 [1] : vector<2x384xf32> to vector<2xf32>
      %324 = vector.shape_cast %323 : vector<2xf32> to vector<2x1xf32>
      %cst_98 = arith.constant 3.840000e+02 : f32
      %325 = vector.broadcast %cst_98 : f32 to vector<2x1xf32>
      %326 = arith.divf %324, %325 : vector<2x1xf32>
      %327 = vector.broadcast %326 : vector<2x1xf32> to vector<2x384xf32>
      %328 = arith.subf %320, %327 : vector<2x384xf32>
      %329 = arith.mulf %328, %328 : vector<2x384xf32>
      %cst_99 = arith.constant dense<0.000000e+00> : vector<2xf32>
      %330 = vector.multi_reduction <add>, %329, %cst_99 [1] : vector<2x384xf32> to vector<2xf32>
      %331 = vector.shape_cast %330 : vector<2xf32> to vector<2x1xf32>
      %cst_100 = arith.constant 3.840000e+02 : f32
      %332 = vector.broadcast %cst_100 : f32 to vector<2x1xf32>
      %333 = arith.divf %331, %332 : vector<2x1xf32>
      %334 = vector.broadcast %326 : vector<2x1xf32> to vector<2x384xf32>
      %335 = arith.subf %320, %334 : vector<2x384xf32>
      %cst_101 = arith.constant 9.99999997E-7 : f32
      %336 = vector.broadcast %cst_101 : f32 to vector<2x1xf32>
      %337 = arith.addf %333, %336 : vector<2x1xf32>
      %338 = math.rsqrt %337 : vector<2x1xf32>
      %339 = vector.broadcast %338 : vector<2x1xf32> to vector<2x384xf32>
      %340 = arith.mulf %335, %339 : vector<2x384xf32>
      %341 = vector.broadcast %321 : vector<1x384xf32> to vector<2x384xf32>
      %342 = arith.mulf %340, %341 : vector<2x384xf32>
      %343 = vector.broadcast %322 : vector<1x384xf32> to vector<2x384xf32>
      %344 = arith.addf %342, %343 : vector<2x384xf32>
      %c0_102 = arith.constant 0 : index
      %c0_103 = arith.constant 0 : index
      %345 = vector.load %arg13[%c0_102, %c0_103] : memref<384x256xf32, #tpu.memory_space<vmem>>, vector<384x256xf32>
      %cst_104 = arith.constant dense<0.000000e+00> : vector<2x256xf32>
      %346 = tpu.matmul %344, %345, %cst_104 {dimension_numbers = #tpu.dot_dimension_numbers<[1], [0], [0], [1], [0, 0, 1, 1], [], []>} : vector<2x384xf32>, vector<384x256xf32>, vector<2x256xf32> -> vector<2x256xf32>
      %c0_105 = arith.constant 0 : index
      %c0_106 = arith.constant 0 : index
      %347 = vector.load %arg14[%c0_105, %c0_106] : memref<1x256xf32, #tpu.memory_space<vmem>>, vector<1x256xf32>
      %348 = vector.broadcast %347 : vector<1x256xf32> to vector<2x256xf32>
      %349 = arith.addf %346, %348 : vector<2x256xf32>
      %cst_107 = arith.constant 0.000000e+00 : f32
      %350 = vector.broadcast %cst_107 : f32 to vector<2x256xf32>
      %351 = arith.maximumf %349, %350 : vector<2x256xf32>
      %c0_108 = arith.constant 0 : index
      %c0_109 = arith.constant 0 : index
      %352 = vector.load %arg15[%c0_108, %c0_109] : memref<256x2xf32, #tpu.memory_space<vmem>>, vector<256x2xf32>
      %cst_110 = arith.constant dense<0.000000e+00> : vector<2x2xf32>
      %353 = tpu.matmul %351, %352, %cst_110 {dimension_numbers = #tpu.dot_dimension_numbers<[1], [0], [0], [1], [0, 0, 1, 1], [], []>} : vector<2x256xf32>, vector<256x2xf32>, vector<2x2xf32> -> vector<2x2xf32>
      %c0_111 = arith.constant 0 : index
      %c0_112 = arith.constant 0 : index
      %354 = vector.load %arg16[%c0_111, %c0_112] : memref<1x2xf32, #tpu.memory_space<vmem>>, vector<1x2xf32>
      %355 = vector.broadcast %354 : vector<1x2xf32> to vector<2x2xf32>
      %356 = arith.addf %353, %355 : vector<2x2xf32>
      %c0_113 = arith.constant 0 : index
      %c0_114 = arith.constant 0 : index
      %357 = vector.load %arg17[%c0_113, %c0_114] : memref<2x2xf32, #tpu.memory_space<vmem>>, vector<2x2xf32>
      tpu.vector_store %arg17[%c0_113, %c0_114], %356 {strides = array<i32>} : memref<2x2xf32, #tpu.memory_space<vmem>>, vector<2x2xf32>,
    } else {
    }
    return
  }
  func.func @transform_0(%arg0: i32) -> (i32, i32) {
    %c0_i32 = arith.constant 0 : i32
    %c0_i32_0 = arith.constant 0 : i32
    %c0_i32_1 = arith.constant 0 : i32
    return %c0_i32, %c0_i32_0 : i32, i32
  }
  func.func @transform_1(%arg0: i32) -> (i32, i32) {
    %c0_i32 = arith.constant 0 : i32
    %c0_i32_0 = arith.constant 0 : i32
    %c0_i32_1 = arith.constant 0 : i32
    return %c0_i32, %c0_i32_0 : i32, i32
  }
  func.func @transform_2(%arg0: i32) -> (i32, i32) {
    %c0_i32 = arith.constant 0 : i32
    %c0_i32_0 = arith.constant 0 : i32
    %c0_i32_1 = arith.constant 0 : i32
    return %c0_i32, %c0_i32_0 : i32, i32
  }
  func.func @transform_3(%arg0: i32) -> (i32, i32) {
    %c0_i32 = arith.constant 0 : i32
    %c0_i32_0 = arith.constant 0 : i32
    %c0_i32_1 = arith.constant 0 : i32
    return %c0_i32, %c0_i32_0 : i32, i32
  }
  func.func @transform_4(%arg0: i32) -> (i32, i32) {
    %c0_i32 = arith.constant 0 : i32
    %c0_i32_0 = arith.constant 0 : i32
    %c0_i32_1 = arith.constant 0 : i32
    return %c0_i32, %c0_i32_0 : i32, i32
  }
  func.func @transform_5(%arg0: i32) -> (i32, i32, i32) {
    %c0_i32 = arith.constant 0 : i32
    %c0_i32_0 = arith.constant 0 : i32
    %c0_i32_1 = arith.constant 0 : i32
    return %arg0, %c0_i32, %c0_i32_0 : i32, i32, i32
  }
  func.func @transform_6(%arg0: i32) -> (i32, i32, i32) {
    %c0_i32 = arith.constant 0 : i32
    %c0_i32_0 = arith.constant 0 : i32
    %c0_i32_1 = arith.constant 0 : i32
    return %arg0, %c0_i32, %c0_i32_0 : i32, i32, i32
  }
  func.func @transform_7(%arg0: i32) -> (i32, i32, i32) {
    %c0_i32 = arith.constant 0 : i32
    %c0_i32_0 = arith.constant 0 : i32
    %c0_i32_1 = arith.constant 0 : i32
    return %arg0, %c0_i32, %c0_i32_0 : i32, i32, i32
  }
  func.func @transform_8(%arg0: i32) -> (i32, i32, i32) {
    %c0_i32 = arith.constant 0 : i32
    %c0_i32_0 = arith.constant 0 : i32
    %c0_i32_1 = arith.constant 0 : i32
    return %arg0, %c0_i32, %c0_i32_0 : i32, i32, i32
  }
  func.func @transform_9(%arg0: i32) -> (i32, i32, i32) {
    %c0_i32 = arith.constant 0 : i32
    %c0_i32_0 = arith.constant 0 : i32
    %c0_i32_1 = arith.constant 0 : i32
    return %arg0, %c0_i32, %c0_i32_0 : i32, i32, i32
  }
  func.func @transform_10(%arg0: i32) -> (i32, i32) {
    %c0_i32 = arith.constant 0 : i32
    %c0_i32_0 = arith.constant 0 : i32
    %c0_i32_1 = arith.constant 0 : i32
    return %c0_i32, %c0_i32_0 : i32, i32
  }
  func.func @transform_11(%arg0: i32) -> (i32, i32) {
    %c0_i32 = arith.constant 0 : i32
    %c0_i32_0 = arith.constant 0 : i32
    %c0_i32_1 = arith.constant 0 : i32
    return %c0_i32, %c0_i32_0 : i32, i32
  }
  func.func @transform_12(%arg0: i32) -> (i32, i32) {
    %c0_i32 = arith.constant 0 : i32
    %c0_i32_0 = arith.constant 0 : i32
    %c0_i32_1 = arith.constant 0 : i32
    return %c0_i32, %c0_i32_0 : i32, i32
  }
  func.func @transform_13(%arg0: i32) -> (i32, i32) {
    %c0_i32 = arith.constant 0 : i32
    %c0_i32_0 = arith.constant 0 : i32
    %c0_i32_1 = arith.constant 0 : i32
    return %c0_i32, %c0_i32_0 : i32, i32
  }
  func.func @transform_14(%arg0: i32) -> (i32, i32) {
    %c0_i32 = arith.constant 0 : i32
    %c0_i32_0 = arith.constant 0 : i32
    %c0_i32_1 = arith.constant 0 : i32
    return %c0_i32, %c0_i32_0 : i32, i32
  }
  func.func @transform_15(%arg0: i32) -> (i32, i32) {
    %c0_i32 = arith.constant 0 : i32
    %c0_i32_0 = arith.constant 0 : i32
    %c0_i32_1 = arith.constant 0 : i32
    return %c0_i32, %c0_i32_0 : i32, i32
  }
  func.func @transform_16(%arg0: i32) -> (i32, i32) {
    %c0_i32 = arith.constant 0 : i32
    %c0_i32_0 = arith.constant 0 : i32
    %c0_i32_1 = arith.constant 0 : i32
    return %c0_i32, %c0_i32_0 : i32, i32
  }
}

</mosaic_0001>

<bundles_post_ra>
// kernel: forward.1
= control target key start
LH: loop header
LB: loop body
LE: loop exit
PB: predicated region body
PF: predicated region fallthrough
CT: control target
= control target key end

     0   :  { %s11557_s0 = inlined_call_operand.vmem [shape: bf16[8,640], index: 0, kind: input, shape index: {}]   ;;  %s11558_s1 = inlined_call_operand.hbm [shape: bf16[640,384], index: 1, kind: input, shape index: {}]   ;;  %s11559_s2 = inlined_call_operand.hbm [shape: f32[1,384], index: 2, kind: input, shape index: {}]   ;;  %s11560_s3 = inlined_call_operand.hbm [shape: f32[1,384], index: 3, kind: input, shape index: {}]   ;;  %s11561_s4 = inlined_call_operand.hbm [shape: f32[5,384], index: 4, kind: input, shape index: {}]   ;;  %s11562_s5 = inlined_call_operand.hbm [shape: s8[12,384,1152], index: 5, kind: input, shape index: {}]   ;;  %s11563_s6 = inlined_call_operand.hbm [shape: s8[12,384,384], index: 6, kind: input, shape index: {}]   ;;  %s11564_s7 = inlined_call_operand.hbm [shape: s8[12,384,1536], index: 7, kind: input, shape index: {}]   ;;  %s11565_s8 = inlined_call_operand.hbm [shape: s8[12,1536,384], index: 8, kind: input, shape index: {}]   ;;  %s11566_s9 = inlined_call_operand.hbm [shape: f32[12,16,1536], index: 9, kind: input, shape index: {}]   ;;  %s11567_s10 = inlined_call_operand.hbm [shape: f32[1,384], index: 10, kind: input, shape index: {}]   ;;  %s11568_s11 = inlined_call_operand.hbm [shape: f32[1,384], index: 11, kind: input, shape index: {}]   ;;  %s11569_s12 = inlined_call_operand.hbm [shape: f32[384,256], index: 12, kind: input, shape index: {}]   ;;  %s11570_s13 = inlined_call_operand.hbm [shape: f32[1,256], index: 13, kind: input, shape index: {}]   ;;  %s11571_s14 = inlined_call_operand.vmem [shape: f32[256,2], index: 14, kind: input, shape index: {}]   ;;  %s11572_s15 = inlined_call_operand.hbm [shape: f32[1,2], index: 15, kind: input, shape index: {}]   ;;  %s11573_s16 = inlined_call_operand.hbm [shape: f32[2,2], index: 16, kind: output, shape index: {}]  }
   0x1   :  { %11607 = sst [smem:[#allocation40_spill]] %s11557_s0 }
   0x2   :  { %11608 = sst [smem:[#allocation41_spill]] %s11558_s1 }
   0x3   :  { %11609 = sst [smem:[#allocation42_spill]] %s11559_s2 }
   0x4   :  { %11610 = sst [smem:[#allocation43_spill]] %s11562_s5 }
   0x5   :  { %11611 = sst [smem:[#allocation44_spill]] %s11566_s9 }
   0x6   :  { %11612 = sst [smem:[#allocation45_spill]] %s11571_s14 }
   0x7   :  { %11613 = sst [smem:[#allocation46_spill]] %s11572_s15 }
   0x8   :  { %11614 = sst [smem:[#allocation47_spill]] %s11573_s16 }
   0x9   :  { %21 = vsyncpa [#allocation4], 0 }
   0xa   :  { %22 = vsyncpa [#allocation7], 0 }
   0xb   :  { %23 = vsyncpa [#allocation10], 0 }
   0xc   :  { %24 = vsyncpa [#allocation19], 0 }
   0xd   :  { %25 = vsyncpa [#allocation22], 0 }
   0xe   :  { %26 = vsyncpa [#allocation5], 0  ;;  %s9537_s21 = smov 0   ;;  %s9539_s22 = smov 0  }
   0xf   :  { %s9541_s23 = smov 0   ;;  %s9543_s24 = smov 0  }
  0x10 LB: > { %11615 = sst [smem:[#allocation33_spill]] %s9409_s22  ;;  %s9419_s25 = smov [#allocation3]   ;;  %s9417_s24 = sphi %s9543_s24, %s11680_s24   ;;  %s9413_s23 = sphi %s9541_s23, %s11683_s23   ;;  %s9409_s22 = sphi %s9539_s22, %s11682_s22   ;;  %s9405_s21 = sphi %s9537_s21, %s11681_s21  }
  0x11   : > { %11616 = sst [smem:[#allocation34_spill]] %s9413_s23  ;;  %s434_s26 = sshll.u32 %s9419_s25, 4  ;;  %s435_s26 = int_to_ptr.vmem [resolvable:$true] %s434_s26 }
  0x12   : > { %s9558_s27 = sadd.s32 4294967295, %s9417_s24   ;;  %p7525_p0 = scmp.ge.s32.totalorder %s9417_s24, 1 }
  0x13   : > { %11617 = sst [smem:[#allocation35_spill]] %s9558_s27  ;;  %p11577_p1 = scmp.eq.s32.totalorder %s9558_s27, 0 }
  0x14   : > { %p419_p2 = scmp.lt.s32.totalorder %s9417_s24, 13  ;;  %s9577_s30 = sadd.s32 1, %s9417_s24  }
  0x15   : > { %11621 = sst [smem:[#allocation37_spill]] %s9577_s30  ;;  %s11622_s1 = sld [smem:[#allocation41_spill]] }
  0x16   : > { %p9564_p4 = pnand %p7525_p0, %p419_p2 }
  0x18   : > { %s11618_s28 = scalar_select %p9564_p4, 1, 0 }
  0x19   : > { %p8509_p5 = pneg %p9564_p4 }
  0x1a   : > { %11619 = sst [smem:[#allocation36_spill]] %s11618_s28 }
  0x1b   : > { %p9572_p6 = pnand %p8509_p5, %p11577_p1  ;;  %s8923_s18 = scalar_lea.hbm %s11622_s1, 15360 }
  0x1c   : > { %p8924_p7 = scmp.ne.s32.totalorder %s11622_s1, %s8923_s18  ;;  %p8930_p11 = scmp.lt.u32.totalorder %s8923_s18, %s11622_s1 }
  0x1d   : > { %s11620_s29 = scalar_select %p9572_p6, 1, 0 }
  0x1e   : > { %p9587_p8 = pneg %p9572_p6 }
  0x20   : > { %s11623_s25 = scalar_select %p9587_p8, 1, 0 }
  0x21   : > { %p8926_p9 = pnand %p9587_p8, %p8924_p7 }
  0x23   : > { %p8927_p10 = pneg %p8926_p9 }
  0x25   : > { %p8932_p12 = pnand %p8930_p11, %p8927_p10 }
  0x27   : > { %8935 = shalt.err (!%p8932_p12)
}
  0x28   : > { %s8936_s0 = scalar_lea.vmem %s435_s26, 15360  ;;  %p8944_p5 = scmp.lt.s32.totalorder %s435_s26, %s435_s26 }
  0x29   : > { %p8937_p13 = scmp.ne.s32.totalorder %s435_s26, %s8936_s0  ;;  %p8945_p3 = scmp.lt.s32.totalorder %s8936_s0, %s8936_s0 }
  0x2b   : > { %p8939_p0 = pnand %p8937_p13, %p9587_p8  ;;  %p8946_p1 = por %p8945_p3, %p8944_p5 }
  0x2d   : > { %p8940_p2 = pneg %p8939_p0 }
  0x2f   : > { %p8947_p4 = pnand %p8946_p1, %p8940_p2 }
  0x31   : > { %8950 = shalt.err (!%p8947_p4)
}
  0x32   : > { %s9420_s17 = smov 192   ;;  %s9421_s14 = smov 12  }
  0x33   : > { %8512 = dma.hbm_to_vmem [thread:$0]  (!%p9572_p6), %s11622_s1, 15360, %s435_s26, [#allocation4], %s9420_s17, %s9420_s17, %s9421_s14  }
  0x34   : > { %s141_s19 = ssub.s32 %s9417_s24, %s9577_s30  ;;  %s144_s20 = sadd.s32 1, %s9413_s23 }
  0x35   : > { %p142_p1 = scmp.eq.s32.totalorder %s141_s19, 0  ;;  %p151_p3 = scmp.ne.s32.totalorder %s9413_s23, %s9409_s22 }
  0x36   : > { %p152_p4 = scmp.eq.s32.totalorder %s9417_s24, 0  ;;  %p157_p7 = scmp.ne.s32.totalorder %s9409_s22, %s9405_s21 }
  0x37   : > { %s9612_s0 = scalar_select %p142_p1, %s9413_s23, %s144_s20  }
  0x38   : > { %p153_p9 = por %p152_p4, %p151_p3  ;;  %p11625_p10 = scmp.eq.s32.totalorder %s9558_s27, 0 }
  0x39   : > { %11624 = sst [smem:[#allocation38_spill]] %s9612_s0  ;;  %p8562_p12 = scmp.lt.s32.totalorder %s9417_s24, 12 }
  0x3a   : > { %p9616_p11 = por %p11625_p10, %p157_p7  ;;  %s541_s9 = sand.u32 1, %s9417_s24  }
  0x3b   : > { %s9623_s15 = sand.u32 1, %s9413_s23   ;;  %p9626_p13 = pnand %p8562_p12, %p153_p9 }
  0x3c   : > { %s11626_s28 = scalar_select %p9616_p11, 1, 0 }
  0x3d   : > { %s8445_s26 = smul.u32 864, %s9623_s15  ;;  %s11629_s5 = sld [smem:[#allocation43_spill]] }
  0x3e   : > { %11627 = sst [smem:[#allocation39_spill]] %s11626_s28  ;;  %s8446_s21 = smul.u32 13824, %s9417_s24 }
  0x3f   : > { %s11628_s17 = scalar_select %p9626_p13, 1, 0 }
  0x40   : > { %s545_s19 = scalar_lea.vmem [#allocation11], %s8445_s26  ;;  %s9638_s1 = scalar_lea.sflag [#allocation4], %s541_s9 }
  0x41   : > { %s552_s20 = sshll.u32 %s545_s19, 4  ;;  %p9644_p2 = pneg %p9626_p13  ;;  %s9636_s20 = int_to_ptr.vmem [resolvable:$true] %s552_s20 }
  0x43   : > { %s9634_s18 = scalar_lea.hbm %s11629_s5, %s8446_s21  ;;  %s8956_s26 = scalar_lea.hbm %s11629_s5, 165888 }
  0x44   : > { %s8951_s0 = scalar_lea.hbm %s9634_s18, 13824  ;;  %p8957_p3 = scmp.lt.u32.totalorder %s9634_s18, %s11629_s5 }
  0x45   : > { %p8952_p0 = scmp.ne.s32.totalorder %s9634_s18, %s8951_s0  ;;  %p8958_p4 = scmp.lt.u32.totalorder %s8956_s26, %s8951_s0 }
  0x46   : > { %s11630_s23 = scalar_select %p9644_p2, 1, 0 }
  0x47   : > { %p8954_p5 = pnand %p9644_p2, %p8952_p0  ;;  %p8959_p7 = por %p8958_p4, %p8957_p3 }
  0x48   : > { %p8960_p9 = scmp.lt.u32.totalorder %s8951_s0, %s9634_s18 }
  0x49   : > { %p8955_p1 = pneg %p8954_p5 }
  0x4a   : > { %p8961_p10 = por %p8960_p9, %p8959_p7 }
  0x4c   : > { %p8962_p12 = pnand %p8961_p10, %p8955_p1 }
  0x4e   : > { %8965 = shalt.err (!%p8962_p12)
}
  0x4f   : > { %s8966_s9 = scalar_lea.vmem %s9636_s20, 13824  ;;  %s9422_s21 = smov [#allocation11]  }
  0x50   : > { %p8967_p0 = scmp.ne.s32.totalorder %s9636_s20, %s8966_s9  ;;  %s8971_s14 = sshll.u32 %s9422_s21, 4  ;;  %s8972_s14 = int_to_ptr.vmem [resolvable:$false] %s8971_s14 }
  0x51   : > { %s8973_s16 = scalar_lea.vmem %s8972_s14, 27648  ;;  %p8974_p6 = scmp.lt.s32.totalorder %s9636_s20, %s8972_s14 }
  0x52   : > { %p8969_p5 = pnand %p8967_p0, %p9644_p2  ;;  %p8975_p8 = scmp.lt.s32.totalorder %s8973_s16, %s8966_s9 }
  0x54   : > { %p8970_p11 = pneg %p8969_p5  ;;  %p8976_p3 = por %p8975_p8, %p8974_p6 }
  0x56   : > { %p8977_p4 = pnand %p8976_p3, %p8970_p11 }
  0x58   : > { %8980 = shalt.err (!%p8977_p4)
}
  0x59   : > { %s9423_s0 = smov 1152   ;;  %s9424_s26 = smov 72  }
  0x5a   : > { %8540 = dma.hbm_to_vmem [thread:$0]  (!%p9626_p13), %s9634_s18, 13824, %s9636_s20, %s9638_s1, %s9423_s0, %s9423_s0, %s9424_s26  }
  0x5b   : > { %s8447_s19 = smul.u32 288, %s9623_s15  ;;  %s9425_s28 = smov [#allocation6]  }
  0x5c   : > { %s8448_s21 = smul.u32 4608, %s9417_s24  ;;  %s9677_s22 = sshll.u32 %s9425_s28, 4  ;;  %s449_s22 = int_to_ptr.vmem [resolvable:$true] %s9677_s22 }
  0x5d   : > { %s566_s14 = scalar_lea.vmem [#allocation12], %s8447_s19  ;;  %s8986_s30 = scalar_lea.hbm %s11563_s6, 55296 }
  0x5e   : > { %s9673_s9 = scalar_lea.hbm %s11563_s6, %s8448_s21  ;;  %s573_s16 = sshll.u32 %s566_s14, 4  ;;  %s9675_s16 = int_to_ptr.vmem [resolvable:$true] %s573_s16 }
  0x5f   : > { %s8981_s27 = scalar_lea.hbm %s9673_s9, 4608  ;;  %p8987_p1 = scmp.lt.u32.totalorder %s9673_s9, %s11563_s6 }
  0x60   : > { %p8982_p6 = scmp.ne.s32.totalorder %s9673_s9, %s8981_s27  ;;  %p8988_p7 = scmp.lt.u32.totalorder %s8986_s30, %s8981_s27 }
  0x61   : > { %p8990_p10 = scmp.lt.u32.totalorder %s8981_s27, %s9673_s9 }
  0x62   : > { %p8984_p8 = pnand %p8982_p6, %p9644_p2  ;;  %p8989_p9 = por %p8988_p7, %p8987_p1 }
  0x64   : > { %p8985_p11 = pneg %p8984_p8  ;;  %p8991_p12 = por %p8990_p10, %p8989_p9 }
  0x66   : > { %p8992_p0 = pnand %p8991_p12, %p8985_p11 }
  0x68   : > { %8995 = shalt.err (!%p8992_p0)
}
  0x69   : > { %s8996_s28 = scalar_lea.vmem %s9675_s16, 4608  ;;  %s9426_s26 = smov [#allocation12]  }
  0x6a   : > { %p8997_p5 = scmp.ne.s32.totalorder %s9675_s16, %s8996_s28  ;;  %s9001_s19 = sshll.u32 %s9426_s26, 4  ;;  %s9002_s19 = int_to_ptr.vmem [resolvable:$false] %s9001_s19 }
  0x6b   : > { %s9003_s21 = scalar_lea.vmem %s9002_s19, 9216  ;;  %p9004_p6 = scmp.lt.s32.totalorder %s9675_s16, %s9002_s19 }
  0x6c   : > { %p8999_p3 = pnand %p8997_p5, %p9644_p2  ;;  %p9005_p8 = scmp.lt.s32.totalorder %s9003_s21, %s8996_s28 }
  0x6e   : > { %p9000_p4 = pneg %p8999_p3  ;;  %p9006_p1 = por %p9005_p8, %p9004_p6 }
  0x70   : > { %p9007_p7 = pnand %p9006_p1, %p9000_p4 }
  0x72   : > { %9010 = shalt.err (!%p9007_p7)
}
  0x73   : > { %s11598_s27 = smov 384   ;;  %s11599_s14 = smov 24  }
  0x74   : > { %8543 = dma.hbm_to_vmem [thread:$0]  (!%p9626_p13), %s9673_s9, 4608, %s9675_s16, %s9638_s1, %s11598_s27, %s11598_s27, %s11599_s14  }
  0x75   : > { %s11600_s18 = smul.u32 1152, %s9623_s15  ;;  %s11631_s2 = sld [smem:[#allocation42_spill]] }
  0x76   : > { %p11632_p9 = scmp.ne.s32.totalorder %s11623_s25, 0 }
  0x7b   : > { %s9011_s20 = scalar_lea.hbm %s11631_s2, 48 }
  0x7c   : > { %p9012_p11 = scmp.ne.s32.totalorder %s11631_s2, %s9011_s20  ;;  %p9018_p0 = scmp.lt.u32.totalorder %s9011_s20, %s11631_s2 }
  0x7e   : > { %p9014_p10 = pnand %p9012_p11, %p11632_p9 }
  0x80   : > { %p9015_p12 = pneg %p9014_p10 }
  0x82   : > { %p9020_p5 = pnand %p9018_p0, %p9015_p12 }
  0x84   : > { %9023 = shalt.err (!%p9020_p5)
}
  0x85   : > { %s9024_s9 = scalar_lea.vmem %s449_s22, 48  ;;  %s9031_s16 = scalar_lea.vmem %s449_s22, 64 }
  0x86   : > { %p9025_p3 = scmp.ne.s32.totalorder %s449_s22, %s9024_s9  ;;  %p9032_p8 = scmp.lt.s32.totalorder %s449_s22, %s449_s22 }
  0x87   : > { %p9033_p1 = scmp.lt.s32.totalorder %s9031_s16, %s9024_s9 }
  0x88   : > { %p9027_p4 = pnand %p9025_p3, %p11632_p9 }
  0x89   : > { %p9034_p7 = por %p9033_p1, %p9032_p8 }
  0x8a   : > { %p9028_p6 = pneg %p9027_p4 }
  0x8c   : > { %p9035_p13 = pnand %p9034_p7, %p9028_p6 }
  0x8e   : > { %9038 = shalt.err (!%p9035_p13)
}
  0x8f   : > { %p11633_p11 = scmp.ne.s32.totalorder %s11620_s29, 0  ;;  %s11601_s30 = smul.u32 18432, %s9417_s24 }
  0x90   : > { %s587_s20 = scalar_lea.vmem [#allocation13], %s11600_s18  ;;  %s9044_s21 = scalar_lea.hbm %s11564_s7, 221184 }
  0x91   : > { %8515 = dma.hbm_to_vmem [thread:$0]  (!%p11633_p11), %s11631_s2, 48, %s449_s22, [#allocation7]  }
  0x92   : > { %s594_s0 = sshll.u32 %s587_s20, 4  ;;  %s9732_s19 = scalar_lea.hbm %s11564_s7, %s11601_s30  ;;  %s9734_s0 = int_to_ptr.vmem [resolvable:$true] %s594_s0 }
  0x93   : > { %s9039_s9 = scalar_lea.hbm %s9732_s19, 18432  ;;  %p9045_p0 = scmp.lt.u32.totalorder %s9732_s19, %s11564_s7 }
  0x94   : > { %p9040_p13 = scmp.ne.s32.totalorder %s9732_s19, %s9039_s9  ;;  %p9046_p5 = scmp.lt.u32.totalorder %s9044_s21, %s9039_s9 }
  0x95   : > { %p9048_p4 = scmp.lt.u32.totalorder %s9039_s9, %s9732_s19 }
  0x96   : > { %p9042_p10 = pnand %p9040_p13, %p9644_p2  ;;  %p9047_p3 = por %p9046_p5, %p9045_p0 }
  0x98   : > { %p9043_p12 = pneg %p9042_p10  ;;  %p9049_p6 = por %p9048_p4, %p9047_p3 }
  0x9a   : > { %p9050_p8 = pnand %p9049_p6, %p9043_p12 }
  0x9c   : > { %9053 = shalt.err (!%p9050_p8)
}
  0x9d   : > { %s9054_s28 = scalar_lea.vmem %s9734_s0, 18432  ;;  %s9429_s26 = smov [#allocation13]  }
  0x9e   : > { %p9055_p1 = scmp.ne.s32.totalorder %s9734_s0, %s9054_s28  ;;  %s9059_s22 = sshll.u32 %s9429_s26, 4  ;;  %s9060_s22 = int_to_ptr.vmem [resolvable:$false] %s9059_s22 }
  0x9f   : > { %s9061_s16 = scalar_lea.vmem %s9060_s22, 36864  ;;  %p9062_p10 = scmp.lt.s32.totalorder %s9734_s0, %s9060_s22 }
  0xa0   : > { %p9057_p7 = pnand %p9055_p1, %p9644_p2  ;;  %p9063_p11 = scmp.lt.s32.totalorder %s9061_s16, %s9054_s28 }
  0xa2   : > { %p9058_p13 = pneg %p9057_p7  ;;  %p9064_p0 = por %p9063_p11, %p9062_p10 }
  0xa4   : > { %p9065_p5 = pnand %p9064_p0, %p9058_p13 }
  0xa6   : > { %9068 = shalt.err (!%p9065_p5)
}
  0xa7   : > { %s11604_s9 = smov 1536   ;;  %s9431_s21 = smov 96  }
  0xa8   : > { %p11634_p12 = scmp.ne.s32.totalorder %s11628_s17, 0  ;;  %s9432_s5 = smov [#allocation8]  }
  0xa9   : > { %s459_s20 = sshll.u32 %s9432_s5, 4  ;;  %s9433_s26 = smov [#allocation9]   ;;  %s460_s20 = int_to_ptr.vmem [resolvable:$true] %s459_s20 }
  0xaa   : > { %8546 = dma.hbm_to_vmem [thread:$0]  (!%p11634_p12), %s9732_s19, 18432, %s9734_s0, %s9638_s1, %s11604_s9, %s11604_s9, %s9431_s21  }
  0xab   : > { %s470_s28 = sshll.u32 %s9433_s26, 4  ;;  %s9069_s27 = scalar_lea.hbm %s11560_s3, 48  ;;  %s471_s28 = int_to_ptr.vmem [resolvable:$true] %s470_s28 }
  0xac   : > { %p9070_p11 = scmp.ne.s32.totalorder %s11560_s3, %s9069_s27  ;;  %p9076_p6 = scmp.lt.u32.totalorder %s9069_s27, %s11560_s3 }
  0xae   : > { %p9072_p3 = pnand %p9070_p11, %p11632_p9 }
  0xb0   : > { %p9073_p4 = pneg %p9072_p3 }
  0xb2   : > { %p9078_p8 = pnand %p9076_p6, %p9073_p4 }
  0xb4   : > { %9081 = shalt.err (!%p9078_p8)
}
  0xb5   : > { %s9082_s0 = scalar_lea.vmem %s460_s20, 48  ;;  %s9089_s19 = scalar_lea.vmem %s460_s20, 64 }
  0xb6   : > { %p9083_p1 = scmp.ne.s32.totalorder %s460_s20, %s9082_s0  ;;  %p9090_p10 = scmp.lt.s32.totalorder %s460_s20, %s460_s20 }
  0xb7   : > { %p9091_p0 = scmp.lt.s32.totalorder %s9089_s19, %s9082_s0 }
  0xb8   : > { %p9085_p7 = pnand %p9083_p1, %p11632_p9 }
  0xb9   : > { %p9092_p5 = por %p9091_p0, %p9090_p10 }
  0xba   : > { %p9086_p13 = pneg %p9085_p7 }
  0xbc   : > { %p9093_p12 = pnand %p9092_p5, %p9086_p13 }
  0xbe   : > { %9096 = shalt.err (!%p9093_p12)
}
  0xbf   : > { %p11635_p11 = scmp.ne.s32.totalorder %s11620_s29, 0  ;;  %s9097_s30 = scalar_lea.hbm %s11561_s4, 384 }
  0xc0   : > { %p9098_p3 = scmp.ne.s32.totalorder %s11561_s4, %s9097_s30  ;;  %p9104_p12 = scmp.lt.u32.totalorder %s9097_s30, %s11561_s4 }
  0xc1   : > { %8518 = dma.hbm_to_vmem [thread:$0]  (!%p11635_p11), %s11560_s3, 48, %s460_s20, [#allocation7]  }
  0xc2   : > { %p9100_p4 = pnand %p9098_p3, %p11632_p9 }
  0xc4   : > { %p9101_p6 = pneg %p9100_p4 }
  0xc6   : > { %p9106_p8 = pnand %p9104_p12, %p9101_p6 }
  0xc8   : > { %9109 = shalt.err (!%p9106_p8)
}
  0xc9   : > { %s9110_s0 = scalar_lea.vmem %s471_s28, 384  ;;  %p9118_p10 = scmp.lt.s32.totalorder %s471_s28, %s471_s28 }
  0xca   : > { %p9111_p1 = scmp.ne.s32.totalorder %s471_s28, %s9110_s0  ;;  %p9119_p0 = scmp.lt.s32.totalorder %s9110_s0, %s9110_s0 }
  0xcc   : > { %p9113_p7 = pnand %p9111_p1, %p11632_p9  ;;  %p9120_p5 = por %p9119_p0, %p9118_p10 }
  0xce   : > { %p9114_p13 = pneg %p9113_p7 }
  0xd0   : > { %p9121_p2 = pnand %p9120_p5, %p9114_p13 }
  0xd2   : > { %9124 = shalt.err (!%p9121_p2)
}
  0xd3   : > { %8521 = dma.hbm_to_vmem [thread:$0]  (!%p11635_p11), %s11561_s4, 384, %s471_s28, [#allocation10]  }
  0xd4   : > { %s9434_s14 = smov [#allocation18]   ;;  %s9125_s30 = scalar_lea.hbm %s11569_s12, 12288 }
  0xd5   : > { %s502_s18 = sshll.u32 %s9434_s14, 4  ;;  %p9126_p3 = scmp.ne.s32.totalorder %s11569_s12, %s9125_s30  ;;  %s503_s18 = int_to_ptr.vmem [resolvable:$true] %s502_s18 }
  0xd6   : > { %p9132_p6 = scmp.lt.u32.totalorder %s9125_s30, %s11569_s12 }
  0xd7   : > { %p9128_p2 = pnand %p9126_p3, %p11632_p9 }
  0xd9   : > { %p9129_p4 = pneg %p9128_p2 }
  0xdb   : > { %p9134_p12 = pnand %p9132_p6, %p9129_p4 }
  0xdd   : > { %9137 = shalt.err (!%p9134_p12)
}
  0xde   : > { %s9138_s28 = scalar_lea.vmem %s503_s18, 12288  ;;  %p9146_p13 = scmp.lt.s32.totalorder %s503_s18, %s503_s18 }
  0xdf   : > { %p9139_p8 = scmp.ne.s32.totalorder %s503_s18, %s9138_s28  ;;  %p9147_p10 = scmp.lt.s32.totalorder %s9138_s28, %s9138_s28 }
  0xe1   : > { %p9141_p1 = pnand %p9139_p8, %p11632_p9  ;;  %p9148_p0 = por %p9147_p10, %p9146_p13 }
  0xe3   : > { %p9142_p7 = pneg %p9141_p1 }
  0xe5   : > { %p9149_p5 = pnand %p9148_p0, %p9142_p7 }
  0xe7   : > { %9152 = shalt.err (!%p9149_p5)
}
  0xe8   : > { %s9435_s0 = smov 256   ;;  %s9436_s20 = smov 16  }
  0xe9   : > { %8530 = dma.hbm_to_vmem [thread:$0]  (!%p11635_p11), %s11569_s12, 12288, %s503_s18, [#allocation19], %s9435_s0, %s9435_s0, %s9436_s20  }
  0xea   : > { %s11636_s2 = smul.u32 18432, %s9417_s24  ;;  %s9437_s28 = smov [#allocation16]  }
  0xeb   : > { %s11637_s26 = smul.u32 1152, %s9623_s15  ;;  %s9826_s9 = sshll.u32 %s9437_s28, 4  ;;  %s482_s9 = int_to_ptr.vmem [resolvable:$true] %s9826_s9 }
  0xec   : > { %s9820_s5 = scalar_lea.hbm %s11565_s8, %s11636_s2  ;;  %p11638_p2 = scmp.ne.s32.totalorder %s11630_s23, 0 }
  0xed   : > { %s608_s22 = scalar_lea.vmem [#allocation14], %s11637_s26  ;;  %s9153_s19 = scalar_lea.hbm %s9820_s5, 18432 }
  0xee   : > { %s615_s16 = sshll.u32 %s608_s22, 4  ;;  %p9154_p3 = scmp.ne.s32.totalorder %s9820_s5, %s9153_s19  ;;  %s9824_s16 = int_to_ptr.vmem [resolvable:$true] %s615_s16 }
  0xef   : > { %s9158_s20 = scalar_lea.hbm %s11565_s8, 221184  ;;  %p9159_p12 = scmp.lt.u32.totalorder %s9820_s5, %s11565_s8 }
  0xf0   : > { %p9156_p4 = pnand %p9154_p3, %p11638_p2  ;;  %p9160_p8 = scmp.lt.u32.totalorder %s9158_s20, %s9153_s19 }
  0xf1   : > { %p9162_p7 = scmp.lt.u32.totalorder %s9153_s19, %s9820_s5 }
  0xf2   : > { %p9157_p6 = pneg %p9156_p4  ;;  %p9161_p1 = por %p9160_p8, %p9159_p12 }
  0xf4   : > { %p9163_p13 = por %p9162_p7, %p9161_p1 }
  0xf6   : > { %p9164_p10 = pnand %p9163_p13, %p9157_p6 }
  0xf8   : > { %9167 = shalt.err (!%p9164_p10)
}
  0xf9   : > { %s9168_s27 = scalar_lea.vmem %s9824_s16, 18432  ;;  %s9438_s30 = smov [#allocation14]  }
  0xfa   : > { %p9169_p0 = scmp.ne.s32.totalorder %s9824_s16, %s9168_s27  ;;  %s9173_s26 = sshll.u32 %s9438_s30, 4  ;;  %s9174_s26 = int_to_ptr.vmem [resolvable:$false] %s9173_s26 }
  0xfb   : > { %s9175_s22 = scalar_lea.vmem %s9174_s26, 36864  ;;  %p9176_p4 = scmp.lt.s32.totalorder %s9824_s16, %s9174_s26 }
  0xfc   : > { %p9171_p5 = pnand %p9169_p0, %p11638_p2  ;;  %p9177_p11 = scmp.lt.s32.totalorder %s9175_s22, %s9168_s27 }
  0xfe   : > { %p9172_p3 = pneg %p9171_p5  ;;  %p9178_p12 = por %p9177_p11, %p9176_p4 }
 0x100   : > { %p9179_p8 = pnand %p9178_p12, %p9172_p3 }
 0x102   : > { %9182 = shalt.err (!%p9179_p8)
}
 0x103   : > { %p11639_p6 = scmp.ne.s32.totalorder %s11628_s17, 0  ;;  %s11640_s28 = smov 24  }
 0x104   : > { %s11641_s19 = smov 384   ;;  %s9183_s20 = scalar_lea.hbm %s11567_s10, 48 }
 0x105   : > { %8549 = dma.hbm_to_vmem [thread:$0]  (!%p11639_p6), %s9820_s5, 18432, %s9824_s16, %s9638_s1, %s11641_s19, %s11641_s19, %s11640_s28  }
 0x106   : > { %p9184_p11 = scmp.ne.s32.totalorder %s11567_s10, %s9183_s20  ;;  %p9190_p13 = scmp.lt.u32.totalorder %s9183_s20, %s11567_s10 }
 0x108   : > { %p9186_p1 = pnand %p9184_p11, %p11632_p9 }
 0x10a   : > { %p9187_p7 = pneg %p9186_p1 }
 0x10c   : > { %p9192_p10 = pnand %p9190_p13, %p9187_p7 }
 0x10e   : > { %9195 = shalt.err (!%p9192_p10)
}
 0x10f   : > { %s9196_s26 = scalar_lea.vmem %s482_s9, 48  ;;  %s9203_s5 = scalar_lea.vmem %s482_s9, 64 }
 0x110   : > { %p9197_p0 = scmp.ne.s32.totalorder %s482_s9, %s9196_s26  ;;  %p9204_p4 = scmp.lt.s32.totalorder %s482_s9, %s482_s9 }
 0x111   : > { %p9205_p12 = scmp.lt.s32.totalorder %s9203_s5, %s9196_s26 }
 0x112   : > { %p9199_p5 = pnand %p9197_p0, %p11632_p9 }
 0x113   : > { %p9206_p8 = por %p9205_p12, %p9204_p4 }
 0x114   : > { %p9200_p3 = pneg %p9199_p5 }
 0x116   : > { %p9207_p6 = pnand %p9206_p8, %p9200_p3 }
 0x118   : > { %9210 = shalt.err (!%p9207_p6)
}
 0x119   : > { %p11642_p11 = scmp.ne.s32.totalorder %s11620_s29, 0  ;;  %s9439_s28 = smov [#allocation17]  }
 0x11a   : > { %s492_s19 = sshll.u32 %s9439_s28, 4  ;;  %s9440_s18 = smov [#allocation20]   ;;  %s493_s19 = int_to_ptr.vmem [resolvable:$true] %s492_s19 }
 0x11b   : > { %8524 = dma.hbm_to_vmem [thread:$0]  (!%p11642_p11), %s11567_s10, 48, %s482_s9, [#allocation7]  }
 0x11c   : > { %s516_s0 = sshll.u32 %s9440_s18, 4  ;;  %s9211_s2 = scalar_lea.hbm %s11568_s11, 48  ;;  %s517_s0 = int_to_ptr.vmem [resolvable:$true] %s516_s0 }
 0x11d   : > { %p9212_p6 = scmp.ne.s32.totalorder %s11568_s11, %s9211_s2  ;;  %p9218_p13 = scmp.lt.u32.totalorder %s9211_s2, %s11568_s11 }
 0x11f   : > { %p9214_p1 = pnand %p9212_p6, %p11632_p9 }
 0x121   : > { %p9215_p7 = pneg %p9214_p1 }
 0x123   : > { %p9220_p10 = pnand %p9218_p13, %p9215_p7 }
 0x125   : > { %9223 = shalt.err (!%p9220_p10)
}
 0x126   : > { %s9224_s9 = scalar_lea.vmem %s493_s19, 48  ;;  %s9231_s16 = scalar_lea.vmem %s493_s19, 64 }
 0x127   : > { %p9225_p0 = scmp.ne.s32.totalorder %s493_s19, %s9224_s9  ;;  %p9232_p4 = scmp.lt.s32.totalorder %s493_s19, %s493_s19 }
 0x128   : > { %p9233_p12 = scmp.lt.s32.totalorder %s9231_s16, %s9224_s9 }
 0x129   : > { %p9227_p5 = pnand %p9225_p0, %p11632_p9 }
 0x12a   : > { %p9234_p8 = por %p9233_p12, %p9232_p4 }
 0x12b   : > { %p9228_p3 = pneg %p9227_p5 }
 0x12d   : > { %p9235_p2 = pnand %p9234_p8, %p9228_p3 }
 0x12f   : > { %9238 = shalt.err (!%p9235_p2)
}
 0x130   : > { %8527 = dma.hbm_to_vmem [thread:$0]  (!%p11642_p11), %s11568_s11, 48, %s493_s19, [#allocation10]  }
 0x131   : > { %s9239_s14 = scalar_lea.hbm %s11570_s13, 32 }
 0x132   : > { %p9240_p6 = scmp.ne.s32.totalorder %s11570_s13, %s9239_s14  ;;  %p9246_p2 = scmp.lt.u32.totalorder %s9239_s14, %s11570_s13 }
 0x134   : > { %p9242_p1 = pnand %p9240_p6, %p11632_p9 }
 0x136   : > { %p9243_p7 = pneg %p9242_p1 }
 0x138   : > { %p9248_p13 = pnand %p9246_p2, %p9243_p7 }
 0x13a   : > { %9251 = shalt.err (!%p9248_p13)
}
 0x13b   : > { %s9252_s5 = scalar_lea.vmem %s517_s0, 32  ;;  %p9260_p3 = scmp.lt.s32.totalorder %s517_s0, %s517_s0 }
 0x13c   : > { %p9253_p10 = scmp.ne.s32.totalorder %s517_s0, %s9252_s5  ;;  %p9261_p4 = scmp.lt.s32.totalorder %s9252_s5, %s9252_s5 }
 0x13e   : > { %p9255_p0 = pnand %p9253_p10, %p11632_p9  ;;  %p9262_p12 = por %p9261_p4, %p9260_p3 }
 0x140   : > { %p9256_p5 = pneg %p9255_p0 }
 0x142   : > { %p9263_p8 = pnand %p9262_p12, %p9256_p5 }
 0x144   : > { %9266 = shalt.err (!%p9263_p8)
}
 0x145   : > { %8533 = dma.hbm_to_vmem [thread:$0]  (!%p11642_p11), %s11570_s13, 32, %s517_s0, [#allocation19]  }
 0x146   : > { %s9441_s16 = smov [#allocation21]   ;;  %s8453_s28 = smul.u32 192, %s9623_s15 }
 0x147   : > { %s530_s22 = sshll.u32 %s9441_s16, 4  ;;  %s8454_s18 = smul.u32 3072, %s9417_s24  ;;  %s531_s22 = int_to_ptr.vmem [resolvable:$true] %s530_s22 }
 0x148   : > { %s11643_s2 = sld [smem:[#allocation46_spill]] }
 0x14e   : > { %s9267_s27 = scalar_lea.hbm %s11643_s2, 16 }
 0x14f   : > { %p9268_p6 = scmp.ne.s32.totalorder %s11643_s2, %s9267_s27  ;;  %p9274_p2 = scmp.lt.u32.totalorder %s9267_s27, %s11643_s2 }
 0x151   : > { %p9270_p1 = pnand %p9268_p6, %p11632_p9 }
 0x153   : > { %p9271_p7 = pneg %p9270_p1 }
 0x155   : > { %p9276_p13 = pnand %p9274_p2, %p9271_p7 }
 0x157   : > { %9279 = shalt.err (!%p9276_p13)
}
 0x158   : > { %s9280_s15 = scalar_lea.vmem %s531_s22, 16  ;;  %s9287_s24 = scalar_lea.vmem %s531_s22, 32 }
 0x159   : > { %p9281_p10 = scmp.ne.s32.totalorder %s531_s22, %s9280_s15  ;;  %p9288_p3 = scmp.lt.s32.totalorder %s531_s22, %s531_s22 }
 0x15a   : > { %p9289_p4 = scmp.lt.s32.totalorder %s9287_s24, %s9280_s15 }
 0x15b   : > { %p9283_p0 = pnand %p9281_p10, %p11632_p9 }
 0x15c   : > { %p9290_p12 = por %p9289_p4, %p9288_p3 }
 0x15d   : > { %p9284_p5 = pneg %p9283_p0 }
 0x15f   : > { %p9291_p8 = pnand %p9290_p12, %p9284_p5 }
 0x161   : > { %9294 = shalt.err (!%p9291_p8)
}
 0x162   : > { %8536 = dma.hbm_to_vmem [thread:$0]  (!%p11642_p11), %s11643_s2, 16, %s531_s22, [#allocation22]  }
 0x163   : > { %s11644_s14 = sld [smem:[#allocation44_spill]]  ;;  %s629_s25 = scalar_lea.vmem [#allocation15], %s8453_s28 }
 0x164   : > { %s636_s30 = sshll.u32 %s629_s25, 4  ;;  %p11645_p6 = scmp.ne.s32.totalorder %s11630_s23, 0  ;;  %s9933_s30 = int_to_ptr.vmem [resolvable:$true] %s636_s30 }
 0x169   : > { %s9931_s27 = scalar_lea.hbm %s11644_s14, %s8454_s18  ;;  %s9300_s5 = scalar_lea.hbm %s11644_s14, 36864 }
 0x16a   : > { %s9295_s26 = scalar_lea.hbm %s9931_s27, 3072  ;;  %p9301_p11 = scmp.lt.u32.totalorder %s9931_s27, %s11644_s14 }
 0x16b   : > { %p9296_p9 = scmp.ne.s32.totalorder %s9931_s27, %s9295_s26  ;;  %p9302_p2 = scmp.lt.u32.totalorder %s9300_s5, %s9295_s26 }
 0x16c   : > { %p9304_p10 = scmp.lt.u32.totalorder %s9295_s26, %s9931_s27 }
 0x16d   : > { %p9298_p1 = pnand %p9296_p9, %p11645_p6  ;;  %p9303_p13 = por %p9302_p2, %p9301_p11 }
 0x16f   : > { %p9299_p7 = pneg %p9298_p1  ;;  %p9305_p0 = por %p9304_p10, %p9303_p13 }
 0x171   : > { %p9306_p5 = pnand %p9305_p0, %p9299_p7 }
 0x173   : > { %9309 = shalt.err (!%p9306_p5)
}
 0x174   : > { %s9310_s28 = scalar_lea.vmem %s9933_s30, 3072  ;;  %s9442_s15 = smov [#allocation15]  }
 0x175   : > { %p9311_p3 = scmp.ne.s32.totalorder %s9933_s30, %s9310_s28  ;;  %s9315_s24 = sshll.u32 %s9442_s15, 4  ;;  %s9316_s24 = int_to_ptr.vmem [resolvable:$false] %s9315_s24 }
 0x176   : > { %s9317_s0 = scalar_lea.vmem %s9316_s24, 6144  ;;  %p9318_p8 = scmp.lt.s32.totalorder %s9933_s30, %s9316_s24 }
 0x177   : > { %p9313_p4 = pnand %p9311_p3, %p11645_p6  ;;  %p9319_p9 = scmp.lt.s32.totalorder %s9317_s0, %s9310_s28 }
 0x179   : > { %p9314_p12 = pneg %p9313_p4  ;;  %p9320_p1 = por %p9319_p9, %p9318_p8 }
 0x17b   : > { %p9321_p11 = pnand %p9320_p1, %p9314_p12 }
 0x17d   : > { %9324 = shalt.err (!%p9321_p11)
}
 0x17e   : > { %p11646_p7 = scmp.ne.s32.totalorder %s11628_s17, 0  ;;  %s11647_s9 = smov 1536  }
 0x17f   : > { %s11648_s23 = sld [smem:[#allocation36_spill]] }
 0x180   : > { %8552 = dma.hbm_to_vmem [thread:$0]  (!%p11646_p7), %s9931_s27, 3072, %s9933_s30, %s9638_s1, %s11647_s9, %s11647_s9, %s9431_s21  }
 0x185   : > { %p11649_p6 = scmp.ne.s32.totalorder %s11648_s23, 0 }
 0x186   : > { %s11650_s16 = sld [smem:[#allocation35_spill]] (!%p11649_p6) }
 0x187   : > { %648 = sbr.rel (%p11649_p6) target bundleno = 5809 (0x16b1), region = 84 }
 0x18c   : > { %p11651_p2 = scmp.eq.s32.totalorder (!%p11649_p6), %s11650_s16, 0 }
 0x18e   : > { %9368 = dma.done.wait (%p11651_p2), [#allocation4], 15360   ;;  %p11652_p13 = pmov %p11651_p2 }
 0x18f   : > { %p11653_p10 = pmov %p11651_p2 }
 0x190   : > { %9370 = vsyncadd (%p11652_p13), [#allocation4], 4294951936 }
 0x191   : > { %9372 = dma.done.wait (%p11653_p10), [#allocation7], 96   ;;  %p11654_p0 = pmov %p11651_p2 }
 0x193   : > { %9374 = vsyncadd (%p11654_p0), [#allocation7], 4294967200  ;;  %p11655_p5 = pmov %p11654_p0 }
 0x194   : > { %p11656_p3 = pmov %p11654_p0 }
 0x195   : > { %9376 = dma.done.wait (%p11655_p5), [#allocation10], 384  }
 0x196   : > { %9378 = vsyncadd (%p11656_p3), [#allocation10], 4294966912  ;;  %s11657_s1 = sld [smem:[#allocation33_spill]]  ;;  %s11658_s17 = sld [smem:[#allocation39_spill]] }
 0x197   : > { %s666_s21 = sand.u32 1, %s11650_s16  }
 0x198   : > { %s667_s25 = scalar_lea.sflag [#allocation4], %s666_s21 }
 0x19c   : > { %s668_s20 = sand.u32 1, %s11657_s1   ;;  %p11659_p4 = scmp.ne.s32.totalorder %s11658_s17, 0 }
 0x19d   : > { %s8455_s27 = smul.u32 864, %s668_s20 }
 0x19f   : > { %s9976_s30 = scalar_lea.vmem [#allocation11], %s8455_s27 }
 0x1a0   : > { %9380 = dma.done.wait (%p11659_p4), %s667_s25, 58368  }
 0x1a1   : > { %9382 = vsyncadd (%p11659_p4), %s667_s25, 4294908928  ;;  %s8456_s26 = smul.u32 288, %s668_s20  ;;  %p11660_p12 = pmov %p11654_p0 }
 0x1a2   : > { %s8457_s29 = smul.u32 1152, %s668_s20 }
 0x1a3   : > { %s8458_s22 = smul.u32 192, %s668_s20  ;;  %s9982_s5 = scalar_lea.vmem [#allocation12], %s8456_s26 }
 0x1a4   : > { %s9984_s19 = scalar_lea.vmem [#allocation13], %s8457_s29  ;;  %s9986_s18 = scalar_lea.vmem [#allocation14], %s8457_s29 }
 0x1a5   : > { %s9988_s28 = scalar_lea.vmem [#allocation15], %s8458_s22 }
 0x1a6   : > { %9384 = dma.done.wait (%p11660_p12), [#allocation7], 48   ;;  %p11661_p8 = pmov %p11654_p0 }
 0x1a7   : > { %p11662_p9 = pmov %p11654_p0 }
 0x1a8   : > { %9386 = vsyncadd (%p11661_p8), [#allocation7], 4294967248 }
 0x1a9   : > { %9388 = dma.done.wait (%p11662_p9), [#allocation10], 48   ;;  %p11663_p1 = pmov %p11654_p0 }
 0x1aa   : > { %p11664_p11 = pmov %p11654_p0 }
 0x1ab   : > { %9390 = vsyncadd (%p11663_p1), [#allocation10], 4294967248 }
 0x1ac   : > { %9392 = dma.done.wait (%p11664_p11), [#allocation19], 12320   ;;  %p11665_p7 = pmov %p11654_p0 }
 0x1ad   : > { %p11666_p6 = pmov %p11654_p0 }
 0x1ae   : > { %9394 = vsyncadd (%p11665_p7), [#allocation19], 4294954976 }
 0x1af   : > { %9396 = dma.done.wait (%p11666_p6), [#allocation22], 16   ;;  %p11667_p2 = pmov %p11654_p0 }
 0x1b0   : > { %p11668_p13 = scmp.ne.s32.totalorder %s11650_s16, 0 }
 0x1b1   : > { %9398 = vsyncadd (%p11667_p2), [#allocation22], 4294967280  ;;  %v8634_v0 = vld [vmem:[#allocation3 + $0x4] ss:$12 sps:$4 sm:$0xff] (!%p11668_p13)   ;;  %vm795_vm0 = vcmask (!%p11668_p13), 9216   ;;  %v9443_v2 = vmov (!%p11668_p13), 0  }
 0x1b2   : > { %794 = sbr.rel (%p11668_p13) target bundleno = 785 (0x311), region = 144  ;;  %v8636_v1 = vld [vmem:[#allocation3 + $0x304] ss:$12 sps:$4 sm:$0xff] (!%p11668_p13)   ;;  %1749 = vmatprep.mubr.bf16.mxu1 (!%p11668_p13), %v9443_v2  ;;  %1635 = vmatprep.subr.bf16.mxu0 (!%p11668_p13), %v8634_v0  ;;  %v8638_v3 = vld [vmem:[#allocation3] ss:$12 sps:$4 sm:$0xff] (!%p11668_p13)   ;;  %v9444_v5 = vmov (!%p11668_p13), 0.0  }
 0x1b3   : > { %v8639_v4 = vld [vmem:[#allocation3 + $0x300] ss:$12 sps:$4 sm:$0xff] (!%p11668_p13)   ;;  %796 = vst.msk [vmem:[#allocation23] sm:$0x3] (!%p11668_p13), %vm795_vm0, %v9444_v5  ;;  %1717 = vmatprep.subr.bf16.mxu1 (!%p11668_p13), %v8636_v1  ;;  %v8640_v6 = vld [vmem:[#allocation3 + $0x1c] ss:$12 sps:$4 sm:$0xff] (!%p11668_p13)   ;;  %1636 = vmatpush1.bf16.msra.mxu0 (!%p11668_p13), %v8638_v3 }
 0x1b4   : > { %1718 = vmatpush1.bf16.msra.mxu1 (!%p11668_p13), %v8639_v4  ;;  %v8642_v7 = vld [vmem:[#allocation3 + $0x31c] ss:$12 sps:$4 sm:$0xff] (!%p11668_p13)   ;;  %v8644_v8 = vld [vmem:[#allocation3 + $0x18] ss:$12 sps:$4 sm:$0xff] (!%p11668_p13)   ;;  %1637 = vmatprep.subr.bf16.mxu0 (!%p11668_p13), %v8640_v6  ;;  %v8646_v10 = vld [vmem:[#allocation3 + $0x34] ss:$12 sps:$4 sm:$0xff] (!%p11668_p13)  }
 0x1b5   : > { %v8645_v9 = vld [vmem:[#allocation3 + $0x318] ss:$12 sps:$4 sm:$0xff] (!%p11668_p13)   ;;  %1719 = vmatprep.subr.bf16.mxu1 (!%p11668_p13), %v8642_v7  ;;  %v8648_v11 = vld [vmem:[#allocation3 + $0x334] ss:$12 sps:$4 sm:$0xff] (!%p11668_p13)   ;;  %v8650_v12 = vld [vmem:[#allocation3 + $0x30] ss:$12 sps:$4 sm:$0xff] (!%p11668_p13)  }
 0x1b6   : > { %v8651_v13 = vld [vmem:[#allocation3 + $0x330] ss:$12 sps:$4 sm:$0xff] (!%p11668_p13)   ;;  %v8652_v14 = vld [vmem:[#allocation3 + $0x4c] ss:$12 sps:$4 sm:$0xff] (!%p11668_p13)   ;;  %v8656_v16 = vld [vmem:[#allocation3 + $0x48] ss:$12 sps:$4 sm:$0xff] (!%p11668_p13)  }
 0x1b7   : > { %1638 = vmatpush1.bf16.msra.mxu0 (!%p11668_p13), %v8644_v8  ;;  %v8654_v15 = vld [vmem:[#allocation3 + $0x34c] ss:$12 sps:$4 sm:$0xff] (!%p11668_p13)   ;;  %v8657_v17 = vld [vmem:[#allocation3 + $0x348] ss:$12 sps:$4 sm:$0xff] (!%p11668_p13)   ;;  %v8658_v18 = vld [vmem:[#allocation3 + $0x64] ss:$12 sps:$4 sm:$0xff] (!%p11668_p13)  }
 0x1b8   : > { %1720 = vmatpush1.bf16.msra.mxu1 (!%p11668_p13), %v8645_v9  ;;  %1639 = vmatprep.subr.bf16.mxu0 (!%p11668_p13), %v8646_v10  ;;  %v8660_v19 = vld [vmem:[#allocation3 + $0x364] ss:$12 sps:$4 sm:$0xff] (!%p11668_p13)   ;;  %v8662_v20 = vld [vmem:[#allocation3 + $0x60] ss:$12 sps:$4 sm:$0xff] (!%p11668_p13)   ;;  %v8664_v22 = vld [vmem:[#allocation3 + $0x7c] ss:$12 sps:$4 sm:$0xff] (!%p11668_p13)  }
 0x1b9   : > { %1721 = vmatprep.subr.bf16.mxu1 %v8648_v11  ;;  %v8663_v21 = vld [vmem:[#allocation3 + $0x360] ss:$12 sps:$4 sm:$0xff]   ;;  %v8666_v23 = vld [vmem:[#allocation3 + $0x37c] ss:$12 sps:$4 sm:$0xff]   ;;  %v8668_v24 = vld [vmem:[#allocation3 + $0x78] ss:$12 sps:$4 sm:$0xff]  }
 0x1ba   : > { %v8669_v25 = vld [vmem:[#allocation3 + $0x378] ss:$12 sps:$4 sm:$0xff]   ;;  %v8670_v26 = vld [vmem:[#allocation3 + $0x94] ss:$12 sps:$4 sm:$0xff]   ;;  %v8674_v28 = vld [vmem:[#allocation3 + $0x90] ss:$12 sps:$4 sm:$0xff]  }
 0x1bb   : > { %1640 = vmatpush1.bf16.msra.mxu0 %v8650_v12  ;;  %v8672_v27 = vld [vmem:[#allocation3 + $0x394] ss:$12 sps:$4 sm:$0xff]   ;;  %v8675_v29 = vld [vmem:[#allocation3 + $0x390] ss:$12 sps:$4 sm:$0xff]   ;;  %v8676_v30 = vld [vmem:[#allocation3 + $0xac] ss:$12 sps:$4 sm:$0xff]  }
 0x1bc   : > { %1722 = vmatpush1.bf16.msra.mxu1 %v8651_v13  ;;  %1641 = vmatprep.subr.bf16.mxu0 %v8652_v14  ;;  %v8678_v31 = vld [vmem:[#allocation3 + $0x3ac] ss:$12 sps:$4 sm:$0xff]   ;;  %v8680_v32 = vld [vmem:[#allocation3 + $0xa8] ss:$12 sps:$4 sm:$0xff]   ;;  %v8682_v34 = vld [vmem:[#allocation3 + $0xc4] ss:$12 sps:$4 sm:$0xff]  }
 0x1bd   : > { %1723 = vmatprep.subr.bf16.mxu1 %v8654_v15  ;;  %v8681_v33 = vld [vmem:[#allocation3 + $0x3a8] ss:$12 sps:$4 sm:$0xff]   ;;  %v8685_v36 = vld [vmem:[#allocation3 + $0xc0] ss:$12 sps:$4 sm:$0xff]   ;;  %s11669_s0 = sld [smem:[#allocation40_spill]]  ;;  %vm9445_vm1 = vmmov 0  }
 0x1be   : > { %v8684_v35 = vld [vmem:[#allocation3 + $0xc8] ss:$12 sps:$4 sm:$0xff]   ;;  %v8690_v40 = vld [vmem:[#allocation3 + $0xe0] ss:$12 sps:$4 sm:$0xff]   ;;  %v8691_v41 = vld [vmem:[#allocation3 + $0xd8] ss:$12 sps:$4 sm:$0xff]  }
 0x1bf   : > { %1642 = vmatpush1.bf16.msra.mxu0 %v8656_v16  ;;  %v8687_v38 = vld [vmem:[#allocation3 + $0x8] ss:$12 sps:$4 sm:$0xff]   ;;  %v8692_v42 = vld [vmem:[#allocation3 + $0x20] ss:$12 sps:$4 sm:$0xff]   ;;  %v8695_v44 = vld [vmem:[#allocation3 + $0xf8] ss:$12 sps:$4 sm:$0xff]  }
 0x1c0   : > { %1724 = vmatpush1.bf16.msra.mxu1 %v8657_v17  ;;  %1643 = vmatprep.subr.bf16.mxu0 %v8658_v18  ;;  %v8688_v39 = vld [vmem:[#allocation3 + $0xdc] ss:$12 sps:$4 sm:$0xff]   ;;  %v8693_v43 = vld [vmem:[#allocation3 + $0xf4] ss:$12 sps:$4 sm:$0xff]   ;;  %v8697_v46 = vld [vmem:[#allocation3 + $0x38] ss:$12 sps:$4 sm:$0xff]  }
 0x1c1   : > { %1725 = vmatprep.subr.bf16.mxu1 %v8660_v19  ;;  %v8696_v45 = vld [vmem:[#allocation3 + $0xf0] ss:$12 sps:$4 sm:$0xff]   ;;  %v8698_v47 = vld [vmem:[#allocation3 + $0x10c] ss:$12 sps:$4 sm:$0xff]   ;;  %v8701_v49 = vld [vmem:[#allocation3 + $0x108] ss:$12 sps:$4 sm:$0xff]  }
 0x1c2   : > { %v8700_v48 = vld [vmem:[#allocation3 + $0x110] ss:$12 sps:$4 sm:$0xff]   ;;  %v8705_v52 = vld [vmem:[#allocation3 + $0x128] ss:$12 sps:$4 sm:$0xff]   ;;  %v8706_v53 = vld [vmem:[#allocation3 + $0x120] ss:$12 sps:$4 sm:$0xff]  }
 0x1c3   : > { %1644 = vmatpush1.bf16.msra.mxu0 %v8662_v20  ;;  %v10012_v37 = vld [vmem:[%s11669_s0 + $0x10] ss:$0 sps:$4 sm:$0xff]   ;;  %v8702_v50 = vld [vmem:[#allocation3 + $0x50] ss:$12 sps:$4 sm:$0xff]   ;;  %v8707_v54 = vld [vmem:[#allocation3 + $0x68] ss:$12 sps:$4 sm:$0xff]  }
 0x1c4   : > { %1726 = vmatpush1.bf16.msra.mxu1 %v8663_v21  ;;  %1645 = vmatprep.subr.bf16.mxu0 %v8664_v22  ;;  %v8703_v51 = vld [vmem:[#allocation3 + $0x124] ss:$12 sps:$4 sm:$0xff]   ;;  %v8708_v55 = vld [vmem:[#allocation3 + $0x13c] ss:$12 sps:$4 sm:$0xff]   ;;  %v8710_v57 = vld [vmem:[#allocation3 + $0x140] ss:$12 sps:$4 sm:$0xff]  }
 0x1c5   : > { %1727 = vmatprep.subr.bf16.mxu1 %v8666_v23  ;;  %v797_v56 = vld [vmem:[%s11669_s0] sm:$0xff]  ;;  %v8711_v59 = vld [vmem:[#allocation3 + $0x138] ss:$12 sps:$4 sm:$0xff]   ;;  %v8712_v60 = vld [vmem:[#allocation3 + $0x80] ss:$12 sps:$4 sm:$0xff]  }
 0x1c6   : > { %v7553_v58 = vcombine.high %v797_v56, %v797_v56  ;;  %v8713_v61 = vld [vmem:[#allocation3 + $0x154] ss:$12 sps:$4 sm:$0xff]   ;;  %v8715_v62 = vld [vmem:[#allocation3 + $0x158] ss:$12 sps:$4 sm:$0xff]   ;;  %v8716_v63 = vld [vmem:[#allocation3 + $0x150] ss:$12 sps:$4 sm:$0xff]   ;;  %v7552_v8 = vcombine.low %v797_v56, %v797_v56 }
 0x1c7   : > { %1646 = vmatpush1.bf16.msra.mxu0 %v8668_v24  ;;  %v8717_v0 = vld [vmem:[#allocation3 + $0x98] ss:$12 sps:$4 sm:$0xff]   ;;  %v8720_v2 = vld [vmem:[#allocation3 + $0x170] ss:$12 sps:$4 sm:$0xff]   ;;  %v8721_v3 = vld [vmem:[#allocation3 + $0x168] ss:$12 sps:$4 sm:$0xff]  }
 0x1c8   : > { %1728 = vmatpush1.bf16.msra.mxu1 %v8669_v25  ;;  %1647 = vmatprep.subr.bf16.mxu0 %v8670_v26  ;;  %v8718_v1 = vld [vmem:[#allocation3 + $0x16c] ss:$12 sps:$4 sm:$0xff]   ;;  %v8722_v4 = vld [vmem:[#allocation3 + $0xb0] ss:$12 sps:$4 sm:$0xff]   ;;  %v8728_v7 = vld [vmem:[#allocation3 + $0x248] ss:$12 sps:$4 sm:$0xff]  }
 0x1c9   : > { %1729 = vmatprep.subr.bf16.mxu1 %v8672_v27  ;;  %1667 = vmatprep.mubr.bf16.mxu0 %v7553_v58  ;;  %v8727_v6 = vld [vmem:[#allocation3 + $0x184] ss:$12 sps:$4 sm:$0xff]   ;;  %v8725_v9 = vld [vmem:[#allocation3 + $0x180] ss:$12 sps:$4 sm:$0xff]   ;;  %v8729_v10 = vld [vmem:[#allocation3 + $0x188] ss:$12 sps:$4 sm:$0xff]  }
 0x1ca   : > { %v8732_v11 = vld [vmem:[#allocation3 + $0x19c] ss:$12 sps:$4 sm:$0xff]   ;;  %v8733_v12 = vld [vmem:[#allocation3 + $0x260] ss:$12 sps:$4 sm:$0xff]   ;;  %v8730_v13 = vld [vmem:[#allocation3 + $0x198] ss:$12 sps:$4 sm:$0xff]  }
 0x1cb   : > { %1648 = vmatpush1.bf16.msra.mxu0 %v8674_v28  ;;  %v8734_v14 = vld [vmem:[#allocation3 + $0x1a0] ss:$12 sps:$4 sm:$0xff]   ;;  %v8738_v16 = vld [vmem:[#allocation3 + $0x278] ss:$12 sps:$4 sm:$0xff]   ;;  %v8735_v17 = vld [vmem:[#allocation3 + $0x1b0] ss:$12 sps:$4 sm:$0xff]  }
 0x1cc   : > { %1730 = vmatpush1.bf16.msra.mxu1 %v8675_v29  ;;  %1649 = vmatprep.subr.bf16.mxu0 %v8676_v30  ;;  %v8737_v15 = vld [vmem:[#allocation3 + $0x1b4] ss:$12 sps:$4 sm:$0xff]   ;;  %v8739_v18 = vld [vmem:[#allocation3 + $0x1b8] ss:$12 sps:$4 sm:$0xff]   ;;  %v8743_v20 = vld [vmem:[#allocation3 + $0x290] ss:$12 sps:$4 sm:$0xff]  }
 0x1cd   : > { %1731 = vmatprep.subr.bf16.mxu1 %v8678_v31  ;;  %v8742_v19 = vld [vmem:[#allocation3 + $0x1cc] ss:$12 sps:$4 sm:$0xff]   ;;  %v8740_v21 = vld [vmem:[#allocation3 + $0x1c8] ss:$12 sps:$4 sm:$0xff]   ;;  %v8744_v22 = vld [vmem:[#allocation3 + $0x1d0] ss:$12 sps:$4 sm:$0xff]  }
 0x1ce   : > { %v798_v23 = vld [vmem:[%s11669_s0 + $0x8] sm:$0xff]  ;;  %v8747_v24 = vld [vmem:[#allocation3 + $0x1e4] ss:$12 sps:$4 sm:$0xff]   ;;  %v8748_v26 = vld [vmem:[#allocation3 + $0x2a8] ss:$12 sps:$4 sm:$0xff]  }
 0x1cf   : > { %1650 = vmatpush1.bf16.msra.mxu0 %v8680_v32  ;;  %v7555_v25 = vcombine.high %v798_v23, %v798_v23  ;;  %v8745_v27 = vld [vmem:[#allocation3 + $0x1e0] ss:$12 sps:$4 sm:$0xff]   ;;  %v8749_v28 = vld [vmem:[#allocation3 + $0x1e8] ss:$12 sps:$4 sm:$0xff]   ;;  %v8750_v31 = vld [vmem:[#allocation3 + $0x1f8] ss:$12 sps:$4 sm:$0xff]  }
 0x1d0   : > { %1732 = vmatpush1.bf16.msra.mxu1 %v8681_v33  ;;  %1651 = vmatprep.subr.bf16.mxu0 %v8682_v34  ;;  %v8752_v29 = vld [vmem:[#allocation3 + $0x1fc] ss:$12 sps:$4 sm:$0xff]   ;;  %v8753_v30 = vld [vmem:[#allocation3 + $0x2c0] ss:$12 sps:$4 sm:$0xff]   ;;  %v8758_v34 = vld [vmem:[#allocation3 + $0x2d8] ss:$12 sps:$4 sm:$0xff]  }
 0x1d1   : > { %7701 = vmatprep.subr.bf16.mxu1 %v8684_v35  ;;  %v8754_v32 = vld [vmem:[#allocation3 + $0x200] ss:$12 sps:$4 sm:$0xff]   ;;  %v8755_v35 = vld [vmem:[#allocation3 + $0x210] ss:$12 sps:$4 sm:$0xff]  }
 0x1d2   : > { %v8757_v33 = vld [vmem:[#allocation3 + $0x214] ss:$12 sps:$4 sm:$0xff]  }
 0x1d3   : > { %1750 = vmatmul.mubr.bf16.vlgmr.msra.gmra.mrb[0].mxu1 %v10012_v37  ;;  %1652 = vmatpush1.bf16.msra.mxu0 %v8685_v36  ;;  %v8759_v36 = vld [vmem:[#allocation3 + $0x218] ss:$12 sps:$4 sm:$0xff]   ;;  %v8783_v56 = vld [vmem:[#allocation3 + $0x2a0] ss:$12 sps:$4 sm:$0xff]  }
 0x1d4   : > { %7702 = vmatpush3.bf16.msra.mxu1 %v8687_v38  ;;  %1653 = vmatprep.subr.bf16.mxu0 %v8688_v39  ;;  %v8762_v38 = vld [vmem:[#allocation3 + $0x22c] ss:$12 sps:$4 sm:$0xff]   ;;  %v8763_v39 = vld [vmem:[#allocation3 + $0x2f0] ss:$12 sps:$4 sm:$0xff]  }
 0x1d5   : > { %7703 = vmatprep.subr.bf16.mxu1 %v8690_v40  ;;  %1790 = vmatprep.mubr.bf16.mxu1 %v7553_v58  ;;  %v8760_v40 = vld [vmem:[#allocation3 + $0x228] ss:$12 sps:$4 sm:$0xff]  }
 0x1d6   : > { %v8789_v58 = vld [vmem:[#allocation3 + $0x2bc] ss:$12 sps:$4 sm:$0xff]  }
 0x1d7   : > { %1654 = vmatpush1.bf16.msra.mxu0 %v8691_v41  ;;  %v8764_v41 = vld [vmem:[#allocation3 + $0x230] ss:$12 sps:$4 sm:$0xff]  }
 0x1d8   : > { %7704 = vmatpush3.bf16.msra.mxu1 %v8692_v42  ;;  %1655 = vmatprep.subr.bf16.mxu0 %v8693_v43  ;;  %v8769_v42 = vld [vmem:[#allocation3 + $0x244] ss:$12 sps:$4 sm:$0xff]   ;;  %v7554_v43 = vcombine.low %v798_v23, %v798_v23 }
 0x1d9   : > { %7705 = vmatprep.subr.bf16.mxu1 %v8695_v44  ;;  %v8767_v44 = vld [vmem:[#allocation3 + $0x240] ss:$12 sps:$4 sm:$0xff]  }
 0x1db   : > { %1656 = vmatpush1.bf16.msra.mxu0 %v8696_v45  ;;  %v8770_v45 = vld [vmem:[#allocation3 + $0x308] ss:$12 sps:$4 sm:$0xff]  }
 0x1dc   : > { %7706 = vmatpush3.bf16.msra.mxu1 %v8697_v46  ;;  %1657 = vmatprep.subr.bf16.mxu0 %v8698_v47  ;;  %v8773_v46 = vld [vmem:[#allocation3 + $0x25c] ss:$12 sps:$4 sm:$0xff]   ;;  %v8771_v47 = vld [vmem:[#allocation3 + $0x258] ss:$12 sps:$4 sm:$0xff]  }
 0x1dd   : > { %7707 = vmatprep.subr.bf16.mxu1 %v8700_v48  ;;  %v8774_v48 = vld [vmem:[#allocation3 + $0x320] ss:$12 sps:$4 sm:$0xff]  }
 0x1df   : > { %1658 = vmatpush1.bf16.msra.mxu0 %v8701_v49  ;;  %v8777_v49 = vld [vmem:[#allocation3 + $0x274] ss:$12 sps:$4 sm:$0xff]  }
 0x1e0   : > { %7708 = vmatpush3.bf16.msra.mxu1 %v8702_v50  ;;  %1659 = vmatprep.subr.bf16.mxu0 %v8703_v51  ;;  %v8775_v50 = vld [vmem:[#allocation3 + $0x270] ss:$12 sps:$4 sm:$0xff]   ;;  %v8778_v51 = vld [vmem:[#allocation3 + $0x338] ss:$12 sps:$4 sm:$0xff]  }
 0x1e1   : > { %7709 = vmatprep.subr.bf16.mxu1 %v8705_v52  ;;  %v8781_v52 = vld [vmem:[#allocation3 + $0x28c] ss:$12 sps:$4 sm:$0xff]  }
 0x1e3   : > { %1660 = vmatpush1.bf16.msra.mxu0 %v8706_v53  ;;  %v8779_v53 = vld [vmem:[#allocation3 + $0x288] ss:$12 sps:$4 sm:$0xff]  }
 0x1e4   : > { %7710 = vmatpush3.bf16.msra.mxu1 %v8707_v54  ;;  %1661 = vmatprep.subr.bf16.mxu0 %v8708_v55  ;;  %v8782_v54 = vld [vmem:[#allocation3 + $0x350] ss:$12 sps:$4 sm:$0xff]  }
 0x1e5   : > { %7711 = vmatprep.subr.bf16.mxu1 %v8710_v57  ;;  %v8785_v55 = vld [vmem:[#allocation3 + $0x2a4] ss:$12 sps:$4 sm:$0xff]   ;;  %v8786_v57 = vld [vmem:[#allocation3 + $0x368] ss:$12 sps:$4 sm:$0xff]  }
 0x1e7   : > { %1662 = vmatpush1.bf16.msra.mxu0 %v8711_v59  ;;  %v8787_v59 = vld [vmem:[#allocation3 + $0x2b8] ss:$12 sps:$4 sm:$0xff]  }
 0x1e8   : > { %7712 = vmatpush3.bf16.msra.mxu1 %v8712_v60  ;;  %1663 = vmatprep.subr.bf16.mxu0 %v8713_v61  ;;  %v8790_v60 = vld [vmem:[#allocation3 + $0x380] ss:$12 sps:$4 sm:$0xff]  }
 0x1e9   : > { %7713 = vmatprep.subr.bf16.mxu1 %v8715_v62  ;;  %v8793_v61 = vld [vmem:[#allocation3 + $0x2d4] ss:$12 sps:$4 sm:$0xff]   ;;  %v8791_v62 = vld [vmem:[#allocation3 + $0x2d0] ss:$12 sps:$4 sm:$0xff]  }
 0x1eb   : > { %1664 = vmatpush1.bf16.msra.mxu0 %v8716_v63  ;;  %v8794_v63 = vld [vmem:[#allocation3 + $0x398] ss:$12 sps:$4 sm:$0xff]  }
 0x1ec   : > { %7714 = vmatpush3.bf16.msra.mxu1 %v8717_v0  ;;  %1665 = vmatprep.subr.bf16.mxu0 %v8718_v1  ;;  %v8797_v0 = vld [vmem:[#allocation3 + $0x2ec] ss:$12 sps:$4 sm:$0xff]   ;;  %v8795_v1 = vld [vmem:[#allocation3 + $0x2e8] ss:$12 sps:$4 sm:$0xff]  }
 0x1ed   : > { %7715 = vmatprep.subr.bf16.mxu1 %v8720_v2  ;;  %v8798_v2 = vld [vmem:[#allocation3 + $0x3b0] ss:$12 sps:$4 sm:$0xff]  }
 0x1ef   : > { %1666 = vmatpush1.bf16.msra.mxu0 %v8721_v3  ;;  %v962_v3 = vlaneseq }
 0x1f0   : > { %7716 = vmatpush3.bf16.msra.mxu1 %v8722_v4  ;;  %1676 = vmatprep.subr.bf16.mxu0 %v8727_v6  ;;  %v1878_v4 = vld [vmem:[#allocation8] sm:$0x7]  ;;  %v1879_v6 = vld [vmem:[#allocation9] ss:$8 sm:$0x7] }
 0x1f1   : > { %7723 = vmatprep.subr.bf16.mxu1 %v8728_v7  ;;  %vm1886_vm2 = vcmp.lt.s32.totalorder %v962_v3, 384  ;;  %v1880_v7 = vadd.f32 %v1879_v6, %v1878_v4 }
 0x1f2   : > { %1668 = vmatmul.mubr.bf16.vlgmr.msra.gmra.mrb[0].mxu0 %v7552_v8 }
 0x1f3   : > { %1791 = vmatmul.mubr.bf16.vlgmr.msra.gmra.mrb[4].mxu1 %v7552_v8  ;;  %1677 = vmatpush1.bf16.msra.mxu0 %v8725_v9  ;;  %1888 = vst.msk [vmem:[#allocation2] ss:$8 sm:$0x7] %vm1886_vm2, %v1880_v7  ;;  %1915 = vst.msk [vmem:[#allocation2 + $0x5] ss:$8 sm:$0x7] %vm1886_vm2, %v1880_v7 }
 0x1f4   : > { %7724 = vmatpush3.bf16.msra.mxu1 %v8729_v10  ;;  %1678 = vmatprep.subr.bf16.mxu0 %v8732_v11 }
 0x1f5   : > { %7725 = vmatprep.subr.bf16.mxu1 %v8733_v12  ;;  %1830 = vmatprep.mubr.bf16.mxu1 %v7555_v25  ;;  %v963_v12 = vshrl.u32 %v962_v3, 7 }
 0x1f6   : > { %1708 = vmatprep.mubr.bf16.mxu0 %v7555_v25 }
 0x1f7   : > { %1679 = vmatpush1.bf16.msra.mxu0 %v8730_v13  ;;  %v972_v13 = vsub.s32 2, %v963_v12 }
 0x1f8   : > { %7726 = vmatpush3.bf16.msra.mxu1 %v8734_v14  ;;  %1680 = vmatprep.subr.bf16.mxu0 %v8737_v15  ;;  %v960_v14 = vld [vmem:[#allocation6] sm:$0x7] }
 0x1f9   : > { %7727 = vmatprep.subr.bf16.mxu1 %v8738_v16  ;;  %v973_v15 = vrot.slane %v960_v14, %v972_v13 }
 0x1fb   : > { %1681 = vmatpush1.bf16.msra.mxu0 %v8735_v17 }
 0x1fc   : > { %7728 = vmatpush3.bf16.msra.mxu1 %v8739_v18  ;;  %1682 = vmatprep.subr.bf16.mxu0 %v8742_v19 }
 0x1fd   : > { %7729 = vmatprep.subr.bf16.mxu1 %v8743_v20 }
 0x1ff   : > { %1683 = vmatpush1.bf16.msra.mxu0 %v8740_v21 }
 0x200   : > { %7730 = vmatpush3.bf16.msra.mxu1 %v8744_v22  ;;  %1684 = vmatprep.subr.bf16.mxu0 %v8747_v24 }
 0x201   : > { %7731 = vmatprep.subr.bf16.mxu1 %v8748_v26  ;;  %v964_v26 = vsub.s32 0, %v963_v12 }
 0x203   : > { %1685 = vmatpush1.bf16.msra.mxu0 %v8745_v27  ;;  %v968_v27 = vsub.s32 1, %v963_v12 }
 0x204   : > { %7732 = vmatpush3.bf16.msra.mxu1 %v8749_v28  ;;  %1686 = vmatprep.subr.bf16.mxu0 %v8752_v29  ;;  %v1883_v28 = vld [vmem:[#allocation9 + $0x10] sm:$0x1e]  ;;  %v965_v29 = vrot.slane %v960_v14, %v964_v26 }
 0x205   : > { %7733 = vmatprep.subr.bf16.mxu1 %v8753_v30  ;;  %v1881_v30 = vld [vmem:[#allocation9] sm:$0x1e] }
 0x207   : > { %1687 = vmatpush1.bf16.msra.mxu0 %v8750_v31  ;;  %v969_v31 = vrot.slane %v960_v14, %v968_v27 }
 0x208   : > { %7734 = vmatpush3.bf16.msra.mxu1 %v8754_v32  ;;  %1688 = vmatprep.subr.bf16.mxu0 %v8757_v33  ;;  %v1895_v32 = vrot.slane %v1883_v28, 1  ;;  %v1919_v33 = vrot.slane %v1883_v28, 5 }
 0x209   : > { %7735 = vmatprep.subr.bf16.mxu1 %v8758_v34  ;;  %v1882_v34 = vld [vmem:[#allocation9 + $0x8] sm:$0x1e] }
 0x20b   : > { %1689 = vmatpush1.bf16.msra.mxu0 %v8755_v35 }
 0x20c   : > { %7736 = vmatpush3.bf16.msra.mxu1 %v8759_v36  ;;  %1690 = vmatprep.subr.bf16.mxu0 %v8762_v38 }
 0x20d   : > { %7737 = vmatprep.subr.bf16.mxu1 %v8763_v39  ;;  %v1893_v39 = vrot.slane %v1881_v30, 1 }
 0x20f   : > { %1691 = vmatpush1.bf16.msra.mxu0 %v8760_v40  ;;  %v1917_v40 = vrot.slane %v1881_v30, 5 }
 0x210   : > { %7738 = vmatpush3.bf16.msra.mxu1 %v8764_v41  ;;  %1692 = vmatprep.subr.bf16.mxu0 %v8769_v42 }
 0x211   : > { %8031 = vmatprep.subr.bf16.mxu1 %v9444_v5 }
 0x213   : > { %1831 = vmatmul.mubr.bf16.vlgmr.msra.gmra.mrb[8].mxu1 %v7554_v43  ;;  %1693 = vmatpush1.bf16.msra.mxu0 %v8767_v44 }
 0x214   : > { %8032 = vmatpush3.bf16.msra.mxu1 %v8770_v45  ;;  %1694 = vmatprep.subr.bf16.mxu0 %v8773_v46  ;;  %v1894_v45 = vrot.slane %v1882_v34, 1  ;;  %v1918_v46 = vrot.slane %v1882_v34, 5 }
 0x215   : > { %8033 = vmatprep.subr.bf16.mxu1 %v9444_v5  ;;  %8047 = vmatprep.mubr.msk.bf16.mxu1 %vm9445_vm1, %v9444_v5 }
 0x217   : > { %1695 = vmatpush1.bf16.msra.mxu0 %v8771_v47 }
 0x218   : > { %8034 = vmatpush3.bf16.msra.mxu1 %v8774_v48  ;;  %1696 = vmatprep.subr.bf16.mxu0 %v8777_v49 }
 0x219   : > { %8035 = vmatprep.subr.bf16.mxu1 %v9444_v5 }
 0x21b   : > { %1697 = vmatpush1.bf16.msra.mxu0 %v8775_v50 }
 0x21c   : > { %8036 = vmatpush3.bf16.msra.mxu1 %v8778_v51  ;;  %1698 = vmatprep.subr.bf16.mxu0 %v8781_v52 }
 0x21d   : > { %8037 = vmatprep.subr.bf16.mxu1 %v9444_v5 }
 0x21f   : > { %1699 = vmatpush1.bf16.msra.mxu0 %v8779_v53 }
 0x220   : > { %8038 = vmatpush3.bf16.msra.mxu1 %v8782_v54  ;;  %1700 = vmatprep.subr.bf16.mxu0 %v8785_v55 }
 0x221   : > { %8039 = vmatprep.subr.bf16.mxu1 %v9444_v5 }
 0x223   : > { %1701 = vmatpush1.bf16.msra.mxu0 %v8783_v56 }
 0x224   : > { %8040 = vmatpush3.bf16.msra.mxu1 %v8786_v57  ;;  %1702 = vmatprep.subr.bf16.mxu0 %v8789_v58 }
 0x225   : > { %8041 = vmatprep.subr.bf16.mxu1 %v9444_v5 }
 0x227   : > { %1703 = vmatpush1.bf16.msra.mxu0 %v8787_v59 }
 0x228   : > { %8042 = vmatpush3.bf16.msra.mxu1 %v8790_v60  ;;  %1704 = vmatprep.subr.bf16.mxu0 %v8793_v61 }
 0x229   : > { %8043 = vmatprep.subr.bf16.mxu1 %v9444_v5 }
 0x22b   : > { %1705 = vmatpush1.bf16.msra.mxu0 %v8791_v62 }
 0x22c   : > { %8044 = vmatpush3.bf16.msra.mxu1 %v8794_v63  ;;  %1706 = vmatprep.subr.bf16.mxu0 %v8797_v0 }
 0x22d   : > { %8045 = vmatprep.subr.bf16.mxu1 %v9444_v5 }
 0x22f   : > { %1707 = vmatpush1.bf16.msra.mxu0 %v8795_v1 }
 0x230   : > { %8046 = vmatpush3.bf16.msra.mxu1 %v8798_v2 }
 0x232   : > { %1709 = vmatmul.mubr.bf16.vlgmr.msra.gmra.mrb[0].mxu0 %v7554_v43 }
 0x233   : > { %8048 = vmatmul.mubr.bf16.vlgmr.msra.gmra.mrb[12].mxu1 %v10012_v37 }
 0x2a6   : > { %v1751_v8 = vpop.f32.mrb[0].mxu1 }
 0x2a7   : > { %v1753_v9 = vpop.f32.mrb[1].mxu1 }
 0x2a8   : > { %v1755_v10 = vpop.f32.mrb[2].mxu1 }
 0x2a9   : > { %v1756_v11 = vpop.f32.mrb[3].mxu1 }
 0x2c6   : > { %v7717_v5 = vpop.f32.mrb[4].mxu1 }
 0x2c7   : > { %v7718_v16 = vpop.f32.mrb[5].mxu1 }
 0x2c8   : > { %v7719_v17 = vadd.f32 %v7718_v16, %v7717_v5  ;;  %v7720_v18 = vpop.f32.mrb[6].mxu1 }
 0x2c9   : > { %v7721_v37 = vpop.f32.mrb[7].mxu1 }
 0x2ca   : > { %v1793_v19 = vadd.f32 %v7719_v17, %v973_v15 }
 0x2e6   : > { %v7739_v20 = vpop.f32.mrb[8].mxu1 }
 0x2e7   : > { %v7740_v21 = vpop.f32.mrb[9].mxu1 }
 0x2e8   : > { %v7741_v22 = vadd.f32 %v7740_v21, %v7739_v20  ;;  %v7742_v23 = vpop.f32.mrb[10].mxu1 }
 0x2e9   : > { %v7743_v24 = vpop.f32.mrb[11].mxu1 }
 0x2ea   : > { %v1833_v25 = vadd.f32 %v7741_v22, %v1793_v19 }
 0x305   : > { %v1710_v35 = vpop.f32.mrb[0].mxu0 }
 0x306   : > { %v1872_v36 = vpop.f32.mrb[12].mxu1  ;;  %v8363_v38 = vadd.f32 %v1710_v35, %v965_v29  ;;  %v1712_v42 = vpop.f32.mrb[1].mxu0 }
 0x307   : > { %v1873_v41 = vadd.f32 %v1872_v36, %v1833_v25  ;;  %v8049_v43 = vpop.f32.mrb[13].mxu1  ;;  %v8365_v44 = vadd.f32 %v1712_v42, %v969_v31  ;;  %v1714_v47 = vpop.f32.mrb[2].mxu0 }
 0x308   : > { %v1875_v48 = vpop.f32.mrb[14].mxu1  ;;  %v8364_v49 = vadd.f32 %v8363_v38, %v1751_v8  ;;  %v1715_v52 = vpop.f32.mrb[3].mxu0 }
 0x309   : > { %v1901_v50 = vadd.f32 %v1895_v32, %v1873_v41  ;;  %v1925_v51 = vadd.f32 %v1919_v33, %v1873_v41  ;;  %v8050_v53 = vpop.f32.mrb[15].mxu1  ;;  %v8366_v54 = vadd.f32 %v8365_v44, %v1753_v9 }
 0x30a   : > { %v1899_v55 = vadd.f32 %v8364_v49, %v1893_v39  ;;  %v1923_v56 = vadd.f32 %v8364_v49, %v1917_v40 }
 0x30b   : > { %v1907_v57 = vrot.slane %v1901_v50, 7  ;;  %v1931_v58 = vrot.slane %v1925_v51, 6  ;;  %v1900_v59 = vadd.f32 %v8366_v54, %v1894_v45  ;;  %v1924_v60 = vadd.f32 %v8366_v54, %v1918_v46 }
 0x30c   : > { %v1905_v61 = vrot.slane %v1899_v55, 7  ;;  %v1929_v62 = vrot.slane %v1923_v56, 6 }
 0x30d   : > { %1913 = vst [vmem:[#allocation2 + $0x10] sm:$0x1e] %v1907_v57  ;;  %1937 = vst [vmem:[#allocation2 + $0x28] ss:$-20 sps:$4 sm:$0xc3] %v1931_v58   ;;  %v1906_v63 = vrot.slane %v1900_v59, 7 }
 0x30e   : > { %v1930_v0 = vrot.slane %v1924_v60, 6  ;;  %1911 = vst [vmem:[#allocation2] sm:$0x1e] %v1905_v61  ;;  %1935 = vst [vmem:[#allocation2 + $0x18] ss:$-20 sps:$4 sm:$0xc3] %v1929_v62  }
 0x30f   : > { %1912 = vst [vmem:[#allocation2 + $0x8] sm:$0x1e] %v1906_v63 }
 0x310   : > { %1936 = vst [vmem:[#allocation2 + $0x20] ss:$-20 sps:$4 sm:$0xc3] %v1930_v0  }
 0x311 PF: > { %vm2003_vm3 = vcmask 1041408   ;;  %v2089_v5 = vld [vmem:[%s9976_s30 + $0x8] sm:$0xff]  ;;  %v2088_v16 = vld [vmem:[%s9976_s30] sm:$0xff]  ;;  %v2098_v23 = vld [vmem:[%s9976_s30 + $0x50] sm:$0xff]  ;;  %vm9448_vm4 = vmmov 0   ;;  %vm9449_vm7 = vmmov 1  }
 0x312   : > { %v2093_v15 = vld [vmem:[%s9976_s30 + $0x28] sm:$0xff]  ;;  %v2197_v17 = vunpack.c.l.s8.bf16 %v2089_v5  ;;  %v2206_v18 = vunpack.c.h.s8.bf16 %v2089_v5  ;;  %v2092_v20 = vld [vmem:[%s9976_s30 + $0x20] sm:$0xff]  ;;  %v2196_v21 = vunpack.c.l.s8.bf16 %v2088_v16  ;;  %v2102_v24 = vld [vmem:[%s9976_s30 + $0x70] sm:$0xff]  ;;  %v2205_v25 = vunpack.c.h.s8.bf16 %v2088_v16  ;;  %s11676_s17 = sld [smem:[#allocation35_spill]] }
 0x313   : > { %v2201_v37 = vunpack.c.l.s8.bf16 %v2093_v15  ;;  %v2210_v19 = vunpack.c.h.s8.bf16 %v2093_v15  ;;  %v2200_v22 = vunpack.c.l.s8.bf16 %v2092_v20  ;;  %v2209_v26 = vunpack.c.h.s8.bf16 %v2092_v20  ;;  %v2097_v29 = vld [vmem:[%s9976_s30 + $0x48] sm:$0xff]  ;;  %v2107_v35 = vld [vmem:[%s9976_s30 + $0x98] sm:$0xff]  ;;  %v2106_v42 = vld [vmem:[%s9976_s30 + $0x90] sm:$0xff] }
 0x314   : > { %v10035_v3 = vld [vmem:[#allocation2 + $0x28] sm:$0x3]  ;;  %v10049_v12 = vld [vmem:[#allocation2 + $0x10] sm:$0xff]  ;;  %2412 = vmatprep.subr.bf16.mxu1 %v2197_v17  ;;  %v2215_v27 = vunpack.c.l.s8.bf16 %v2098_v23  ;;  %v2219_v28 = vunpack.c.l.s8.bf16 %v2102_v24  ;;  %v2101_v30 = vld [vmem:[%s9976_s30 + $0x68] sm:$0xff]  ;;  %v2214_v31 = vunpack.c.l.s8.bf16 %v2097_v29  ;;  %v2224_v33 = vunpack.c.h.s8.bf16 %v2098_v23 }
 0x315   : > { %v10031_v1 = vld [vmem:[#allocation2 + $0x18] sm:$0x3]  ;;  %v10037_v4 = vld [vmem:[#allocation2] sm:$0xff]  ;;  %v2007_v9 = vsel %vm2003_vm3, %v10035_v3, 0.0  ;;  %2584 = vmatprep.subr.bf16.mxu0 %v2201_v37  ;;  %2413 = vmatpush1.bf16.msra.mxu1 %v2196_v21  ;;  %v2218_v32 = vunpack.c.l.s8.bf16 %v2101_v30  ;;  %v2228_v34 = vunpack.c.h.s8.bf16 %v2102_v24  ;;  %v2111_v36 = vld [vmem:[%s9976_s30 + $0xb8] sm:$0xff]  ;;  %v2223_v38 = vunpack.c.h.s8.bf16 %v2097_v29 }
 0x316   : > { %v2004_v7 = vsel %vm2003_vm3, %v10031_v1, 0.0  ;;  %2585 = vmatpush1.bf16.msra.mxu0 %v2200_v22  ;;  %2414 = vmatprep.subr.bf16.mxu1 %v2206_v18  ;;  %v2227_v39 = vunpack.c.h.s8.bf16 %v2101_v30  ;;  %v2233_v40 = vunpack.c.l.s8.bf16 %v2107_v35  ;;  %v2237_v41 = vunpack.c.l.s8.bf16 %v2111_v36  ;;  %v2110_v43 = vld [vmem:[%s9976_s30 + $0xb0] sm:$0xff]  ;;  %v2116_v48 = vld [vmem:[%s9976_s30 + $0xe0] sm:$0xff]  ;;  %v2115_v54 = vld [vmem:[%s9976_s30 + $0xd8] sm:$0xff] }
 0x317   : > { %v10033_v2 = vld [vmem:[#allocation2 + $0x20] sm:$0x3]  ;;  %v10039_v6 = vld [vmem:[#allocation2 + $0x8] sm:$0xff]  ;;  %2586 = vmatprep.subr.bf16.mxu0 %v2210_v19  ;;  %v2232_v44 = vunpack.c.l.s8.bf16 %v2106_v42  ;;  %v2236_v45 = vunpack.c.l.s8.bf16 %v2110_v43  ;;  %v2242_v46 = vunpack.c.h.s8.bf16 %v2107_v35  ;;  %v2246_v47 = vunpack.c.h.s8.bf16 %v2111_v36  ;;  %v2120_v49 = vld [vmem:[%s9976_s30 + $0x100] sm:$0xff] }
 0x318   : > { %v2005_v8 = vsel %vm2003_vm3, %v10033_v2, 0.0  ;;  %v1999_v11 = vadd.f32 %v10039_v6, %v10037_v4  ;;  %v2241_v50 = vunpack.c.h.s8.bf16 %v2106_v42  ;;  %v2245_v51 = vunpack.c.h.s8.bf16 %v2110_v43  ;;  %v2119_v55 = vld [vmem:[%s9976_s30 + $0xf8] sm:$0xff]  ;;  %v2125_v60 = vld [vmem:[%s9976_s30 + $0x128] sm:$0xff]  ;;  %vm10345_vm8 = vmpackc.low %vm2003_vm3, %vm9449_vm7  ;;  %p7695_p10 = scmp.ne.s32.totalorder %s11676_s17, 11 }
 0x319   : > { %v2006_v10 = vadd.f32 %v2005_v8, %v2004_v7  ;;  %2415 = vmatpush1.bf16.msra.mxu1 %v2205_v25  ;;  %v2251_v52 = vunpack.c.l.s8.bf16 %v2116_v48  ;;  %v2255_v53 = vunpack.c.l.s8.bf16 %v2120_v49  ;;  %v2250_v56 = vunpack.c.l.s8.bf16 %v2115_v54  ;;  %v2129_v61 = vld [vmem:[%s9976_s30 + $0x148] sm:$0xff]  ;;  %v2124_v8 = vld [vmem:[%s9976_s30 + $0x120] sm:$0xff]  ;;  %s11677_s27 = sld [smem:[#allocation45_spill]] (!%p7695_p10) }
 0x31a   : > { %v2000_v14 = vadd.f32 %v1999_v11, %v10049_v12  ;;  %2587 = vmatpush1.bf16.msra.mxu0 %v2209_v26  ;;  %2416 = vmatprep.subr.bf16.mxu1 %v2215_v27  ;;  %v2254_v57 = vunpack.c.l.s8.bf16 %v2119_v55  ;;  %v2260_v58 = vunpack.c.h.s8.bf16 %v2116_v48  ;;  %v2264_v59 = vunpack.c.h.s8.bf16 %v2120_v49  ;;  %v2133_v36 = vld [vmem:[%s9976_s30 + $0x168] sm:$0xff] }
 0x31b   : > { %v2008_v13 = vadd.f32 %v2007_v9, %v2006_v10  ;;  %2588 = vmatprep.subr.bf16.mxu0 %v2219_v28  ;;  %v2259_v62 = vunpack.c.h.s8.bf16 %v2115_v54  ;;  %v2263_v63 = vunpack.c.h.s8.bf16 %v2119_v55  ;;  %v2269_v0 = vunpack.c.l.s8.bf16 %v2125_v60  ;;  %v2128_v9 = vld [vmem:[%s9976_s30 + $0x140] sm:$0xff] }
 0x31c   : > { %v2273_v7 = vunpack.c.l.s8.bf16 %v2129_v61  ;;  %v2268_v10 = vunpack.c.l.s8.bf16 %v2124_v8  ;;  %v2272_v11 = vunpack.c.l.s8.bf16 %v2128_v9  ;;  %v2277_v30 = vunpack.c.h.s8.bf16 %v2124_v8  ;;  %v2152_v55 = vld [vmem:[%s9976_s30 + $0x200] sm:$0xff] }
 0x31d   : > { %2009 = vadd.xlane.f32.xlu0 %v2008_v13  ;;  %2417 = vmatpush1.bf16.msra.mxu1 %v2214_v31  ;;  %v2278_v13 = vunpack.c.h.s8.bf16 %v2125_v60  ;;  %v2281_v31 = vunpack.c.h.s8.bf16 %v2128_v9  ;;  %v2295_v43 = vunpack.c.h.s8.bf16 %v2133_v36  ;;  %vm3033_vm7 = vcmask 74752  }
 0x31e   : > { %2589 = vmatpush1.bf16.msra.mxu0 %v2218_v32  ;;  %2418 = vmatprep.subr.bf16.mxu1 %v2224_v33  ;;  %v2134_v32 = vld [vmem:[%s9976_s30 + $0x170] sm:$0xff] }
 0x31f   : > { %2590 = vmatprep.subr.bf16.mxu0 %v2228_v34  ;;  %v2138_v33 = vld [vmem:[%s9976_s30 + $0x190] sm:$0xff]  ;;  %v2287_v34 = vunpack.c.l.s8.bf16 %v2134_v32 }
 0x320   : > { %v2291_v35 = vunpack.c.l.s8.bf16 %v2138_v33  ;;  %v2300_v42 = vunpack.c.h.s8.bf16 %v2138_v33 }
 0x321   : > { %2001 = vadd.xlane.f32.xlu0 %v2000_v14  ;;  %2419 = vmatpush1.bf16.msra.mxu1 %v2223_v38  ;;  %v2282_v14 = vunpack.c.h.s8.bf16 %v2129_v61  ;;  %v2137_v38 = vld [vmem:[%s9976_s30 + $0x188] sm:$0xff]  ;;  %v2151_v61 = vld [vmem:[%s9976_s30 + $0x1f8] sm:$0xff] }
 0x322   : > { %2591 = vmatpush1.bf16.msra.mxu0 %v2227_v39  ;;  %2420 = vmatprep.subr.bf16.mxu1 %v2233_v40  ;;  %v2286_v39 = vunpack.c.l.s8.bf16 %v2133_v36  ;;  %v2290_v40 = vunpack.c.l.s8.bf16 %v2137_v38  ;;  %v2331_v9 = vunpack.c.h.s8.bf16 %v2151_v61 }
 0x323   : > { %2592 = vmatprep.subr.bf16.mxu0 %v2237_v41  ;;  %v2296_v41 = vunpack.c.h.s8.bf16 %v2134_v32 }
 0x325   : > { %2421 = vmatpush1.bf16.msra.mxu1 %v2232_v44  ;;  %v2299_v44 = vunpack.c.h.s8.bf16 %v2137_v38 }
 0x326   : > { %2593 = vmatpush1.bf16.msra.mxu0 %v2236_v45  ;;  %2422 = vmatprep.subr.bf16.mxu1 %v2242_v46  ;;  %v2143_v45 = vld [vmem:[%s9976_s30 + $0x1b8] sm:$0xff] }
 0x327   : > { %2594 = vmatprep.subr.bf16.mxu0 %v2246_v47  ;;  %v2147_v46 = vld [vmem:[%s9976_s30 + $0x1d8] sm:$0xff]  ;;  %v2142_v47 = vld [vmem:[%s9976_s30 + $0x1b0] sm:$0xff]  ;;  %v2305_v48 = vunpack.c.l.s8.bf16 %v2143_v45 }
 0x328   : > { %v2309_v49 = vunpack.c.l.s8.bf16 %v2147_v46  ;;  %v2318_v54 = vunpack.c.h.s8.bf16 %v2147_v46 }
 0x329   : > { %2423 = vmatpush1.bf16.msra.mxu1 %v2241_v50  ;;  %v2304_v50 = vunpack.c.l.s8.bf16 %v2142_v47 }
 0x32a   : > { %2595 = vmatpush1.bf16.msra.mxu0 %v2245_v51  ;;  %2424 = vmatprep.subr.bf16.mxu1 %v2251_v52  ;;  %v2146_v51 = vld [vmem:[%s9976_s30 + $0x1d0] sm:$0xff] }
 0x32b   : > { %2596 = vmatprep.subr.bf16.mxu0 %v2255_v53  ;;  %v2308_v52 = vunpack.c.l.s8.bf16 %v2146_v51  ;;  %v2314_v53 = vunpack.c.h.s8.bf16 %v2143_v45 }
 0x32d   : > { %2425 = vmatpush1.bf16.msra.mxu1 %v2250_v56  ;;  %v2156_v56 = vld [vmem:[%s9976_s30 + $0x220] sm:$0xff] }
 0x32e   : > { %2597 = vmatpush1.bf16.msra.mxu0 %v2254_v57  ;;  %2426 = vmatprep.subr.bf16.mxu1 %v2260_v58  ;;  %v2313_v57 = vunpack.c.h.s8.bf16 %v2142_v47  ;;  %v2317_v58 = vunpack.c.h.s8.bf16 %v2146_v51  ;;  %v2327_v60 = vunpack.c.l.s8.bf16 %v2156_v56  ;;  %v2336_v8 = vunpack.c.h.s8.bf16 %v2156_v56  ;;  %v2173_v56 = vld [vmem:[%s9976_s30 + $0x2a8] sm:$0xff] }
 0x32f   : > { %2598 = vmatprep.subr.bf16.mxu0 %v2264_v59  ;;  %v2323_v59 = vunpack.c.l.s8.bf16 %v2152_v55 }
 0x331   : > { %2427 = vmatpush1.bf16.msra.mxu1 %v2259_v62  ;;  %v2155_v62 = vld [vmem:[%s9976_s30 + $0x218] sm:$0xff] }
 0x332   : > { %2599 = vmatpush1.bf16.msra.mxu0 %v2263_v63  ;;  %2428 = vmatprep.subr.bf16.mxu1 %v2269_v0  ;;  %v2322_v63 = vunpack.c.l.s8.bf16 %v2151_v61  ;;  %v2326_v0 = vunpack.c.l.s8.bf16 %v2155_v62 }
 0x333   : > { %2600 = vmatprep.subr.bf16.mxu0 %v2273_v7  ;;  %v2332_v7 = vunpack.c.h.s8.bf16 %v2152_v55  ;;  %v2169_v55 = vld [vmem:[%s9976_s30 + $0x288] sm:$0xff] }
 0x335   : > { %2429 = vmatpush1.bf16.msra.mxu1 %v2268_v10  ;;  %v2335_v10 = vunpack.c.h.s8.bf16 %v2155_v62  ;;  %v2179_v62 = vld [vmem:[%s9976_s30 + $0x2d8] sm:$0xff] }
 0x336   : > { %2601 = vmatpush1.bf16.msra.mxu0 %v2272_v11  ;;  %2430 = vmatprep.subr.bf16.mxu1 %v2278_v13  ;;  %v2161_v11 = vld [vmem:[%s9976_s30 + $0x248] sm:$0xff] }
 0x337   : > { %2602 = vmatprep.subr.bf16.mxu0 %v2282_v14  ;;  %v2165_v13 = vld [vmem:[%s9976_s30 + $0x268] sm:$0xff]  ;;  %v2341_v14 = vunpack.c.l.s8.bf16 %v2161_v11 }
 0x339   : > { %2431 = vmatpush1.bf16.msra.mxu1 %v2277_v30 }
 0x33a   : > { %2603 = vmatpush1.bf16.msra.mxu0 %v2281_v31  ;;  %2432 = vmatprep.subr.bf16.mxu1 %v2287_v34 }
 0x33b   : > { %2604 = vmatprep.subr.bf16.mxu0 %v2291_v35 }
 0x33d   : > { %2433 = vmatpush1.bf16.msra.mxu1 %v2286_v39  ;;  %v2160_v39 = vld [vmem:[%s9976_s30 + $0x240] sm:$0xff] }
 0x33e   : > { %2605 = vmatpush1.bf16.msra.mxu0 %v2290_v40  ;;  %2434 = vmatprep.subr.bf16.mxu1 %v2296_v41  ;;  %v2164_v40 = vld [vmem:[%s9976_s30 + $0x260] sm:$0xff]  ;;  %v2349_v51 = vunpack.c.h.s8.bf16 %v2160_v39 }
 0x33f   : > { %2606 = vmatprep.subr.bf16.mxu0 %v2300_v42  ;;  %v2344_v47 = vunpack.c.l.s8.bf16 %v2164_v40 }
 0x341   : > { %2435 = vmatpush1.bf16.msra.mxu1 %v2295_v43 }
 0x342   : > { %2607 = vmatpush1.bf16.msra.mxu0 %v2299_v44  ;;  %2436 = vmatprep.subr.bf16.mxu1 %v2305_v48  ;;  %v2350_v48 = vunpack.c.h.s8.bf16 %v2161_v11  ;;  %v2182_v11 = vld [vmem:[%s9976_s30 + $0x2f0] sm:$0xff] }
 0x343   : > { %2608 = vmatprep.subr.bf16.mxu0 %v2309_v49  ;;  %v2170_v49 = vld [vmem:[%s9976_s30 + $0x290] sm:$0xff] }
 0x345   : > { %2437 = vmatpush1.bf16.msra.mxu1 %v2304_v50  ;;  %v2174_v50 = vld [vmem:[%s9976_s30 + $0x2b0] sm:$0xff] }
 0x346   : > { %2609 = vmatpush1.bf16.msra.mxu0 %v2308_v52  ;;  %2438 = vmatprep.subr.bf16.mxu1 %v2314_v53  ;;  %v2353_v52 = vunpack.c.h.s8.bf16 %v2164_v40  ;;  %v2359_v53 = vunpack.c.l.s8.bf16 %v2170_v49  ;;  %v2372_v61 = vunpack.c.h.s8.bf16 %v2174_v50  ;;  %v2132_v40 = vld [vmem:[%s9976_s30 + $0x160] sm:$0xff] }
 0x347   : > { %2610 = vmatprep.subr.bf16.mxu0 %v2318_v54  ;;  %v2363_v54 = vunpack.c.l.s8.bf16 %v2174_v50 }
 0x349   : > { %2439 = vmatpush1.bf16.msra.mxu1 %v2313_v57  ;;  %v9446_v57 = vmov 0  }
 0x34a   : > { %2611 = vmatpush1.bf16.msra.mxu0 %v2317_v58  ;;  %2440 = vmatprep.subr.bf16.mxu1 %v2323_v59  ;;  %v2358_v58 = vunpack.c.l.s8.bf16 %v2169_v55  ;;  %v2362_v59 = vunpack.c.l.s8.bf16 %v2173_v56 }
 0x34b   : > { %2612 = vmatprep.subr.bf16.mxu0 %v2327_v60  ;;  %v2368_v60 = vunpack.c.h.s8.bf16 %v2170_v49 }
 0x34d   : > { %2441 = vmatpush1.bf16.msra.mxu1 %v2322_v63  ;;  %v2183_v63 = vld [vmem:[%s9976_s30 + $0x2f8] sm:$0xff] }
 0x34e   : > { %2613 = vmatpush1.bf16.msra.mxu0 %v2326_v0  ;;  %2442 = vmatprep.subr.bf16.mxu1 %v2332_v7  ;;  %v2367_v0 = vunpack.c.h.s8.bf16 %v2169_v55  ;;  %v2371_v7 = vunpack.c.h.s8.bf16 %v2173_v56 }
 0x34f   : > { %2614 = vmatprep.subr.bf16.mxu0 %v2336_v8  ;;  %v2377_v8 = vunpack.c.l.s8.bf16 %v2179_v62 }
 0x351   : > { %2443 = vmatpush1.bf16.msra.mxu1 %v2331_v9  ;;  %v2381_v9 = vunpack.c.l.s8.bf16 %v2183_v63 }
 0x352   : > { %2615 = vmatpush1.bf16.msra.mxu0 %v2335_v10  ;;  %2455 = vmatprep.subr.bf16.mxu1 %v2341_v14  ;;  %v2178_v10 = vld [vmem:[%s9976_s30 + $0x2d0] sm:$0xff]  ;;  %v2380_v14 = vunpack.c.l.s8.bf16 %v2182_v11 }
 0x3aa   : > { %v2010_v5 = vpop.xlane.xlu0 %2009 }
 0x3ab   : > { %v2013_v15 = vmul.f32 0.0026041667, %v2010_v5  ;;  %v2345_v5 = vunpack.c.l.s8.bf16 %v2165_v13 }
 0x3ad   : > { %v10073_v16 = vsub.f32 %v10031_v1, %v2013_v15  ;;  %v10076_v17 = vsub.f32 %v10033_v2, %v2013_v15  ;;  %v10092_v2 = vsub.f32 %v10035_v3, %v2013_v15  ;;  %2627 = vmatprep.subr.bf16.mxu0 %v2345_v5  ;;  %v2386_v5 = vunpack.c.h.s8.bf16 %v2179_v62 }
 0x3ae   : > { %v2002_v18 = vpop.xlane.xlu0 %2001 }
 0x3af   : > { %v2012_v37 = vmul.f32 0.0026041667, %v2002_v18  ;;  %v2023_v19 = vmul.f32 %v10073_v16, %v10073_v16  ;;  %v2024_v20 = vmul.f32 %v10076_v17, %v10076_v17  ;;  %v2025_v3 = vmul.f32 %v10092_v2, %v10092_v2 }
 0x3b1   : > { %v10083_v21 = vsub.f32 %v10037_v4, %v2012_v37  ;;  %v10086_v22 = vsub.f32 %v10039_v6, %v2012_v37  ;;  %v10089_v1 = vsub.f32 %v10049_v12, %v2012_v37  ;;  %v2030_v25 = vsel %vm2003_vm3, %v2023_v19, 0.0 }
 0x3b2   : > { %v2031_v4 = vsel %vm2003_vm3, %v2024_v20, 0.0  ;;  %v2033_v28 = vsel %vm2003_vm3, %v2025_v3, 0.0  ;;  %v1968_v20 = vlaneseq }
 0x3b3   : > { %v2020_v23 = vmul.f32 %v10083_v21, %v10083_v21  ;;  %v2021_v24 = vmul.f32 %v10086_v22, %v10086_v22  ;;  %v2022_v6 = vmul.f32 %v10089_v1, %v10089_v1  ;;  %v2032_v27 = vadd.f32 %v2031_v4, %v2030_v25 }
 0x3b4   : > { %v10120_v25 = vshrl.u32 %v1968_v20, 7 }
 0x3b5   : > { %v2026_v12 = vadd.f32 %v2021_v24, %v2020_v23  ;;  %v2034_v29 = vadd.f32 %v2033_v28, %v2032_v27 }
 0x3b6   : > { %v10123_v4 = vsub.s32 0, %v10120_v25  ;;  %vm1985_vm10 = vcmp.ge.s32.totalorder %v10120_v25, 5  ;;  %vm1975_vm12 = vcmp.lt.s32.totalorder %v10120_v25, 5 }
 0x3b7   : > { %v2027_v26 = vadd.f32 %v2026_v12, %v2022_v6  ;;  %v10126_v6 = vld [vmem:[%s9988_s28 + $0x8] sm:$0xff]  ;;  %v10129_v12 = vld [vmem:[%s9988_s28] sm:$0xff] }
 0x3b8   : > { %v2056_v28 = vrot.slane %v10126_v6, %v10123_v4  ;;  %v2052_v30 = vrot.slane %v10129_v12, %v10123_v4 }
 0x3b9   : > { %2028 = vadd.xlane.f32.xlu1 %v2027_v26  ;;  %v10134_v26 = vsub.s32 1, %v10120_v25 }
 0x3bb   : > { %v2074_v32 = vrot.slane %v10126_v6, %v10134_v26  ;;  %v2070_v33 = vrot.slane %v10129_v12, %v10134_v26 }
 0x3bd   : > { %2035 = vadd.xlane.f32.xlu1 %v2034_v29 }
 0x446   : > { %v2029_v15 = vpop.xlane.xlu1 %2028 }
 0x447   : > { %v2037_v18 = vmul.f32 0.0026041667, %v2029_v15  ;;  %v2390_v15 = vunpack.c.h.s8.bf16 %v2183_v63 }
 0x449   : > { %v2039_v37 = vadd.f32 1e-06, %v2037_v18  ;;  %v2188_v18 = vld [vmem:[%s9976_s30 + $0x320] sm:$0xff] }
 0x44a   : > { %v2036_v19 = vpop.xlane.xlu1 %2035 }
 0x44b   : > { %8799 = vrsqrt.f32 %v2039_v37  ;;  %v2038_v23 = vmul.f32 0.0026041667, %v2036_v19  ;;  %v2192_v37 = vld [vmem:[%s9976_s30 + $0x340] sm:$0xff]  ;;  %v2385_v19 = vunpack.c.h.s8.bf16 %v2178_v10 }
 0x44d   : > { %v2040_v24 = vadd.f32 1e-06, %v2038_v23  ;;  %v2389_v23 = vunpack.c.h.s8.bf16 %v2182_v11 }
 0x44f   : > { %8801 = vrsqrt.f32 %v2040_v24  ;;  %v1949_v24 = vld [vmem:[%s9988_s28 + $0x10] sm:$0xff] }
 0x455   : > { %v10131_v3 = vpop.eup %8799 }
 0x456   : > { %v2044_v27 = vmul.f32 %v10131_v3, %v10086_v22  ;;  %v2043_v29 = vmul.f32 %v10131_v3, %v10083_v21 }
 0x458   : > { %v2062_v34 = vmul.f32 %v2056_v28, %v2044_v27  ;;  %v2061_v36 = vmul.f32 %v2052_v30, %v2043_v29  ;;  %v2395_v27 = vunpack.c.l.s8.bf16 %v2188_v18  ;;  %v2187_v29 = vld [vmem:[%s9976_s30 + $0x318] sm:$0xff] }
 0x459   : > { %v10144_v31 = vpop.eup %8801 }
 0x45a   : > { %v2047_v22 = vmul.f32 %v10144_v31, %v10076_v17  ;;  %v2046_v35 = vmul.f32 %v10144_v31, %v10073_v16  ;;  %v2080_v41 = vadd.f32 %v2074_v32, %v2062_v34  ;;  %v2079_v43 = vadd.f32 %v2070_v33, %v2061_v36 }
 0x45b   : > { %v2340_v17 = vunpack.c.l.s8.bf16 %v2160_v39  ;;  %v2354_v16 = vunpack.c.h.s8.bf16 %v2165_v13  ;;  %v2376_v13 = vunpack.c.l.s8.bf16 %v2178_v10  ;;  %v2394_v34 = vunpack.c.l.s8.bf16 %v2187_v29  ;;  %v2091_v39 = vld [vmem:[%s9976_s30 + $0x18] sm:$0xff] }
 0x45c   : > { %v2065_v21 = vmul.f32 %v2056_v28, %v2047_v22  ;;  %v2064_v38 = vmul.f32 %v2052_v30, %v2046_v35  ;;  %v2399_v28 = vunpack.c.l.s8.bf16 %v2192_v37  ;;  %v2191_v30 = vld [vmem:[%s9976_s30 + $0x338] sm:$0xff]  ;;  %v2060_v22 = vrot.slane %v1949_v24, %v10123_v4 }
 0x45d   : > { %v2398_v35 = vunpack.c.l.s8.bf16 %v2191_v30  ;;  %v2404_v36 = vunpack.c.h.s8.bf16 %v2188_v18  ;;  %v2208_v50 = vunpack.c.h.s8.bf16 %v2091_v39 }
 0x45e   : > { %v2083_v42 = vadd.f32 %v2074_v32, %v2065_v21  ;;  %v2082_v44 = vadd.f32 %v2070_v33, %v2064_v38  ;;  %v2048_v32 = vmul.f32 %v10144_v31, %v10092_v2  ;;  %v2045_v33 = vmul.f32 %v10131_v3, %v10089_v1 }
 0x45f   : > { %v2408_v21 = vunpack.c.h.s8.bf16 %v2192_v37  ;;  %v2078_v2 = vrot.slane %v1949_v24, %v10134_v26  ;;  %v2403_v1 = vunpack.c.h.s8.bf16 %v2187_v29  ;;  %v2407_v3 = vunpack.c.h.s8.bf16 %v2191_v30  ;;  %v2159_v24 = vld [vmem:[%s9976_s30 + $0x238] sm:$0xff]  ;;  %v2117_v30 = vld [vmem:[%s9976_s30 + $0xe8] sm:$0xff] }
 0x460   : > { %v10156_v45 = vpack.c.bf16 %v2083_v42, %v2080_v41  ;;  %v10158_v46 = vpack.c.bf16 %v2082_v44, %v2079_v43  ;;  %v2066_v38 = vmul.f32 %v2060_v22, %v2048_v32  ;;  %v2063_v41 = vmul.f32 %v2060_v22, %v2045_v33  ;;  %v2090_v44 = vld [vmem:[%s9976_s30 + $0x10] sm:$0xff]  ;;  %v2123_v33 = vld [vmem:[%s9976_s30 + $0x118] sm:$0xff] }
 0x461   : > { %v2199_v42 = vunpack.c.l.s8.bf16 %v2091_v39  ;;  %v2276_v43 = vunpack.c.l.s8.bf16 %v2132_v40  ;;  %v2330_v32 = vunpack.c.l.s8.bf16 %v2159_v24  ;;  %v2252_v22 = vunpack.c.l.s8.bf16 %v2117_v30 }
 0x462   : > { %2444 = vmatprep.mubr.bf16.mxu1 %v10156_v45  ;;  %2616 = vmatprep.mubr.bf16.mxu0 %v10156_v45  ;;  %v2084_v31 = vadd.f32 %v2078_v2, %v2066_v38  ;;  %v2261_v38 = vunpack.c.h.s8.bf16 %v2117_v30  ;;  %v2267_v39 = vunpack.c.h.s8.bf16 %v2123_v33 }
 0x463   : > { %2445 = vmatmul.mubr.bf16.vlgmr.msra.gmra.mrb[0].mxu1 %v10158_v46  ;;  %2617 = vmatmul.mubr.bf16.vlgmr.msra.gmra.mrb[0].mxu0 %v10158_v46 }
 0x464   : > { %2456 = vmatpush1.bf16.msra.mxu1 %v2340_v17  ;;  %2628 = vmatpush1.bf16.msra.mxu0 %v2344_v47  ;;  %v2096_v17 = vld [vmem:[%s9976_s30 + $0x40] sm:$0xff]  ;;  %v2081_v47 = vadd.f32 %v2078_v2, %v2063_v41  ;;  %v2126_v41 = vld [vmem:[%s9976_s30 + $0x130] sm:$0xff] }
 0x465   : > { %2457 = vmatprep.subr.bf16.mxu1 %v2350_v48  ;;  %2629 = vmatprep.subr.bf16.mxu0 %v2354_v16  ;;  %v2198_v48 = vunpack.c.l.s8.bf16 %v2090_v44  ;;  %v2204_v49 = vunpack.c.l.s8.bf16 %v2096_v17  ;;  %v2213_v55 = vunpack.c.h.s8.bf16 %v2096_v17  ;;  %v2270_v2 = vunpack.c.l.s8.bf16 %v2126_v41 }
 0x466   : > { %2487 = vmatprep.mubr.bf16.mxu1 %v9446_v57  ;;  %2659 = vmatprep.mubr.bf16.mxu0 %v9446_v57  ;;  %v10189_v16 = vpack.c.bf16 %v2084_v31, %v2081_v47  ;;  %v2279_v31 = vunpack.c.h.s8.bf16 %v2126_v41  ;;  %v2145_v47 = vld [vmem:[%s9976_s30 + $0x1c8] sm:$0xff]  ;;  %v2103_v41 = vld [vmem:[%s9976_s30 + $0x78] sm:$0xff] }
 0x468   : > { %2458 = vmatpush1.bf16.msra.mxu1 %v2349_v51  ;;  %2630 = vmatpush1.bf16.msra.mxu0 %v2353_v52  ;;  %v2285_v51 = vunpack.c.h.s8.bf16 %v2132_v40  ;;  %v2100_v52 = vld [vmem:[%s9976_s30 + $0x60] sm:$0xff] }
 0x469   : > { %2459 = vmatprep.subr.bf16.mxu1 %v2359_v53  ;;  %2631 = vmatprep.subr.bf16.mxu0 %v2363_v54  ;;  %v2141_v53 = vld [vmem:[%s9976_s30 + $0x1a8] sm:$0xff]  ;;  %v2207_v54 = vunpack.c.h.s8.bf16 %v2090_v44  ;;  %v2217_v56 = vunpack.c.l.s8.bf16 %v2100_v52  ;;  %v2226_v63 = vunpack.c.h.s8.bf16 %v2100_v52  ;;  %v2316_v52 = vunpack.c.h.s8.bf16 %v2145_v47 }
 0x46c   : > { %2460 = vmatpush1.bf16.msra.mxu1 %v2358_v58  ;;  %2632 = vmatpush1.bf16.msra.mxu0 %v2362_v59  ;;  %v2099_v58 = vld [vmem:[%s9976_s30 + $0x58] sm:$0xff]  ;;  %v2294_v59 = vunpack.c.l.s8.bf16 %v2141_v53 }
 0x46d   : > { %2461 = vmatprep.subr.bf16.mxu1 %v2368_v60  ;;  %2633 = vmatprep.subr.bf16.mxu0 %v2372_v61  ;;  %v2105_v60 = vld [vmem:[%s9976_s30 + $0x88] sm:$0xff]  ;;  %v2216_v61 = vunpack.c.l.s8.bf16 %v2099_v58 }
 0x46e   : > { %v2222_v62 = vunpack.c.l.s8.bf16 %v2105_v60  ;;  %v2231_v10 = vunpack.c.h.s8.bf16 %v2105_v60  ;;  %v2163_v60 = vld [vmem:[%s9976_s30 + $0x258] sm:$0xff] }
 0x470   : > { %2462 = vmatpush1.bf16.msra.mxu1 %v2367_v0  ;;  %2634 = vmatpush1.bf16.msra.mxu0 %v2371_v7  ;;  %v2303_v0 = vunpack.c.h.s8.bf16 %v2141_v53  ;;  %v2109_v7 = vld [vmem:[%s9976_s30 + $0xa8] sm:$0xff]  ;;  %v2154_v53 = vld [vmem:[%s9976_s30 + $0x210] sm:$0xff] }
 0x471   : > { %2463 = vmatprep.subr.bf16.mxu1 %v2377_v8  ;;  %2635 = vmatprep.subr.bf16.mxu0 %v2381_v9  ;;  %v2150_v8 = vld [vmem:[%s9976_s30 + $0x1f0] sm:$0xff]  ;;  %v2225_v9 = vunpack.c.h.s8.bf16 %v2099_v58  ;;  %v2235_v11 = vunpack.c.l.s8.bf16 %v2109_v7  ;;  %v2244_v37 = vunpack.c.h.s8.bf16 %v2109_v7  ;;  %v2352_v7 = vunpack.c.h.s8.bf16 %v2163_v60 }
 0x474   : > { %2464 = vmatpush1.bf16.msra.mxu1 %v2376_v13  ;;  %2636 = vmatpush1.bf16.msra.mxu0 %v2380_v14  ;;  %v2108_v13 = vld [vmem:[%s9976_s30 + $0xa0] sm:$0xff]  ;;  %v2312_v14 = vunpack.c.l.s8.bf16 %v2150_v8 }
 0x475   : > { %2465 = vmatprep.subr.bf16.mxu1 %v2386_v5  ;;  %2637 = vmatprep.subr.bf16.mxu0 %v2390_v15  ;;  %v2114_v5 = vld [vmem:[%s9976_s30 + $0xd0] sm:$0xff]  ;;  %v2234_v15 = vunpack.c.l.s8.bf16 %v2108_v13 }
 0x476   : > { %v2240_v18 = vunpack.c.l.s8.bf16 %v2114_v5 }
 0x478   : > { %2466 = vmatpush1.bf16.msra.mxu1 %v2385_v19  ;;  %2638 = vmatpush1.bf16.msra.mxu0 %v2389_v23  ;;  %v2321_v19 = vunpack.c.h.s8.bf16 %v2150_v8  ;;  %v2118_v23 = vld [vmem:[%s9976_s30 + $0xf0] sm:$0xff]  ;;  %v2172_v8 = vld [vmem:[%s9976_s30 + $0x2a0] sm:$0xff] }
 0x479   : > { %2467 = vmatprep.subr.bf16.mxu1 %v2395_v27  ;;  %2639 = vmatprep.subr.bf16.mxu0 %v2399_v28  ;;  %v2243_v27 = vunpack.c.h.s8.bf16 %v2108_v13  ;;  %v2249_v28 = vunpack.c.h.s8.bf16 %v2114_v5  ;;  %v2253_v29 = vunpack.c.l.s8.bf16 %v2118_v23  ;;  %v2181_v5 = vld [vmem:[%s9976_s30 + $0x2e8] sm:$0xff] }
 0x47c   : > { %2468 = vmatpush1.bf16.msra.mxu1 %v2394_v34  ;;  %2640 = vmatpush1.bf16.msra.mxu0 %v2398_v35  ;;  %v2258_v34 = vunpack.c.l.s8.bf16 %v2123_v33  ;;  %v2262_v35 = vunpack.c.h.s8.bf16 %v2118_v23  ;;  %v2388_v23 = vunpack.c.h.s8.bf16 %v2181_v5  ;;  %v2095_v33 = vld [vmem:[%s9976_s30 + $0x38] sm:$0xff] }
 0x47d   : > { %2469 = vmatprep.subr.bf16.mxu1 %v2404_v36  ;;  %2641 = vmatprep.subr.bf16.mxu0 %v2408_v21  ;;  %v2339_v36 = vunpack.c.h.s8.bf16 %v2159_v24  ;;  %v2127_v21 = vld [vmem:[%s9976_s30 + $0x138] sm:$0xff]  ;;  %v2190_v24 = vld [vmem:[%s9976_s30 + $0x330] sm:$0xff] }
 0x47e   : > { %v2271_v40 = vunpack.c.l.s8.bf16 %v2127_v21 }
 0x480   : > { %2470 = vmatpush1.bf16.msra.mxu1 %v2403_v1  ;;  %2642 = vmatpush1.bf16.msra.mxu0 %v2407_v3  ;;  %v2280_v1 = vunpack.c.h.s8.bf16 %v2127_v21  ;;  %v2136_v3 = vld [vmem:[%s9976_s30 + $0x180] sm:$0xff]  ;;  %v2212_v21 = vunpack.c.h.s8.bf16 %v2095_v33 }
 0x481   : > { %2498 = vmatprep.subr.bf16.mxu1 %v2199_v42  ;;  %7754 = vmatprep.subr.bf16.mxu0 %v2276_v43  ;;  %v2289_v42 = vunpack.c.l.s8.bf16 %v2136_v3  ;;  %v2135_v43 = vld [vmem:[%s9976_s30 + $0x178] sm:$0xff]  ;;  %v2298_v17 = vunpack.c.h.s8.bf16 %v2136_v3  ;;  %v2113_v3 = vld [vmem:[%s9976_s30 + $0xc8] sm:$0xff] }
 0x482   : > { %v2288_v44 = vunpack.c.l.s8.bf16 %v2135_v43 }
 0x483   : > { %2488 = vmatmul.mubr.bf16.vlgmr.msra.gmra.mrb[0].mxu1 %v10189_v16  ;;  %2660 = vmatmul.mubr.bf16.vlgmr.msra.gmra.mrb[0].mxu0 %v10189_v16 }
 0x484   : > { %2499 = vmatpush1.bf16.msra.mxu1 %v2198_v48  ;;  %2530 = vmatprep.mubr.bf16.mxu1 %v10156_v45  ;;  %v2297_v48 = vunpack.c.h.s8.bf16 %v2135_v43  ;;  %v2112_v43 = vld [vmem:[%s9976_s30 + $0xc0] sm:$0xff] }
 0x485   : > { %7755 = vmatpush3.bf16.msra.mxu0 %v2204_v49  ;;  %2788 = vmatprep.mubr.bf16.mxu0 %v10156_v45  ;;  %v2307_v49 = vunpack.c.l.s8.bf16 %v2145_v47  ;;  %v2247_v47 = vunpack.c.h.s8.bf16 %v2112_v43 }
 0x486   : > { %2500 = vmatprep.subr.bf16.mxu1 %v2208_v50  ;;  %7756 = vmatprep.subr.bf16.mxu0 %v2285_v51  ;;  %v2144_v50 = vld [vmem:[%s9976_s30 + $0x1c0] sm:$0xff] }
 0x487   : > { %v2306_v51 = vunpack.c.l.s8.bf16 %v2144_v50 }
 0x488   : > { %2501 = vmatpush1.bf16.msra.mxu1 %v2207_v54  ;;  %v2315_v54 = vunpack.c.h.s8.bf16 %v2144_v50 }
 0x489   : > { %7757 = vmatpush3.bf16.msra.mxu0 %v2213_v55  ;;  %2502 = vmatprep.subr.bf16.mxu1 %v2217_v56  ;;  %v2325_v55 = vunpack.c.l.s8.bf16 %v2154_v53  ;;  %v2153_v56 = vld [vmem:[%s9976_s30 + $0x208] sm:$0xff] }
 0x48a   : > { %7758 = vmatprep.subr.bf16.mxu0 %v2294_v59  ;;  %v2324_v58 = vunpack.c.l.s8.bf16 %v2153_v56  ;;  %v2334_v59 = vunpack.c.h.s8.bf16 %v2154_v53 }
 0x48c   : > { %2503 = vmatpush1.bf16.msra.mxu1 %v2216_v61  ;;  %v2333_v61 = vunpack.c.h.s8.bf16 %v2153_v56 }
 0x48d   : > { %7759 = vmatpush3.bf16.msra.mxu0 %v2222_v62  ;;  %2504 = vmatprep.subr.bf16.mxu1 %v2226_v63  ;;  %v2343_v62 = vunpack.c.l.s8.bf16 %v2163_v60  ;;  %v2162_v63 = vld [vmem:[%s9976_s30 + $0x250] sm:$0xff] }
 0x48e   : > { %7760 = vmatprep.subr.bf16.mxu0 %v2303_v0  ;;  %v2342_v0 = vunpack.c.l.s8.bf16 %v2162_v63 }
 0x490   : > { %2505 = vmatpush1.bf16.msra.mxu1 %v2225_v9  ;;  %v2351_v9 = vunpack.c.h.s8.bf16 %v2162_v63 }
 0x491   : > { %7761 = vmatpush3.bf16.msra.mxu0 %v2231_v10  ;;  %2506 = vmatprep.subr.bf16.mxu1 %v2235_v11  ;;  %v2361_v10 = vunpack.c.l.s8.bf16 %v2172_v8  ;;  %v2171_v11 = vld [vmem:[%s9976_s30 + $0x298] sm:$0xff] }
 0x492   : > { %7762 = vmatprep.subr.bf16.mxu0 %v2312_v14  ;;  %v2360_v13 = vunpack.c.l.s8.bf16 %v2171_v11  ;;  %v2370_v14 = vunpack.c.h.s8.bf16 %v2172_v8 }
 0x494   : > { %2507 = vmatpush1.bf16.msra.mxu1 %v2234_v15  ;;  %v2369_v15 = vunpack.c.h.s8.bf16 %v2171_v11 }
 0x495   : > { %7763 = vmatpush3.bf16.msra.mxu0 %v2240_v18  ;;  %2508 = vmatprep.subr.bf16.mxu1 %v2244_v37  ;;  %v2379_v18 = vunpack.c.l.s8.bf16 %v2181_v5  ;;  %v2180_v37 = vld [vmem:[%s9976_s30 + $0x2e0] sm:$0xff] }
 0x496   : > { %7764 = vmatprep.subr.bf16.mxu0 %v2321_v19  ;;  %v2378_v19 = vunpack.c.l.s8.bf16 %v2180_v37 }
 0x498   : > { %2509 = vmatpush1.bf16.msra.mxu1 %v2243_v27  ;;  %v2387_v27 = vunpack.c.h.s8.bf16 %v2180_v37 }
 0x499   : > { %7765 = vmatpush3.bf16.msra.mxu0 %v2249_v28  ;;  %2510 = vmatprep.subr.bf16.mxu1 %v2253_v29  ;;  %v2397_v28 = vunpack.c.l.s8.bf16 %v2190_v24  ;;  %v2189_v29 = vld [vmem:[%s9976_s30 + $0x328] sm:$0xff] }
 0x49a   : > { %7766 = vmatprep.subr.bf16.mxu0 %v2330_v32  ;;  %v2396_v30 = vunpack.c.l.s8.bf16 %v2189_v29  ;;  %v2406_v32 = vunpack.c.h.s8.bf16 %v2190_v24 }
 0x49c   : > { %2511 = vmatpush1.bf16.msra.mxu1 %v2252_v22  ;;  %v2405_v22 = vunpack.c.h.s8.bf16 %v2189_v29 }
 0x49d   : > { %7767 = vmatpush3.bf16.msra.mxu0 %v2258_v34  ;;  %2512 = vmatprep.subr.bf16.mxu1 %v2262_v35  ;;  %v2203_v34 = vunpack.c.l.s8.bf16 %v2095_v33  ;;  %v2094_v35 = vld [vmem:[%s9976_s30 + $0x30] sm:$0xff] }
 0x49e   : > { %7768 = vmatprep.subr.bf16.mxu0 %v2339_v36  ;;  %v2202_v36 = vunpack.c.l.s8.bf16 %v2094_v35 }
 0x4a0   : > { %2513 = vmatpush1.bf16.msra.mxu1 %v2261_v38  ;;  %v2104_v38 = vld [vmem:[%s9976_s30 + $0x80] sm:$0xff] }
 0x4a1   : > { %7769 = vmatpush3.bf16.msra.mxu0 %v2267_v39  ;;  %2514 = vmatprep.subr.bf16.mxu1 %v2271_v40  ;;  %v2211_v39 = vunpack.c.h.s8.bf16 %v2094_v35  ;;  %v2221_v40 = vunpack.c.l.s8.bf16 %v2104_v38 }
 0x4a4   : > { %2789 = vmatmul.mubr.bf16.vlgmr.msra.gmra.mrb[4].mxu0 %v10158_v46  ;;  %2515 = vmatpush1.bf16.msra.mxu1 %v2270_v2  ;;  %v2220_v2 = vunpack.c.l.s8.bf16 %v2103_v41 }
 0x4a5   : > { %2516 = vmatprep.subr.bf16.mxu1 %v2280_v1  ;;  %v2230_v1 = vunpack.c.h.s8.bf16 %v2104_v38 }
 0x4a8   : > { %2517 = vmatpush1.bf16.msra.mxu1 %v2279_v31  ;;  %v2229_v31 = vunpack.c.h.s8.bf16 %v2103_v41 }
 0x4a9   : > { %2518 = vmatprep.subr.bf16.mxu1 %v2289_v42  ;;  %v2239_v42 = vunpack.c.l.s8.bf16 %v2113_v3 }
 0x4ac   : > { %2519 = vmatpush1.bf16.msra.mxu1 %v2288_v44  ;;  %v2238_v44 = vunpack.c.l.s8.bf16 %v2112_v43 }
 0x4ad   : > { %2520 = vmatprep.subr.bf16.mxu1 %v2298_v17  ;;  %v2122_v17 = vld [vmem:[%s9976_s30 + $0x110] sm:$0xff] }
 0x4b0   : > { %2521 = vmatpush1.bf16.msra.mxu1 %v2297_v48  ;;  %v2257_v48 = vunpack.c.l.s8.bf16 %v2122_v17 }
 0x4b1   : > { %2522 = vmatprep.subr.bf16.mxu1 %v2307_v49  ;;  %v2121_v49 = vld [vmem:[%s9976_s30 + $0x108] sm:$0xff] }
 0x4b2   : > { %v2256_v50 = vunpack.c.l.s8.bf16 %v2121_v49  ;;  %v2265_v53 = vunpack.c.h.s8.bf16 %v2121_v49  ;;  %v2177_v49 = vld [vmem:[%s9976_s30 + $0x2c8] sm:$0xff] }
 0x4b4   : > { %2523 = vmatpush1.bf16.msra.mxu1 %v2306_v51  ;;  %v2266_v51 = vunpack.c.h.s8.bf16 %v2122_v17 }
 0x4b5   : > { %2524 = vmatprep.subr.bf16.mxu1 %v2316_v52  ;;  %v2131_v52 = vld [vmem:[%s9976_s30 + $0x158] sm:$0xff] }
 0x4b8   : > { %2525 = vmatpush1.bf16.msra.mxu1 %v2315_v54  ;;  %v2275_v54 = vunpack.c.l.s8.bf16 %v2131_v52 }
 0x4b9   : > { %2526 = vmatprep.subr.bf16.mxu1 %v2325_v55  ;;  %v2130_v55 = vld [vmem:[%s9976_s30 + $0x150] sm:$0xff] }
 0x4ba   : > { %v2274_v56 = vunpack.c.l.s8.bf16 %v2130_v55  ;;  %v2283_v60 = vunpack.c.h.s8.bf16 %v2130_v55  ;;  %v1951_v55 = vld [vmem:[%s9988_s28 + $0x20] sm:$0xff] }
 0x4bc   : > { %2527 = vmatpush1.bf16.msra.mxu1 %v2324_v58  ;;  %v2284_v58 = vunpack.c.h.s8.bf16 %v2131_v52  ;;  %v2186_v52 = vld [vmem:[%s9976_s30 + $0x310] sm:$0xff] }
 0x4bd   : > { %2528 = vmatprep.subr.bf16.mxu1 %v2334_v59  ;;  %v2140_v59 = vld [vmem:[%s9976_s30 + $0x1a0] sm:$0xff] }
 0x4c0   : > { %2529 = vmatpush1.bf16.msra.mxu1 %v2333_v61  ;;  %v2293_v61 = vunpack.c.l.s8.bf16 %v2140_v59 }
 0x4c1   : > { %2541 = vmatprep.subr.bf16.mxu1 %v2343_v62  ;;  %v2139_v62 = vld [vmem:[%s9976_s30 + $0x198] sm:$0xff] }
 0x4c2   : > { %v2292_v63 = vunpack.c.l.s8.bf16 %v2139_v62  ;;  %v2301_v8 = vunpack.c.h.s8.bf16 %v2139_v62 }
 0x4c3   : > { %2531 = vmatmul.mubr.bf16.vlgmr.msra.gmra.mrb[4].mxu1 %v10158_v46 }
 0x4c4   : > { %2542 = vmatpush1.bf16.msra.mxu1 %v2342_v0  ;;  %2573 = vmatprep.mubr.bf16.mxu1 %v9446_v57  ;;  %v2302_v0 = vunpack.c.h.s8.bf16 %v2140_v59  ;;  %v10274_v59 = vand.u32 127, %v1968_v20 }
 0x4c5   : > { %2543 = vmatprep.subr.bf16.mxu1 %v2352_v7  ;;  %v2149_v7 = vld [vmem:[%s9976_s30 + $0x1e8] sm:$0xff] }
 0x4c6   : > { %vm2946_vm5 = vcmp.lt.s32.totalorder %v10274_v59, 64  ;;  %vm2948_vm6 = vcmp.ge.s32.totalorder %v10274_v59, 64  ;;  %vm1991_vm9 = vcmp.ge.s32.totalorder %v10274_v59, 5  ;;  %vm1982_vm13 = vcmp.lt.s32.totalorder %v10274_v59, 5 }
 0x4c7   : > { %vm1994_vm14 = vcmp.lt.s32.totalorder %v10274_v59, 10  ;;  %vm1992_vm15 = vmand %vm1985_vm10, %vm1991_vm9 }
 0x4c8   : > { %2544 = vmatpush1.bf16.msra.mxu1 %v2351_v9  ;;  %v2311_v9 = vunpack.c.l.s8.bf16 %v2149_v7  ;;  %vm1983_vm1 = vmand %vm1975_vm12, %vm1982_vm13 }
 0x4c9   : > { %2545 = vmatprep.subr.bf16.mxu1 %v2361_v10  ;;  %v2148_v10 = vld [vmem:[%s9976_s30 + $0x1e0] sm:$0xff]  ;;  %vm1995_vm2 = vmand %vm1992_vm15, %vm1994_vm14 }
 0x4ca   : > { %v2310_v11 = vunpack.c.l.s8.bf16 %v2148_v10  ;;  %v2319_v5 = vunpack.c.h.s8.bf16 %v2148_v10 }
 0x4cc   : > { %2546 = vmatpush1.bf16.msra.mxu1 %v2360_v13  ;;  %v2320_v13 = vunpack.c.h.s8.bf16 %v2149_v7  ;;  %v2195_v7 = vld [vmem:[%s9976_s30 + $0x358] sm:$0xff] }
 0x4cd   : > { %2547 = vmatprep.subr.bf16.mxu1 %v2370_v14  ;;  %v2158_v14 = vld [vmem:[%s9976_s30 + $0x230] sm:$0xff] }
 0x4d0   : > { %2548 = vmatpush1.bf16.msra.mxu1 %v2369_v15  ;;  %v2329_v15 = vunpack.c.l.s8.bf16 %v2158_v14 }
 0x4d1   : > { %2549 = vmatprep.subr.bf16.mxu1 %v2379_v18  ;;  %v2157_v18 = vld [vmem:[%s9976_s30 + $0x228] sm:$0xff] }
 0x4d2   : > { %v2328_v37 = vunpack.c.l.s8.bf16 %v2157_v18  ;;  %v2337_v24 = vunpack.c.h.s8.bf16 %v2157_v18 }
 0x4d4   : > { %2550 = vmatpush1.bf16.msra.mxu1 %v2378_v19  ;;  %v2338_v19 = vunpack.c.h.s8.bf16 %v2158_v14 }
 0x4d5   : > { %2551 = vmatprep.subr.bf16.mxu1 %v2388_v23  ;;  %v2167_v23 = vld [vmem:[%s9976_s30 + $0x278] sm:$0xff] }
 0x4d8   : > { %2552 = vmatpush1.bf16.msra.mxu1 %v2387_v27  ;;  %v2347_v27 = vunpack.c.l.s8.bf16 %v2167_v23 }
 0x4d9   : > { %2553 = vmatprep.subr.bf16.mxu1 %v2397_v28  ;;  %v2166_v28 = vld [vmem:[%s9976_s30 + $0x270] sm:$0xff] }
 0x4da   : > { %v2346_v29 = vunpack.c.l.s8.bf16 %v2166_v28  ;;  %v2355_v33 = vunpack.c.h.s8.bf16 %v2166_v28 }
 0x4dc   : > { %2554 = vmatpush1.bf16.msra.mxu1 %v2396_v30  ;;  %v2356_v30 = vunpack.c.h.s8.bf16 %v2167_v23  ;;  %v2402_v23 = vunpack.c.l.s8.bf16 %v2195_v7 }
 0x4dd   : > { %2555 = vmatprep.subr.bf16.mxu1 %v2406_v32  ;;  %v2176_v32 = vld [vmem:[%s9976_s30 + $0x2c0] sm:$0xff] }
 0x4e0   : > { %2556 = vmatpush1.bf16.msra.mxu1 %v2405_v22  ;;  %v2365_v22 = vunpack.c.l.s8.bf16 %v2176_v32 }
 0x4e1   : > { %2670 = vmatprep.subr.bf16.mxu1 %v2203_v34  ;;  %v2175_v34 = vld [vmem:[%s9976_s30 + $0x2b8] sm:$0xff] }
 0x4e2   : > { %v2364_v35 = vunpack.c.l.s8.bf16 %v2175_v34  ;;  %v2373_v38 = vunpack.c.h.s8.bf16 %v2175_v34 }
 0x4e3   : > { %2574 = vmatmul.mubr.bf16.vlgmr.msra.gmra.mrb[4].mxu1 %v10189_v16 }
 0x4e4   : > { %2671 = vmatpush1.bf16.msra.mxu1 %v2202_v36  ;;  %2702 = vmatprep.mubr.bf16.mxu1 %v10156_v45  ;;  %v2248_v45 = vunpack.c.h.s8.bf16 %v2113_v3  ;;  %v2374_v36 = vunpack.c.h.s8.bf16 %v2176_v32 }
 0x4e5   : > { %2672 = vmatprep.subr.bf16.mxu1 %v2212_v21  ;;  %v2185_v21 = vld [vmem:[%s9976_s30 + $0x308] sm:$0xff] }
 0x4e6   : > { %v2392_v41 = vunpack.c.h.s8.bf16 %v2185_v21 }
 0x4e8   : > { %2673 = vmatpush1.bf16.msra.mxu1 %v2211_v39  ;;  %v2383_v39 = vunpack.c.l.s8.bf16 %v2185_v21 }
 0x4e9   : > { %2674 = vmatprep.subr.bf16.mxu1 %v2221_v40 }
 0x4ec   : > { %2675 = vmatpush1.bf16.msra.mxu1 %v2220_v2  ;;  %v2194_v2 = vld [vmem:[%s9976_s30 + $0x350] sm:$0xff] }
 0x4ed   : > { %2676 = vmatprep.subr.bf16.mxu1 %v2230_v1  ;;  %v2401_v3 = vunpack.c.l.s8.bf16 %v2194_v2  ;;  %v2410_v43 = vunpack.c.h.s8.bf16 %v2194_v2 }
 0x4f0   : > { %2677 = vmatpush1.bf16.msra.mxu1 %v2229_v31  ;;  %v2193_v31 = vld [vmem:[%s9976_s30 + $0x348] sm:$0xff] }
 0x4f1   : > { %2678 = vmatprep.subr.bf16.mxu1 %v2239_v42  ;;  %v2400_v42 = vunpack.c.l.s8.bf16 %v2193_v31 }
 0x4f4   : > { %2679 = vmatpush1.bf16.msra.mxu1 %v2238_v44  ;;  %v2409_v44 = vunpack.c.h.s8.bf16 %v2193_v31 }
 0x4f5   : > { %2680 = vmatprep.subr.bf16.mxu1 %v2248_v45  ;;  %v2168_v45 = vld [vmem:[%s9976_s30 + $0x280] sm:$0xff] }
 0x4f6   : > { %v2348_v17 = vunpack.c.l.s8.bf16 %v2168_v45 }
 0x4f8   : > { %2681 = vmatpush1.bf16.msra.mxu1 %v2247_v47  ;;  %v9447_v47 = vmov 0.0  }
 0x4f9   : > { %2682 = vmatprep.subr.bf16.mxu1 %v2257_v48  ;;  %v2357_v48 = vunpack.c.h.s8.bf16 %v2168_v45 }
 0x4fc   : > { %2683 = vmatpush1.bf16.msra.mxu1 %v2256_v50  ;;  %v2366_v50 = vunpack.c.l.s8.bf16 %v2177_v49 }
 0x4fd   : > { %2684 = vmatprep.subr.bf16.mxu1 %v2266_v51  ;;  %v2375_v51 = vunpack.c.h.s8.bf16 %v2177_v49  ;;  %v1950_v49 = vld [vmem:[%s9988_s28 + $0x18] sm:$0xff] }
 0x500   : > { %2685 = vmatpush1.bf16.msra.mxu1 %v2265_v53  ;;  %v10265_v53 = vsub.s32 3, %v10120_v25 }
 0x501   : > { %2686 = vmatprep.subr.bf16.mxu1 %v2275_v54  ;;  %v2384_v54 = vunpack.c.l.s8.bf16 %v2186_v52 }
 0x504   : > { %2687 = vmatpush1.bf16.msra.mxu1 %v2274_v56  ;;  %v10270_v56 = vsub.s32 2, %v10120_v25 }
 0x505   : > { %2688 = vmatprep.subr.bf16.mxu1 %v2284_v58  ;;  %v1952_v58 = vld [vmem:[%s9988_s28 + $0x28] sm:$0xff] }
 0x506   : > { %v2861_v62 = vrot.slane %v1952_v58, %v10265_v53  ;;  %v2915_v18 = vrot.slane %v1952_v58, %v10270_v56 }
 0x508   : > { %2689 = vmatpush1.bf16.msra.mxu1 %v2283_v60  ;;  %v2841_v60 = vrot.slane %v10129_v12, %v10265_v53 }
 0x509   : > { %2690 = vmatprep.subr.bf16.mxu1 %v2293_v61  ;;  %v2857_v61 = vrot.slane %v1951_v55, %v10265_v53 }
 0x50c   : > { %2691 = vmatpush1.bf16.msra.mxu1 %v2292_v63  ;;  %v2393_v63 = vunpack.c.h.s8.bf16 %v2186_v52 }
 0x50d   : > { %2692 = vmatprep.subr.bf16.mxu1 %v2302_v0  ;;  %v2895_v0 = vrot.slane %v10129_v12, %v10270_v56 }
 0x510   : > { %2693 = vmatpush1.bf16.msra.mxu1 %v2301_v8 }
 0x511   : > { %2694 = vmatprep.subr.bf16.mxu1 %v2311_v9  ;;  %v2845_v9 = vrot.slane %v10126_v6, %v10265_v53 }
 0x514   : > { %2695 = vmatpush1.bf16.msra.mxu1 %v2310_v11 }
 0x515   : > { %2696 = vmatprep.subr.bf16.mxu1 %v2320_v13  ;;  %v2911_v13 = vrot.slane %v1951_v55, %v10270_v56 }
 0x518   : > { %2697 = vmatpush1.bf16.msra.mxu1 %v2319_v5 }
 0x519   : > { %2698 = vmatprep.subr.bf16.mxu1 %v2329_v15 }
 0x51c   : > { %2699 = vmatpush1.bf16.msra.mxu1 %v2328_v37  ;;  %v10290_v37 = vsel %vm2946_vm5, 1.0, %v9447_v47 }
 0x51d   : > { %2700 = vmatprep.subr.bf16.mxu1 %v2338_v19 }
 0x520   : > { %2701 = vmatpush1.bf16.msra.mxu1 %v2337_v24 }
 0x521   : > { %2713 = vmatprep.subr.bf16.mxu1 %v2347_v27 }
 0x523   : > { %2703 = vmatmul.mubr.bf16.vlgmr.msra.gmra.mrb[8].mxu1 %v10158_v46  ;;  %v2184_v46 = vld [vmem:[%s9976_s30 + $0x300] sm:$0xff] }
 0x524   : > { %2714 = vmatpush1.bf16.msra.mxu1 %v2346_v29  ;;  %2745 = vmatprep.mubr.bf16.mxu1 %v9446_v57  ;;  %v2382_v40 = vunpack.c.l.s8.bf16 %v2184_v46  ;;  %v2391_v1 = vunpack.c.h.s8.bf16 %v2184_v46  ;;  %v2411_v46 = vunpack.c.h.s8.bf16 %v2195_v7 }
 0x525   : > { %2715 = vmatprep.subr.bf16.mxu1 %v2356_v30 }
 0x528   : > { %2716 = vmatpush1.bf16.msra.mxu1 %v2355_v33  ;;  %v2899_v33 = vrot.slane %v10126_v6, %v10270_v56 }
 0x529   : > { %2717 = vmatprep.subr.bf16.mxu1 %v2365_v22 }
 0x52c   : > { %2718 = vmatpush1.bf16.msra.mxu1 %v2364_v35 }
 0x52d   : > { %2719 = vmatprep.subr.bf16.mxu1 %v2374_v36 }
 0x530   : > { %2720 = vmatpush1.bf16.msra.mxu1 %v2373_v38 }
 0x531   : > { %2721 = vmatprep.subr.bf16.mxu1 %v2383_v39 }
 0x534   : > { %2722 = vmatpush1.bf16.msra.mxu1 %v2382_v40 }
 0x535   : > { %2723 = vmatprep.subr.bf16.mxu1 %v2392_v41 }
 0x538   : > { %2724 = vmatpush1.bf16.msra.mxu1 %v2391_v1 }
 0x539   : > { %2725 = vmatprep.subr.bf16.mxu1 %v2401_v3 }
 0x53c   : > { %2726 = vmatpush1.bf16.msra.mxu1 %v2400_v42 }
 0x53d   : > { %2727 = vmatprep.subr.bf16.mxu1 %v2410_v43 }
 0x540   : > { %2728 = vmatpush1.bf16.msra.mxu1 %v2409_v44 }
 0x541   : > { %8051 = vmatprep.subr.bf16.mxu1 %v9447_v47 }
 0x543   : > { %2746 = vmatmul.mubr.bf16.vlgmr.msra.gmra.mrb[8].mxu1 %v10189_v16 }
 0x544   : > { %8052 = vmatpush3.bf16.msra.mxu1 %v2348_v17  ;;  %8067 = vmatprep.mubr.msk.bf16.mxu1 %vm9448_vm4, %v9447_v47 }
 0x545   : > { %8053 = vmatprep.subr.bf16.mxu1 %v9447_v47 }
 0x548   : > { %8054 = vmatpush3.bf16.msra.mxu1 %v2357_v48 }
 0x549   : > { %8055 = vmatprep.subr.bf16.mxu1 %v9447_v47 }
 0x54c   : > { %8056 = vmatpush3.bf16.msra.mxu1 %v2366_v50 }
 0x54d   : > { %8057 = vmatprep.subr.bf16.mxu1 %v9447_v47 }
 0x550   : > { %8058 = vmatpush3.bf16.msra.mxu1 %v2375_v51 }
 0x551   : > { %8059 = vmatprep.subr.bf16.mxu1 %v9447_v47 }
 0x554   : > { %8060 = vmatpush3.bf16.msra.mxu1 %v2384_v54  ;;  %v2907_v54 = vrot.slane %v1950_v49, %v10270_v56 }
 0x555   : > { %8061 = vmatprep.subr.bf16.mxu1 %v9447_v47 }
 0x556   : > { %v2489_v8 = vpop.f32.mrb[0].mxu1  ;;  %v2661_v20 = vpop.f32.mrb[0].mxu0 }
 0x557   : > { %v2874_v10 = vmul.f32 %v2841_v60, %v2489_v8  ;;  %v2878_v11 = vmul.f32 %v2857_v61, %v2661_v20  ;;  %v2491_v14 = vpop.f32.mrb[1].mxu1  ;;  %v2663_v5 = vpop.f32.mrb[1].mxu0 }
 0x558   : > { %v2879_v15 = vmul.f32 %v2861_v62, %v2663_v5  ;;  %v2493_v12 = vpop.f32.mrb[2].mxu1  ;;  %v2665_v19 = vpop.f32.mrb[2].mxu0  ;;  %8062 = vmatpush3.bf16.msra.mxu1 %v2393_v63  ;;  %v2875_v32 = vmul.f32 %v2845_v9, %v2491_v14 }
 0x559   : > { %v2928_v24 = vadd.f32 %v2895_v0, %v2874_v10  ;;  %v2883_v27 = vmul.f32 %v2841_v60, %v2493_v12  ;;  %v2887_v28 = vmul.f32 %v2857_v61, %v2665_v19  ;;  %v2495_v29 = vpop.f32.mrb[3].mxu1  ;;  %v2667_v30 = vpop.f32.mrb[3].mxu0  ;;  %8063 = vmatprep.subr.bf16.mxu1 %v9447_v47  ;;  %v2932_v34 = vadd.f32 %v2911_v13, %v2878_v11  ;;  %v1954_v10 = vld [vmem:[%s9988_s28 + $0x38] sm:$0xff] }
 0x55a   : > { %v2888_v22 = vmul.f32 %v2861_v62, %v2667_v30  ;;  %v2933_v38 = vadd.f32 %v2915_v18, %v2879_v15  ;;  %v10299_v41 = vadd.f32 %v2899_v33, %v2875_v32  ;;  %v2884_v1 = vmul.f32 %v2845_v9, %v2495_v29  ;;  %v1953_v9 = vld [vmem:[%s9988_s28 + $0x30] sm:$0xff] }
 0x55b   : > { %v2937_v35 = vadd.f32 %v2895_v0, %v2883_v27  ;;  %v2941_v36 = vadd.f32 %v2911_v13, %v2887_v28  ;;  %v2950_v21 = vmul.f32 %v10290_v37, %v2928_v24  ;;  %v10325_v0 = vsel %vm2948_vm6, 1.0, %v9447_v47  ;;  %vm10388_vm6 = vmor %vm1983_vm1, %vm1995_vm2 }
 0x55c   : > { %v2942_v39 = vadd.f32 %v2915_v18, %v2888_v22  ;;  %8064 = vmatpush3.bf16.msra.mxu1 %v2402_v23  ;;  %v3326_v6 = vmul.f32 %v10290_v37, %v10299_v41  ;;  %v10308_v3 = vadd.f32 %v2899_v33, %v2884_v1  ;;  %v3055_v8 = vmul.f32 %v10325_v0, %v2928_v24 }
 0x55d   : > { %v10296_v40 = vpack.c.bf16 %v2941_v36, %v2932_v34  ;;  %8075 = vmatprep.mubr.f32.mxu0 %v2950_v21  ;;  %8065 = vmatprep.subr.bf16.mxu1 %v9447_v47  ;;  %v2951_v7 = vmul.f32 %v10290_v37, %v2937_v35  ;;  %v3056_v20 = vmul.f32 %v10325_v0, %v2937_v35 }
 0x55e   : > { %v10301_v2 = vpack.c.bf16 %v2942_v39, %v2933_v38  ;;  %v3327_v31 = vmul.f32 %v10290_v37, %v10308_v3  ;;  %v2865_v11 = vrot.slane %v1953_v9, %v10265_v53  ;;  %v2869_v13 = vrot.slane %v1954_v10, %v10265_v53 }
 0x55f   : > { %v2919_v14 = vrot.slane %v1953_v9, %v10270_v56  ;;  %v2923_v15 = vrot.slane %v1954_v10, %v10270_v56 }
 0x560   : > { %8066 = vmatpush3.bf16.msra.mxu1 %v2411_v46 }
 0x561   : > { %8196 = vmatprep.subr.bf16.mxu1 %v10296_v40 }
 0x563   : > { %8068 = vmatmul.mubr.bf16.vlgmr.msra.gmra.mrb[12].mxu1 %v10189_v16  ;;  %v2853_v16 = vrot.slane %v1950_v49, %v10265_v53 }
 0x564   : > { %8103 = vmatprep.mubr.f32.mxu1 %v3326_v6 }
 0x569   : > { %8198 = vmatpush3.bf16.xpose.msra.mxu1 %v10296_v40 }
 0x570   : > { %8104 = vmatmul.mubr.f32.vlgmr.msra.gmra.mrb[16].mxu1 %v3327_v31 }
 0x577   : > { %v7770_v42 = vpop.f32.mrb[4].mxu0 }
 0x578   : > { %v7771_v43 = vpop.f32.mrb[5].mxu0 }
 0x579   : > { %v10312_v44 = vadd.f32 %v7771_v43, %v7770_v42  ;;  %v7773_v45 = vpop.f32.mrb[6].mxu0 }
 0x57a   : > { %v7774_v17 = vpop.f32.mrb[7].mxu0 }
 0x57b   : > { %v10314_v48 = vadd.f32 %v7774_v17, %v7773_v45  ;;  %v1955_v45 = vld [vmem:[%s9988_s28 + $0x40] sm:$0xff] }
 0x57c   : > { %v2873_v17 = vrot.slane %v1955_v45, %v10265_v53 }
 0x5b6   : > { %v10318_v50 = vpop.f32.mrb[4].mxu1 }
 0x5b7   : > { %v2577_v51 = vpop.f32.mrb[5].mxu1 }
 0x5b8   : > { %v2877_v52 = vmul.f32 %v2853_v16, %v2577_v51  ;;  %v10321_v55 = vpop.f32.mrb[6].mxu1  ;;  %v2927_v51 = vrot.slane %v1955_v45, %v10270_v56 }
 0x5b9   : > { %v2581_v58 = vpop.f32.mrb[7].mxu1 }
 0x5ba   : > { %v2886_v60 = vmul.f32 %v2853_v16, %v2581_v58  ;;  %v2931_v61 = vadd.f32 %v2907_v54, %v2877_v52 }
 0x5bc   : > { %v2940_v62 = vadd.f32 %v2907_v54, %v2886_v60 }
 0x5be   : > { %v8175_v63 = vpack.c.bf16 %v2940_v62, %v2931_v61 }
 0x5c0   : > { %8176 = vmatprep.subr.bf16.mxu0 %v8175_v63 }
 0x5c1   : > { %8178 = vmatpush3.bf16.xpose.msra.mxu0 %v8175_v63 }
 0x5c2   : > { %8180 = vmatprep.subr.bf16.mxu0 %v8175_v63 }
 0x5c8   : > { %8076 = vmatmul.mubr.f32.vlgmr.msra.gmra.mrb[8].mxu0 %v2951_v7 }
 0x5c9   : > { %8182 = vmatpush3.bf16.xpose.msra.mxu0 %v8175_v63  ;;  %8082 = vmatprep.mubr.f32.mxu0 %v3055_v8 }
 0x5d0   : > { %8083 = vmatmul.mubr.f32.vlgmr.msra.gmra.mrb[10].mxu0 %v3056_v20 }
 0x616   : > { %v2747_v5 = vpop.f32.mrb[8].mxu1 }
 0x617   : > { %v2880_v18 = vmul.f32 %v2865_v11, %v2747_v5  ;;  %v2749_v12 = vpop.f32.mrb[9].mxu1 }
 0x618   : > { %v2881_v19 = vmul.f32 %v2869_v13, %v2749_v12  ;;  %v2751_v23 = vpop.f32.mrb[10].mxu1 }
 0x619   : > { %v2934_v24 = vadd.f32 %v2919_v14, %v2880_v18  ;;  %v2889_v27 = vmul.f32 %v2865_v11, %v2751_v23  ;;  %v2753_v28 = vpop.f32.mrb[11].mxu1 }
 0x61a   : > { %v2935_v29 = vadd.f32 %v2923_v15, %v2881_v19  ;;  %v2890_v30 = vmul.f32 %v2869_v13, %v2753_v28 }
 0x61b   : > { %v2943_v32 = vadd.f32 %v2919_v14, %v2889_v27  ;;  %v3053_v22 = vmul.f32 %v10290_v37, %v2934_v24  ;;  %v3156_v34 = vmul.f32 %v10325_v0, %v2934_v24 }
 0x61c   : > { %v2944_v33 = vadd.f32 %v2923_v15, %v2890_v30  ;;  %v3427_v21 = vmul.f32 %v10290_v37, %v2935_v29  ;;  %v3530_v38 = vmul.f32 %v10325_v0, %v2935_v29 }
 0x61d   : > { %v3054_v35 = vmul.f32 %v10290_v37, %v2943_v32  ;;  %v3157_v36 = vmul.f32 %v10325_v0, %v2943_v32 }
 0x61e   : > { %v3428_v39 = vmul.f32 %v10290_v37, %v2944_v33  ;;  %v3531_v46 = vmul.f32 %v10325_v0, %v2944_v33 }
 0x61f   : > { %v8183_v1 = vpack.c.bf16 %v3157_v36, %v3156_v34  ;;  %v10349_v31 = vpack.c.bf16 %v3054_v35, %v3053_v22 }
 0x620   : > { %v10351_v42 = vpack.c.bf16 %v3531_v46, %v3530_v38  ;;  %v8209_v43 = vpack.c.bf16 %v3428_v39, %v3427_v21 }
 0x621   : > { %8185 = vmatprep.subr.msk.bf16.mxu0 %vm10345_vm8, %v8183_v1 }
 0x622   : > { %8188 = vmatpush3.bf16.msk.msra.mxu0 %vm10345_vm8, %v8183_v1  ;;  %8211 = vmatprep.subr.msk.bf16.mxu1 %vm10345_vm8, %v8209_v43 }
 0x623   : > { %8191 = vmatprep.subr.msk.bf16.mxu0 %vm10345_vm8, %v10349_v31  ;;  %8214 = vmatpush3.bf16.msk.msra.mxu1 %vm10345_vm8, %v8209_v43 }
 0x624   : > { %8220 = vmatprep.subr.bf16.mxu1 %v10301_v2 }
 0x636   : > { %v2831_v49 = vpop.f32.mrb[12].mxu1 }
 0x637   : > { %v2832_v16 = vadd.f32 %v10312_v44, %v2831_v49  ;;  %v8069_v52 = vpop.f32.mrb[13].mxu1 }
 0x638   : > { %v2834_v54 = vpop.f32.mrb[14].mxu1 }
 0x639   : > { %v2882_v58 = vmul.f32 %v2873_v17, %v2832_v16  ;;  %v2835_v60 = vadd.f32 %v10314_v48, %v2834_v54  ;;  %v8070_v61 = vpop.f32.mrb[15].mxu1  ;;  %v1970_v48 = vadd.s32 8, %v10120_v25 }
 0x63b   : > { %v2936_v62 = vadd.f32 %v2927_v51, %v2882_v58  ;;  %v2891_v63 = vmul.f32 %v2873_v17, %v2835_v60  ;;  %vm1988_vm11 = vcmp.lt.s32.totalorder %v1970_v48, 10 }
 0x63c   : > { %vm1993_vm0 = vmand %vm1988_vm11, %vm1991_vm9  ;;  %vm3029_vm9 = vcmask 80896  }
 0x63d   : > { %v2945_v7 = vadd.f32 %v2927_v51, %v2891_v63  ;;  %v3801_v8 = vmul.f32 %v10290_v37, %v2936_v62  ;;  %v3904_v20 = vmul.f32 %v10325_v0, %v2936_v62  ;;  %vm10384_vm5 = vmand %vm1993_vm0, %vm1994_vm14 }
 0x63f   : > { %v3802_v9 = vmul.f32 %v10290_v37, %v2945_v7  ;;  %v3905_v10 = vmul.f32 %v10325_v0, %v2945_v7 }
 0x641   : > { %v10374_v44 = vpack.c.bf16 %v3905_v10, %v3904_v20  ;;  %v10376_v11 = vpack.c.bf16 %v3802_v9, %v3801_v8 }
 0x643   : > { %v8105_v13 = vpop.f32.mrb[16].mxu1 }
 0x644   : > { %v3394_v14 = vpop.f32.mrb[17].mxu1  ;;  %v3404_v61 = vsel %vm10384_vm5, %v8105_v13, -1e+30 }
 0x645   : > { %v3403_v63 = vsel %vm10388_vm6, %v3394_v14, -1e+30  ;;  %v3408_v7 = vsel %vm3033_vm7, %v3404_v61, -inf }
 0x646   : > { %v3405_v8 = vsel %vm3029_vm9, %v3403_v63, -inf }
 0x69b   : > { %v8077_v5 = vpop.f32.mrb[8].mxu0 }
 0x69c   : > { %v3018_v15 = vpop.f32.mrb[9].mxu0  ;;  %v3028_v28 = vsel %vm10384_vm5, %v8077_v5, -1e+30 }
 0x69d   : > { %v3027_v30 = vsel %vm10388_vm6, %v3018_v15, -1e+30  ;;  %v3034_v32 = vsel %vm3033_vm7, %v3028_v28, -inf }
 0x69e   : > { %v3030_v33 = vsel %vm3029_vm9, %v3027_v30, -inf }
 0x6a3   : > { %v8084_v12 = vpop.f32.mrb[10].mxu0 }
 0x6a4   : > { %v3133_v23 = vsel %vm10384_vm5, %v8084_v12, -1e+30  ;;  %v3123_v24 = vpop.f32.mrb[11].mxu0 }
 0x6a5   : > { %v3132_v59 = vsel %vm10388_vm6, %v3123_v24, -1e+30  ;;  %v3137_v27 = vsel %vm3033_vm7, %v3133_v23, -inf }
 0x6a6   : > { %3138 = vmax.xlane.f32.xlu1 %v3137_v27  ;;  %v3134_v29 = vsel %vm3029_vm9, %v3132_v59, -inf  ;;  %v3429_v27 = vmul.f32 %v10325_v0, %v10299_v41 }
 0x6a7   : > { %3135 = vmax.xlane.f32.xlu0 %v3134_v29 }
 0x6aa   : > { %3035 = vmax.xlane.f32.xlu1 %v3034_v32 }
 0x6ab   : > { %3031 = vmax.xlane.f32.xlu0 %v3030_v33 }
 0x733   : > { %v3139_v22 = vpop.xlane.xlu1 %3138 }
 0x734   : > { %v3141_v34 = vsub.f32 %v3133_v23, %v3139_v22  ;;  %v3136_v35 = vpop.xlane.xlu0 %3135 }
 0x735   : > { %v3140_v36 = vsub.f32 %v3132_v59, %v3136_v35 }
 0x736   : > { %v3144_v21 = vmul.f32 1.442695, %v3141_v34 }
 0x737   : > { %v3142_v38 = vmul.f32 1.442695, %v3140_v36  ;;  %v3036_v39 = vpop.xlane.xlu1 %3035 }
 0x738   : > { %8803 = vpow2.f32 %v3144_v21  ;;  %v3038_v46 = vsub.f32 %v3028_v28, %v3036_v39  ;;  %v3032_v1 = vpop.xlane.xlu0 %3031 }
 0x739   : > { %8805 = vpow2.f32 %v3142_v38  ;;  %v3037_v43 = vsub.f32 %v3027_v30, %v3032_v1 }
 0x73a   : > { %v3041_v45 = vmul.f32 1.442695, %v3038_v46 }
 0x73b   : > { %v3039_v17 = vmul.f32 1.442695, %v3037_v43 }
 0x73c   : > { %8807 = vpow2.f32 %v3041_v45 }
 0x73d   : > { %8809 = vpow2.f32 %v3039_v17 }
 0x742   : > { %v8804_v49 = vpop.eup %8803 }
 0x743   : > { %v8806_v16 = vpop.eup %8805  ;;  %v3149_v51 = vsel %vm3033_vm7, %v8804_v49, 0.0 }
 0x744   : > { %3150 = vadd.xlane.f32.xlu1 %v3149_v51  ;;  %v3146_v52 = vsel %vm3029_vm9, %v8806_v16, 0.0 }
 0x745   : > { %3147 = vadd.xlane.f32.xlu0 %v3146_v52 }
 0x746   : > { %v8808_v54 = vpop.eup %8807 }
 0x747   : > { %v8810_v58 = vpop.eup %8809  ;;  %v3046_v60 = vsel %vm3033_vm7, %v8808_v54, 0.0 }
 0x748   : > { %3047 = vadd.xlane.f32.xlu1 %v3046_v60  ;;  %v3043_v62 = vsel %vm3029_vm9, %v8810_v58, 0.0  ;;  %v10445_v60 = vld [vmem:[%s9988_s28 + $0x10] sm:$0xff] }
 0x749   : > { %3044 = vadd.xlane.f32.xlu0 %v3043_v62 }
 0x74c   : > { %3409 = vmax.xlane.f32.xlu1 %v3408_v7 }
 0x74d   : > { %3406 = vmax.xlane.f32.xlu0 %v3405_v8 }
 0x7d1   : > { %v3151_v20 = vpop.xlane.xlu1 %3150 }
 0x7d2   : > { %8811 = vrcp.f32 %v3151_v20  ;;  %v3148_v9 = vpop.xlane.xlu0 %3147 }
 0x7d3   : > { %8813 = vrcp.f32 %v3148_v9 }
 0x7d5   : > { %v3048_v48 = vpop.xlane.xlu1 %3047 }
 0x7d6   : > { %v3045_v10 = vpop.xlane.xlu0 %3044 }
 0x7d7   : > { %8815 = vrcp.f32 %v3045_v10 }
 0x7d8   : > { %8817 = vrcp.f32 %v3048_v48 }
 0x7d9   : > { %v3410_v41 = vpop.xlane.xlu1 %3409 }
 0x7da   : > { %v3407_v28 = vpop.xlane.xlu0 %3406  ;;  %v3412_v29 = vsub.f32 %v3404_v61, %v3410_v41  ;;  %v2849_v61 = vrot.slane %v10445_v60, %v10265_v53  ;;  %v4081_v41 = vld [vmem:[%s9982_s5 + $0x20] sm:$0xff] }
 0x7db   : > { %v3411_v30 = vsub.f32 %v3403_v63, %v3407_v28  ;;  %v2903_v63 = vrot.slane %v10445_v60, %v10270_v56 }
 0x7dc   : > { %v8812_v13 = vpop.eup %8811  ;;  %v3415_v32 = vmul.f32 1.442695, %v3412_v29  ;;  %v2876_v62 = vmul.f32 %v2849_v61, %v10318_v50  ;;  %v4120_v29 = vunpack.c.l.s8.bf16 %v4081_v41 }
 0x7dd   : > { %v8814_v5 = vpop.eup %8813  ;;  %v3155_v12 = vmul.f32 %v8812_v13, %v8804_v49 }
 0x7de   : > { %v3153_v15 = vmul.f32 %v8814_v5, %v8806_v16  ;;  %8819 = vpow2.f32 %v3415_v32  ;;  %v10458_v10 = vadd.f32 %v2903_v63, %v2876_v62  ;;  %v2885_v5 = vmul.f32 %v2849_v61, %v10321_v55  ;;  %v4077_v55 = vld [vmem:[%s9982_s5] sm:$0xff]  ;;  %v4092_v61 = vld [vmem:[%s9982_s5 + $0x78] sm:$0xff] }
 0x7df   : > { %v4116_v28 = vunpack.c.h.s8.bf16 %v4077_v55  ;;  %v4143_v62 = vunpack.c.l.s8.bf16 %v4092_v61 }
 0x7e0   : > { %8089 = vmatprep.mubr.msk.f32.mxu0 %vm3029_vm9, %v3153_v15 }
 0x7e1   : > { %v8816_v14 = vpop.eup %8815  ;;  %8090 = vmatmul.mubr.msk.f32.vlgmr.msra.gmra.mrb[12].mxu0 %vm3029_vm9, %v3155_v12  ;;  %v3803_v12 = vmul.f32 %v10325_v0, %v10458_v10 }
 0x7e2   : > { %8194 = vmatpush3.bf16.msk.msra.mxu0 %vm10345_vm8, %v10349_v31  ;;  %v3050_v23 = vmul.f32 %v8816_v14, %v8810_v58  ;;  %v8818_v24 = vpop.eup %8817  ;;  %v3430_v31 = vmul.f32 %v10325_v0, %v10308_v3  ;;  %v10468_v14 = vadd.f32 %v2903_v63, %v2885_v5  ;;  %v4095_v5 = vld [vmem:[%s9982_s5 + $0x90] sm:$0xff] }
 0x7e3   : > { %8200 = vmatprep.subr.bf16.mxu0 %v10296_v40  ;;  %v3052_v59 = vmul.f32 %v8818_v24, %v8808_v54  ;;  %v4078_v24 = vld [vmem:[%s9982_s5 + $0x8] sm:$0xff] }
 0x7e4   : > { %8096 = vmatprep.mubr.msk.f32.mxu0 %vm3029_vm9, %v3050_v23  ;;  %v3804_v23 = vmul.f32 %v10325_v0, %v10468_v14  ;;  %v4123_v0 = vunpack.c.h.s8.bf16 %v4081_v41 }
 0x7e8   : > { %v8820_v38 = vpop.eup %8819 }
 0x7e9   : > { %8097 = vmatmul.mubr.msk.f32.vlgmr.msra.gmra.mrb[12].mxu0 %vm3029_vm9, %v3052_v59  ;;  %v3420_v1 = vsel %vm3033_vm7, %v8820_v38, 0.0  ;;  %v4114_v59 = vunpack.c.l.s8.bf16 %v4078_v24 }
 0x7ea   : > { %8110 = vmatprep.mubr.f32.mxu0 %v3429_v27  ;;  %v4113_v27 = vunpack.c.l.s8.bf16 %v4077_v55 }
 0x7eb   : > { %8202 = vmatpush3.bf16.xpose.msra.mxu0 %v10296_v40  ;;  %v3413_v40 = vmul.f32 1.442695, %v3411_v30  ;;  %v4080_v30 = vld [vmem:[%s9982_s5 + $0x18] sm:$0xff] }
 0x7ec   : > { %8205 = vmatprep.subr.msk.bf16.mxu0 %vm10345_vm8, %v10351_v42  ;;  %v4119_v32 = vunpack.c.l.s8.bf16 %v4080_v30 }
 0x7ed   : > { %8821 = vpow2.f32 %v3413_v40  ;;  %v4084_v40 = vld [vmem:[%s9982_s5 + $0x38] sm:$0xff] }
 0x7f2   : > { %8111 = vmatmul.mubr.f32.vlgmr.msra.gmra.mrb[14].mxu0 %v3430_v31  ;;  %v4117_v31 = vunpack.c.h.s8.bf16 %v4078_v24  ;;  %v4152_v24 = vunpack.c.h.s8.bf16 %v4095_v5 }
 0x7f3   : > { %8208 = vmatpush3.bf16.msk.msra.mxu0 %vm10345_vm8, %v10351_v42 }
 0x7f4   : > { %8216 = vmatprep.subr.bf16.mxu0 %v10301_v2 }
 0x7f7   : > { %v8822_v46 = vpop.eup %8821 }
 0x7f8   : > { %v3417_v43 = vsel %vm3029_vm9, %v8822_v46, 0.0 }
 0x8bc   : > { %v8098_v33 = vpop.f32.mrb[12].mxu0 }
 0x8bd   : > { %v3317_v22 = vpop.f32.mrb[13].mxu0 }
 0x8be   : > { %v10434_v34 = vpack.c.bf16 %v8098_v33, %v3317_v22  ;;  %v4122_v33 = vunpack.c.h.s8.bf16 %v4080_v30  ;;  %v4126_v22 = vunpack.c.l.s8.bf16 %v4084_v40 }
 0x8c5   : > { %v8112_v3 = vpop.f32.mrb[14].mxu0 }
 0x8c6   : > { %v3507_v35 = vsel %vm10384_vm5, %v8112_v3, -1e+30  ;;  %v3497_v36 = vpop.f32.mrb[15].mxu0  ;;  %v4083_v3 = vld [vmem:[%s9982_s5 + $0x30] sm:$0xff] }
 0x8c7   : > { %v3506_v42 = vsel %vm10388_vm6, %v3497_v36, -1e+30  ;;  %v3511_v21 = vsel %vm3033_vm7, %v3507_v35, -inf  ;;  %v4129_v36 = vunpack.c.h.s8.bf16 %v4084_v40 }
 0x8c8   : > { %3512 = vmax.xlane.f32.xlu1 %v3511_v21  ;;  %v3508_v39 = vsel %vm3029_vm9, %v3506_v42, -inf  ;;  %v4128_v21 = vunpack.c.h.s8.bf16 %v4083_v3 }
 0x8c9   : > { %3509 = vmax.xlane.f32.xlu0 %v3508_v39  ;;  %v4086_v39 = vld [vmem:[%s9982_s5 + $0x48] sm:$0xff] }
 0x8cc   : > { %3421 = vadd.xlane.f32.xlu1 %v3420_v1 }
 0x8cd   : > { %3418 = vadd.xlane.f32.xlu0 %v3417_v43  ;;  %v4090_v43 = vld [vmem:[%s9982_s5 + $0x68] sm:$0xff] }
 0x955   : > { %v3513_v45 = vpop.xlane.xlu1 %3512 }
 0x956   : > { %v3515_v17 = vsub.f32 %v3507_v35, %v3513_v45  ;;  %v3510_v49 = vpop.xlane.xlu0 %3509  ;;  %v4125_v35 = vunpack.c.l.s8.bf16 %v4083_v3  ;;  %v4134_v45 = vunpack.c.h.s8.bf16 %v4086_v39 }
 0x957   : > { %v3514_v16 = vsub.f32 %v3506_v42, %v3510_v49  ;;  %v4087_v42 = vld [vmem:[%s9982_s5 + $0x50] sm:$0xff]  ;;  %v4089_v49 = vld [vmem:[%s9982_s5 + $0x60] sm:$0xff] }
 0x958   : > { %v3518_v51 = vmul.f32 1.442695, %v3515_v17  ;;  %v4135_v1 = vunpack.c.h.s8.bf16 %v4087_v42  ;;  %v4138_v17 = vunpack.c.l.s8.bf16 %v4090_v43 }
 0x959   : > { %v3516_v52 = vmul.f32 1.442695, %v3514_v16  ;;  %v3422_v54 = vpop.xlane.xlu1 %3421  ;;  %v4137_v16 = vunpack.c.l.s8.bf16 %v4089_v49 }
 0x95a   : > { %8823 = vpow2.f32 %v3518_v51  ;;  %v3419_v58 = vpop.xlane.xlu0 %3418  ;;  %v4141_v51 = vunpack.c.h.s8.bf16 %v4090_v43 }
 0x95b   : > { %8825 = vpow2.f32 %v3516_v52  ;;  %v4093_v52 = vld [vmem:[%s9982_s5 + $0x80] sm:$0xff] }
 0x95c   : > { %8827 = vrcp.f32 %v3422_v54  ;;  %v4140_v54 = vunpack.c.h.s8.bf16 %v4089_v49 }
 0x95d   : > { %8829 = vrcp.f32 %v3419_v58  ;;  %v4144_v58 = vunpack.c.l.s8.bf16 %v4093_v52 }
 0x964   : > { %v10452_v7 = vpop.eup %8823 }
 0x965   : > { %v10454_v8 = vpop.eup %8825  ;;  %v3523_v20 = vsel %vm3033_vm7, %v10452_v7, 0.0 }
 0x966   : > { %v8828_v9 = vpop.eup %8827  ;;  %3524 = vadd.xlane.f32.xlu1 %v3523_v20  ;;  %v3520_v48 = vsel %vm3029_vm9, %v10454_v8, 0.0  ;;  %v4147_v20 = vunpack.c.h.s8.bf16 %v4093_v52 }
 0x967   : > { %v8830_v50 = vpop.eup %8829  ;;  %3521 = vadd.xlane.f32.xlu0 %v3520_v48  ;;  %v3426_v15 = vmul.f32 %v8828_v9, %v8820_v38  ;;  %v4132_v38 = vunpack.c.l.s8.bf16 %v4087_v42  ;;  %v4096_v48 = vld [vmem:[%s9982_s5 + $0x98] sm:$0xff] }
 0x968   : > { %v3424_v13 = vmul.f32 %v8830_v50, %v8822_v46  ;;  %v4131_v46 = vunpack.c.l.s8.bf16 %v4086_v39  ;;  %v4146_v50 = vunpack.c.h.s8.bf16 %v4092_v61 }
 0x96a   : > { %8124 = vmatprep.mubr.msk.f32.mxu1 %vm3029_vm9, %v3424_v13  ;;  %v4150_v13 = vunpack.c.l.s8.bf16 %v4096_v48 }
 0x96b   : > { %8125 = vmatmul.mubr.msk.f32.vlgmr.msra.gmra.mrb[18].mxu1 %vm3029_vm9, %v3426_v15  ;;  %v4149_v15 = vunpack.c.l.s8.bf16 %v4095_v5 }
 0x96c   : > { %8222 = vmatpush3.bf16.xpose.msra.mxu1 %v10301_v2  ;;  %8138 = vmatprep.mubr.f32.mxu1 %v3803_v12  ;;  %v4153_v12 = vunpack.c.h.s8.bf16 %v4096_v48 }
 0x96d   : > { %4185 = vmatprep.subr.bf16.mxu1 %v4114_v59 }
 0x973   : > { %8139 = vmatmul.mubr.f32.vlgmr.msra.gmra.mrb[20].mxu1 %v3804_v23 }
 0x974   : > { %4186 = vmatpush1.bf16.msra.mxu1 %v4113_v27 }
 0x975   : > { %4187 = vmatprep.subr.bf16.mxu1 %v4117_v31  ;;  %v3700_v31 = vmul.f32 %v10290_v37, %v10458_v10 }
 0x978   : > { %4188 = vmatpush1.bf16.msra.mxu1 %v4116_v28 }
 0x979   : > { %4189 = vmatprep.subr.bf16.mxu1 %v4120_v29 }
 0x97c   : > { %4190 = vmatpush1.bf16.msra.mxu1 %v4119_v32  ;;  %v4098_v32 = vld [vmem:[%s9982_s5 + $0xa8] sm:$0xff] }
 0x97d   : > { %4191 = vmatprep.subr.bf16.mxu1 %v4123_v0  ;;  %v4155_v0 = vunpack.c.l.s8.bf16 %v4098_v32 }
 0x980   : > { %4192 = vmatpush1.bf16.msra.mxu1 %v4122_v33  ;;  %v4158_v33 = vunpack.c.h.s8.bf16 %v4098_v32  ;;  %v4108_v32 = vld [vmem:[%s9982_s5 + $0xf8] sm:$0xff] }
 0x981   : > { %4193 = vmatprep.subr.bf16.mxu1 %v4126_v22 }
 0x984   : > { %4194 = vmatpush1.bf16.msra.mxu1 %v4125_v35 }
 0x985   : > { %4195 = vmatprep.subr.bf16.mxu1 %v4129_v36 }
 0x988   : > { %4196 = vmatpush1.bf16.msra.mxu1 %v4128_v21 }
 0x989   : > { %4197 = vmatprep.subr.bf16.mxu1 %v4132_v38 }
 0x98c   : > { %4198 = vmatpush1.bf16.msra.mxu1 %v4131_v46 }
 0x98d   : > { %4199 = vmatprep.subr.bf16.mxu1 %v4135_v1 }
 0x990   : > { %4200 = vmatpush1.bf16.msra.mxu1 %v4134_v45 }
 0x991   : > { %4201 = vmatprep.subr.bf16.mxu1 %v4138_v17 }
 0x994   : > { %4202 = vmatpush1.bf16.msra.mxu1 %v4137_v16 }
 0x995   : > { %4203 = vmatprep.subr.bf16.mxu1 %v4141_v51 }
 0x998   : > { %4204 = vmatpush1.bf16.msra.mxu1 %v4140_v54 }
 0x999   : > { %4205 = vmatprep.subr.bf16.mxu1 %v4144_v58 }
 0x99c   : > { %4206 = vmatpush1.bf16.msra.mxu1 %v4143_v62 }
 0x99d   : > { %4207 = vmatprep.subr.bf16.mxu1 %v4147_v20 }
 0x9a0   : > { %4208 = vmatpush1.bf16.msra.mxu1 %v4146_v50 }
 0x9a1   : > { %4209 = vmatprep.subr.bf16.mxu1 %v4150_v13 }
 0x9a4   : > { %4210 = vmatpush1.bf16.msra.mxu1 %v4149_v15 }
 0x9a5   : > { %4211 = vmatprep.subr.bf16.mxu1 %v4153_v12 }
 0x9a8   : > { %4212 = vmatpush1.bf16.msra.mxu1 %v4152_v24 }
 0x9f3   : > { %v3525_v63 = vpop.xlane.xlu1 %3524 }
 0x9f4   : > { %8831 = vrcp.f32 %v3525_v63  ;;  %v3522_v9 = vpop.xlane.xlu0 %3521 }
 0x9f5   : > { %8833 = vrcp.f32 %v3522_v9 }
 0x9fe   : > { %v8832_v23 = vpop.eup %8831 }
 0x9ff   : > { %v8834_v55 = vpop.eup %8833  ;;  %v3529_v27 = vmul.f32 %v8832_v23, %v10452_v7 }
 0xa00   : > { %v3527_v59 = vmul.f32 %v8834_v55, %v10454_v8  ;;  %v3701_v8 = vmul.f32 %v10290_v37, %v10468_v14 }
 0xa02   : > { %8117 = vmatprep.mubr.msk.f32.mxu0 %vm3029_vm9, %v3527_v59 }
 0xa03   : > { %8118 = vmatmul.mubr.msk.f32.vlgmr.msra.gmra.mrb[16].mxu0 %vm3029_vm9, %v3529_v27 }
 0xa04   : > { %8218 = vmatpush3.bf16.xpose.msra.mxu0 %v10301_v2  ;;  %8131 = vmatprep.mubr.f32.mxu0 %v3700_v31  ;;  %v4091_v31 = vld [vmem:[%s9982_s5 + $0x70] sm:$0xff] }
 0xa05   : > { %8225 = vmatprep.subr.msk.bf16.mxu0 %vm10345_vm8, %v10374_v44 }
 0xa0b   : > { %8132 = vmatmul.mubr.f32.vlgmr.msra.gmra.mrb[18].mxu0 %v3701_v8  ;;  %v4139_v8 = vunpack.c.l.s8.bf16 %v4091_v31 }
 0xa0c   : > { %8228 = vmatpush3.bf16.msk.msra.mxu0 %vm10345_vm8, %v10374_v44  ;;  %v4099_v44 = vld [vmem:[%s9982_s5 + $0xb0] sm:$0xff] }
 0xa0d   : > { %8231 = vmatprep.subr.msk.bf16.mxu0 %vm10345_vm8, %v10376_v11  ;;  %v4156_v30 = vunpack.c.l.s8.bf16 %v4099_v44  ;;  %v4159_v40 = vunpack.c.h.s8.bf16 %v4099_v44  ;;  %v4104_v44 = vld [vmem:[%s9982_s5 + $0xd8] sm:$0xff] }
 0xa0e   : > { %v4167_v6 = vunpack.c.l.s8.bf16 %v4104_v44 }
 0xa0f   : > { %4213 = vmatprep.subr.bf16.mxu1 %v4156_v30  ;;  %v4170_v30 = vunpack.c.h.s8.bf16 %v4104_v44 }
 0xa10   : > { %4214 = vmatpush1.bf16.msra.mxu1 %v4155_v0  ;;  %v4174_v0 = vunpack.c.l.s8.bf16 %v4108_v32 }
 0xa11   : > { %4215 = vmatprep.subr.bf16.mxu1 %v4159_v40  ;;  %v4107_v40 = vld [vmem:[%s9982_s5 + $0xf0] sm:$0xff] }
 0xa14   : > { %4216 = vmatpush1.bf16.msra.mxu1 %v4158_v33  ;;  %v4173_v33 = vunpack.c.l.s8.bf16 %v4107_v40 }
 0xa3e   : > { %v8126_v2 = vpop.f32.mrb[18].mxu1 }
 0xa3f   : > { %v3691_v7 = vpop.f32.mrb[19].mxu1 }
 0xa46   : > { %v8140_v10 = vpop.f32.mrb[20].mxu1 }
 0xa47   : > { %v3881_v41 = vsel %vm10384_vm5, %v8140_v10, -1e+30  ;;  %v3871_v28 = vpop.f32.mrb[21].mxu1 }
 0xa48   : > { %v3880_v37 = vsel %vm10388_vm6, %v3871_v28, -1e+30  ;;  %v3885_v14 = vsel %vm3033_vm7, %v3881_v41, -inf }
 0xa49   : > { %3886 = vmax.xlane.f32.xlu1 %v3885_v14  ;;  %v3882_v29 = vsel %vm3029_vm9, %v3880_v37, -inf  ;;  %v4105_v14 = vld [vmem:[%s9982_s5 + $0xe0] sm:$0xff] }
 0xa4a   : > { %3883 = vmax.xlane.f32.xlu0 %v3882_v29  ;;  %v4168_v29 = vunpack.c.l.s8.bf16 %v4105_v14 }
 0xad6   : > { %v3887_v22 = vpop.xlane.xlu1 %3886  ;;  %v8119_v3 = vpop.f32.mrb[16].mxu0 }
 0xad7   : > { %v3889_v35 = vsub.f32 %v3881_v41, %v3887_v22  ;;  %v3884_v36 = vpop.xlane.xlu0 %3883  ;;  %v3697_v42 = vadd.f32 %v8126_v2, %v8119_v3  ;;  %v3607_v21 = vpop.f32.mrb[17].mxu0  ;;  %v4102_v2 = vld [vmem:[%s9982_s5 + $0xc8] sm:$0xff]  ;;  %v4177_v22 = vunpack.c.h.s8.bf16 %v4108_v32  ;;  %v4176_v3 = vunpack.c.h.s8.bf16 %v4107_v40 }
 0xad8   : > { %v3888_v38 = vsub.f32 %v3880_v37, %v3884_v36  ;;  %v3692_v39 = vadd.f32 %v3691_v7, %v3607_v21  ;;  %v4101_v7 = vld [vmem:[%s9982_s5 + $0xc0] sm:$0xff]  ;;  %v4162_v10 = vunpack.c.l.s8.bf16 %v4102_v2  ;;  %v4165_v28 = vunpack.c.h.s8.bf16 %v4102_v2 }
 0xad9   : > { %v3892_v46 = vmul.f32 1.442695, %v3889_v35  ;;  %v4161_v41 = vunpack.c.l.s8.bf16 %v4101_v7  ;;  %v4164_v37 = vunpack.c.h.s8.bf16 %v4101_v7  ;;  %v10540_v35 = vld [vmem:[%s9982_s5 + $0x110] sm:$0xff]  ;;  %v4109_v7 = vld [vmem:[%s9982_s5 + $0x100] sm:$0xff] }
 0xada   : > { %v3890_v1 = vmul.f32 1.442695, %v3888_v38  ;;  %v10512_v43 = vpack.c.bf16 %v3697_v42, %v3692_v39  ;;  %4228 = vmatprep.subr.bf16.mxu1 %v4162_v10  ;;  %v4180_v36 = vunpack.c.l.s8.bf16 %v10540_v35  ;;  %v10544_v42 = vld [vmem:[%s9982_s5 + $0x108] sm:$0xff]  ;;  %v4178_v10 = vunpack.c.h.s8.bf16 %v4109_v7 }
 0xadb   : > { %8835 = vpow2.f32 %v3892_v46  ;;  %v4179_v21 = vunpack.c.l.s8.bf16 %v10544_v42  ;;  %v4079_v46 = vld [vmem:[%s9982_s5 + $0x10] sm:$0xff] }
 0xadc   : > { %8837 = vpow2.f32 %v3890_v1  ;;  %4217 = vmatprep.mubr.bf16.mxu1 %v10512_v43 }
 0xadd   : > { %4218 = vmatmul.mubr.bf16.vlgmr.msra.gmra.mrb[24].mxu1 %v10434_v34 }
 0xade   : > { %v8133_v45 = vpop.f32.mrb[18].mxu0  ;;  %4260 = vmatprep.mubr.bf16.mxu1 %v9446_v57  ;;  %4229 = vmatpush1.bf16.msra.mxu1 %v4161_v41  ;;  %v4112_v41 = vld [vmem:[%s9982_s5 + $0x118] sm:$0xff] }
 0xadf   : > { %v3778_v17 = vsel %vm10384_vm5, %v8133_v45, -1e+30  ;;  %v3768_v49 = vpop.f32.mrb[19].mxu0  ;;  %4230 = vmatprep.subr.bf16.mxu1 %v4165_v28  ;;  %v4181_v28 = vunpack.c.l.s8.bf16 %v4112_v41 }
 0xae0   : > { %v3777_v16 = vsel %vm10388_vm6, %v3768_v49, -1e+30  ;;  %v3782_v51 = vsel %vm3033_vm7, %v3778_v17, -inf  ;;  %v4115_v49 = vunpack.c.l.s8.bf16 %v4079_v46 }
 0xae1   : > { %3783 = vmax.xlane.f32.xlu1 %v3782_v51  ;;  %v3779_v52 = vsel %vm3029_vm9, %v3777_v16, -inf  ;;  %v4142_v51 = vunpack.c.h.s8.bf16 %v4091_v31  ;;  %v4106_v31 = vld [vmem:[%s9982_s5 + $0xe8] sm:$0xff] }
 0xae2   : > { %3780 = vmax.xlane.f32.xlu0 %v3779_v52  ;;  %4231 = vmatpush1.bf16.msra.mxu1 %v4164_v37  ;;  %v4094_v52 = vld [vmem:[%s9982_s5 + $0x88] sm:$0xff]  ;;  %v4172_v2 = vunpack.c.h.s8.bf16 %v4106_v31  ;;  %v4183_v37 = vunpack.c.h.s8.bf16 %v10540_v35  ;;  %v10581_v35 = vld [vmem:[%s9988_s28] sm:$0xff] }
 0xae3   : > { %4232 = vmatprep.subr.bf16.mxu1 %v4168_v29  ;;  %v4184_v29 = vunpack.c.h.s8.bf16 %v4112_v41 }
 0xae5   : > { %v8836_v54 = vpop.eup %8835 }
 0xae6   : > { %v8838_v58 = vpop.eup %8837  ;;  %v3897_v61 = vsel %vm3033_vm7, %v8836_v54, 0.0  ;;  %4233 = vmatpush1.bf16.msra.mxu1 %v4167_v6 }
 0xae7   : > { %3898 = vadd.xlane.f32.xlu1 %v3897_v61  ;;  %v3894_v62 = vsel %vm3029_vm9, %v8838_v58, 0.0  ;;  %v4082_v61 = vld [vmem:[%s9982_s5 + $0x28] sm:$0xff] }
 0xae8   : > { %3895 = vadd.xlane.f32.xlu0 %v3894_v62  ;;  %v4121_v62 = vunpack.c.l.s8.bf16 %v4082_v61 }
 0xb6e   : > { %v3784_v18 = vpop.xlane.xlu1 %3783 }
 0xb6f   : > { %v3786_v63 = vsub.f32 %v3778_v17, %v3784_v18  ;;  %v3781_v20 = vpop.xlane.xlu0 %3780  ;;  %v4148_v18 = vunpack.c.h.s8.bf16 %v4094_v52 }
 0xb70   : > { %v3785_v9 = vsub.f32 %v3777_v16, %v3781_v20  ;;  %v4124_v20 = vunpack.c.h.s8.bf16 %v4082_v61 }
 0xb71   : > { %v3789_v19 = vmul.f32 1.442695, %v3786_v63  ;;  %v4097_v63 = vld [vmem:[%s9982_s5 + $0xa0] sm:$0xff] }
 0xb72   : > { %v3787_v48 = vmul.f32 1.442695, %v3785_v9  ;;  %v4151_v9 = vunpack.c.l.s8.bf16 %v4097_v63 }
 0xb73   : > { %8839 = vpow2.f32 %v3789_v19  ;;  %v4085_v19 = vld [vmem:[%s9982_s5 + $0x40] sm:$0xff] }
 0xb74   : > { %8841 = vpow2.f32 %v3787_v48  ;;  %v3899_v50 = vpop.xlane.xlu1 %3898  ;;  %v4127_v48 = vunpack.c.l.s8.bf16 %v4085_v19 }
 0xb75   : > { %8843 = vrcp.f32 %v3899_v50  ;;  %v3896_v13 = vpop.xlane.xlu0 %3895  ;;  %v4100_v50 = vld [vmem:[%s9982_s5 + $0xb8] sm:$0xff] }
 0xb76   : > { %8845 = vrcp.f32 %v3896_v13  ;;  %v4130_v13 = vunpack.c.h.s8.bf16 %v4085_v19 }
 0xb7d   : > { %v8840_v5 = vpop.eup %8839 }
 0xb7e   : > { %v8842_v15 = vpop.eup %8841  ;;  %v3794_v12 = vsel %vm3033_vm7, %v8840_v5, 0.0 }
 0xb7f   : > { %v8844_v23 = vpop.eup %8843  ;;  %3795 = vadd.xlane.f32.xlu1 %v3794_v12  ;;  %v3791_v24 = vsel %vm3029_vm9, %v8842_v15, 0.0 }
 0xb80   : > { %v8846_v55 = vpop.eup %8845  ;;  %3792 = vadd.xlane.f32.xlu0 %v3791_v24  ;;  %v3903_v27 = vmul.f32 %v8844_v23, %v8836_v54  ;;  %v4118_v54 = vunpack.c.h.s8.bf16 %v4079_v46  ;;  %v4160_v23 = vunpack.c.h.s8.bf16 %v4100_v50 }
 0xb81   : > { %v3901_v59 = vmul.f32 %v8846_v55, %v8838_v58  ;;  %v4145_v58 = vunpack.c.l.s8.bf16 %v4094_v52  ;;  %v4103_v55 = vld [vmem:[%s9982_s5 + $0xd0] sm:$0xff] }
 0xb83   : > { %8145 = vmatprep.mubr.msk.f32.mxu0 %vm3029_vm9, %v3901_v59  ;;  %v4163_v59 = vunpack.c.l.s8.bf16 %v4103_v55 }
 0xb84   : > { %8146 = vmatmul.mubr.msk.f32.vlgmr.msra.gmra.mrb[20].mxu0 %vm3029_vm9, %v3903_v27  ;;  %v4166_v27 = vunpack.c.h.s8.bf16 %v4103_v55 }
 0xb85   : > { %8234 = vmatpush3.bf16.msk.msra.mxu0 %vm10345_vm8, %v10376_v11  ;;  %v4171_v11 = vunpack.c.h.s8.bf16 %v4105_v14  ;;  %v4182_v14 = vunpack.c.h.s8.bf16 %v10544_v42  ;;  %v4391_v42 = vsub.s32 6, %v10120_v25 }
 0xb86   : > { %7833 = vmatprep.subr.bf16.mxu0 %v4139_v8  ;;  %v4169_v8 = vunpack.c.l.s8.bf16 %v4106_v31 }
 0xb87   : > { %4234 = vmatprep.subr.bf16.mxu1 %v4171_v11  ;;  %v4400_v61 = vrot.slane %v10445_v60, %v4391_v42 }
 0xb88   : > { %4235 = vmatpush1.bf16.msra.mxu1 %v4170_v30 }
 0xb89   : > { %4236 = vmatprep.subr.bf16.mxu1 %v4174_v0 }
 0xb8c   : > { %4237 = vmatpush1.bf16.msra.mxu1 %v4173_v33 }
 0xb8d   : > { %4238 = vmatprep.subr.bf16.mxu1 %v4177_v22  ;;  %v10575_v22 = vsub.s32 5, %v10120_v25 }
 0xb8f   : > { %v4364_v46 = vrot.slane %v10445_v60, %v10575_v22 }
 0xb90   : > { %4239 = vmatpush1.bf16.msra.mxu1 %v4176_v3  ;;  %v10578_v3 = vsub.s32 4, %v10120_v25 }
 0xb91   : > { %4240 = vmatprep.subr.bf16.mxu1 %v4180_v36  ;;  %v4356_v36 = vrot.slane %v10581_v35, %v10575_v22 }
 0xb92   : > { %v4382_v52 = vrot.slane %v10445_v60, %v10578_v3  ;;  %v8906_v60 = vld [vmem:[#allocation2] sm:$0xff] }
 0xb94   : > { %4241 = vmatpush1.bf16.msra.mxu1 %v4179_v21  ;;  %v10587_v21 = vld [vmem:[%s9988_s28 + $0x8] sm:$0xff] }
 0xb95   : > { %4242 = vmatprep.subr.bf16.mxu1 %v4183_v37 }
 0xb98   : > { %4243 = vmatpush1.bf16.msra.mxu1 %v4182_v14 }
 0xc0c   : > { %v3796_v38 = vpop.xlane.xlu1 %3795 }
 0xc0d   : > { %8847 = vrcp.f32 %v3796_v38  ;;  %v3793_v39 = vpop.xlane.xlu0 %3792  ;;  %v4360_v38 = vrot.slane %v10587_v21, %v10575_v22 }
 0xc0e   : > { %8849 = vrcp.f32 %v3793_v39  ;;  %v4374_v39 = vrot.slane %v10581_v35, %v10578_v3 }
 0xc17   : > { %v8848_v1 = vpop.eup %8847 }
 0xc18   : > { %v8850_v45 = vpop.eup %8849  ;;  %v3800_v16 = vmul.f32 %v8848_v1, %v8840_v5  ;;  %v4157_v5 = vunpack.c.l.s8.bf16 %v4100_v50 }
 0xc19   : > { %v3798_v17 = vmul.f32 %v8850_v45, %v8842_v15  ;;  %v4088_v15 = vld [vmem:[%s9982_s5 + $0x58] sm:$0xff] }
 0xc1a   : > { %v4133_v12 = vunpack.c.l.s8.bf16 %v4088_v15  ;;  %v4136_v24 = vunpack.c.h.s8.bf16 %v4088_v15 }
 0xc1b   : > { %8152 = vmatprep.mubr.msk.f32.mxu0 %vm3029_vm9, %v3798_v17  ;;  %v4378_v17 = vrot.slane %v10587_v21, %v10578_v3 }
 0xc1c   : > { %8153 = vmatmul.mubr.msk.f32.vlgmr.msra.gmra.mrb[20].mxu0 %vm3029_vm9, %v3800_v16  ;;  %v4392_v16 = vrot.slane %v10581_v35, %v4391_v42 }
 0xc1d   : > { %7834 = vmatpush3.bf16.msra.mxu0 %v4115_v49  ;;  %4303 = vmatprep.mubr.bf16.mxu0 %v10512_v43  ;;  %v4154_v43 = vunpack.c.h.s8.bf16 %v4097_v63 }
 0xc1e   : > { %7835 = vmatprep.subr.bf16.mxu0 %v4142_v51 }
 0xc21   : > { %7836 = vmatpush3.bf16.msra.mxu0 %v4118_v54 }
 0xc22   : > { %7837 = vmatprep.subr.bf16.mxu0 %v4145_v58 }
 0xc25   : > { %7838 = vmatpush3.bf16.msra.mxu0 %v4121_v62 }
 0xc26   : > { %7839 = vmatprep.subr.bf16.mxu0 %v4148_v18  ;;  %v4396_v18 = vrot.slane %v10587_v21, %v4391_v42 }
 0xc29   : > { %7840 = vmatpush3.bf16.msra.mxu0 %v4124_v20 }
 0xc2a   : > { %7841 = vmatprep.subr.bf16.mxu0 %v4151_v9 }
 0xc2d   : > { %7842 = vmatpush3.bf16.msra.mxu0 %v4127_v48 }
 0xc2e   : > { %7843 = vmatprep.subr.bf16.mxu0 %v4154_v43 }
 0xc31   : > { %7844 = vmatpush3.bf16.msra.mxu0 %v4130_v13 }
 0xc32   : > { %7845 = vmatprep.subr.bf16.mxu0 %v4157_v5 }
 0xc35   : > { %7846 = vmatpush3.bf16.msra.mxu0 %v4133_v12 }
 0xc36   : > { %7847 = vmatprep.subr.bf16.mxu0 %v4160_v23 }
 0xc39   : > { %7848 = vmatpush3.bf16.msra.mxu0 %v4136_v24 }
 0xc3a   : > { %8155 = vmatprep.subr.bf16.mxu0 %v9447_v47 }
 0xc3c   : > { %4304 = vmatmul.mubr.bf16.vlgmr.msra.gmra.mrb[24].mxu0 %v10434_v34  ;;  %v4175_v34 = vunpack.c.l.s8.bf16 %v4109_v7 }
 0xc3d   : > { %8156 = vmatpush3.bf16.msra.mxu0 %v4163_v59  ;;  %8171 = vmatprep.mubr.msk.bf16.mxu0 %vm9448_vm4, %v9447_v47  ;;  %vm6835_vm4 = vcmask (!%p7695_p10), 1040384  }
 0xc3e   : > { %8157 = vmatprep.subr.bf16.mxu0 %v9447_v47 }
 0xc41   : > { %8158 = vmatpush3.bf16.msra.mxu0 %v4166_v27 }
 0xc42   : > { %8159 = vmatprep.subr.bf16.mxu0 %v9447_v47 }
 0xc45   : > { %8160 = vmatpush3.bf16.msra.mxu0 %v4169_v8 }
 0xc46   : > { %8161 = vmatprep.subr.bf16.mxu0 %v9447_v47 }
 0xc49   : > { %8162 = vmatpush3.bf16.msra.mxu0 %v4172_v2 }
 0xc4a   : > { %8163 = vmatprep.subr.bf16.mxu0 %v9447_v47 }
 0xc4d   : > { %8164 = vmatpush3.bf16.msra.mxu0 %v4175_v34  ;;  %v8907_v34 = vld [vmem:[#allocation2 + $0x8] sm:$0xff] }
 0xc4e   : > { %8165 = vmatprep.subr.bf16.mxu0 %v9447_v47 }
 0xc51   : > { %8166 = vmatpush3.bf16.msra.mxu0 %v4178_v10 }
 0xc52   : > { %8167 = vmatprep.subr.bf16.mxu0 %v9447_v47 }
 0xc55   : > { %8168 = vmatpush3.bf16.msra.mxu0 %v4181_v28  ;;  %v8908_v28 = vld [vmem:[#allocation2 + $0x18] sm:$0x3] }
 0xc56   : > { %8169 = vmatprep.subr.bf16.mxu0 %v9447_v47 }
 0xc59   : > { %8170 = vmatpush3.bf16.msra.mxu0 %v4184_v29  ;;  %v8909_v29 = vld [vmem:[#allocation2 + $0x10] sm:$0xff] }
 0xcef   : > { %v8154_v44 = vpop.f32.mrb[20].mxu0 }
 0xcf0   : > { %v4065_v6 = vpop.f32.mrb[21].mxu0 }
 0xcf1   : > { %v4076_v11 = vpack.c.bf16 %v8154_v44, %v4065_v6  ;;  %v8910_v6 = vld [vmem:[#allocation2 + $0x20] sm:$0x3] }
 0xcf3   : > { %4261 = vmatmul.mubr.bf16.vlgmr.msra.gmra.mrb[24].mxu1 %v4076_v11  ;;  %8172 = vmatmul.mubr.bf16.vlgmr.msra.gmra.mrb[28].mxu0 %v4076_v11 }
 0xd0f   : > { %v7849_v30 = vpop.f32.mrb[24].mxu0 }
 0xd10   : > { %v7850_v32 = vpop.f32.mrb[25].mxu0 }
 0xd11   : > { %v7851_v0 = vadd.f32 %v7850_v32, %v7849_v30  ;;  %v7852_v40 = vpop.f32.mrb[26].mxu0  ;;  %v8911_v32 = vld [vmem:[#allocation2 + $0x28] sm:$0x3] }
 0xd12   : > { %v7853_v47 = vpop.f32.mrb[27].mxu0 }
 0xd13   : > { %v7854_v33 = vadd.f32 %v7853_v47, %v7852_v40 }
 0xdc6   : > { %v4262_v1 = vpop.f32.mrb[24].mxu1  ;;  %v4346_v45 = vpop.f32.mrb[28].mxu0 }
 0xdc7   : > { %v4365_v49 = vmul.f32 %v4356_v36, %v4262_v1  ;;  %v4347_v51 = vadd.f32 %v7851_v0, %v4346_v45  ;;  %v4264_v54 = vpop.f32.mrb[25].mxu1  ;;  %v8173_v58 = vpop.f32.mrb[29].mxu0  ;;  %v4500_v1 = vld [vmem:[%s9984_s19] sm:$0xff] }
 0xdc8   : > { %v4366_v62 = vmul.f32 %v4360_v38, %v4264_v54  ;;  %v4266_v63 = vpop.f32.mrb[26].mxu1  ;;  %v4349_v20 = vpop.f32.mrb[30].mxu0  ;;  %v4513_v58 = vld [vmem:[%s9984_s19 + $0x68] sm:$0xff] }
 0xdc9   : > { %v4383_v9 = vadd.f32 %v4374_v39, %v4365_v49  ;;  %v4367_v19 = vmul.f32 %v4364_v46, %v4347_v51  ;;  %v4368_v48 = vmul.f32 %v4356_v36, %v4266_v63  ;;  %v4350_v43 = vadd.f32 %v7854_v33, %v4349_v20  ;;  %v4268_v50 = vpop.f32.mrb[27].mxu1  ;;  %v8174_v13 = vpop.f32.mrb[31].mxu0 }
 0xdca   : > { %v4384_v5 = vadd.f32 %v4378_v17, %v4366_v62  ;;  %v4369_v15 = vmul.f32 %v4360_v38, %v4268_v50  ;;  %v4644_v49 = vunpack.c.l.s8.bf16 %v4500_v1  ;;  %v4656_v62 = vunpack.c.h.s8.bf16 %v4500_v1 }
 0xdcb   : > { %v4401_v12 = vmul.f32 %v4392_v16, %v4383_v9  ;;  %v4385_v23 = vadd.f32 %v4382_v52, %v4367_v19  ;;  %v4386_v24 = vadd.f32 %v4374_v39, %v4368_v48  ;;  %v4370_v55 = vmul.f32 %v4364_v46, %v4350_v43  ;;  %v4501_v39 = vld [vmem:[%s9984_s19 + $0x8] sm:$0xff]  ;;  %v4503_v46 = vld [vmem:[%s9984_s19 + $0x18] sm:$0xff]  ;;  %v4512_v9 = vld [vmem:[%s9984_s19 + $0x60] sm:$0xff] }
 0xdcc   : > { %v4402_v59 = vmul.f32 %v4396_v18, %v4384_v5  ;;  %v4387_v27 = vadd.f32 %v4378_v17, %v4369_v15  ;;  %v4645_v45 = vunpack.c.l.s8.bf16 %v4501_v39  ;;  %v4647_v17 = vunpack.c.l.s8.bf16 %v4503_v46  ;;  %v4514_v19 = vld [vmem:[%s9984_s19 + $0x70] sm:$0xff]  ;;  %v4525_v5 = vld [vmem:[%s9984_s19 + $0xc8] sm:$0xff]  ;;  %v4527_v15 = vld [vmem:[%s9984_s19 + $0xd8] sm:$0xff] }
 0xdcd   : > { %v10602_v31 = vadd.f32 %v8906_v60, %v4401_v12  ;;  %v4403_v8 = vmul.f32 %v4400_v61, %v4385_v23  ;;  %v4404_v2 = vmul.f32 %v4392_v16, %v4386_v24  ;;  %v4388_v7 = vadd.f32 %v4382_v52, %v4370_v55  ;;  %v4502_v16 = vld [vmem:[%s9984_s19 + $0x10] sm:$0xff] }
 0xdce   : > { %v10604_v10 = vadd.f32 %v8907_v34, %v4402_v59  ;;  %v4405_v41 = vmul.f32 %v4396_v18, %v4387_v27  ;;  %v4657_v51 = vunpack.c.h.s8.bf16 %v4501_v39  ;;  %v4646_v52 = vunpack.c.l.s8.bf16 %v4502_v16  ;;  %4932 = vmatprep.subr.bf16.mxu0 %v4645_v45  ;;  %5018 = vmatprep.subr.bf16.mxu1 %v4647_v17  ;;  %v4524_v59 = vld [vmem:[%s9984_s19 + $0xc0] sm:$0xff]  ;;  %v4526_v27 = vld [vmem:[%s9984_s19 + $0xd0] sm:$0xff]  ;;  %v4537_v34 = vld [vmem:[%s9984_s19 + $0x128] sm:$0xff] }
 0xdcf   : > { %v10606_v37 = vadd.f32 %v8908_v28, %v4404_v2  ;;  %v4406_v14 = vmul.f32 %v4400_v61, %v4388_v7  ;;  %v10608_v44 = vadd.f32 %v8909_v29, %v4403_v8  ;;  %v4659_v54 = vunpack.c.h.s8.bf16 %v4503_v46  ;;  %v4515_v61 = vld [vmem:[%s9984_s19 + $0x78] sm:$0xff]  ;;  %4933 = vmatpush1.bf16.msra.mxu0 %v4644_v49  ;;  %v4548_v17 = vld [vmem:[%s9984_s19 + $0x180] sm:$0xff]  ;;  %v4550_v49 = vld [vmem:[%s9984_s19 + $0x190] sm:$0xff] }
 0xdd0   : > { %v10610_v11 = vadd.f32 %v8910_v6, %v4405_v41  ;;  %v4413_v30 = vadd.f32 %v10604_v10, %v10602_v31  ;;  %5019 = vmatpush1.bf16.msra.mxu1 %v4646_v52  ;;  %v4658_v18 = vunpack.c.h.s8.bf16 %v4502_v16  ;;  %4934 = vmatprep.subr.bf16.mxu0 %v4657_v51  ;;  %v4669_v63 = vunpack.c.l.s8.bf16 %v4513_v58  ;;  %v4539_v41 = vld [vmem:[%s9984_s19 + $0x138] sm:$0xff] }
 0xdd1   : > { %v10614_v0 = vadd.f32 %v8911_v32, %v4406_v14  ;;  %v4417_v40 = vsel %vm2003_vm3, %v10606_v37, 0.0  ;;  %5020 = vmatprep.subr.bf16.mxu1 %v4659_v54  ;;  %v4671_v20 = vunpack.c.l.s8.bf16 %v4515_v61  ;;  %v4668_v48 = vunpack.c.l.s8.bf16 %v4512_v9  ;;  %v4538_v32 = vld [vmem:[%s9984_s19 + $0x130] sm:$0xff] }
 0xdd2   : > { %v4414_v47 = vadd.f32 %v4413_v30, %v10608_v44  ;;  %v4418_v33 = vsel %vm2003_vm3, %v10610_v11, 0.0  ;;  %v4670_v43 = vunpack.c.l.s8.bf16 %v4514_v19  ;;  %v4681_v50 = vunpack.c.h.s8.bf16 %v4513_v58  ;;  %v4536_v30 = vld [vmem:[%s9984_s19 + $0x120] sm:$0xff] }
 0xdd3   : > { %v4419_v36 = vadd.f32 %v4418_v33, %v4417_v40  ;;  %v4420_v42 = vsel %vm2003_vm3, %v10614_v0, 0.0  ;;  %4935 = vmatpush1.bf16.msra.mxu0 %v4656_v62  ;;  %v4683_v13 = vunpack.c.h.s8.bf16 %v4515_v61  ;;  %v4680_v12 = vunpack.c.h.s8.bf16 %v4512_v9 }
 0xdd4   : > { %4415 = vadd.xlane.f32.xlu1 %v4414_v47  ;;  %5021 = vmatpush1.bf16.msra.mxu1 %v4658_v18  ;;  %v4682_v23 = vunpack.c.h.s8.bf16 %v4514_v19  ;;  %v4693_v24 = vunpack.c.l.s8.bf16 %v4525_v5  ;;  %v4695_v55 = vunpack.c.l.s8.bf16 %v4527_v15  ;;  %v4692_v60 = vunpack.c.l.s8.bf16 %v4524_v59 }
 0xdd5   : > { %v4421_v38 = vadd.f32 %v4420_v42, %v4419_v36  ;;  %4936 = vmatprep.subr.bf16.mxu0 %v4669_v63  ;;  %5022 = vmatprep.subr.bf16.mxu1 %v4671_v20  ;;  %v4694_v8 = vunpack.c.l.s8.bf16 %v4526_v27  ;;  %v4705_v2 = vunpack.c.h.s8.bf16 %v4525_v5  ;;  %v4707_v7 = vunpack.c.h.s8.bf16 %v4527_v15  ;;  %v4549_v42 = vld [vmem:[%s9984_s19 + $0x188] sm:$0xff] }
 0xdd6   : > { %v4704_v28 = vunpack.c.h.s8.bf16 %v4524_v59  ;;  %v4706_v14 = vunpack.c.h.s8.bf16 %v4526_v27  ;;  %v4717_v29 = vunpack.c.l.s8.bf16 %v4537_v34  ;;  %v4719_v6 = vunpack.c.l.s8.bf16 %v4539_v41 }
 0xdd7   : > { %4422 = vadd.xlane.f32.xlu0 %v4421_v38  ;;  %4937 = vmatpush1.bf16.msra.mxu0 %v4668_v48  ;;  %v4716_v40 = vunpack.c.l.s8.bf16 %v4536_v30  ;;  %v4718_v47 = vunpack.c.l.s8.bf16 %v4538_v32  ;;  %v4729_v33 = vunpack.c.h.s8.bf16 %v4537_v34  ;;  %v4731_v36 = vunpack.c.h.s8.bf16 %v4539_v41  ;;  %v4551_v38 = vld [vmem:[%s9984_s19 + $0x198] sm:$0xff]  ;;  %v4561_v41 = vld [vmem:[%s9984_s19 + $0x1e8] sm:$0xff] }
 0xdd8   : > { %5023 = vmatpush1.bf16.msra.mxu1 %v4670_v43  ;;  %4938 = vmatprep.subr.bf16.mxu0 %v4681_v50  ;;  %v4728_v39 = vunpack.c.h.s8.bf16 %v4536_v30  ;;  %v4730_v46 = vunpack.c.h.s8.bf16 %v4538_v32  ;;  %v4741_v1 = vunpack.c.l.s8.bf16 %v4549_v42  ;;  %v4743_v45 = vunpack.c.l.s8.bf16 %v4551_v38  ;;  %v4562_v30 = vld [vmem:[%s9984_s19 + $0x1f0] sm:$0xff] }
 0xdd9   : > { %5024 = vmatprep.subr.bf16.mxu1 %v4683_v13  ;;  %v4740_v16 = vunpack.c.l.s8.bf16 %v4548_v17  ;;  %v4742_v51 = vunpack.c.l.s8.bf16 %v4550_v49  ;;  %v4753_v52 = vunpack.c.h.s8.bf16 %v4549_v42  ;;  %v4755_v54 = vunpack.c.h.s8.bf16 %v4551_v38  ;;  %v4573_v38 = vld [vmem:[%s9984_s19 + $0x248] sm:$0xff] }
 0xdda   : > { %v4754_v34 = vunpack.c.h.s8.bf16 %v4550_v49  ;;  %v4778_v42 = vunpack.c.h.s8.bf16 %v4562_v30 }
 0xddb   : > { %4939 = vmatpush1.bf16.msra.mxu0 %v4680_v12 }
 0xddc   : > { %5025 = vmatpush1.bf16.msra.mxu1 %v4682_v23  ;;  %4940 = vmatprep.subr.bf16.mxu0 %v4693_v24 }
 0xddd   : > { %5026 = vmatprep.subr.bf16.mxu1 %v4695_v55 }
 0xddf   : > { %4941 = vmatpush1.bf16.msra.mxu0 %v4692_v60 }
 0xde0   : > { %5027 = vmatpush1.bf16.msra.mxu1 %v4694_v8  ;;  %4942 = vmatprep.subr.bf16.mxu0 %v4705_v2 }
 0xde1   : > { %5028 = vmatprep.subr.bf16.mxu1 %v4707_v7  ;;  %v4752_v7 = vunpack.c.h.s8.bf16 %v4548_v17  ;;  %v4574_v17 = vld [vmem:[%s9984_s19 + $0x250] sm:$0xff] }
 0xde3   : > { %4943 = vmatpush1.bf16.msra.mxu0 %v4704_v28  ;;  %v4563_v28 = vld [vmem:[%s9984_s19 + $0x1f8] sm:$0xff] }
 0xde4   : > { %5029 = vmatpush1.bf16.msra.mxu1 %v4706_v14  ;;  %4944 = vmatprep.subr.bf16.mxu0 %v4717_v29  ;;  %v4765_v14 = vunpack.c.l.s8.bf16 %v4561_v41  ;;  %v4767_v29 = vunpack.c.l.s8.bf16 %v4563_v28 }
 0xde5   : > { %5030 = vmatprep.subr.bf16.mxu1 %v4719_v6  ;;  %v4560_v6 = vld [vmem:[%s9984_s19 + $0x1e0] sm:$0xff] }
 0xde6   : > { %v4764_v32 = vunpack.c.l.s8.bf16 %v4560_v6 }
 0xde7   : > { %4945 = vmatpush1.bf16.msra.mxu0 %v4716_v40  ;;  %v4766_v40 = vunpack.c.l.s8.bf16 %v4562_v30 }
 0xde8   : > { %5031 = vmatpush1.bf16.msra.mxu1 %v4718_v47  ;;  %4946 = vmatprep.subr.bf16.mxu0 %v4729_v33  ;;  %v4777_v47 = vunpack.c.h.s8.bf16 %v4561_v41  ;;  %v4779_v33 = vunpack.c.h.s8.bf16 %v4563_v28 }
 0xde9   : > { %5032 = vmatprep.subr.bf16.mxu1 %v4731_v36  ;;  %v4776_v36 = vunpack.c.h.s8.bf16 %v4560_v6  ;;  %v10691_v6 = vsub.s32 7, %v10120_v25 }
 0xdeb   : > { %4947 = vmatpush1.bf16.msra.mxu0 %v4728_v39  ;;  %v4575_v39 = vld [vmem:[%s9984_s19 + $0x258] sm:$0xff] }
 0xdec   : > { %5033 = vmatpush1.bf16.msra.mxu1 %v4730_v46  ;;  %4948 = vmatprep.subr.bf16.mxu0 %v4741_v1  ;;  %v4572_v46 = vld [vmem:[%s9984_s19 + $0x240] sm:$0xff]  ;;  %v4789_v1 = vunpack.c.l.s8.bf16 %v4573_v38 }
 0xded   : > { %5034 = vmatprep.subr.bf16.mxu1 %v4743_v45  ;;  %v4791_v45 = vunpack.c.l.s8.bf16 %v4575_v39  ;;  %v4788_v49 = vunpack.c.l.s8.bf16 %v4572_v46 }
 0xdef   : > { %4949 = vmatpush1.bf16.msra.mxu0 %v4740_v16  ;;  %v4790_v16 = vunpack.c.l.s8.bf16 %v4574_v17 }
 0xdf0   : > { %5035 = vmatpush1.bf16.msra.mxu1 %v4742_v51  ;;  %4950 = vmatprep.subr.bf16.mxu0 %v4753_v52  ;;  %v4801_v51 = vunpack.c.h.s8.bf16 %v4573_v38  ;;  %v4803_v52 = vunpack.c.h.s8.bf16 %v4575_v39 }
 0xdf1   : > { %5036 = vmatprep.subr.bf16.mxu1 %v4755_v54  ;;  %v4585_v54 = vld [vmem:[%s9984_s19 + $0x2a8] sm:$0xff] }
 0xdf3   : > { %4951 = vmatpush1.bf16.msra.mxu0 %v4752_v7 }
 0xdf4   : > { %5037 = vmatpush1.bf16.msra.mxu1 %v4754_v34  ;;  %4952 = vmatprep.subr.bf16.mxu0 %v4765_v14 }
 0xdf5   : > { %5038 = vmatprep.subr.bf16.mxu1 %v4767_v29 }
 0xdf7   : > { %4953 = vmatpush1.bf16.msra.mxu0 %v4764_v32  ;;  %v1957_v32 = vld [vmem:[%s9988_s28 + $0x68] sm:$0xff] }
 0xdf8   : > { %5039 = vmatpush1.bf16.msra.mxu1 %v4766_v40  ;;  %4954 = vmatprep.subr.bf16.mxu0 %v4777_v47  ;;  %v4468_v47 = vrot.slane %v10587_v21, %v10691_v6  ;;  %v4486_v38 = vrot.slane %v1957_v32, %v10123_v4 }
 0xdf9   : > { %5040 = vmatprep.subr.bf16.mxu1 %v4779_v33  ;;  %v1956_v33 = vld [vmem:[%s9988_s28 + $0x60] sm:$0xff] }
 0xdfa   : > { %v4482_v39 = vrot.slane %v1956_v33, %v10123_v4 }
 0xdfb   : > { %4955 = vmatpush1.bf16.msra.mxu0 %v4776_v36 }
 0xdfc   : > { %5041 = vmatpush1.bf16.msra.mxu1 %v4778_v42  ;;  %4956 = vmatprep.subr.bf16.mxu0 %v4789_v1  ;;  %v4464_v42 = vrot.slane %v10581_v35, %v10691_v6  ;;  %v4598_v35 = vld [vmem:[%s9984_s19 + $0x310] sm:$0xff] }
 0xdfd   : > { %5042 = vmatprep.subr.bf16.mxu1 %v4791_v45 }
 0xdff   : > { %4957 = vmatpush1.bf16.msra.mxu0 %v4788_v49 }
 0xe00   : > { %5043 = vmatpush1.bf16.msra.mxu1 %v4790_v16  ;;  %4958 = vmatprep.subr.bf16.mxu0 %v4801_v51 }
 0xe01   : > { %5044 = vmatprep.subr.bf16.mxu1 %v4803_v52 }
 0xe61   : > { %v4416_v58 = vpop.xlane.xlu1 %4415 }
 0xe62   : > { %v4424_v61 = vmul.f32 0.0026041667, %v4416_v58  ;;  %v4587_v58 = vld [vmem:[%s9984_s19 + $0x2b8] sm:$0xff] }
 0xe64   : > { %v10644_v62 = vsub.f32 %v10602_v31, %v4424_v61  ;;  %v10647_v18 = vsub.f32 %v10604_v10, %v4424_v61  ;;  %v10650_v63 = vsub.f32 %v10608_v44, %v4424_v61  ;;  %v4423_v20 = vpop.xlane.xlu0 %4422  ;;  %v4800_v61 = vunpack.c.h.s8.bf16 %v4572_v46 }
 0xe65   : > { %v4425_v9 = vmul.f32 0.0026041667, %v4423_v20  ;;  %v4802_v20 = vunpack.c.h.s8.bf16 %v4574_v17  ;;  %v4596_v17 = vld [vmem:[%s9984_s19 + $0x300] sm:$0xff] }
 0xe66   : > { %v4432_v19 = vmul.f32 %v10644_v62, %v10644_v62  ;;  %v4433_v48 = vmul.f32 %v10647_v18, %v10647_v18  ;;  %v4434_v5 = vmul.f32 %v10650_v63, %v10650_v63  ;;  %4959 = vmatpush1.bf16.msra.mxu0 %v4800_v61  ;;  %v4838_v61 = vunpack.c.l.s8.bf16 %v4598_v35 }
 0xe67   : > { %v10657_v43 = vsub.f32 %v10606_v37, %v4425_v9  ;;  %v10660_v50 = vsub.f32 %v10610_v11, %v4425_v9  ;;  %v10663_v13 = vsub.f32 %v10614_v0, %v4425_v9  ;;  %v4813_v9 = vunpack.c.l.s8.bf16 %v4585_v54  ;;  %5045 = vmatpush1.bf16.msra.mxu1 %v4802_v20 }
 0xe68   : > { %v4438_v15 = vadd.f32 %v4433_v48, %v4432_v19  ;;  %v4815_v19 = vunpack.c.l.s8.bf16 %v4587_v58  ;;  %v4584_v48 = vld [vmem:[%s9984_s19 + $0x2a0] sm:$0xff] }
 0xe69   : > { %v4435_v12 = vmul.f32 %v10657_v43, %v10657_v43  ;;  %v4436_v23 = vmul.f32 %v10660_v50, %v10660_v50  ;;  %v4437_v24 = vmul.f32 %v10663_v13, %v10663_v13  ;;  %4960 = vmatprep.subr.bf16.mxu0 %v4813_v9  ;;  %v4609_v9 = vld [vmem:[%s9984_s19 + $0x368] sm:$0xff] }
 0xe6a   : > { %v4439_v55 = vadd.f32 %v4438_v15, %v4434_v5  ;;  %v4586_v5 = vld [vmem:[%s9984_s19 + $0x2b0] sm:$0xff]  ;;  %v4812_v15 = vunpack.c.l.s8.bf16 %v4584_v48  ;;  %5046 = vmatprep.subr.bf16.mxu1 %v4815_v19  ;;  %v4611_v19 = vld [vmem:[%s9984_s19 + $0x378] sm:$0xff] }
 0xe6b   : > { %v4442_v59 = vsel %vm2003_vm3, %v4435_v12, 0.0  ;;  %v4443_v27 = vsel %vm2003_vm3, %v4436_v23, 0.0  ;;  %v4445_v8 = vsel %vm2003_vm3, %v4437_v24, 0.0  ;;  %v4814_v12 = vunpack.c.l.s8.bf16 %v4586_v5 }
 0xe6c   : > { %4440 = vadd.xlane.f32.xlu0 %v4439_v55  ;;  %v4444_v60 = vadd.f32 %v4443_v27, %v4442_v59  ;;  %v4825_v23 = vunpack.c.h.s8.bf16 %v4585_v54  ;;  %v4827_v24 = vunpack.c.h.s8.bf16 %v4587_v58  ;;  %4961 = vmatpush1.bf16.msra.mxu0 %v4812_v15  ;;  %v4824_v55 = vunpack.c.h.s8.bf16 %v4584_v48  ;;  %v4597_v27 = vld [vmem:[%s9984_s19 + $0x308] sm:$0xff] }
 0xe6d   : > { %5047 = vmatpush1.bf16.msra.mxu1 %v4814_v12  ;;  %v4826_v59 = vunpack.c.h.s8.bf16 %v4586_v5  ;;  %v4849_v20 = vunpack.c.h.s8.bf16 %v4597_v27  ;;  %v4848_v48 = vunpack.c.h.s8.bf16 %v4596_v17  ;;  %v4850_v5 = vunpack.c.h.s8.bf16 %v4598_v35 }
 0xe6e   : > { %v4446_v2 = vadd.f32 %v4445_v8, %v4444_v60  ;;  %4962 = vmatprep.subr.bf16.mxu0 %v4825_v23  ;;  %5048 = vmatprep.subr.bf16.mxu1 %v4827_v24  ;;  %v4599_v60 = vld [vmem:[%s9984_s19 + $0x318] sm:$0xff]  ;;  %v4837_v8 = vunpack.c.l.s8.bf16 %v4597_v27  ;;  %v4861_v15 = vunpack.c.l.s8.bf16 %v4609_v9  ;;  %v4863_v12 = vunpack.c.l.s8.bf16 %v4611_v19  ;;  %v4608_v23 = vld [vmem:[%s9984_s19 + $0x360] sm:$0xff]  ;;  %v4610_v24 = vld [vmem:[%s9984_s19 + $0x370] sm:$0xff] }
 0xe6f   : > { %v4873_v27 = vunpack.c.h.s8.bf16 %v4609_v9 }
 0xe70   : > { %4447 = vadd.xlane.f32.xlu1 %v4446_v2  ;;  %4963 = vmatpush1.bf16.msra.mxu0 %v4824_v55  ;;  %v4839_v2 = vunpack.c.l.s8.bf16 %v4599_v60  ;;  %v4860_v55 = vunpack.c.l.s8.bf16 %v4608_v23 }
 0xe71   : > { %5049 = vmatpush1.bf16.msra.mxu1 %v4826_v59  ;;  %4975 = vmatprep.subr.bf16.mxu0 %v4837_v8  ;;  %v4862_v59 = vunpack.c.l.s8.bf16 %v4610_v24  ;;  %v4621_v8 = vld [vmem:[%s9984_s19 + $0x3c8] sm:$0xff] }
 0xe72   : > { %5061 = vmatprep.subr.bf16.mxu1 %v4839_v2  ;;  %v4623_v2 = vld [vmem:[%s9984_s19 + $0x3d8] sm:$0xff] }
 0xe73   : > { %v4899_v33 = vunpack.c.h.s8.bf16 %v4623_v2 }
 0xef9   : > { %v4441_v7 = vpop.xlane.xlu0 %4440 }
 0xefa   : > { %v4449_v34 = vmul.f32 0.0026041667, %v4441_v7  ;;  %v4872_v7 = vunpack.c.h.s8.bf16 %v4608_v23 }
 0xefc   : > { %v4451_v41 = vadd.f32 1e-06, %v4449_v34  ;;  %v4874_v34 = vunpack.c.h.s8.bf16 %v4610_v24 }
 0xefd   : > { %v4448_v28 = vpop.xlane.xlu1 %4447 }
 0xefe   : > { %8851 = vrsqrt.f32 %v4451_v41  ;;  %v4450_v14 = vmul.f32 0.0026041667, %v4448_v28  ;;  %v4885_v41 = vunpack.c.l.s8.bf16 %v4621_v8  ;;  %v4887_v28 = vunpack.c.l.s8.bf16 %v4623_v2 }
 0xf00   : > { %v4452_v29 = vadd.f32 1e-06, %v4450_v14  ;;  %v4620_v14 = vld [vmem:[%s9984_s19 + $0x3c0] sm:$0xff] }
 0xf01   : > { %v4884_v32 = vunpack.c.l.s8.bf16 %v4620_v14 }
 0xf02   : > { %8853 = vrsqrt.f32 %v4452_v29  ;;  %v4622_v29 = vld [vmem:[%s9984_s19 + $0x3d0] sm:$0xff] }
 0xf08   : > { %v10693_v30 = vpop.eup %8851 }
 0xf09   : > { %v4456_v40 = vmul.f32 %v10693_v30, %v10647_v18  ;;  %v4455_v36 = vmul.f32 %v10693_v30, %v10644_v62 }
 0xf0b   : > { %v4474_v18 = vmul.f32 %v4468_v47, %v4456_v40  ;;  %v4473_v1 = vmul.f32 %v4464_v42, %v4455_v36  ;;  %v4886_v40 = vunpack.c.l.s8.bf16 %v4622_v29  ;;  %v4633_v36 = vld [vmem:[%s9984_s19 + $0x428] sm:$0xff] }
 0xf0c   : > { %v10705_v25 = vpop.eup %8853 }
 0xf0d   : > { %v4459_v46 = vmul.f32 %v10705_v25, %v10660_v50  ;;  %v4458_v21 = vmul.f32 %v10705_v25, %v10657_v43  ;;  %v4492_v49 = vadd.f32 %v4486_v38, %v4474_v18  ;;  %v4491_v51 = vadd.f32 %v4482_v39, %v4473_v1  ;;  %v4634_v1 = vld [vmem:[%s9984_s19 + $0x430] sm:$0xff] }
 0xf0e   : > { %v4836_v50 = vunpack.c.l.s8.bf16 %v4596_v17  ;;  %v4851_v43 = vunpack.c.h.s8.bf16 %v4599_v60  ;;  %v4875_v60 = vunpack.c.h.s8.bf16 %v4611_v19  ;;  %v8912_v17 = vld [vmem:[%s9988_s28 + $0x10] sm:$0xff] }
 0xf0f   : > { %v4477_v45 = vmul.f32 %v4468_v47, %v4459_v46  ;;  %v4476_v62 = vmul.f32 %v4464_v42, %v4458_v21  ;;  %v4897_v47 = vunpack.c.h.s8.bf16 %v4621_v8  ;;  %v4635_v42 = vld [vmem:[%s9984_s19 + $0x438] sm:$0xff]  ;;  %v4909_v46 = vunpack.c.l.s8.bf16 %v4633_v36  ;;  %v4632_v21 = vld [vmem:[%s9984_s19 + $0x420] sm:$0xff] }
 0xf10   : > { %v4911_v18 = vunpack.c.l.s8.bf16 %v4635_v42  ;;  %v4472_v35 = vrot.slane %v8912_v17, %v10691_v6  ;;  %v4920_v6 = vunpack.c.h.s8.bf16 %v4632_v21  ;;  %v4541_v17 = vld [vmem:[%s9984_s19 + $0x148] sm:$0xff] }
 0xf11   : > { %v4495_v16 = vadd.f32 %v4486_v38, %v4477_v45  ;;  %v4494_v52 = vadd.f32 %v4482_v39, %v4476_v62  ;;  %v4896_v38 = vunpack.c.h.s8.bf16 %v4620_v14  ;;  %v4898_v39 = vunpack.c.h.s8.bf16 %v4622_v29 }
 0xf12   : > { %v4460_v45 = vmul.f32 %v10705_v25, %v10663_v13  ;;  %v4457_v62 = vmul.f32 %v10693_v30, %v10650_v63  ;;  %v4507_v13 = vld [vmem:[%s9984_s19 + $0x38] sm:$0xff]  ;;  %v4922_v30 = vunpack.c.h.s8.bf16 %v4634_v1 }
 0xf13   : > { %v10715_v54 = vpack.c.bf16 %v4495_v16, %v4492_v49  ;;  %v10717_v58 = vpack.c.bf16 %v4494_v52, %v4491_v51  ;;  %v4908_v49 = vunpack.c.l.s8.bf16 %v4632_v21  ;;  %v4910_v16 = vunpack.c.l.s8.bf16 %v4634_v1  ;;  %v1958_v51 = vld [vmem:[%s9988_s28 + $0x70] sm:$0xff] }
 0xf14   : > { %v4921_v52 = vunpack.c.h.s8.bf16 %v4633_v36  ;;  %v4475_v25 = vmul.f32 %v4472_v35, %v4457_v62  ;;  %v4490_v63 = vrot.slane %v1958_v51, %v10123_v4  ;;  %v4651_v19 = vunpack.c.l.s8.bf16 %v4507_v13 }
 0xf15   : > { %4964 = vmatprep.mubr.bf16.mxu0 %v10715_v54  ;;  %5050 = vmatprep.mubr.bf16.mxu1 %v10715_v54  ;;  %v4721_v51 = vunpack.c.l.s8.bf16 %v4541_v17 }
 0xf16   : > { %4965 = vmatmul.mubr.bf16.vlgmr.msra.gmra.mrb[32].mxu0 %v10717_v58  ;;  %5051 = vmatmul.mubr.bf16.vlgmr.msra.gmra.mrb[28].mxu1 %v10717_v58 }
 0xf17   : > { %4976 = vmatpush1.bf16.msra.mxu0 %v4836_v50  ;;  %5062 = vmatpush1.bf16.msra.mxu1 %v4838_v61  ;;  %v4923_v50 = vunpack.c.h.s8.bf16 %v4635_v42  ;;  %v4478_v61 = vmul.f32 %v4472_v35, %v4460_v45  ;;  %v4543_v35 = vld [vmem:[%s9984_s19 + $0x158] sm:$0xff] }
 0xf18   : > { %4977 = vmatprep.subr.bf16.mxu0 %v4849_v20  ;;  %5063 = vmatprep.subr.bf16.mxu1 %v4851_v43  ;;  %v4505_v20 = vld [vmem:[%s9984_s19 + $0x28] sm:$0xff] }
 0xf19   : > { %5007 = vmatprep.mubr.bf16.mxu0 %v9446_v57  ;;  %5093 = vmatprep.mubr.bf16.mxu1 %v9446_v57  ;;  %v4496_v43 = vadd.f32 %v4490_v63, %v4478_v61  ;;  %v4649_v9 = vunpack.c.l.s8.bf16 %v4505_v20  ;;  %v4542_v61 = vld [vmem:[%s9984_s19 + $0x150] sm:$0xff] }
 0xf1b   : > { %4978 = vmatpush1.bf16.msra.mxu0 %v4848_v48  ;;  %5064 = vmatpush1.bf16.msra.mxu1 %v4850_v5  ;;  %v4504_v48 = vld [vmem:[%s9984_s19 + $0x20] sm:$0xff]  ;;  %v4506_v5 = vld [vmem:[%s9984_s19 + $0x30] sm:$0xff] }
 0xf1c   : > { %4979 = vmatprep.subr.bf16.mxu0 %v4861_v15  ;;  %5065 = vmatprep.subr.bf16.mxu1 %v4863_v12  ;;  %v4493_v15 = vadd.f32 %v4490_v63, %v4475_v25  ;;  %v4648_v12 = vunpack.c.l.s8.bf16 %v4504_v48  ;;  %v4650_v24 = vunpack.c.l.s8.bf16 %v4506_v5  ;;  %v4660_v8 = vunpack.c.h.s8.bf16 %v4504_v48  ;;  %v4552_v48 = vld [vmem:[%s9984_s19 + $0x1a0] sm:$0xff] }
 0xf1d   : > { %v4662_v2 = vunpack.c.h.s8.bf16 %v4506_v5  ;;  %v4733_v25 = vunpack.c.h.s8.bf16 %v4541_v17  ;;  %v4735_v63 = vunpack.c.h.s8.bf16 %v4543_v35  ;;  %v4589_v17 = vld [vmem:[%s9984_s19 + $0x2c8] sm:$0xff] }
 0xf1e   : > { %v10749_v23 = vpack.c.bf16 %v4496_v43, %v4493_v15  ;;  %v4554_v15 = vld [vmem:[%s9984_s19 + $0x1b0] sm:$0xff] }
 0xf1f   : > { %4980 = vmatpush1.bf16.msra.mxu0 %v4860_v55  ;;  %5066 = vmatpush1.bf16.msra.mxu1 %v4862_v59  ;;  %v4661_v55 = vunpack.c.h.s8.bf16 %v4505_v20  ;;  %v4663_v59 = vunpack.c.h.s8.bf16 %v4507_v13  ;;  %v4722_v13 = vunpack.c.l.s8.bf16 %v4542_v61 }
 0xf20   : > { %4981 = vmatprep.subr.bf16.mxu0 %v4873_v27  ;;  %5067 = vmatprep.subr.bf16.mxu1 %v4875_v60  ;;  %v4517_v27 = vld [vmem:[%s9984_s19 + $0x88] sm:$0xff]  ;;  %v4519_v60 = vld [vmem:[%s9984_s19 + $0x98] sm:$0xff] }
 0xf23   : > { %4982 = vmatpush1.bf16.msra.mxu0 %v4872_v7  ;;  %5068 = vmatpush1.bf16.msra.mxu1 %v4874_v34  ;;  %v4673_v7 = vunpack.c.l.s8.bf16 %v4517_v27  ;;  %v4516_v34 = vld [vmem:[%s9984_s19 + $0x80] sm:$0xff] }
 0xf24   : > { %4983 = vmatprep.subr.bf16.mxu0 %v4885_v41  ;;  %5069 = vmatprep.subr.bf16.mxu1 %v4887_v28  ;;  %v4675_v41 = vunpack.c.l.s8.bf16 %v4519_v60  ;;  %v4518_v28 = vld [vmem:[%s9984_s19 + $0x90] sm:$0xff]  ;;  %v4672_v14 = vunpack.c.l.s8.bf16 %v4516_v34  ;;  %v4684_v36 = vunpack.c.h.s8.bf16 %v4516_v34  ;;  %v4564_v34 = vld [vmem:[%s9984_s19 + $0x200] sm:$0xff] }
 0xf25   : > { %v4674_v29 = vunpack.c.l.s8.bf16 %v4518_v28  ;;  %v4686_v42 = vunpack.c.h.s8.bf16 %v4518_v28  ;;  %v4566_v28 = vld [vmem:[%s9984_s19 + $0x210] sm:$0xff] }
 0xf27   : > { %4984 = vmatpush1.bf16.msra.mxu0 %v4884_v32  ;;  %5070 = vmatpush1.bf16.msra.mxu1 %v4886_v40  ;;  %v4685_v32 = vunpack.c.h.s8.bf16 %v4517_v27  ;;  %v4687_v40 = vunpack.c.h.s8.bf16 %v4519_v60  ;;  %v4565_v27 = vld [vmem:[%s9984_s19 + $0x208] sm:$0xff]  ;;  %v4567_v60 = vld [vmem:[%s9984_s19 + $0x218] sm:$0xff] }
 0xf28   : > { %4985 = vmatprep.subr.bf16.mxu0 %v4897_v47  ;;  %5071 = vmatprep.subr.bf16.mxu1 %v4899_v33  ;;  %v4529_v47 = vld [vmem:[%s9984_s19 + $0xe8] sm:$0xff]  ;;  %v4531_v33 = vld [vmem:[%s9984_s19 + $0xf8] sm:$0xff] }
 0xf29   : > { %v4709_v45 = vunpack.c.h.s8.bf16 %v4529_v47  ;;  %v4711_v62 = vunpack.c.h.s8.bf16 %v4531_v33 }
 0xf2b   : > { %4986 = vmatpush1.bf16.msra.mxu0 %v4896_v38  ;;  %5072 = vmatpush1.bf16.msra.mxu1 %v4898_v39  ;;  %v4697_v38 = vunpack.c.l.s8.bf16 %v4529_v47  ;;  %v4528_v39 = vld [vmem:[%s9984_s19 + $0xe0] sm:$0xff]  ;;  %v4577_v47 = vld [vmem:[%s9984_s19 + $0x268] sm:$0xff] }
 0xf2c   : > { %4987 = vmatprep.subr.bf16.mxu0 %v4909_v46  ;;  %5073 = vmatprep.subr.bf16.mxu1 %v4911_v18  ;;  %v4699_v46 = vunpack.c.l.s8.bf16 %v4531_v33  ;;  %v4530_v18 = vld [vmem:[%s9984_s19 + $0xf0] sm:$0xff]  ;;  %v4696_v21 = vunpack.c.l.s8.bf16 %v4528_v39  ;;  %v4579_v33 = vld [vmem:[%s9984_s19 + $0x278] sm:$0xff] }
 0xf2d   : > { %v4698_v1 = vunpack.c.l.s8.bf16 %v4530_v18 }
 0xf2f   : > { %4988 = vmatpush1.bf16.msra.mxu0 %v4908_v49  ;;  %5074 = vmatpush1.bf16.msra.mxu1 %v4910_v16  ;;  %v4708_v49 = vunpack.c.h.s8.bf16 %v4528_v39  ;;  %v4710_v16 = vunpack.c.h.s8.bf16 %v4530_v18  ;;  %v4576_v39 = vld [vmem:[%s9984_s19 + $0x260] sm:$0xff]  ;;  %v4578_v18 = vld [vmem:[%s9984_s19 + $0x270] sm:$0xff] }
 0xf30   : > { %4989 = vmatprep.subr.bf16.mxu0 %v4921_v52  ;;  %5075 = vmatprep.subr.bf16.mxu1 %v4923_v50  ;;  %v4540_v52 = vld [vmem:[%s9984_s19 + $0x140] sm:$0xff]  ;;  %v4723_v50 = vunpack.c.l.s8.bf16 %v4543_v35  ;;  %v4591_v35 = vld [vmem:[%s9984_s19 + $0x2d8] sm:$0xff] }
 0xf31   : > { %v4720_v20 = vunpack.c.l.s8.bf16 %v4540_v52  ;;  %v4732_v43 = vunpack.c.h.s8.bf16 %v4540_v52  ;;  %v4588_v52 = vld [vmem:[%s9984_s19 + $0x2c0] sm:$0xff] }
 0xf33   : > { %4990 = vmatpush1.bf16.msra.mxu0 %v4920_v6  ;;  %5076 = vmatpush1.bf16.msra.mxu1 %v4922_v30  ;;  %v4553_v6 = vld [vmem:[%s9984_s19 + $0x1a8] sm:$0xff]  ;;  %v4555_v30 = vld [vmem:[%s9984_s19 + $0x1b8] sm:$0xff] }
 0xf34   : > { %5104 = vmatprep.subr.bf16.mxu0 %v4649_v9  ;;  %5190 = vmatprep.subr.bf16.mxu1 %v4651_v19  ;;  %v4734_v9 = vunpack.c.h.s8.bf16 %v4542_v61  ;;  %v4745_v19 = vunpack.c.l.s8.bf16 %v4553_v6  ;;  %v4747_v5 = vunpack.c.l.s8.bf16 %v4555_v30  ;;  %v4590_v61 = vld [vmem:[%s9984_s19 + $0x2d0] sm:$0xff] }
 0xf36   : > { %5008 = vmatmul.mubr.bf16.vlgmr.msra.gmra.mrb[32].mxu0 %v10749_v23  ;;  %5094 = vmatmul.mubr.bf16.vlgmr.msra.gmra.mrb[28].mxu1 %v10749_v23 }
 0xf37   : > { %5105 = vmatpush1.bf16.msra.mxu0 %v4648_v12  ;;  %5136 = vmatprep.mubr.bf16.mxu0 %v10715_v54  ;;  %v4744_v12 = vunpack.c.l.s8.bf16 %v4552_v48 }
 0xf38   : > { %5191 = vmatpush1.bf16.msra.mxu1 %v4650_v24  ;;  %5222 = vmatprep.mubr.bf16.mxu1 %v10715_v54  ;;  %v4746_v24 = vunpack.c.l.s8.bf16 %v4554_v15 }
 0xf39   : > { %5106 = vmatprep.subr.bf16.mxu0 %v4661_v55  ;;  %5192 = vmatprep.subr.bf16.mxu1 %v4663_v59  ;;  %v4757_v55 = vunpack.c.h.s8.bf16 %v4553_v6  ;;  %v4759_v59 = vunpack.c.h.s8.bf16 %v4555_v30  ;;  %v4601_v6 = vld [vmem:[%s9984_s19 + $0x328] sm:$0xff]  ;;  %v4603_v30 = vld [vmem:[%s9984_s19 + $0x338] sm:$0xff] }
 0xf3b   : > { %5107 = vmatpush1.bf16.msra.mxu0 %v4660_v8  ;;  %v4756_v8 = vunpack.c.h.s8.bf16 %v4552_v48  ;;  %v4600_v48 = vld [vmem:[%s9984_s19 + $0x320] sm:$0xff] }
 0xf3c   : > { %5193 = vmatpush1.bf16.msra.mxu1 %v4662_v2  ;;  %5108 = vmatprep.subr.bf16.mxu0 %v4673_v7  ;;  %v4758_v2 = vunpack.c.h.s8.bf16 %v4554_v15  ;;  %v4769_v7 = vunpack.c.l.s8.bf16 %v4565_v27  ;;  %v4602_v15 = vld [vmem:[%s9984_s19 + $0x330] sm:$0xff] }
 0xf3d   : > { %5194 = vmatprep.subr.bf16.mxu1 %v4675_v41  ;;  %v4771_v41 = vunpack.c.l.s8.bf16 %v4567_v60 }
 0xf3f   : > { %5109 = vmatpush1.bf16.msra.mxu0 %v4672_v14  ;;  %v4768_v14 = vunpack.c.l.s8.bf16 %v4564_v34 }
 0xf40   : > { %5195 = vmatpush1.bf16.msra.mxu1 %v4674_v29  ;;  %5110 = vmatprep.subr.bf16.mxu0 %v4685_v32  ;;  %v4770_v29 = vunpack.c.l.s8.bf16 %v4566_v28  ;;  %v4781_v32 = vunpack.c.h.s8.bf16 %v4565_v27  ;;  %v4613_v27 = vld [vmem:[%s9984_s19 + $0x388] sm:$0xff] }
 0xf41   : > { %5196 = vmatprep.subr.bf16.mxu1 %v4687_v40  ;;  %v4783_v40 = vunpack.c.h.s8.bf16 %v4567_v60  ;;  %v4615_v60 = vld [vmem:[%s9984_s19 + $0x398] sm:$0xff] }
 0xf43   : > { %5111 = vmatpush1.bf16.msra.mxu0 %v4684_v36  ;;  %v4780_v36 = vunpack.c.h.s8.bf16 %v4564_v34  ;;  %v4612_v34 = vld [vmem:[%s9984_s19 + $0x380] sm:$0xff] }
 0xf44   : > { %5197 = vmatpush1.bf16.msra.mxu1 %v4686_v42  ;;  %5112 = vmatprep.subr.bf16.mxu0 %v4697_v38  ;;  %v4782_v42 = vunpack.c.h.s8.bf16 %v4566_v28  ;;  %v4793_v38 = vunpack.c.l.s8.bf16 %v4577_v47  ;;  %v4614_v28 = vld [vmem:[%s9984_s19 + $0x390] sm:$0xff] }
 0xf45   : > { %5198 = vmatprep.subr.bf16.mxu1 %v4699_v46  ;;  %v4795_v46 = vunpack.c.l.s8.bf16 %v4579_v33 }
 0xf47   : > { %5113 = vmatpush1.bf16.msra.mxu0 %v4696_v21  ;;  %v4792_v21 = vunpack.c.l.s8.bf16 %v4576_v39 }
 0xf48   : > { %5199 = vmatpush1.bf16.msra.mxu1 %v4698_v1  ;;  %5114 = vmatprep.subr.bf16.mxu0 %v4709_v45  ;;  %v4794_v1 = vunpack.c.l.s8.bf16 %v4578_v18  ;;  %v4805_v45 = vunpack.c.h.s8.bf16 %v4577_v47  ;;  %v4625_v47 = vld [vmem:[%s9984_s19 + $0x3e8] sm:$0xff] }
 0xf49   : > { %5200 = vmatprep.subr.bf16.mxu1 %v4711_v62  ;;  %v4807_v62 = vunpack.c.h.s8.bf16 %v4579_v33  ;;  %v4627_v33 = vld [vmem:[%s9984_s19 + $0x3f8] sm:$0xff] }
 0xf4b   : > { %5115 = vmatpush1.bf16.msra.mxu0 %v4708_v49  ;;  %v4804_v49 = vunpack.c.h.s8.bf16 %v4576_v39  ;;  %v4624_v39 = vld [vmem:[%s9984_s19 + $0x3e0] sm:$0xff] }
 0xf4c   : > { %5201 = vmatpush1.bf16.msra.mxu1 %v4710_v16  ;;  %5116 = vmatprep.subr.bf16.mxu0 %v4721_v51  ;;  %v4806_v16 = vunpack.c.h.s8.bf16 %v4578_v18  ;;  %v4817_v51 = vunpack.c.l.s8.bf16 %v4589_v17  ;;  %v4626_v18 = vld [vmem:[%s9984_s19 + $0x3f0] sm:$0xff] }
 0xf4d   : > { %5202 = vmatprep.subr.bf16.mxu1 %v4723_v50  ;;  %v4819_v50 = vunpack.c.l.s8.bf16 %v4591_v35 }
 0xf4f   : > { %5117 = vmatpush1.bf16.msra.mxu0 %v4720_v20  ;;  %v4816_v20 = vunpack.c.l.s8.bf16 %v4588_v52 }
 0xf50   : > { %5203 = vmatpush1.bf16.msra.mxu1 %v4722_v13  ;;  %5118 = vmatprep.subr.bf16.mxu0 %v4733_v25  ;;  %v4818_v13 = vunpack.c.l.s8.bf16 %v4590_v61  ;;  %v4829_v25 = vunpack.c.h.s8.bf16 %v4589_v17  ;;  %v4637_v17 = vld [vmem:[%s9984_s19 + $0x448] sm:$0xff] }
 0xf51   : > { %5204 = vmatprep.subr.bf16.mxu1 %v4735_v63  ;;  %v4831_v63 = vunpack.c.h.s8.bf16 %v4591_v35  ;;  %v4639_v35 = vld [vmem:[%s9984_s19 + $0x458] sm:$0xff] }
 0xf53   : > { %5119 = vmatpush1.bf16.msra.mxu0 %v4732_v43  ;;  %v4828_v43 = vunpack.c.h.s8.bf16 %v4588_v52  ;;  %v4636_v52 = vld [vmem:[%s9984_s19 + $0x440] sm:$0xff] }
 0xf54   : > { %5205 = vmatpush1.bf16.msra.mxu1 %v4734_v9  ;;  %5120 = vmatprep.subr.bf16.mxu0 %v4745_v19  ;;  %v4830_v9 = vunpack.c.h.s8.bf16 %v4590_v61  ;;  %v4841_v19 = vunpack.c.l.s8.bf16 %v4601_v6  ;;  %v4638_v61 = vld [vmem:[%s9984_s19 + $0x450] sm:$0xff] }
 0xf55   : > { %5206 = vmatprep.subr.bf16.mxu1 %v4747_v5  ;;  %v4843_v5 = vunpack.c.l.s8.bf16 %v4603_v30 }
 0xf57   : > { %5121 = vmatpush1.bf16.msra.mxu0 %v4744_v12  ;;  %v4840_v12 = vunpack.c.l.s8.bf16 %v4600_v48 }
 0xf58   : > { %5207 = vmatpush1.bf16.msra.mxu1 %v4746_v24  ;;  %5122 = vmatprep.subr.bf16.mxu0 %v4757_v55  ;;  %v4842_v24 = vunpack.c.l.s8.bf16 %v4602_v15  ;;  %v4853_v55 = vunpack.c.h.s8.bf16 %v4601_v6  ;;  %v4509_v6 = vld [vmem:[%s9984_s19 + $0x48] sm:$0xff] }
 0xf59   : > { %5208 = vmatprep.subr.bf16.mxu1 %v4759_v59  ;;  %v4855_v59 = vunpack.c.h.s8.bf16 %v4603_v30  ;;  %v4511_v30 = vld [vmem:[%s9984_s19 + $0x58] sm:$0xff] }
 0xf5b   : > { %5123 = vmatpush1.bf16.msra.mxu0 %v4756_v8  ;;  %v4852_v8 = vunpack.c.h.s8.bf16 %v4600_v48  ;;  %v4508_v48 = vld [vmem:[%s9984_s19 + $0x40] sm:$0xff] }
 0xf5c   : > { %5209 = vmatpush1.bf16.msra.mxu1 %v4758_v2  ;;  %5124 = vmatprep.subr.bf16.mxu0 %v4769_v7  ;;  %v4854_v2 = vunpack.c.h.s8.bf16 %v4602_v15  ;;  %v4865_v7 = vunpack.c.l.s8.bf16 %v4613_v27  ;;  %v4510_v15 = vld [vmem:[%s9984_s19 + $0x50] sm:$0xff] }
 0xf5d   : > { %5210 = vmatprep.subr.bf16.mxu1 %v4771_v41  ;;  %v4867_v41 = vunpack.c.l.s8.bf16 %v4615_v60 }
 0xf5f   : > { %5125 = vmatpush1.bf16.msra.mxu0 %v4768_v14  ;;  %v4864_v14 = vunpack.c.l.s8.bf16 %v4612_v34 }
 0xf60   : > { %5211 = vmatpush1.bf16.msra.mxu1 %v4770_v29  ;;  %5126 = vmatprep.subr.bf16.mxu0 %v4781_v32  ;;  %v4866_v29 = vunpack.c.l.s8.bf16 %v4614_v28  ;;  %v4877_v32 = vunpack.c.h.s8.bf16 %v4613_v27  ;;  %v4667_v27 = vunpack.c.h.s8.bf16 %v4511_v30 }
 0xf61   : > { %5212 = vmatprep.subr.bf16.mxu1 %v4783_v40  ;;  %v4879_v40 = vunpack.c.h.s8.bf16 %v4615_v60  ;;  %v4523_v60 = vld [vmem:[%s9984_s19 + $0xb8] sm:$0xff] }
 0xf63   : > { %5127 = vmatpush1.bf16.msra.mxu0 %v4780_v36  ;;  %v4876_v36 = vunpack.c.h.s8.bf16 %v4612_v34  ;;  %v4520_v34 = vld [vmem:[%s9984_s19 + $0xa0] sm:$0xff] }
 0xf64   : > { %5213 = vmatpush1.bf16.msra.mxu1 %v4782_v42  ;;  %5128 = vmatprep.subr.bf16.mxu0 %v4793_v38  ;;  %v4878_v42 = vunpack.c.h.s8.bf16 %v4614_v28  ;;  %v4889_v38 = vunpack.c.l.s8.bf16 %v4625_v47  ;;  %v4522_v28 = vld [vmem:[%s9984_s19 + $0xb0] sm:$0xff] }
 0xf65   : > { %5214 = vmatprep.subr.bf16.mxu1 %v4795_v46  ;;  %v4891_v46 = vunpack.c.l.s8.bf16 %v4627_v33 }
 0xf67   : > { %5129 = vmatpush1.bf16.msra.mxu0 %v4792_v21  ;;  %v4888_v21 = vunpack.c.l.s8.bf16 %v4624_v39 }
 0xf68   : > { %5215 = vmatpush1.bf16.msra.mxu1 %v4794_v1  ;;  %5130 = vmatprep.subr.bf16.mxu0 %v4805_v45  ;;  %v4890_v1 = vunpack.c.l.s8.bf16 %v4626_v18  ;;  %v4901_v45 = vunpack.c.h.s8.bf16 %v4625_v47  ;;  %v4533_v47 = vld [vmem:[%s9984_s19 + $0x108] sm:$0xff] }
 0xf69   : > { %5216 = vmatprep.subr.bf16.mxu1 %v4807_v62  ;;  %v4903_v62 = vunpack.c.h.s8.bf16 %v4627_v33  ;;  %v4535_v33 = vld [vmem:[%s9984_s19 + $0x118] sm:$0xff] }
 0xf6b   : > { %5131 = vmatpush1.bf16.msra.mxu0 %v4804_v49  ;;  %v4900_v49 = vunpack.c.h.s8.bf16 %v4624_v39  ;;  %v4703_v39 = vunpack.c.l.s8.bf16 %v4535_v33 }
 0xf6c   : > { %5217 = vmatpush1.bf16.msra.mxu1 %v4806_v16  ;;  %5132 = vmatprep.subr.bf16.mxu0 %v4817_v51  ;;  %v4902_v16 = vunpack.c.h.s8.bf16 %v4626_v18  ;;  %v4913_v51 = vunpack.c.l.s8.bf16 %v4637_v17 }
 0xf6d   : > { %5218 = vmatprep.subr.bf16.mxu1 %v4819_v50  ;;  %v4915_v50 = vunpack.c.l.s8.bf16 %v4639_v35 }
 0xf6f   : > { %5133 = vmatpush1.bf16.msra.mxu0 %v4816_v20  ;;  %v4912_v20 = vunpack.c.l.s8.bf16 %v4636_v52 }
 0xf70   : > { %5219 = vmatpush1.bf16.msra.mxu1 %v4818_v13  ;;  %5134 = vmatprep.subr.bf16.mxu0 %v4829_v25  ;;  %v4914_v13 = vunpack.c.l.s8.bf16 %v4638_v61  ;;  %v4925_v25 = vunpack.c.h.s8.bf16 %v4637_v17  ;;  %v4547_v17 = vld [vmem:[%s9984_s19 + $0x178] sm:$0xff] }
 0xf71   : > { %5220 = vmatprep.subr.bf16.mxu1 %v4831_v63  ;;  %v4927_v63 = vunpack.c.h.s8.bf16 %v4639_v35 }
 0xf73   : > { %5135 = vmatpush1.bf16.msra.mxu0 %v4828_v43  ;;  %v4924_v43 = vunpack.c.h.s8.bf16 %v4636_v52  ;;  %v4727_v52 = vunpack.c.l.s8.bf16 %v4547_v17 }
 0xf74   : > { %5221 = vmatpush1.bf16.msra.mxu1 %v4830_v9  ;;  %5147 = vmatprep.subr.bf16.mxu0 %v4841_v19  ;;  %v4926_v9 = vunpack.c.h.s8.bf16 %v4638_v61  ;;  %v4653_v19 = vunpack.c.l.s8.bf16 %v4509_v6 }
 0xf75   : > { %5233 = vmatprep.subr.bf16.mxu1 %v4843_v5  ;;  %v4655_v5 = vunpack.c.l.s8.bf16 %v4511_v30 }
 0xf76   : > { %5137 = vmatmul.mubr.bf16.vlgmr.msra.gmra.mrb[36].mxu0 %v10717_v58 }
 0xf77   : > { %5223 = vmatmul.mubr.bf16.vlgmr.msra.gmra.mrb[32].mxu1 %v10717_v58  ;;  %5148 = vmatpush1.bf16.msra.mxu0 %v4840_v12  ;;  %v4652_v12 = vunpack.c.l.s8.bf16 %v4508_v48 }
 0xf78   : > { %5234 = vmatpush1.bf16.msra.mxu1 %v4842_v24  ;;  %5149 = vmatprep.subr.bf16.mxu0 %v4853_v55  ;;  %v4654_v24 = vunpack.c.l.s8.bf16 %v4510_v15  ;;  %v4665_v55 = vunpack.c.h.s8.bf16 %v4509_v6  ;;  %v4559_v6 = vld [vmem:[%s9984_s19 + $0x1d8] sm:$0xff] }
 0xf79   : > { %5235 = vmatprep.subr.bf16.mxu1 %v4855_v59  ;;  %5179 = vmatprep.mubr.bf16.mxu0 %v9446_v57  ;;  %v4521_v59 = vld [vmem:[%s9984_s19 + $0xa8] sm:$0xff] }
 0xf7a   : > { %5265 = vmatprep.mubr.bf16.mxu1 %v9446_v57 }
 0xf7b   : > { %5150 = vmatpush1.bf16.msra.mxu0 %v4852_v8  ;;  %v4664_v8 = vunpack.c.h.s8.bf16 %v4508_v48  ;;  %v4751_v48 = vunpack.c.l.s8.bf16 %v4559_v6 }
 0xf7c   : > { %5236 = vmatpush1.bf16.msra.mxu1 %v4854_v2  ;;  %5151 = vmatprep.subr.bf16.mxu0 %v4865_v7  ;;  %v4666_v2 = vunpack.c.h.s8.bf16 %v4510_v15  ;;  %v4677_v7 = vunpack.c.l.s8.bf16 %v4521_v59 }
 0xf7d   : > { %5237 = vmatprep.subr.bf16.mxu1 %v4867_v41  ;;  %v4679_v41 = vunpack.c.l.s8.bf16 %v4523_v60 }
 0xf7f   : > { %5152 = vmatpush1.bf16.msra.mxu0 %v4864_v14  ;;  %v4676_v14 = vunpack.c.l.s8.bf16 %v4520_v34 }
 0xf80   : > { %5238 = vmatpush1.bf16.msra.mxu1 %v4866_v29  ;;  %5153 = vmatprep.subr.bf16.mxu0 %v4877_v32  ;;  %v4678_v29 = vunpack.c.l.s8.bf16 %v4522_v28  ;;  %v4689_v32 = vunpack.c.h.s8.bf16 %v4521_v59  ;;  %v4569_v59 = vld [vmem:[%s9984_s19 + $0x228] sm:$0xff] }
 0xf81   : > { %5239 = vmatprep.subr.bf16.mxu1 %v4879_v40  ;;  %v4691_v40 = vunpack.c.h.s8.bf16 %v4523_v60 }
 0xf83   : > { %5154 = vmatpush1.bf16.msra.mxu0 %v4876_v36  ;;  %v4688_v36 = vunpack.c.h.s8.bf16 %v4520_v34 }
 0xf84   : > { %5240 = vmatpush1.bf16.msra.mxu1 %v4878_v42  ;;  %5155 = vmatprep.subr.bf16.mxu0 %v4889_v38  ;;  %v4701_v42 = vunpack.c.l.s8.bf16 %v4533_v47  ;;  %v4532_v38 = vld [vmem:[%s9984_s19 + $0x100] sm:$0xff] }
 0xf85   : > { %5241 = vmatprep.subr.bf16.mxu1 %v4891_v46  ;;  %v4534_v46 = vld [vmem:[%s9984_s19 + $0x110] sm:$0xff]  ;;  %v4700_v18 = vunpack.c.l.s8.bf16 %v4532_v38  ;;  %v4712_v35 = vunpack.c.h.s8.bf16 %v4532_v38 }
 0xf87   : > { %5156 = vmatpush1.bf16.msra.mxu0 %v4888_v21  ;;  %v4702_v21 = vunpack.c.l.s8.bf16 %v4534_v46 }
 0xf88   : > { %5242 = vmatpush1.bf16.msra.mxu1 %v4890_v1  ;;  %5157 = vmatprep.subr.bf16.mxu0 %v4901_v45  ;;  %v4713_v1 = vunpack.c.h.s8.bf16 %v4533_v47  ;;  %v4715_v45 = vunpack.c.h.s8.bf16 %v4535_v33  ;;  %v4583_v47 = vld [vmem:[%s9984_s19 + $0x298] sm:$0xff] }
 0xf89   : > { %5243 = vmatprep.subr.bf16.mxu1 %v4903_v62  ;;  %v4545_v62 = vld [vmem:[%s9984_s19 + $0x168] sm:$0xff]  ;;  %v4799_v38 = vunpack.c.l.s8.bf16 %v4583_v47 }
 0xf8b   : > { %5158 = vmatpush1.bf16.msra.mxu0 %v4900_v49  ;;  %v4714_v49 = vunpack.c.h.s8.bf16 %v4534_v46 }
 0xf8c   : > { %5244 = vmatpush1.bf16.msra.mxu1 %v4902_v16  ;;  %5159 = vmatprep.subr.bf16.mxu0 %v4913_v51  ;;  %v4725_v16 = vunpack.c.l.s8.bf16 %v4545_v62  ;;  %v4544_v51 = vld [vmem:[%s9984_s19 + $0x160] sm:$0xff] }
 0xf8d   : > { %5245 = vmatprep.subr.bf16.mxu1 %v4915_v50  ;;  %v4546_v50 = vld [vmem:[%s9984_s19 + $0x170] sm:$0xff]  ;;  %v4724_v61 = vunpack.c.l.s8.bf16 %v4544_v51  ;;  %v4736_v30 = vunpack.c.h.s8.bf16 %v4544_v51 }
 0xf8f   : > { %5160 = vmatpush1.bf16.msra.mxu0 %v4912_v20  ;;  %v4726_v20 = vunpack.c.l.s8.bf16 %v4546_v50 }
 0xf90   : > { %5246 = vmatpush1.bf16.msra.mxu1 %v4914_v13  ;;  %5161 = vmatprep.subr.bf16.mxu0 %v4925_v25  ;;  %v4737_v13 = vunpack.c.h.s8.bf16 %v4545_v62  ;;  %v4739_v25 = vunpack.c.h.s8.bf16 %v4547_v17  ;;  %v4595_v62 = vld [vmem:[%s9984_s19 + $0x2f8] sm:$0xff] }
 0xf91   : > { %5247 = vmatprep.subr.bf16.mxu1 %v4927_v63  ;;  %v4557_v63 = vld [vmem:[%s9984_s19 + $0x1c8] sm:$0xff]  ;;  %v4823_v51 = vunpack.c.l.s8.bf16 %v4595_v62 }
 0xf93   : > { %5162 = vmatpush1.bf16.msra.mxu0 %v4924_v43  ;;  %v4738_v43 = vunpack.c.h.s8.bf16 %v4546_v50 }
 0xf94   : > { %5248 = vmatpush1.bf16.msra.mxu1 %v4926_v9  ;;  %5276 = vmatprep.subr.bf16.mxu0 %v4653_v19  ;;  %v4749_v9 = vunpack.c.l.s8.bf16 %v4557_v63  ;;  %v4556_v19 = vld [vmem:[%s9984_s19 + $0x1c0] sm:$0xff] }
 0xf95   : > { %5362 = vmatprep.subr.bf16.mxu1 %v4655_v5  ;;  %v4558_v5 = vld [vmem:[%s9984_s19 + $0x1d0] sm:$0xff]  ;;  %v4748_v15 = vunpack.c.l.s8.bf16 %v4556_v19  ;;  %v4760_v60 = vunpack.c.h.s8.bf16 %v4556_v19 }
 0xf96   : > { %5180 = vmatmul.mubr.bf16.vlgmr.msra.gmra.mrb[36].mxu0 %v10749_v23 }
 0xf97   : > { %5266 = vmatmul.mubr.bf16.vlgmr.msra.gmra.mrb[32].mxu1 %v10749_v23  ;;  %5277 = vmatpush1.bf16.msra.mxu0 %v4652_v12  ;;  %v4750_v12 = vunpack.c.l.s8.bf16 %v4558_v5 }
 0xf98   : > { %5308 = vmatprep.mubr.bf16.mxu0 %v10715_v54  ;;  %5363 = vmatpush1.bf16.msra.mxu1 %v4654_v24  ;;  %v4761_v24 = vunpack.c.h.s8.bf16 %v4557_v63  ;;  %v4607_v63 = vld [vmem:[%s9984_s19 + $0x358] sm:$0xff] }
 0xf99   : > { %5394 = vmatprep.mubr.bf16.mxu1 %v10715_v54  ;;  %5278 = vmatprep.subr.bf16.mxu0 %v4665_v55  ;;  %v4690_v54 = vunpack.c.h.s8.bf16 %v4522_v28  ;;  %v4763_v55 = vunpack.c.h.s8.bf16 %v4559_v6  ;;  %v4847_v19 = vunpack.c.l.s8.bf16 %v4607_v63 }
 0xf9a   : > { %5364 = vmatprep.subr.bf16.mxu1 %v4667_v27  ;;  %v4571_v27 = vld [vmem:[%s9984_s19 + $0x238] sm:$0xff] }
 0xf9b   : > { %5279 = vmatpush1.bf16.msra.mxu0 %v4664_v8  ;;  %v4762_v8 = vunpack.c.h.s8.bf16 %v4558_v5  ;;  %v4775_v34 = vunpack.c.l.s8.bf16 %v4571_v27 }
 0xf9c   : > { %5365 = vmatpush1.bf16.msra.mxu1 %v4666_v2  ;;  %5280 = vmatprep.subr.bf16.mxu0 %v4677_v7  ;;  %v4773_v2 = vunpack.c.l.s8.bf16 %v4569_v59  ;;  %v4568_v7 = vld [vmem:[%s9984_s19 + $0x220] sm:$0xff] }
 0xf9d   : > { %5366 = vmatprep.subr.bf16.mxu1 %v4679_v41  ;;  %v4570_v41 = vld [vmem:[%s9984_s19 + $0x230] sm:$0xff]  ;;  %v4772_v28 = vunpack.c.l.s8.bf16 %v4568_v7  ;;  %v4784_v33 = vunpack.c.h.s8.bf16 %v4568_v7 }
 0xf9f   : > { %5281 = vmatpush1.bf16.msra.mxu0 %v4676_v14  ;;  %v4774_v14 = vunpack.c.l.s8.bf16 %v4570_v41 }
 0xfa0   : > { %5367 = vmatpush1.bf16.msra.mxu1 %v4678_v29  ;;  %5282 = vmatprep.subr.bf16.mxu0 %v4689_v32  ;;  %v4785_v29 = vunpack.c.h.s8.bf16 %v4569_v59  ;;  %v4787_v32 = vunpack.c.h.s8.bf16 %v4571_v27  ;;  %v4619_v59 = vld [vmem:[%s9984_s19 + $0x3b8] sm:$0xff] }
 0xfa1   : > { %5368 = vmatprep.subr.bf16.mxu1 %v4691_v40  ;;  %v4581_v40 = vld [vmem:[%s9984_s19 + $0x288] sm:$0xff]  ;;  %v4871_v7 = vunpack.c.l.s8.bf16 %v4619_v59 }
 0xfa3   : > { %5283 = vmatpush1.bf16.msra.mxu0 %v4688_v36  ;;  %v4786_v36 = vunpack.c.h.s8.bf16 %v4570_v41 }
 0xfa4   : > { %5369 = vmatpush1.bf16.msra.mxu1 %v4690_v54  ;;  %5284 = vmatprep.subr.bf16.mxu0 %v4701_v42  ;;  %v4797_v54 = vunpack.c.l.s8.bf16 %v4581_v40  ;;  %v4580_v42 = vld [vmem:[%s9984_s19 + $0x280] sm:$0xff] }
 0xfa5   : > { %5370 = vmatprep.subr.bf16.mxu1 %v4703_v39  ;;  %v4582_v39 = vld [vmem:[%s9984_s19 + $0x290] sm:$0xff]  ;;  %v4796_v46 = vunpack.c.l.s8.bf16 %v4580_v42  ;;  %v4808_v17 = vunpack.c.h.s8.bf16 %v4580_v42 }
 0xfa7   : > { %5285 = vmatpush1.bf16.msra.mxu0 %v4700_v18  ;;  %v4798_v18 = vunpack.c.l.s8.bf16 %v4582_v39 }
 0xfa8   : > { %5371 = vmatpush1.bf16.msra.mxu1 %v4702_v21  ;;  %5286 = vmatprep.subr.bf16.mxu0 %v4713_v1  ;;  %v4809_v21 = vunpack.c.h.s8.bf16 %v4581_v40  ;;  %v4811_v1 = vunpack.c.h.s8.bf16 %v4583_v47 }
 0xfa9   : > { %5372 = vmatprep.subr.bf16.mxu1 %v4715_v45  ;;  %v4593_v45 = vld [vmem:[%s9984_s19 + $0x2e8] sm:$0xff] }
 0xfab   : > { %5287 = vmatpush1.bf16.msra.mxu0 %v4712_v35  ;;  %v4810_v35 = vunpack.c.h.s8.bf16 %v4582_v39 }
 0xfac   : > { %5373 = vmatpush1.bf16.msra.mxu1 %v4714_v49  ;;  %5288 = vmatprep.subr.bf16.mxu0 %v4725_v16  ;;  %v4821_v49 = vunpack.c.l.s8.bf16 %v4593_v45  ;;  %v4592_v16 = vld [vmem:[%s9984_s19 + $0x2e0] sm:$0xff] }
 0xfad   : > { %5374 = vmatprep.subr.bf16.mxu1 %v4727_v52  ;;  %v4594_v52 = vld [vmem:[%s9984_s19 + $0x2f0] sm:$0xff]  ;;  %v4820_v50 = vunpack.c.l.s8.bf16 %v4592_v16  ;;  %v4832_v6 = vunpack.c.h.s8.bf16 %v4592_v16 }
 0xfaf   : > { %5289 = vmatpush1.bf16.msra.mxu0 %v4724_v61  ;;  %v4822_v61 = vunpack.c.l.s8.bf16 %v4594_v52 }
 0xfb0   : > { %5375 = vmatpush1.bf16.msra.mxu1 %v4726_v20  ;;  %5290 = vmatprep.subr.bf16.mxu0 %v4737_v13  ;;  %v4833_v20 = vunpack.c.h.s8.bf16 %v4593_v45  ;;  %v4835_v13 = vunpack.c.h.s8.bf16 %v4595_v62 }
 0xfb1   : > { %5376 = vmatprep.subr.bf16.mxu1 %v4739_v25  ;;  %v4605_v25 = vld [vmem:[%s9984_s19 + $0x348] sm:$0xff] }
 0xfb3   : > { %5291 = vmatpush1.bf16.msra.mxu0 %v4736_v30  ;;  %v4834_v30 = vunpack.c.h.s8.bf16 %v4594_v52 }
 0xfb4   : > { %5377 = vmatpush1.bf16.msra.mxu1 %v4738_v43  ;;  %5292 = vmatprep.subr.bf16.mxu0 %v4749_v9  ;;  %v4845_v43 = vunpack.c.l.s8.bf16 %v4605_v25  ;;  %v4604_v9 = vld [vmem:[%s9984_s19 + $0x340] sm:$0xff] }
 0xfb5   : > { %5378 = vmatprep.subr.bf16.mxu1 %v4751_v48  ;;  %v4606_v48 = vld [vmem:[%s9984_s19 + $0x350] sm:$0xff]  ;;  %v4844_v5 = vunpack.c.l.s8.bf16 %v4604_v9  ;;  %v4856_v27 = vunpack.c.h.s8.bf16 %v4604_v9 }
 0xfb7   : > { %5293 = vmatpush1.bf16.msra.mxu0 %v4748_v15  ;;  %v4846_v15 = vunpack.c.l.s8.bf16 %v4606_v48 }
 0xfb8   : > { %5379 = vmatpush1.bf16.msra.mxu1 %v4750_v12  ;;  %5294 = vmatprep.subr.bf16.mxu0 %v4761_v24  ;;  %v4857_v12 = vunpack.c.h.s8.bf16 %v4605_v25  ;;  %v4859_v24 = vunpack.c.h.s8.bf16 %v4607_v63 }
 0xfb9   : > { %5380 = vmatprep.subr.bf16.mxu1 %v4763_v55  ;;  %v4617_v55 = vld [vmem:[%s9984_s19 + $0x3a8] sm:$0xff] }
 0xfbb   : > { %5295 = vmatpush1.bf16.msra.mxu0 %v4760_v60  ;;  %v4858_v60 = vunpack.c.h.s8.bf16 %v4606_v48 }
 0xfbc   : > { %5381 = vmatpush1.bf16.msra.mxu1 %v4762_v8  ;;  %5296 = vmatprep.subr.bf16.mxu0 %v4773_v2  ;;  %v4869_v8 = vunpack.c.l.s8.bf16 %v4617_v55  ;;  %v4616_v2 = vld [vmem:[%s9984_s19 + $0x3a0] sm:$0xff] }
 0xfbd   : > { %5382 = vmatprep.subr.bf16.mxu1 %v4775_v34  ;;  %v4618_v34 = vld [vmem:[%s9984_s19 + $0x3b0] sm:$0xff]  ;;  %v4868_v41 = vunpack.c.l.s8.bf16 %v4616_v2  ;;  %v4880_v40 = vunpack.c.h.s8.bf16 %v4616_v2 }
 0xfbe   : > { %v4882_v47 = vunpack.c.h.s8.bf16 %v4618_v34 }
 0xfbf   : > { %5297 = vmatpush1.bf16.msra.mxu0 %v4772_v28  ;;  %v4881_v28 = vunpack.c.h.s8.bf16 %v4617_v55 }
 0xfc0   : > { %5383 = vmatpush1.bf16.msra.mxu1 %v4774_v14  ;;  %5298 = vmatprep.subr.bf16.mxu0 %v4785_v29  ;;  %v4883_v14 = vunpack.c.h.s8.bf16 %v4619_v59  ;;  %v4629_v29 = vld [vmem:[%s9984_s19 + $0x408] sm:$0xff]  ;;  %v5823_v59 = vld [vmem:[%s9986_s18 + $0x18] sm:$0xff] }
 0xfc1   : > { %5384 = vmatprep.subr.bf16.mxu1 %v4787_v32  ;;  %v4631_v32 = vld [vmem:[%s9984_s19 + $0x418] sm:$0xff]  ;;  %v4905_v39 = vunpack.c.h.s8.bf16 %v4629_v29  ;;  %v5970_v2 = vunpack.c.l.s8.bf16 %v5823_v59 }
 0xfc3   : > { %5299 = vmatpush1.bf16.msra.mxu0 %v4784_v33  ;;  %v4628_v33 = vld [vmem:[%s9984_s19 + $0x400] sm:$0xff] }
 0xfc4   : > { %5385 = vmatpush1.bf16.msra.mxu1 %v4786_v36  ;;  %5300 = vmatprep.subr.bf16.mxu0 %v4797_v54  ;;  %v4895_v36 = vunpack.c.l.s8.bf16 %v4631_v32  ;;  %v4630_v54 = vld [vmem:[%s9984_s19 + $0x410] sm:$0xff]  ;;  %v4892_v42 = vunpack.c.l.s8.bf16 %v4628_v33 }
 0xfc5   : > { %5386 = vmatprep.subr.bf16.mxu1 %v4799_v38  ;;  %v4894_v38 = vunpack.c.l.s8.bf16 %v4630_v54  ;;  %v4906_v45 = vunpack.c.h.s8.bf16 %v4630_v54  ;;  %v10877_v54 = vld [vmem:[%s9986_s18 + $0x50] sm:$0xff] }
 0xfc7   : > { %5301 = vmatpush1.bf16.msra.mxu0 %v4796_v46  ;;  %v4907_v46 = vunpack.c.h.s8.bf16 %v4631_v32 }
 0xfc8   : > { %5387 = vmatpush1.bf16.msra.mxu1 %v4798_v18  ;;  %5302 = vmatprep.subr.bf16.mxu0 %v4809_v21  ;;  %v4641_v18 = vld [vmem:[%s9984_s19 + $0x468] sm:$0xff]  ;;  %v4643_v21 = vld [vmem:[%s9984_s19 + $0x478] sm:$0xff] }
 0xfc9   : > { %5388 = vmatprep.subr.bf16.mxu1 %v4811_v1  ;;  %v4904_v1 = vunpack.c.h.s8.bf16 %v4628_v33  ;;  %v4917_v62 = vunpack.c.l.s8.bf16 %v4641_v18  ;;  %v4929_v52 = vunpack.c.h.s8.bf16 %v4641_v18  ;;  %v1959_v33 = vld [vmem:[%s9988_s28 + $0x78] sm:$0xff]  ;;  %v10884_v18 = vld [vmem:[%s9986_s18 + $0x48] sm:$0xff] }
 0xfcb   : > { %5303 = vmatpush1.bf16.msra.mxu0 %v4808_v17  ;;  %v4640_v17 = vld [vmem:[%s9984_s19 + $0x460] sm:$0xff] }
 0xfcc   : > { %5389 = vmatpush1.bf16.msra.mxu1 %v4810_v35  ;;  %5304 = vmatprep.subr.bf16.mxu0 %v4821_v49  ;;  %v4919_v35 = vunpack.c.l.s8.bf16 %v4643_v21  ;;  %v4642_v49 = vld [vmem:[%s9984_s19 + $0x470] sm:$0xff]  ;;  %v4916_v16 = vunpack.c.l.s8.bf16 %v4640_v17 }
 0xfcd   : > { %5390 = vmatprep.subr.bf16.mxu1 %v4823_v51  ;;  %v4918_v51 = vunpack.c.l.s8.bf16 %v4642_v49  ;;  %v4930_v25 = vunpack.c.h.s8.bf16 %v4642_v49  ;;  %v5463_v49 = vrot.slane %v1959_v33, %v10270_v56 }
 0xfcf   : > { %5305 = vmatpush1.bf16.msra.mxu0 %v4820_v50  ;;  %v4931_v50 = vunpack.c.h.s8.bf16 %v4643_v21  ;;  %v10887_v21 = vld [vmem:[%s9986_s18 + $0x68] sm:$0xff] }
 0xfd0   : > { %5391 = vmatpush1.bf16.msra.mxu1 %v4822_v61  ;;  %5306 = vmatprep.subr.bf16.mxu0 %v4833_v20  ;;  %v5821_v61 = vld [vmem:[%s9986_s18 + $0x8] sm:$0xff]  ;;  %v5834_v20 = vld [vmem:[%s9986_s18 + $0x70] sm:$0xff] }
 0xfd1   : > { %5392 = vmatprep.subr.bf16.mxu1 %v4835_v13  ;;  %v4928_v13 = vunpack.c.h.s8.bf16 %v4640_v17  ;;  %v5965_v63 = vunpack.c.l.s8.bf16 %v5821_v61  ;;  %v8915_v17 = vld [vmem:[%s9988_s28 + $0x68] sm:$0xff] }
 0xfd3   : > { %5307 = vmatpush1.bf16.msra.mxu0 %v4832_v6  ;;  %v5820_v6 = vld [vmem:[%s9986_s18] sm:$0xff] }
 0xfd4   : > { %5393 = vmatpush1.bf16.msra.mxu1 %v4834_v30  ;;  %5319 = vmatprep.subr.bf16.mxu0 %v4845_v43  ;;  %v5990_v30 = vunpack.c.l.s8.bf16 %v5834_v20  ;;  %v5822_v43 = vld [vmem:[%s9986_s18 + $0x10] sm:$0xff]  ;;  %v5964_v9 = vunpack.c.l.s8.bf16 %v5820_v6 }
 0xfd5   : > { %5405 = vmatprep.subr.bf16.mxu1 %v4847_v19  ;;  %v5968_v19 = vunpack.c.h.s8.bf16 %v5821_v61  ;;  %v5966_v48 = vunpack.c.l.s8.bf16 %v5822_v43  ;;  %v5527_v61 = vrot.slane %v8915_v17, %v10134_v26 }
 0xfd6   : > { %5309 = vmatmul.mubr.bf16.vlgmr.msra.gmra.mrb[40].mxu0 %v10717_v58 }
 0xfd7   : > { %5395 = vmatmul.mubr.bf16.vlgmr.msra.gmra.mrb[36].mxu1 %v10717_v58  ;;  %5320 = vmatpush1.bf16.msra.mxu0 %v4844_v5  ;;  %v4870_v58 = vunpack.c.l.s8.bf16 %v4618_v34  ;;  %v5824_v5 = vld [vmem:[%s9986_s18 + $0x20] sm:$0xff]  ;;  %v5827_v34 = vld [vmem:[%s9986_s18 + $0x38] sm:$0xff] }
 0xfd8   : > { %5406 = vmatpush1.bf16.msra.mxu1 %v4846_v15  ;;  %5321 = vmatprep.subr.bf16.mxu0 %v4857_v12  ;;  %v5993_v15 = vunpack.c.h.s8.bf16 %v5834_v20  ;;  %v5837_v12 = vld [vmem:[%s9986_s18 + $0x88] sm:$0xff]  ;;  %v5971_v55 = vunpack.c.l.s8.bf16 %v5824_v5  ;;  %v5535_v20 = vrot.slane %v1959_v33, %v10134_v26 }
 0xfd9   : > { %5407 = vmatprep.subr.bf16.mxu1 %v4859_v24  ;;  %5351 = vmatprep.mubr.bf16.mxu0 %v9446_v57  ;;  %v5967_v24 = vunpack.c.h.s8.bf16 %v5820_v6  ;;  %v5986_v6 = vunpack.c.h.s8.bf16 %v10877_v54 }
 0xfda   : > { %5437 = vmatprep.mubr.bf16.mxu1 %v9446_v57  ;;  %v4893_v57 = vunpack.c.l.s8.bf16 %v4629_v29  ;;  %v5826_v29 = vld [vmem:[%s9986_s18 + $0x30] sm:$0xff] }
 0xfdb   : > { %5322 = vmatpush1.bf16.msra.mxu0 %v4856_v27  ;;  %v5969_v27 = vunpack.c.h.s8.bf16 %v5822_v43  ;;  %v5989_v43 = vunpack.c.l.s8.bf16 %v10887_v21 }
 0xfdc   : > { %5408 = vmatpush1.bf16.msra.mxu1 %v4858_v60  ;;  %5323 = vmatprep.subr.bf16.mxu0 %v4869_v8  ;;  %v5996_v60 = vunpack.c.l.s8.bf16 %v5837_v12  ;;  %v5825_v8 = vld [vmem:[%s9986_s18 + $0x28] sm:$0xff] }
 0xfdd   : > { %5409 = vmatprep.subr.bf16.mxu1 %v4871_v7  ;;  %v5974_v7 = vunpack.c.h.s8.bf16 %v5824_v5  ;;  %v5975_v32 = vunpack.c.h.s8.bf16 %v5825_v8 }
 0xfdf   : > { %5324 = vmatpush1.bf16.msra.mxu0 %v4868_v41  ;;  %v5999_v41 = vunpack.c.h.s8.bf16 %v5837_v12 }
 0xfe0   : > { %5410 = vmatpush1.bf16.msra.mxu1 %v4870_v58  ;;  %5325 = vmatprep.subr.bf16.mxu0 %v4881_v28  ;;  %v5840_v58 = vld [vmem:[%s9986_s18 + $0xa0] sm:$0xff]  ;;  %v5973_v28 = vunpack.c.h.s8.bf16 %v5823_v59 }
 0xfe1   : > { %5411 = vmatprep.subr.bf16.mxu1 %v4883_v14  ;;  %v5977_v14 = vunpack.c.l.s8.bf16 %v5827_v34 }
 0xfe3   : > { %5326 = vmatpush1.bf16.msra.mxu0 %v4880_v40  ;;  %v6002_v40 = vunpack.c.l.s8.bf16 %v5840_v58 }
 0xfe4   : > { %5412 = vmatpush1.bf16.msra.mxu1 %v4882_v47  ;;  %5327 = vmatprep.subr.bf16.mxu0 %v4893_v57  ;;  %v10873_v47 = vld [vmem:[%s9986_s18 + $0x40] sm:$0xff]  ;;  %v5976_v57 = vunpack.c.l.s8.bf16 %v5826_v29 }
 0xfe5   : > { %5413 = vmatprep.subr.bf16.mxu1 %v4895_v36  ;;  %v5980_v36 = vunpack.c.h.s8.bf16 %v5827_v34  ;;  %v5981_v12 = vunpack.c.h.s8.bf16 %v10873_v47 }
 0xfe7   : > { %5328 = vmatpush1.bf16.msra.mxu0 %v4892_v42  ;;  %v5978_v42 = vunpack.c.l.s8.bf16 %v10873_v47 }
 0xfe8   : > { %5414 = vmatpush1.bf16.msra.mxu1 %v4894_v38  ;;  %5329 = vmatprep.subr.bf16.mxu0 %v4905_v39  ;;  %v8913_v38 = vld [vmem:[%s9988_s28 + $0x60] sm:$0xff] }
 0xfe9   : > { %5415 = vmatprep.subr.bf16.mxu1 %v4907_v46  ;;  %v5451_v39 = vrot.slane %v8913_v38, %v10270_v56  ;;  %v5523_v46 = vrot.slane %v8913_v38, %v10134_v26 }
 0xfeb   : > { %5330 = vmatpush1.bf16.msra.mxu0 %v4904_v1  ;;  %v6005_v1 = vunpack.c.h.s8.bf16 %v5840_v58 }
 0xfec   : > { %5416 = vmatpush1.bf16.msra.mxu1 %v4906_v45  ;;  %5331 = vmatprep.subr.bf16.mxu0 %v4917_v62  ;;  %v8914_v45 = vld [vmem:[%s9988_s28 + $0x70] sm:$0xff] }
 0xfed   : > { %5417 = vmatprep.subr.bf16.mxu1 %v4919_v35  ;;  %v5459_v62 = vrot.slane %v8914_v45, %v10270_v56  ;;  %v5455_v35 = vrot.slane %v8915_v17, %v10270_v56 }
 0xfef   : > { %5332 = vmatpush1.bf16.msra.mxu0 %v4916_v16  ;;  %v5979_v16 = vunpack.c.h.s8.bf16 %v5826_v29 }
 0xff0   : > { %5418 = vmatpush1.bf16.msra.mxu1 %v4918_v51  ;;  %5333 = vmatprep.subr.bf16.mxu0 %v4929_v52  ;;  %v10895_v51 = vld [vmem:[%s9986_s18 + $0x60] sm:$0xff]  ;;  %v10898_v52 = vld [vmem:[%s9986_s18 + $0xb8] sm:$0xff] }
 0xff1   : > { %5419 = vmatprep.subr.bf16.mxu1 %v4931_v50  ;;  %v5531_v50 = vrot.slane %v8914_v45, %v10134_v26  ;;  %v5988_v5 = vunpack.c.l.s8.bf16 %v10895_v51 }
 0xff3   : > { %5334 = vmatpush1.bf16.msra.mxu0 %v4928_v13  ;;  %v5983_v13 = vunpack.c.l.s8.bf16 %v10877_v54 }
 0xff4   : > { %5420 = vmatpush1.bf16.msra.mxu1 %v4930_v25  ;;  %6252 = vmatprep.subr.bf16.mxu0 %v5965_v63  ;;  %v10905_v25 = vld [vmem:[%s9986_s18 + $0x58] sm:$0xff]  ;;  %v5982_v63 = vunpack.c.l.s8.bf16 %v10884_v18 }
 0xff5   : > { %7864 = vmatprep.subr.bf16.mxu1 %v5990_v30  ;;  %v5985_v30 = vunpack.c.h.s8.bf16 %v10884_v18  ;;  %v5987_v58 = vunpack.c.h.s8.bf16 %v10905_v25 }
 0xff6   : > { %5352 = vmatmul.mubr.bf16.vlgmr.msra.gmra.mrb[40].mxu0 %v10749_v23 }
 0xff7   : > { %5438 = vmatmul.mubr.bf16.vlgmr.msra.gmra.mrb[36].mxu1 %v10749_v23  ;;  %6253 = vmatpush1.bf16.msra.mxu0 %v5964_v9  ;;  %v5972_v23 = vunpack.c.l.s8.bf16 %v5825_v8  ;;  %v10912_v9 = vld [vmem:[%s9986_s18 + $0x130] sm:$0xff]  ;;  %v5984_v8 = vunpack.c.l.s8.bf16 %v10905_v25 }
 0xff8   : > { %6254 = vmatprep.subr.bf16.mxu0 %v5968_v19  ;;  %7865 = vmatpush3.bf16.msra.mxu1 %v5966_v48 }
 0xff9   : > { %7866 = vmatprep.subr.bf16.mxu1 %v5993_v15  ;;  %v5992_v15 = vunpack.c.h.s8.bf16 %v10887_v21 }
 0xffb   : > { %6255 = vmatpush1.bf16.msra.mxu0 %v5967_v24  ;;  %v6008_v24 = vunpack.c.l.s8.bf16 %v10898_v52 }
 0xffc   : > { %6256 = vmatprep.subr.bf16.mxu0 %v5971_v55  ;;  %7867 = vmatpush3.bf16.msra.mxu1 %v5969_v27 }
 0xffd   : > { %7868 = vmatprep.subr.bf16.mxu1 %v5996_v60 }
 0xfff   : > { %6257 = vmatpush1.bf16.msra.mxu0 %v5970_v2  ;;  %v6011_v2 = vunpack.c.h.s8.bf16 %v10898_v52 }
0x1000   : > { %6258 = vmatprep.subr.bf16.mxu0 %v5974_v7  ;;  %7869 = vmatpush3.bf16.msra.mxu1 %v5972_v23 }
0x1001   : > { %7870 = vmatprep.subr.bf16.mxu1 %v5999_v41 }
0x1003   : > { %6259 = vmatpush1.bf16.msra.mxu0 %v5973_v28  ;;  %v6038_v28 = vunpack.c.l.s8.bf16 %v10912_v9 }
0x1004   : > { %6260 = vmatprep.subr.bf16.mxu0 %v5977_v14  ;;  %7871 = vmatpush3.bf16.msra.mxu1 %v5975_v32 }
0x1005   : > { %7872 = vmatprep.subr.bf16.mxu1 %v6002_v40 }
0x1007   : > { %6261 = vmatpush1.bf16.msra.mxu0 %v5976_v57 }
0x1008   : > { %6262 = vmatprep.subr.bf16.mxu0 %v5980_v36  ;;  %7873 = vmatpush3.bf16.msra.mxu1 %v5978_v42 }
0x1009   : > { %v5009_v19 = vpop.f32.mrb[32].mxu0  ;;  %v5095_v48 = vpop.f32.mrb[28].mxu1  ;;  %7874 = vmatprep.subr.bf16.mxu1 %v6005_v1 }
0x100a   : > { %v5496_v55 = vmul.f32 %v5451_v39, %v5009_v19  ;;  %v5498_v59 = vmul.f32 %v5459_v62, %v5095_v48  ;;  %v5011_v27 = vpop.f32.mrb[33].mxu0  ;;  %v5097_v60 = vpop.f32.mrb[29].mxu1 }
0x100b   : > { %v5497_v7 = vmul.f32 %v5455_v35, %v5011_v27  ;;  %v5499_v23 = vmul.f32 %v5463_v49, %v5097_v60  ;;  %v5013_v34 = vpop.f32.mrb[34].mxu0  ;;  %v5099_v41 = vpop.f32.mrb[30].mxu1  ;;  %6263 = vmatpush1.bf16.msra.mxu0 %v5979_v16 }
0x100c   : > { %v10922_v14 = vadd.f32 %v5523_v46, %v5496_v55  ;;  %v10924_v29 = vadd.f32 %v5531_v50, %v5498_v59  ;;  %v5508_v32 = vmul.f32 %v5451_v39, %v5013_v34  ;;  %v5510_v40 = vmul.f32 %v5459_v62, %v5099_v41  ;;  %v5015_v47 = vpop.f32.mrb[35].mxu0  ;;  %v5101_v57 = vpop.f32.mrb[31].mxu1  ;;  %6264 = vmatprep.subr.bf16.mxu0 %v5983_v13 }
0x100d   : > { %v10926_v33 = vadd.f32 %v5527_v61, %v5497_v7  ;;  %v10928_v36 = vadd.f32 %v5535_v20, %v5499_v23  ;;  %v5509_v54 = vmul.f32 %v5455_v35, %v5015_v47  ;;  %v5511_v42 = vmul.f32 %v5463_v49, %v5101_v57  ;;  %7875 = vmatpush3.bf16.msra.mxu1 %v5981_v12  ;;  %v5836_v23 = vld [vmem:[%s9986_s18 + $0x80] sm:$0xff] }
0x100e   : > { %v5592_v38 = vmul.f32 %v10922_v14, %v10922_v14  ;;  %v5594_v1 = vmul.f32 %v10924_v29, %v10924_v29  ;;  %v10934_v45 = vadd.f32 %v5523_v46, %v5508_v32  ;;  %v10936_v39 = vadd.f32 %v5531_v50, %v5510_v40  ;;  %7876 = vmatprep.subr.bf16.mxu1 %v6008_v24 }
0x100f   : > { %v5593_v62 = vmul.f32 %v10926_v33, %v10926_v33  ;;  %v5595_v17 = vmul.f32 %v10928_v36, %v10928_v36  ;;  %v10942_v35 = vadd.f32 %v5527_v61, %v5509_v54  ;;  %v10944_v49 = vadd.f32 %v5535_v20, %v5511_v42  ;;  %6265 = vmatpush1.bf16.msra.mxu0 %v5982_v63 }
0x1010   : > { %v5616_v16 = vmul.f32 %v5592_v38, %v10922_v14  ;;  %v5618_v52 = vmul.f32 %v5594_v1, %v10924_v29  ;;  %v5604_v46 = vmul.f32 %v10934_v45, %v10934_v45  ;;  %v5606_v50 = vmul.f32 %v10936_v39, %v10936_v39  ;;  %6266 = vmatprep.subr.bf16.mxu0 %v5986_v6  ;;  %v5835_v38 = vld [vmem:[%s9986_s18 + $0x78] sm:$0xff] }
0x1011   : > { %v5617_v13 = vmul.f32 %v5593_v62, %v10926_v33  ;;  %v5619_v25 = vmul.f32 %v5595_v17, %v10928_v36  ;;  %v5605_v61 = vmul.f32 %v10942_v35, %v10942_v35  ;;  %v5607_v20 = vmul.f32 %v10944_v49, %v10944_v49  ;;  %7877 = vmatpush3.bf16.msra.mxu1 %v5984_v8 }
0x1012   : > { %v5640_v63 = vmul.f32 0.044715, %v5616_v16  ;;  %v5642_v19 = vmul.f32 0.044715, %v5618_v52  ;;  %v5628_v48 = vmul.f32 %v5604_v46, %v10934_v45  ;;  %v5630_v12 = vmul.f32 %v5606_v50, %v10936_v39  ;;  %7878 = vmatprep.subr.bf16.mxu1 %v6011_v2  ;;  %v5839_v52 = vld [vmem:[%s9986_s18 + $0x98] sm:$0xff] }
0x1013   : > { %v5641_v6 = vmul.f32 0.044715, %v5617_v13  ;;  %v5643_v24 = vmul.f32 0.044715, %v5619_v25  ;;  %v5629_v55 = vmul.f32 %v5605_v61, %v10942_v35  ;;  %v5631_v59 = vmul.f32 %v5607_v20, %v10944_v49  ;;  %6267 = vmatpush1.bf16.msra.mxu0 %v5985_v30 }
0x1014   : > { %v5664_v27 = vadd.f32 %v5640_v63, %v10922_v14  ;;  %v5666_v60 = vadd.f32 %v5642_v19, %v10924_v29  ;;  %v5652_v8 = vmul.f32 0.044715, %v5628_v48  ;;  %v5654_v7 = vmul.f32 0.044715, %v5630_v12  ;;  %6268 = vmatprep.subr.bf16.mxu0 %v5989_v43  ;;  %v5842_v12 = vld [vmem:[%s9986_s18 + $0xb0] sm:$0xff] }
0x1015   : > { %v5665_v2 = vadd.f32 %v5641_v6, %v10926_v33  ;;  %v5667_v34 = vadd.f32 %v5643_v24, %v10928_v36  ;;  %v5653_v41 = vmul.f32 0.044715, %v5629_v55  ;;  %v5655_v32 = vmul.f32 0.044715, %v5631_v59  ;;  %7879 = vmatpush3.bf16.msra.mxu1 %v5987_v58 }
0x1016   : > { %v5688_v18 = vmul.f32 0.7978846, %v5664_v27  ;;  %v5690_v30 = vmul.f32 0.7978846, %v5666_v60  ;;  %v5676_v40 = vadd.f32 %v5652_v8, %v10934_v45  ;;  %v5678_v47 = vadd.f32 %v5654_v7, %v10936_v39  ;;  %7886 = vmatprep.subr.bf16.mxu1 %v6038_v28 }
0x1017   : > { %v5677_v57 = vadd.f32 %v5653_v41, %v10942_v35  ;;  %v5679_v43 = vadd.f32 %v5655_v32, %v10944_v49  ;;  %6269 = vmatpush1.bf16.msra.mxu0 %v5988_v5  ;;  %v5991_v54 = vunpack.c.h.s8.bf16 %v10895_v51  ;;  %v5995_v42 = vunpack.c.l.s8.bf16 %v5836_v23  ;;  %v5841_v32 = vld [vmem:[%s9986_s18 + $0xa8] sm:$0xff] }
0x1018   : > { %8855 = vtanh.f32 %v5688_v18  ;;  %v5689_v58 = vmul.f32 0.7978846, %v5665_v2  ;;  %v5700_v1 = vmul.f32 0.7978846, %v5676_v40  ;;  %v5702_v62 = vmul.f32 0.7978846, %v5678_v47  ;;  %6270 = vmatprep.subr.bf16.mxu0 %v5992_v15 }
0x1019   : > { %8857 = vtanh.f32 %v5690_v30  ;;  %v5701_v28 = vmul.f32 0.7978846, %v5677_v57  ;;  %v5691_v17 = vmul.f32 0.7978846, %v5667_v34  ;;  %v5703_v16 = vmul.f32 0.7978846, %v5679_v43 }
0x101a   : > { %8859 = vtanh.f32 %v5700_v1  ;;  %v5994_v5 = vunpack.c.l.s8.bf16 %v5835_v38  ;;  %v5998_v51 = vunpack.c.h.s8.bf16 %v5836_v23  ;;  %v5997_v46 = vunpack.c.h.s8.bf16 %v5835_v38  ;;  %v5838_v15 = vld [vmem:[%s9986_s18 + $0x90] sm:$0xff] }
0x101b   : > { %8861 = vtanh.f32 %v5702_v62  ;;  %6271 = vmatpush1.bf16.msra.mxu0 %v5991_v54  ;;  %v6001_v21 = vunpack.c.l.s8.bf16 %v5839_v52  ;;  %v6000_v25 = vunpack.c.l.s8.bf16 %v5838_v15  ;;  %v6004_v63 = vunpack.c.h.s8.bf16 %v5839_v52  ;;  %v5845_v52 = vld [vmem:[%s9986_s18 + $0xc8] sm:$0xff] }
0x101c   : > { %6272 = vmatprep.subr.bf16.mxu0 %v5995_v42  ;;  %8863 = vtanh.f32 %v5689_v58  ;;  %v6003_v8 = vunpack.c.h.s8.bf16 %v5838_v15  ;;  %v6007_v34 = vunpack.c.l.s8.bf16 %v5842_v12  ;;  %v6006_v1 = vunpack.c.l.s8.bf16 %v5841_v32 }
0x101d   : > { %8865 = vtanh.f32 %v5701_v28  ;;  %v5846_v28 = vld [vmem:[%s9986_s18 + $0xd0] sm:$0xff]  ;;  %v6041_v15 = vunpack.c.h.s8.bf16 %v10912_v9  ;;  %v5849_v9 = vld [vmem:[%s9986_s18 + $0xe8] sm:$0xff] }
0x101e   : > { %8867 = vtanh.f32 %v5691_v17 }
0x101f   : > { %6273 = vmatpush1.bf16.msra.mxu0 %v5994_v5  ;;  %8869 = vtanh.f32 %v5703_v16 }
0x1020   : > { %6274 = vmatprep.subr.bf16.mxu0 %v5998_v51  ;;  %v6010_v51 = vunpack.c.h.s8.bf16 %v5842_v12 }
0x1022   : > { %v8856_v50 = vpop.eup %8855 }
0x1023   : > { %v8858_v13 = vpop.eup %8857  ;;  %6275 = vmatpush1.bf16.msra.mxu0 %v5997_v46  ;;  %v5736_v61 = vadd.f32 1.0, %v8856_v50  ;;  %v6014_v46 = vunpack.c.l.s8.bf16 %v5846_v28  ;;  %v6009_v50 = vunpack.c.h.s8.bf16 %v5841_v32 }
0x1024   : > { %v8860_v20 = vpop.eup %8859  ;;  %6276 = vmatprep.subr.bf16.mxu0 %v6001_v21  ;;  %v5738_v19 = vadd.f32 1.0, %v8858_v13  ;;  %v5861_v13 = vld [vmem:[%s9986_s18 + $0x148] sm:$0xff] }
0x1025   : > { %v8862_v48 = vpop.eup %8861  ;;  %v5748_v6 = vadd.f32 1.0, %v8860_v20  ;;  %v5760_v24 = vmul.f32 0.5, %v5736_v61  ;;  %v6017_v61 = vunpack.c.h.s8.bf16 %v5846_v28  ;;  %v6016_v20 = vunpack.c.h.s8.bf16 %v5845_v52  ;;  %v5853_v28 = vld [vmem:[%s9986_s18 + $0x108] sm:$0xff] }
0x1026   : > { %v8864_v55 = vpop.eup %8863  ;;  %v5750_v59 = vadd.f32 1.0, %v8862_v48  ;;  %v5762_v27 = vmul.f32 0.5, %v5738_v19  ;;  %v6020_v19 = vunpack.c.l.s8.bf16 %v5849_v9  ;;  %v6047_v48 = vunpack.c.h.s8.bf16 %v5861_v13 }
0x1027   : > { %v8866_v60 = vpop.eup %8865  ;;  %6277 = vmatpush1.bf16.msra.mxu0 %v6000_v25  ;;  %v5737_v7 = vadd.f32 1.0, %v8864_v55  ;;  %v5772_v23 = vmul.f32 0.5, %v5748_v6  ;;  %v5784_v47 = vmul.f32 %v5760_v24, %v10922_v14  ;;  %v5844_v25 = vld [vmem:[%s9986_s18 + $0xc0] sm:$0xff]  ;;  %v5847_v55 = vld [vmem:[%s9986_s18 + $0xd8] sm:$0xff] }
0x1028   : > { %v8868_v2 = vpop.eup %8867  ;;  %6278 = vmatprep.subr.bf16.mxu0 %v6004_v63  ;;  %v5749_v41 = vadd.f32 1.0, %v8866_v60  ;;  %v5774_v18 = vmul.f32 0.5, %v5750_v59  ;;  %v5786_v38 = vmul.f32 %v5762_v27, %v10924_v29  ;;  %v5848_v63 = vld [vmem:[%s9986_s18 + $0xe0] sm:$0xff]  ;;  %v6015_v12 = vunpack.c.h.s8.bf16 %v5844_v25 }
0x1029   : > { %v8870_v30 = vpop.eup %8869  ;;  %v5761_v40 = vmul.f32 0.5, %v5737_v7  ;;  %v5796_v57 = vmul.f32 %v5772_v23, %v10934_v45  ;;  %v5739_v43 = vadd.f32 1.0, %v8868_v2  ;;  %v6019_v6 = vunpack.c.l.s8.bf16 %v5848_v63  ;;  %v5864_v24 = vld [vmem:[%s9986_s18 + $0x160] sm:$0xff]  ;;  %v5851_v23 = vld [vmem:[%s9986_s18 + $0xf8] sm:$0xff] }
0x102a   : > { %v5773_v54 = vmul.f32 0.5, %v5749_v41  ;;  %v5751_v42 = vadd.f32 1.0, %v8870_v30  ;;  %v5798_v58 = vmul.f32 %v5774_v18, %v10936_v39  ;;  %v6023_v59 = vunpack.c.h.s8.bf16 %v5849_v9  ;;  %v5867_v18 = vld [vmem:[%s9986_s18 + $0x178] sm:$0xff]  ;;  %v5850_v30 = vld [vmem:[%s9986_s18 + $0xf0] sm:$0xff] }
0x102b   : > { %6279 = vmatpush1.bf16.msra.mxu0 %v6003_v8  ;;  %v5808_v62 = vpack.c.bf16 %v5796_v57, %v5784_v47  ;;  %v5763_v17 = vmul.f32 0.5, %v5739_v43  ;;  %v5785_v16 = vmul.f32 %v5761_v40, %v10926_v33  ;;  %v6050_v27 = vunpack.c.l.s8.bf16 %v5864_v24  ;;  %v5852_v8 = vld [vmem:[%s9986_s18 + $0x100] sm:$0xff]  ;;  %v5855_v43 = vld [vmem:[%s9986_s18 + $0x118] sm:$0xff] }
0x102c   : > { %6280 = vmatprep.subr.bf16.mxu0 %v6007_v34  ;;  %v5797_v14 = vmul.f32 %v5773_v54, %v10942_v35  ;;  %v5775_v45 = vmul.f32 0.5, %v5751_v42  ;;  %v10992_v5 = vpack.c.bf16 %v5798_v58, %v5786_v38  ;;  %v6013_v35 = vunpack.c.l.s8.bf16 %v5845_v52  ;;  %v5854_v42 = vld [vmem:[%s9986_s18 + $0x110] sm:$0xff] }
0x102d   : > { %v5787_v39 = vmul.f32 %v5763_v17, %v10928_v36  ;;  %v6044_v36 = vunpack.c.l.s8.bf16 %v5861_v13  ;;  %v6018_v60 = vunpack.c.l.s8.bf16 %v5847_v55  ;;  %v6022_v7 = vunpack.c.h.s8.bf16 %v5848_v63  ;;  %v5882_v17 = vld [vmem:[%s9986_s18 + $0x1f0] sm:$0xff] }
0x102e   : > { %v5809_v29 = vpack.c.bf16 %v5797_v14, %v5785_v16  ;;  %v5799_v21 = vmul.f32 %v5775_v45, %v10944_v49  ;;  %v6012_v49 = vunpack.c.l.s8.bf16 %v5844_v25  ;;  %v6026_v2 = vunpack.c.l.s8.bf16 %v5852_v8 }
0x102f   : > { %6281 = vmatpush1.bf16.msra.mxu0 %v6006_v1  ;;  %v6053_v34 = vunpack.c.h.s8.bf16 %v5864_v24  ;;  %v6021_v41 = vunpack.c.h.s8.bf16 %v5847_v55  ;;  %v6025_v32 = vunpack.c.l.s8.bf16 %v5851_v23  ;;  %v6029_v40 = vunpack.c.h.s8.bf16 %v5852_v8 }
0x1030   : > { %6284 = vmatprep.mubr.bf16.mxu0 %v5809_v29  ;;  %6542 = vmatprep.mubr.bf16.mxu1 %v5809_v29  ;;  %v5811_v33 = vpack.c.bf16 %v5799_v21, %v5787_v39  ;;  %v6056_v47 = vunpack.c.l.s8.bf16 %v5867_v18  ;;  %v6024_v57 = vunpack.c.l.s8.bf16 %v5850_v30  ;;  %v6028_v54 = vunpack.c.h.s8.bf16 %v5851_v23  ;;  %v5857_v29 = vld [vmem:[%s9986_s18 + $0x128] sm:$0xff] }
0x1031   : > { %6543 = vmatmul.mubr.bf16.vlgmr.msra.gmra.mrb[40].mxu1 %v5808_v62  ;;  %6282 = vmatprep.subr.bf16.mxu0 %v6010_v51  ;;  %v6032_v38 = vunpack.c.l.s8.bf16 %v5855_v43  ;;  %v6059_v58 = vunpack.c.h.s8.bf16 %v5867_v18  ;;  %v6027_v1 = vunpack.c.h.s8.bf16 %v5850_v30  ;;  %v6035_v16 = vunpack.c.h.s8.bf16 %v5855_v43  ;;  %v5870_v51 = vld [vmem:[%s9986_s18 + $0x190] sm:$0xff]  ;;  %v1960_v30 = vld [vmem:[%s9988_s28 + $0x80] sm:$0xff]  ;;  %v1961_v43 = vld [vmem:[%s9988_s28 + $0x88] sm:$0xff] }
0x1032   : > { %7887 = vmatpush3.bf16.msra.mxu1 %v6014_v46  ;;  %6583 = vmatprep.mubr.bf16.mxu1 %v5811_v33  ;;  %v6030_v14 = vunpack.c.l.s8.bf16 %v5853_v28  ;;  %v6086_v45 = vunpack.c.l.s8.bf16 %v5882_v17  ;;  %v6034_v52 = vunpack.c.h.s8.bf16 %v5854_v42  ;;  %v6062_v46 = vunpack.c.l.s8.bf16 %v5870_v51 }
0x1033   : > { %7888 = vmatprep.subr.bf16.mxu1 %v6041_v15  ;;  %6283 = vmatpush1.bf16.msra.mxu0 %v6009_v50  ;;  %v6033_v39 = vunpack.c.h.s8.bf16 %v5853_v28  ;;  %v6089_v21 = vunpack.c.h.s8.bf16 %v5882_v17  ;;  %v6037_v15 = vunpack.c.l.s8.bf16 %v5857_v29  ;;  %v5856_v50 = vld [vmem:[%s9986_s18 + $0x120] sm:$0xff] }
0x1034   : > { %6295 = vmatprep.subr.bf16.mxu0 %v6013_v35  ;;  %v6065_v35 = vunpack.c.h.s8.bf16 %v5870_v51  ;;  %v6036_v13 = vunpack.c.l.s8.bf16 %v5856_v50  ;;  %v11044_v51 = vld [vmem:[%s9986_s18 + $0x180] sm:$0xff] }
0x1036   : > { %7889 = vmatpush3.bf16.msra.mxu1 %v6017_v61  ;;  %6285 = vmatmul.mubr.bf16.vlgmr.msra.gmra.mrb[44].mxu0 %v5808_v62  ;;  %v6031_v62 = vunpack.c.l.s8.bf16 %v5854_v42  ;;  %v5873_v61 = vld [vmem:[%s9986_s18 + $0x1a8] sm:$0xff]  ;;  %v1963_v42 = vld [vmem:[%s9988_s28 + $0x98] sm:$0xff] }
0x1037   : > { %7890 = vmatprep.subr.bf16.mxu1 %v6044_v36  ;;  %6296 = vmatpush1.bf16.msra.mxu0 %v6012_v49  ;;  %v6040_v36 = vunpack.c.h.s8.bf16 %v5857_v29  ;;  %v5860_v49 = vld [vmem:[%s9986_s18 + $0x140] sm:$0xff]  ;;  %v6068_v9 = vunpack.c.l.s8.bf16 %v5873_v61 }
0x1038   : > { %6327 = vmatprep.mubr.bf16.mxu0 %v5811_v33  ;;  %6297 = vmatprep.subr.bf16.mxu0 %v6016_v20  ;;  %v5885_v33 = vld [vmem:[%s9986_s18 + $0x208] sm:$0xff]  ;;  %v6039_v20 = vunpack.c.h.s8.bf16 %v5856_v50  ;;  %v5551_v50 = vrot.slane %v1963_v42, %v10134_v26 }
0x1039   : > { %v6092_v25 = vunpack.c.l.s8.bf16 %v5885_v33  ;;  %v6095_v63 = vunpack.c.h.s8.bf16 %v5885_v33 }
0x103a   : > { %7891 = vmatpush3.bf16.msra.mxu1 %v6020_v19  ;;  %v6043_v19 = vunpack.c.l.s8.bf16 %v5860_v49 }
0x103b   : > { %7892 = vmatprep.subr.bf16.mxu1 %v6047_v48  ;;  %6298 = vmatpush1.bf16.msra.mxu0 %v6015_v12  ;;  %v5859_v48 = vld [vmem:[%s9986_s18 + $0x138] sm:$0xff]  ;;  %v5888_v12 = vld [vmem:[%s9986_s18 + $0x220] sm:$0xff] }
0x103c   : > { %6299 = vmatprep.subr.bf16.mxu0 %v6019_v6  ;;  %v6071_v6 = vunpack.c.h.s8.bf16 %v5873_v61  ;;  %v6042_v24 = vunpack.c.l.s8.bf16 %v5859_v48  ;;  %v6098_v55 = vunpack.c.l.s8.bf16 %v5888_v12  ;;  %v6101_v23 = vunpack.c.h.s8.bf16 %v5888_v12 }
0x103e   : > { %7893 = vmatpush3.bf16.msra.mxu1 %v6023_v59  ;;  %v5876_v59 = vld [vmem:[%s9986_s18 + $0x1c0] sm:$0xff] }
0x103f   : > { %7894 = vmatprep.subr.bf16.mxu1 %v6050_v27  ;;  %6300 = vmatpush1.bf16.msra.mxu0 %v6018_v60  ;;  %v6046_v27 = vunpack.c.h.s8.bf16 %v5860_v49  ;;  %v5863_v60 = vld [vmem:[%s9986_s18 + $0x158] sm:$0xff]  ;;  %v6074_v8 = vunpack.c.l.s8.bf16 %v5876_v59 }
0x1040   : > { %6301 = vmatprep.subr.bf16.mxu0 %v6022_v7  ;;  %v6045_v7 = vunpack.c.h.s8.bf16 %v5859_v48 }
0x1042   : > { %7895 = vmatpush3.bf16.msra.mxu1 %v6026_v2  ;;  %v6049_v2 = vunpack.c.l.s8.bf16 %v5863_v60 }
0x1043   : > { %7896 = vmatprep.subr.bf16.mxu1 %v6053_v34  ;;  %6302 = vmatpush1.bf16.msra.mxu0 %v6021_v41  ;;  %v5862_v34 = vld [vmem:[%s9986_s18 + $0x150] sm:$0xff]  ;;  %v5891_v41 = vld [vmem:[%s9986_s18 + $0x238] sm:$0xff] }
0x1044   : > { %6303 = vmatprep.subr.bf16.mxu0 %v6025_v32  ;;  %v6077_v32 = vunpack.c.h.s8.bf16 %v5876_v59  ;;  %v6048_v18 = vunpack.c.l.s8.bf16 %v5862_v34 }
0x1046   : > { %7897 = vmatpush3.bf16.msra.mxu1 %v6029_v40  ;;  %v6104_v40 = vunpack.c.l.s8.bf16 %v5891_v41 }
0x1047   : > { %7898 = vmatprep.subr.bf16.mxu1 %v6056_v47  ;;  %6304 = vmatpush1.bf16.msra.mxu0 %v6024_v57  ;;  %v5879_v47 = vld [vmem:[%s9986_s18 + $0x1d8] sm:$0xff]  ;;  %v1962_v57 = vld [vmem:[%s9988_s28 + $0x90] sm:$0xff] }
0x1048   : > { %6305 = vmatprep.subr.bf16.mxu0 %v6028_v54  ;;  %v6052_v54 = vunpack.c.h.s8.bf16 %v5863_v60  ;;  %v6080_v28 = vunpack.c.l.s8.bf16 %v5879_v47  ;;  %v5475_v17 = vrot.slane %v1962_v57, %v10270_v56  ;;  %v5547_v29 = vrot.slane %v1962_v57, %v10134_v26 }
0x104a   : > { %7899 = vmatpush3.bf16.msra.mxu1 %v6032_v38  ;;  %v11031_v38 = vld [vmem:[%s9986_s18 + $0x170] sm:$0xff] }
0x104b   : > { %7900 = vmatprep.subr.bf16.mxu1 %v6059_v58  ;;  %6306 = vmatpush1.bf16.msra.mxu0 %v6027_v1  ;;  %v5467_v58 = vrot.slane %v1960_v30, %v10270_v56  ;;  %v5539_v1 = vrot.slane %v1960_v30, %v10134_v26 }
0x104c   : > { %6307 = vmatprep.subr.bf16.mxu0 %v6031_v62  ;;  %v11036_v62 = vld [vmem:[%s9986_s18 + $0x168] sm:$0xff] }
0x104d   : > { %v6054_v33 = vunpack.c.l.s8.bf16 %v11036_v62 }
0x104e   : > { %7901 = vmatpush3.bf16.msra.mxu1 %v6035_v16  ;;  %v5471_v16 = vrot.slane %v1961_v43, %v10270_v56 }
0x104f   : > { %6308 = vmatpush1.bf16.msra.mxu0 %v6030_v14  ;;  %7908 = vmatprep.subr.bf16.mxu1 %v6086_v45  ;;  %v6051_v14 = vunpack.c.h.s8.bf16 %v5862_v34  ;;  %v11041_v45 = vld [vmem:[%s9986_s18 + $0x188] sm:$0xff] }
0x1050   : > { %6309 = vmatprep.subr.bf16.mxu0 %v6034_v52  ;;  %v6107_v52 = vunpack.c.h.s8.bf16 %v5891_v41 }
0x1051   : > { %6584 = vmatmul.mubr.bf16.vlgmr.msra.gmra.mrb[44].mxu1 %v10992_v5 }
0x1052   : > { %7909 = vmatpush3.bf16.msra.mxu1 %v6062_v46  ;;  %v5543_v46 = vrot.slane %v1961_v43, %v10134_v26 }
0x1053   : > { %6310 = vmatpush1.bf16.msra.mxu0 %v6033_v39  ;;  %7910 = vmatprep.subr.bf16.mxu1 %v6089_v21  ;;  %v5479_v39 = vrot.slane %v1963_v42, %v10270_v56  ;;  %v6055_v21 = vunpack.c.l.s8.bf16 %v11031_v38 }
0x1054   : > { %6311 = vmatprep.subr.bf16.mxu0 %v6037_v15 }
0x1056   : > { %7911 = vmatpush3.bf16.msra.mxu1 %v6065_v35  ;;  %v6058_v35 = vunpack.c.h.s8.bf16 %v11031_v38 }
0x1057   : > { %6312 = vmatpush1.bf16.msra.mxu0 %v6036_v13  ;;  %7912 = vmatprep.subr.bf16.mxu1 %v6092_v25  ;;  %v6057_v13 = vunpack.c.h.s8.bf16 %v11036_v62  ;;  %v11055_v25 = vld [vmem:[%s9986_s18 + $0x2b0] sm:$0xff] }
0x1058   : > { %6313 = vmatprep.subr.bf16.mxu0 %v6040_v36 }
0x105a   : > { %7913 = vmatpush3.bf16.msra.mxu1 %v6068_v9  ;;  %v6061_v9 = vunpack.c.l.s8.bf16 %v11041_v45 }
0x105b   : > { %6314 = vmatpush1.bf16.msra.mxu0 %v6039_v20  ;;  %7914 = vmatprep.subr.bf16.mxu1 %v6095_v63  ;;  %v6060_v20 = vunpack.c.l.s8.bf16 %v11044_v51  ;;  %v6083_v63 = vunpack.c.h.s8.bf16 %v5879_v47 }
0x105c   : > { %6315 = vmatprep.subr.bf16.mxu0 %v6043_v19 }
0x105e   : > { %7915 = vmatpush3.bf16.msra.mxu1 %v6071_v6 }
0x105f   : > { %6316 = vmatpush1.bf16.msra.mxu0 %v6042_v24  ;;  %7916 = vmatprep.subr.bf16.mxu1 %v6098_v55  ;;  %v6064_v24 = vunpack.c.h.s8.bf16 %v11041_v45  ;;  %v6063_v55 = vunpack.c.h.s8.bf16 %v11044_v51 }
0x1060   : > { %6317 = vmatprep.subr.bf16.mxu0 %v6046_v27 }
0x1062   : > { %7917 = vmatpush3.bf16.msra.mxu1 %v6074_v8 }
0x1063   : > { %6318 = vmatpush1.bf16.msra.mxu0 %v6045_v7  ;;  %7918 = vmatprep.subr.bf16.mxu1 %v6101_v23  ;;  %v6134_v23 = vunpack.c.l.s8.bf16 %v11055_v25 }
0x1064   : > { %6319 = vmatprep.subr.bf16.mxu0 %v6049_v2 }
0x1066   : > { %7919 = vmatpush3.bf16.msra.mxu1 %v6077_v32 }
0x1067   : > { %6320 = vmatpush1.bf16.msra.mxu0 %v6048_v18  ;;  %7920 = vmatprep.subr.bf16.mxu1 %v6104_v40 }
0x1068   : > { %6321 = vmatprep.subr.bf16.mxu0 %v6052_v54 }
0x1069   : > { %v5181_v15 = vpop.f32.mrb[36].mxu0 }
0x106a   : > { %v5500_v61 = vmul.f32 %v5467_v58, %v5181_v15  ;;  %v5267_v36 = vpop.f32.mrb[32].mxu1  ;;  %v5183_v49 = vpop.f32.mrb[37].mxu0  ;;  %7921 = vmatpush3.bf16.msra.mxu1 %v6080_v28 }
0x106b   : > { %v5502_v19 = vmul.f32 %v5475_v17, %v5267_v36  ;;  %v5501_v48 = vmul.f32 %v5471_v16, %v5183_v49  ;;  %v5269_v12 = vpop.f32.mrb[33].mxu1  ;;  %v5185_v6 = vpop.f32.mrb[38].mxu0  ;;  %6322 = vmatpush1.bf16.msra.mxu0 %v6051_v14  ;;  %7922 = vmatprep.subr.bf16.mxu1 %v6107_v52 }
0x106c   : > { %v11061_v59 = vadd.f32 %v5539_v1, %v5500_v61  ;;  %v5503_v27 = vmul.f32 %v5479_v39, %v5269_v12  ;;  %v5512_v60 = vmul.f32 %v5467_v58, %v5185_v6  ;;  %v5271_v8 = vpop.f32.mrb[34].mxu1  ;;  %v5187_v7 = vpop.f32.mrb[39].mxu0  ;;  %6323 = vmatprep.subr.bf16.mxu0 %v6055_v21 }
0x106d   : > { %v11064_v2 = vadd.f32 %v5547_v29, %v5502_v19  ;;  %v11066_v34 = vadd.f32 %v5543_v46, %v5501_v48  ;;  %v5514_v41 = vmul.f32 %v5475_v17, %v5271_v8  ;;  %v5513_v32 = vmul.f32 %v5471_v16, %v5187_v7  ;;  %v5273_v18 = vpop.f32.mrb[35].mxu1  ;;  %v5872_v19 = vld [vmem:[%s9986_s18 + $0x1a0] sm:$0xff] }
0x106e   : > { %v5596_v30 = vmul.f32 %v11061_v59, %v11061_v59  ;;  %v11070_v40 = vadd.f32 %v5551_v50, %v5503_v27  ;;  %v11072_v47 = vadd.f32 %v5539_v1, %v5512_v60  ;;  %v5515_v57 = vmul.f32 %v5479_v39, %v5273_v18  ;;  %7923 = vmatpush3.bf16.msra.mxu1 %v6083_v63 }
0x106f   : > { %v5598_v43 = vmul.f32 %v11064_v2, %v11064_v2  ;;  %v5597_v54 = vmul.f32 %v11066_v34, %v11066_v34  ;;  %v11078_v42 = vadd.f32 %v5547_v29, %v5514_v41  ;;  %v11080_v38 = vadd.f32 %v5543_v46, %v5513_v32  ;;  %6324 = vmatpush1.bf16.msra.mxu0 %v6054_v33 }
0x1070   : > { %v5620_v58 = vmul.f32 %v5596_v30, %v11061_v59  ;;  %v5599_v62 = vmul.f32 %v11070_v40, %v11070_v40  ;;  %v5608_v1 = vmul.f32 %v11072_v47, %v11072_v47  ;;  %v11087_v28 = vadd.f32 %v5551_v50, %v5515_v57  ;;  %6325 = vmatprep.subr.bf16.mxu0 %v6058_v35 }
0x1071   : > { %v5622_v17 = vmul.f32 %v5598_v43, %v11064_v2  ;;  %v5621_v16 = vmul.f32 %v5597_v54, %v11066_v34  ;;  %v5610_v14 = vmul.f32 %v11078_v42, %v11078_v42  ;;  %v5609_v52 = vmul.f32 %v11080_v38, %v11080_v38  ;;  %7930 = vmatprep.subr.bf16.mxu1 %v6134_v23  ;;  %v5871_v43 = vld [vmem:[%s9986_s18 + $0x198] sm:$0xff] }
0x1072   : > { %v5644_v29 = vmul.f32 0.044715, %v5620_v58  ;;  %v5623_v46 = vmul.f32 %v5599_v62, %v11070_v40  ;;  %v5632_v39 = vmul.f32 %v5608_v1, %v11072_v47  ;;  %v5611_v21 = vmul.f32 %v11087_v28, %v11087_v28 }
0x1073   : > { %v5646_v15 = vmul.f32 0.044715, %v5622_v17  ;;  %v5645_v50 = vmul.f32 0.044715, %v5621_v16  ;;  %v5634_v33 = vmul.f32 %v5610_v14, %v11078_v42  ;;  %v5633_v35 = vmul.f32 %v5609_v52, %v11080_v38  ;;  %6326 = vmatpush1.bf16.msra.mxu0 %v6057_v13  ;;  %v5875_v17 = vld [vmem:[%s9986_s18 + $0x1b8] sm:$0xff]  ;;  %v5874_v16 = vld [vmem:[%s9986_s18 + $0x1b0] sm:$0xff] }
0x1074   : > { %v5668_v61 = vadd.f32 %v5644_v29, %v11061_v59  ;;  %v5647_v36 = vmul.f32 0.044715, %v5623_v46  ;;  %v5656_v49 = vmul.f32 0.044715, %v5632_v39  ;;  %v5635_v63 = vmul.f32 %v5611_v21, %v11087_v28  ;;  %6338 = vmatprep.subr.bf16.mxu0 %v6061_v9 }
0x1075   : > { %v5670_v48 = vadd.f32 %v5646_v15, %v11064_v2  ;;  %v5669_v12 = vadd.f32 %v5645_v50, %v11066_v34  ;;  %v5658_v6 = vmul.f32 0.044715, %v5634_v33  ;;  %v5657_v27 = vmul.f32 0.044715, %v5633_v35  ;;  %v5878_v15 = vld [vmem:[%s9986_s18 + $0x1d0] sm:$0xff] }
0x1076   : > { %v5692_v60 = vmul.f32 0.7978846, %v5668_v61  ;;  %v5671_v8 = vadd.f32 %v5647_v36, %v11070_v40  ;;  %v5680_v13 = vadd.f32 %v5656_v49, %v11072_v47  ;;  %v5659_v7 = vmul.f32 0.044715, %v5635_v63  ;;  %6328 = vmatmul.mubr.bf16.vlgmr.msra.gmra.mrb[44].mxu0 %v10992_v5 }
0x1077   : > { %v5694_v23 = vmul.f32 0.7978846, %v5670_v48  ;;  %v5682_v41 = vadd.f32 %v5658_v6, %v11078_v42  ;;  %v5681_v9 = vadd.f32 %v5657_v27, %v11080_v38  ;;  %6339 = vmatpush1.bf16.msra.mxu0 %v6060_v20  ;;  %v6067_v32 = vunpack.c.l.s8.bf16 %v5872_v19 }
0x1078   : > { %8871 = vtanh.f32 %v5692_v60  ;;  %v5693_v18 = vmul.f32 0.7978846, %v5669_v12  ;;  %v5704_v30 = vmul.f32 0.7978846, %v5680_v13  ;;  %v5683_v57 = vadd.f32 %v5659_v7, %v11087_v28  ;;  %6340 = vmatprep.subr.bf16.mxu0 %v6064_v24  ;;  %v5877_v60 = vld [vmem:[%s9986_s18 + $0x1c8] sm:$0xff] }
0x1079   : > { %8873 = vtanh.f32 %v5694_v23  ;;  %v5706_v5 = vmul.f32 0.7978846, %v5682_v41  ;;  %v5705_v54 = vmul.f32 0.7978846, %v5681_v9  ;;  %v5695_v58 = vmul.f32 0.7978846, %v5671_v8 }
0x107a   : > { %8875 = vtanh.f32 %v5704_v30  ;;  %v5707_v62 = vmul.f32 0.7978846, %v5683_v57  ;;  %v6066_v20 = vunpack.c.l.s8.bf16 %v5871_v43  ;;  %v6070_v1 = vunpack.c.h.s8.bf16 %v5872_v19 }
0x107b   : > { %8877 = vtanh.f32 %v5706_v5  ;;  %6341 = vmatpush1.bf16.msra.mxu0 %v6063_v55  ;;  %v6069_v45 = vunpack.c.h.s8.bf16 %v5871_v43  ;;  %v6073_v24 = vunpack.c.l.s8.bf16 %v5875_v17  ;;  %v6072_v29 = vunpack.c.l.s8.bf16 %v5874_v16 }
0x107c   : > { %6342 = vmatprep.subr.bf16.mxu0 %v6067_v32  ;;  %8879 = vtanh.f32 %v5693_v18  ;;  %v6076_v46 = vunpack.c.h.s8.bf16 %v5875_v17  ;;  %v6075_v63 = vunpack.c.h.s8.bf16 %v5874_v16  ;;  %v6079_v6 = vunpack.c.l.s8.bf16 %v5878_v15 }
0x107d   : > { %8881 = vtanh.f32 %v5705_v54  ;;  %v6078_v43 = vunpack.c.l.s8.bf16 %v5877_v60  ;;  %v5894_v54 = vld [vmem:[%s9986_s18 + $0x250] sm:$0xff]  ;;  %v6137_v16 = vunpack.c.h.s8.bf16 %v11055_v25 }
0x107e   : > { %8883 = vtanh.f32 %v5695_v58 }
0x107f   : > { %6343 = vmatpush1.bf16.msra.mxu0 %v6066_v20  ;;  %8885 = vtanh.f32 %v5707_v62 }
0x1080   : > { %6344 = vmatprep.subr.bf16.mxu0 %v6070_v1  ;;  %v6082_v1 = vunpack.c.h.s8.bf16 %v5878_v15 }
0x1082   : > { %v8872_v14 = vpop.eup %8871 }
0x1083   : > { %v8874_v52 = vpop.eup %8873  ;;  %6345 = vmatpush1.bf16.msra.mxu0 %v6069_v45  ;;  %v5740_v51 = vadd.f32 1.0, %v8872_v14  ;;  %v6081_v14 = vunpack.c.h.s8.bf16 %v5877_v60 }
0x1084   : > { %v8876_v55 = vpop.eup %8875  ;;  %6346 = vmatprep.subr.bf16.mxu0 %v6073_v24  ;;  %v5742_v39 = vadd.f32 1.0, %v8874_v52  ;;  %v5909_v52 = vld [vmem:[%s9986_s18 + $0x2c8] sm:$0xff] }
0x1085   : > { %v8878_v21 = vpop.eup %8877  ;;  %v5752_v50 = vadd.f32 1.0, %v8876_v55  ;;  %v5764_v33 = vmul.f32 0.5, %v5740_v51  ;;  %v6140_v25 = vunpack.c.l.s8.bf16 %v5909_v52  ;;  %v5897_v51 = vld [vmem:[%s9986_s18 + $0x268] sm:$0xff] }
0x1086   : > { %v8880_v35 = vpop.eup %8879  ;;  %v5754_v61 = vadd.f32 1.0, %v8878_v21  ;;  %v5766_v36 = vmul.f32 0.5, %v5742_v39  ;;  %v6116_v39 = vunpack.c.l.s8.bf16 %v5897_v51  ;;  %v6143_v21 = vunpack.c.h.s8.bf16 %v5909_v52  ;;  %v5933_v52 = vld [vmem:[%s9986_s18 + $0x388] sm:$0xff] }
0x1087   : > { %v8882_v49 = vpop.eup %8881  ;;  %6347 = vmatpush1.bf16.msra.mxu0 %v6072_v29  ;;  %v5741_v19 = vadd.f32 1.0, %v8880_v35  ;;  %v5776_v48 = vmul.f32 0.5, %v5752_v50  ;;  %v5788_v23 = vmul.f32 %v5764_v33, %v11061_v59  ;;  %v5880_v29 = vld [vmem:[%s9986_s18 + $0x1e0] sm:$0xff]  ;;  %v5883_v35 = vld [vmem:[%s9986_s18 + $0x1f8] sm:$0xff] }
0x1088   : > { %v8884_v12 = vpop.eup %8883  ;;  %6348 = vmatprep.subr.bf16.mxu0 %v6076_v46  ;;  %v5753_v27 = vadd.f32 1.0, %v8882_v49  ;;  %v5778_v8 = vmul.f32 0.5, %v5754_v61  ;;  %v5790_v30 = vmul.f32 %v5766_v36, %v11064_v2  ;;  %v5881_v2 = vld [vmem:[%s9986_s18 + $0x1e8] sm:$0xff]  ;;  %v5884_v46 = vld [vmem:[%s9986_s18 + $0x200] sm:$0xff]  ;;  %v6087_v15 = vunpack.c.h.s8.bf16 %v5880_v29 }
0x1089   : > { %v8886_v13 = vpop.eup %8885  ;;  %v5765_v7 = vmul.f32 0.5, %v5741_v19  ;;  %v5800_v41 = vmul.f32 %v5776_v48, %v11072_v47  ;;  %v5743_v9 = vadd.f32 1.0, %v8884_v12  ;;  %v6088_v55 = vunpack.c.h.s8.bf16 %v5881_v2  ;;  %v5912_v33 = vld [vmem:[%s9986_s18 + $0x2e0] sm:$0xff]  ;;  %v5887_v48 = vld [vmem:[%s9986_s18 + $0x218] sm:$0xff] }
0x108a   : > { %v5777_v32 = vmul.f32 0.5, %v5753_v27  ;;  %v5755_v18 = vadd.f32 1.0, %v8886_v13  ;;  %v5802_v57 = vmul.f32 %v5778_v8, %v11078_v42  ;;  %v6110_v42 = vunpack.c.l.s8.bf16 %v5894_v54  ;;  %v5915_v8 = vld [vmem:[%s9986_s18 + $0x2f8] sm:$0xff]  ;;  %v5886_v13 = vld [vmem:[%s9986_s18 + $0x210] sm:$0xff] }
0x108b   : > { %6349 = vmatpush1.bf16.msra.mxu0 %v6075_v63  ;;  %v11127_v5 = vpack.c.bf16 %v5800_v41, %v5788_v23  ;;  %v5767_v58 = vmul.f32 0.5, %v5743_v9  ;;  %v5789_v62 = vmul.f32 %v5765_v7, %v11066_v34  ;;  %v6091_v50 = vunpack.c.l.s8.bf16 %v5884_v46  ;;  %v5900_v63 = vld [vmem:[%s9986_s18 + $0x280] sm:$0xff]  ;;  %v5903_v9 = vld [vmem:[%s9986_s18 + $0x298] sm:$0xff] }
0x108c   : > { %6350 = vmatprep.subr.bf16.mxu0 %v6079_v6  ;;  %v5801_v59 = vmul.f32 %v5777_v32, %v11080_v38  ;;  %v5779_v47 = vmul.f32 0.5, %v5755_v18  ;;  %v11132_v20 = vpack.c.bf16 %v5802_v57, %v5790_v30  ;;  %v6085_v38 = vunpack.c.l.s8.bf16 %v5881_v2  ;;  %v5890_v18 = vld [vmem:[%s9986_s18 + $0x230] sm:$0xff] }
0x108d   : > { %v5791_v45 = vmul.f32 %v5767_v58, %v11070_v40  ;;  %v6113_v40 = vunpack.c.h.s8.bf16 %v5894_v54  ;;  %v6119_v61 = vunpack.c.h.s8.bf16 %v5897_v51  ;;  %v6146_v36 = vunpack.c.l.s8.bf16 %v5912_v33  ;;  %v5889_v58 = vld [vmem:[%s9986_s18 + $0x228] sm:$0xff]  ;;  %v5918_v2 = vld [vmem:[%s9986_s18 + $0x310] sm:$0xff] }
0x108e   : > { %v5813_v17 = vpack.c.bf16 %v5801_v59, %v5789_v62  ;;  %v5803_v24 = vmul.f32 %v5779_v47, %v11087_v28  ;;  %v6084_v28 = vunpack.c.l.s8.bf16 %v5880_v29  ;;  %v6090_v49 = vunpack.c.l.s8.bf16 %v5883_v35  ;;  %v5930_v62 = vld [vmem:[%s9986_s18 + $0x370] sm:$0xff] }
0x108f   : > { %6351 = vmatpush1.bf16.msra.mxu0 %v6078_v43  ;;  %v6094_v19 = vunpack.c.h.s8.bf16 %v5884_v46  ;;  %v6122_v12 = vunpack.c.l.s8.bf16 %v5900_v63  ;;  %v6149_v6 = vunpack.c.h.s8.bf16 %v5912_v33  ;;  %v6093_v27 = vunpack.c.h.s8.bf16 %v5883_v35  ;;  %v5936_v33 = vld [vmem:[%s9986_s18 + $0x3a0] sm:$0xff] }
0x1090   : > { %6370 = vmatprep.mubr.bf16.mxu0 %v5813_v17  ;;  %6624 = vmatprep.mubr.bf16.mxu1 %v5813_v17  ;;  %v11138_v34 = vpack.c.bf16 %v5803_v24, %v5791_v45  ;;  %v6097_v60 = vunpack.c.l.s8.bf16 %v5887_v48  ;;  %v6125_v7 = vunpack.c.h.s8.bf16 %v5900_v63  ;;  %v6152_v23 = vunpack.c.l.s8.bf16 %v5915_v8 }
0x1091   : > { %6625 = vmatmul.mubr.bf16.vlgmr.msra.gmra.mrb[48].mxu1 %v11127_v5  ;;  %6352 = vmatprep.subr.bf16.mxu0 %v6082_v1  ;;  %v6096_v41 = vunpack.c.l.s8.bf16 %v5886_v13  ;;  %v6100_v32 = vunpack.c.h.s8.bf16 %v5887_v48  ;;  %v6128_v30 = vunpack.c.l.s8.bf16 %v5903_v9  ;;  %v6155_v57 = vunpack.c.h.s8.bf16 %v5915_v8 }
0x1092   : > { %7931 = vmatpush3.bf16.msra.mxu1 %v6110_v42  ;;  %6665 = vmatprep.mubr.bf16.mxu1 %v11138_v34  ;;  %v6099_v43 = vunpack.c.h.s8.bf16 %v5886_v13  ;;  %v6103_v54 = vunpack.c.l.s8.bf16 %v5890_v18  ;;  %v6131_v59 = vunpack.c.h.s8.bf16 %v5903_v9  ;;  %v6102_v47 = vunpack.c.l.s8.bf16 %v5889_v58  ;;  %v5893_v42 = vld [vmem:[%s9986_s18 + $0x248] sm:$0xff]  ;;  %v1964_v13 = vld [vmem:[%s9988_s28 + $0xa0] sm:$0xff] }
0x1093   : > { %7932 = vmatprep.subr.bf16.mxu1 %v6137_v16  ;;  %6353 = vmatpush1.bf16.msra.mxu0 %v6081_v14  ;;  %v6182_v1 = vunpack.c.l.s8.bf16 %v5930_v62  ;;  %v6106_v17 = vunpack.c.h.s8.bf16 %v5890_v18  ;;  %v6158_v45 = vunpack.c.l.s8.bf16 %v5918_v2  ;;  %v6105_v24 = vunpack.c.h.s8.bf16 %v5889_v58  ;;  %v1965_v9 = vld [vmem:[%s9988_s28 + $0xa8] sm:$0xff]  ;;  %v1967_v18 = vld [vmem:[%s9988_s28 + $0xb8] sm:$0xff] }
0x1094   : > { %6354 = vmatprep.subr.bf16.mxu0 %v6085_v38  ;;  %v6185_v16 = vunpack.c.h.s8.bf16 %v5930_v62  ;;  %v6109_v14 = vunpack.c.l.s8.bf16 %v5893_v42  ;;  %v5892_v38 = vld [vmem:[%s9986_s18 + $0x240] sm:$0xff]  ;;  %v6161_v29 = vunpack.c.h.s8.bf16 %v5918_v2  ;;  %v6188_v51 = vunpack.c.l.s8.bf16 %v5933_v52 }
0x1095   : > { %v6197_v48 = vunpack.c.h.s8.bf16 %v5936_v33  ;;  %v11190_v2 = vld [vmem:[%s9986_s18 + $0x2a0] sm:$0xff] }
0x1096   : > { %7933 = vmatpush3.bf16.msra.mxu1 %v6113_v40  ;;  %v6108_v40 = vunpack.c.l.s8.bf16 %v5892_v38 }
0x1097   : > { %7934 = vmatprep.subr.bf16.mxu1 %v6140_v25  ;;  %6355 = vmatpush1.bf16.msra.mxu0 %v6084_v28  ;;  %v5921_v25 = vld [vmem:[%s9986_s18 + $0x328] sm:$0xff]  ;;  %v6112_v28 = vunpack.c.h.s8.bf16 %v5893_v42 }
0x1098   : > { %6356 = vmatprep.subr.bf16.mxu0 %v6088_v55  ;;  %v5896_v55 = vld [vmem:[%s9986_s18 + $0x260] sm:$0xff]  ;;  %v6164_v46 = vunpack.c.l.s8.bf16 %v5921_v25  ;;  %v6167_v35 = vunpack.c.h.s8.bf16 %v5921_v25  ;;  %v11201_v25 = vld [vmem:[%s9986_s18 + $0x430] sm:$0xff] }
0x109a   : > { %7935 = vmatpush3.bf16.msra.mxu1 %v6116_v39  ;;  %v6111_v39 = vunpack.c.h.s8.bf16 %v5892_v38  ;;  %v5567_v38 = vrot.slane %v1967_v18, %v10134_v26 }
0x109b   : > { %7936 = vmatprep.subr.bf16.mxu1 %v6143_v21  ;;  %6357 = vmatpush1.bf16.msra.mxu0 %v6087_v15  ;;  %v6191_v21 = vunpack.c.h.s8.bf16 %v5933_v52  ;;  %v6115_v15 = vunpack.c.l.s8.bf16 %v5896_v55 }
0x109c   : > { %6358 = vmatprep.subr.bf16.mxu0 %v6091_v50  ;;  %v5895_v50 = vld [vmem:[%s9986_s18 + $0x258] sm:$0xff] }
0x109e   : > { %7937 = vmatpush3.bf16.msra.mxu1 %v6119_v61  ;;  %v6114_v61 = vunpack.c.l.s8.bf16 %v5895_v50 }
0x109f   : > { %7938 = vmatprep.subr.bf16.mxu1 %v6146_v36  ;;  %6359 = vmatpush1.bf16.msra.mxu0 %v6090_v49  ;;  %v5924_v36 = vld [vmem:[%s9986_s18 + $0x340] sm:$0xff]  ;;  %v6118_v49 = vunpack.c.h.s8.bf16 %v5896_v55 }
0x10a0   : > { %6360 = vmatprep.subr.bf16.mxu0 %v6094_v19  ;;  %v6170_v63 = vunpack.c.l.s8.bf16 %v5924_v36  ;;  %v6117_v19 = vunpack.c.h.s8.bf16 %v5895_v50 }
0x10a2   : > { %7939 = vmatpush3.bf16.msra.mxu1 %v6122_v12 }
0x10a3   : > { %7940 = vmatprep.subr.bf16.mxu1 %v6149_v6  ;;  %6361 = vmatpush1.bf16.msra.mxu0 %v6093_v27  ;;  %v5898_v6 = vld [vmem:[%s9986_s18 + $0x270] sm:$0xff]  ;;  %v5939_v27 = vld [vmem:[%s9986_s18 + $0x3b8] sm:$0xff] }
0x10a4   : > { %6362 = vmatprep.subr.bf16.mxu0 %v6097_v60  ;;  %v6173_v60 = vunpack.c.h.s8.bf16 %v5924_v36  ;;  %v6120_v8 = vunpack.c.l.s8.bf16 %v5898_v6 }
0x10a6   : > { %7941 = vmatpush3.bf16.msra.mxu1 %v6125_v7  ;;  %v6200_v7 = vunpack.c.l.s8.bf16 %v5939_v27 }
0x10a7   : > { %7942 = vmatprep.subr.bf16.mxu1 %v6152_v23  ;;  %6363 = vmatpush1.bf16.msra.mxu0 %v6096_v41  ;;  %v5927_v23 = vld [vmem:[%s9986_s18 + $0x358] sm:$0xff]  ;;  %v1966_v41 = vld [vmem:[%s9988_s28 + $0xb0] sm:$0xff] }
0x10a8   : > { %6364 = vmatprep.subr.bf16.mxu0 %v6100_v32  ;;  %v6176_v58 = vunpack.c.l.s8.bf16 %v5927_v23  ;;  %v5491_v62 = vrot.slane %v1966_v41, %v10270_v56  ;;  %v5563_v42 = vrot.slane %v1966_v41, %v10134_v26 }
0x10aa   : > { %7943 = vmatpush3.bf16.msra.mxu1 %v6128_v30  ;;  %v11177_v30 = vld [vmem:[%s9986_s18 + $0x290] sm:$0xff] }
0x10ab   : > { %7944 = vmatprep.subr.bf16.mxu1 %v6155_v57  ;;  %6365 = vmatpush1.bf16.msra.mxu0 %v6099_v43  ;;  %v5483_v57 = vrot.slane %v1964_v13, %v10270_v56  ;;  %v5555_v43 = vrot.slane %v1964_v13, %v10134_v26 }
0x10ac   : > { %6366 = vmatprep.subr.bf16.mxu0 %v6103_v54  ;;  %v11182_v54 = vld [vmem:[%s9986_s18 + $0x288] sm:$0xff] }
0x10ad   : > { %v6126_v52 = vunpack.c.l.s8.bf16 %v11182_v54 }
0x10ae   : > { %7945 = vmatpush3.bf16.msra.mxu1 %v6131_v59  ;;  %v5487_v59 = vrot.slane %v1965_v9, %v10270_v56 }
0x10af   : > { %6367 = vmatpush1.bf16.msra.mxu0 %v6102_v47  ;;  %7952 = vmatprep.subr.bf16.mxu1 %v6182_v1  ;;  %v6123_v47 = vunpack.c.h.s8.bf16 %v5898_v6  ;;  %v11187_v1 = vld [vmem:[%s9986_s18 + $0x2a8] sm:$0xff] }
0x10b0   : > { %6368 = vmatprep.subr.bf16.mxu0 %v6106_v17  ;;  %v6203_v17 = vunpack.c.h.s8.bf16 %v5939_v27 }
0x10b1   : > { %6666 = vmatmul.mubr.bf16.vlgmr.msra.gmra.mrb[52].mxu1 %v11132_v20 }
0x10b2   : > { %7953 = vmatpush3.bf16.msra.mxu1 %v6158_v45  ;;  %v5559_v45 = vrot.slane %v1965_v9, %v10134_v26 }
0x10b3   : > { %6369 = vmatpush1.bf16.msra.mxu0 %v6105_v24  ;;  %7954 = vmatprep.subr.bf16.mxu1 %v6185_v16  ;;  %v5495_v24 = vrot.slane %v1967_v18, %v10270_v56  ;;  %v6127_v16 = vunpack.c.l.s8.bf16 %v11177_v30 }
0x10b4   : > { %6381 = vmatprep.subr.bf16.mxu0 %v6109_v14 }
0x10b6   : > { %6371 = vmatmul.mubr.bf16.vlgmr.msra.gmra.mrb[44].mxu0 %v11127_v5  ;;  %7955 = vmatpush3.bf16.msra.mxu1 %v6161_v29  ;;  %v6194_v5 = vunpack.c.l.s8.bf16 %v5936_v33  ;;  %v6130_v29 = vunpack.c.h.s8.bf16 %v11177_v30 }
0x10b7   : > { %6382 = vmatpush1.bf16.msra.mxu0 %v6108_v40  ;;  %6413 = vmatprep.mubr.bf16.mxu0 %v11138_v34  ;;  %v5899_v34 = vld [vmem:[%s9986_s18 + $0x278] sm:$0xff]  ;;  %v6129_v40 = vunpack.c.h.s8.bf16 %v11182_v54 }
0x10b8   : > { %6383 = vmatprep.subr.bf16.mxu0 %v6112_v28  ;;  %7956 = vmatprep.subr.bf16.mxu1 %v6188_v51  ;;  %v6121_v12 = vunpack.c.l.s8.bf16 %v5899_v34  ;;  %v6124_v32 = vunpack.c.h.s8.bf16 %v5899_v34 }
0x10ba   : > { %7957 = vmatpush3.bf16.msra.mxu1 %v6164_v46  ;;  %v6133_v46 = vunpack.c.l.s8.bf16 %v11187_v1 }
0x10bb   : > { %6384 = vmatpush1.bf16.msra.mxu0 %v6111_v39  ;;  %7958 = vmatprep.subr.bf16.mxu1 %v6191_v21  ;;  %v6132_v39 = vunpack.c.l.s8.bf16 %v11190_v2  ;;  %v6179_v21 = vunpack.c.h.s8.bf16 %v5927_v23 }
0x10bc   : > { %6385 = vmatprep.subr.bf16.mxu0 %v6115_v15 }
0x10be   : > { %7959 = vmatpush3.bf16.msra.mxu1 %v6167_v35 }
0x10bf   : > { %6386 = vmatpush1.bf16.msra.mxu0 %v6114_v61  ;;  %7960 = vmatprep.subr.bf16.mxu1 %v6194_v5  ;;  %v6136_v61 = vunpack.c.h.s8.bf16 %v11187_v1  ;;  %v6135_v5 = vunpack.c.h.s8.bf16 %v11190_v2 }
0x10c0   : > { %6387 = vmatprep.subr.bf16.mxu0 %v6118_v49 }
0x10c2   : > { %7961 = vmatpush3.bf16.msra.mxu1 %v6170_v63 }
0x10c3   : > { %6388 = vmatpush1.bf16.msra.mxu0 %v6117_v19  ;;  %7962 = vmatprep.subr.bf16.mxu1 %v6197_v48  ;;  %v6230_v48 = vunpack.c.l.s8.bf16 %v11201_v25 }
0x10c4   : > { %6389 = vmatprep.subr.bf16.mxu0 %v6121_v12 }
0x10c6   : > { %7963 = vmatpush3.bf16.msra.mxu1 %v6173_v60 }
0x10c7   : > { %6390 = vmatpush1.bf16.msra.mxu0 %v6120_v8  ;;  %7964 = vmatprep.subr.bf16.mxu1 %v6200_v7 }
0x10c8   : > { %6391 = vmatprep.subr.bf16.mxu0 %v6124_v32 }
0x10c9   : > { %v5353_v14 = vpop.f32.mrb[40].mxu0 }
0x10ca   : > { %v5504_v28 = vmul.f32 %v5483_v57, %v5353_v14  ;;  %v5439_v51 = vpop.f32.mrb[36].mxu1  ;;  %v5355_v55 = vpop.f32.mrb[41].mxu0  ;;  %7965 = vmatpush3.bf16.msra.mxu1 %v6176_v58 }
0x10cb   : > { %v5506_v15 = vmul.f32 %v5491_v62, %v5439_v51  ;;  %v5505_v50 = vmul.f32 %v5487_v59, %v5355_v55  ;;  %v5441_v33 = vpop.f32.mrb[37].mxu1  ;;  %v5357_v35 = vpop.f32.mrb[42].mxu0  ;;  %6392 = vmatpush1.bf16.msra.mxu0 %v6123_v47  ;;  %7966 = vmatprep.subr.bf16.mxu1 %v6203_v17 }
0x10cc   : > { %v11207_v36 = vadd.f32 %v5555_v43, %v5504_v28  ;;  %v5507_v49 = vmul.f32 %v5495_v24, %v5441_v33  ;;  %v5516_v34 = vmul.f32 %v5483_v57, %v5357_v35  ;;  %v5443_v63 = vpop.f32.mrb[38].mxu1  ;;  %v5359_v19 = vpop.f32.mrb[43].mxu0  ;;  %6393 = vmatprep.subr.bf16.mxu0 %v6127_v16 }
0x10cd   : > { %v11210_v12 = vadd.f32 %v5563_v42, %v5506_v15  ;;  %v11212_v6 = vadd.f32 %v5559_v45, %v5505_v50  ;;  %v5518_v27 = vmul.f32 %v5491_v62, %v5443_v63  ;;  %v5517_v60 = vmul.f32 %v5487_v59, %v5359_v19  ;;  %v5445_v8 = vpop.f32.mrb[39].mxu1  ;;  %v5908_v15 = vld [vmem:[%s9986_s18 + $0x2c0] sm:$0xff] }
0x10ce   : > { %v5600_v13 = vmul.f32 %v11207_v36, %v11207_v36  ;;  %v11216_v7 = vadd.f32 %v5567_v38, %v5507_v49  ;;  %v11218_v23 = vadd.f32 %v5555_v43, %v5516_v34  ;;  %v5519_v41 = vmul.f32 %v5495_v24, %v5445_v8  ;;  %7967 = vmatpush3.bf16.msra.mxu1 %v6179_v21 }
0x10cf   : > { %v5602_v9 = vmul.f32 %v11210_v12, %v11210_v12  ;;  %v5601_v32 = vmul.f32 %v11212_v6, %v11212_v6  ;;  %v11224_v18 = vadd.f32 %v5563_v42, %v5518_v27  ;;  %v11226_v30 = vadd.f32 %v5559_v45, %v5517_v60  ;;  %6394 = vmatpush1.bf16.msra.mxu0 %v6126_v52 }
0x10d0   : > { %v5624_v57 = vmul.f32 %v5600_v13, %v11207_v36  ;;  %v5603_v54 = vmul.f32 %v11216_v7, %v11216_v7  ;;  %v5612_v43 = vmul.f32 %v11218_v23, %v11218_v23  ;;  %v11233_v58 = vadd.f32 %v5567_v38, %v5519_v41  ;;  %6395 = vmatprep.subr.bf16.mxu0 %v6130_v29 }
0x10d1   : > { %v5626_v62 = vmul.f32 %v5602_v9, %v11210_v12  ;;  %v5625_v59 = vmul.f32 %v5601_v32, %v11212_v6  ;;  %v5614_v47 = vmul.f32 %v11224_v18, %v11224_v18  ;;  %v5613_v17 = vmul.f32 %v11226_v30, %v11226_v30  ;;  %7974 = vmatprep.subr.bf16.mxu1 %v6230_v48  ;;  %v5907_v9 = vld [vmem:[%s9986_s18 + $0x2b8] sm:$0xff] }
0x10d2   : > { %v5648_v42 = vmul.f32 0.044715, %v5624_v57  ;;  %v5627_v45 = vmul.f32 %v5603_v54, %v11216_v7  ;;  %v5636_v24 = vmul.f32 %v5612_v43, %v11218_v23  ;;  %v5615_v16 = vmul.f32 %v11233_v58, %v11233_v58 }
0x10d3   : > { %v5650_v14 = vmul.f32 0.044715, %v5626_v62  ;;  %v5649_v38 = vmul.f32 0.044715, %v5625_v59  ;;  %v5638_v52 = vmul.f32 %v5614_v47, %v11224_v18  ;;  %v5637_v29 = vmul.f32 %v5613_v17, %v11226_v30  ;;  %6396 = vmatpush1.bf16.msra.mxu0 %v6129_v40  ;;  %v5911_v59 = vld [vmem:[%s9986_s18 + $0x2d8] sm:$0xff]  ;;  %v5910_v47 = vld [vmem:[%s9986_s18 + $0x2d0] sm:$0xff] }
0x10d4   : > { %v5672_v28 = vadd.f32 %v5648_v42, %v11207_v36  ;;  %v5651_v51 = vmul.f32 0.044715, %v5627_v45  ;;  %v5660_v55 = vmul.f32 0.044715, %v5636_v24  ;;  %v5639_v21 = vmul.f32 %v5615_v16, %v11233_v58  ;;  %6397 = vmatprep.subr.bf16.mxu0 %v6133_v46 }
0x10d5   : > { %v5674_v50 = vadd.f32 %v5650_v14, %v11210_v12  ;;  %v5673_v33 = vadd.f32 %v5649_v38, %v11212_v6  ;;  %v5662_v35 = vmul.f32 0.044715, %v5638_v52  ;;  %v5661_v49 = vmul.f32 0.044715, %v5637_v29  ;;  %v5914_v38 = vld [vmem:[%s9986_s18 + $0x2f0] sm:$0xff] }
0x10d6   : > { %v5696_v34 = vmul.f32 0.7978846, %v5672_v28  ;;  %v5675_v63 = vadd.f32 %v5651_v51, %v11216_v7  ;;  %v5684_v40 = vadd.f32 %v5660_v55, %v11218_v23  ;;  %v5663_v19 = vmul.f32 0.044715, %v5639_v21 }
0x10d7   : > { %v5698_v48 = vmul.f32 0.7978846, %v5674_v50  ;;  %v5686_v27 = vadd.f32 %v5662_v35, %v11224_v18  ;;  %v5685_v60 = vadd.f32 %v5661_v49, %v11226_v30  ;;  %6398 = vmatpush1.bf16.msra.mxu0 %v6132_v39  ;;  %v6139_v46 = vunpack.c.l.s8.bf16 %v5908_v15 }
0x10d8   : > { %8887 = vtanh.f32 %v5696_v34  ;;  %v5697_v8 = vmul.f32 0.7978846, %v5673_v33  ;;  %v5708_v13 = vmul.f32 0.7978846, %v5684_v40  ;;  %v5687_v41 = vadd.f32 %v5663_v19, %v11233_v58  ;;  %6399 = vmatprep.subr.bf16.mxu0 %v6136_v61 }
0x10d9   : > { %8889 = vtanh.f32 %v5698_v48  ;;  %v5710_v32 = vmul.f32 0.7978846, %v5686_v27  ;;  %v5709_v57 = vmul.f32 0.7978846, %v5685_v60  ;;  %v5699_v54 = vmul.f32 0.7978846, %v5675_v63 }
0x10da   : > { %8891 = vtanh.f32 %v5708_v13  ;;  %v5711_v43 = vmul.f32 0.7978846, %v5687_v41  ;;  %v6138_v39 = vunpack.c.l.s8.bf16 %v5907_v9  ;;  %v6142_v62 = vunpack.c.h.s8.bf16 %v5908_v15  ;;  %v5913_v63 = vld [vmem:[%s9986_s18 + $0x2e8] sm:$0xff] }
0x10db   : > { %8893 = vtanh.f32 %v5710_v32  ;;  %6400 = vmatpush1.bf16.msra.mxu0 %v6135_v5  ;;  %v6141_v1 = vunpack.c.h.s8.bf16 %v5907_v9  ;;  %v6145_v61 = vunpack.c.l.s8.bf16 %v5911_v59  ;;  %v6144_v45 = vunpack.c.l.s8.bf16 %v5910_v47 }
0x10dc   : > { %6401 = vmatprep.subr.bf16.mxu0 %v6139_v46  ;;  %8895 = vtanh.f32 %v5697_v8  ;;  %v6148_v24 = vunpack.c.h.s8.bf16 %v5911_v59  ;;  %v6147_v15 = vunpack.c.h.s8.bf16 %v5910_v47  ;;  %v6151_v49 = vunpack.c.l.s8.bf16 %v5914_v38 }
0x10dd   : > { %8897 = vtanh.f32 %v5709_v57  ;;  %v6150_v32 = vunpack.c.l.s8.bf16 %v5913_v63 }
0x10de   : > { %8899 = vtanh.f32 %v5699_v54  ;;  %v5942_v54 = vld [vmem:[%s9986_s18 + $0x3d0] sm:$0xff] }
0x10df   : > { %6402 = vmatpush1.bf16.msra.mxu0 %v6138_v39  ;;  %8901 = vtanh.f32 %v5711_v43  ;;  %v6154_v39 = vunpack.c.h.s8.bf16 %v5914_v38 }
0x10e0   : > { %6403 = vmatprep.subr.bf16.mxu0 %v6142_v62 }
0x10e2   : > { %v8888_v17 = vpop.eup %8887 }
0x10e3   : > { %v8890_v42 = vpop.eup %8889  ;;  %6404 = vmatpush1.bf16.msra.mxu0 %v6141_v1  ;;  %v5744_v2 = vadd.f32 1.0, %v8888_v17  ;;  %v6233_v17 = vunpack.c.h.s8.bf16 %v11201_v25 }
0x10e4   : > { %v8892_v5 = vpop.eup %8891  ;;  %6405 = vmatprep.subr.bf16.mxu0 %v6145_v61  ;;  %v5746_v16 = vadd.f32 1.0, %v8890_v42  ;;  %v6153_v42 = vunpack.c.h.s8.bf16 %v5913_v63 }
0x10e5   : > { %v8894_v14 = vpop.eup %8893  ;;  %v5756_v52 = vadd.f32 1.0, %v8892_v5  ;;  %v5768_v29 = vmul.f32 0.5, %v5744_v2  ;;  %v5916_v2 = vld [vmem:[%s9986_s18 + $0x300] sm:$0xff]  ;;  %v5945_v5 = vld [vmem:[%s9986_s18 + $0x3e8] sm:$0xff] }
0x10e6   : > { %v8896_v28 = vpop.eup %8895  ;;  %v5758_v51 = vadd.f32 1.0, %v8894_v14  ;;  %v5770_v55 = vmul.f32 0.5, %v5746_v16  ;;  %v6156_v25 = vunpack.c.l.s8.bf16 %v5916_v2  ;;  %v5920_v16 = vld [vmem:[%s9986_s18 + $0x320] sm:$0xff]  ;;  %v6212_v14 = vunpack.c.l.s8.bf16 %v5945_v5 }
0x10e7   : > { %v8898_v21 = vpop.eup %8897  ;;  %6406 = vmatpush1.bf16.msra.mxu0 %v6144_v45  ;;  %v5745_v50 = vadd.f32 1.0, %v8896_v28  ;;  %v5780_v33 = vmul.f32 0.5, %v5756_v52  ;;  %v5792_v27 = vmul.f32 %v5768_v29, %v11207_v36  ;;  %v5957_v45 = vld [vmem:[%s9986_s18 + $0x448] sm:$0xff]  ;;  %v6159_v52 = vunpack.c.h.s8.bf16 %v5916_v2  ;;  %v5960_v28 = vld [vmem:[%s9986_s18 + $0x460] sm:$0xff] }
0x10e8   : > { %v8900_v35 = vpop.eup %8899  ;;  %6407 = vmatprep.subr.bf16.mxu0 %v6148_v24  ;;  %v5757_v34 = vadd.f32 1.0, %v8898_v21  ;;  %v5782_v40 = vmul.f32 0.5, %v5758_v51  ;;  %v5794_v41 = vmul.f32 %v5770_v55, %v11210_v12  ;;  %v5917_v12 = vld [vmem:[%s9986_s18 + $0x308] sm:$0xff]  ;;  %v6239_v38 = vunpack.c.h.s8.bf16 %v5957_v45  ;;  %v5919_v51 = vld [vmem:[%s9986_s18 + $0x318] sm:$0xff] }
0x10e9   : > { %v8902_v19 = vpop.eup %8901  ;;  %v5769_v48 = vmul.f32 0.5, %v5745_v50  ;;  %v5804_v60 = vmul.f32 %v5780_v33, %v11218_v23  ;;  %v5747_v46 = vadd.f32 1.0, %v8900_v35  ;;  %v6160_v24 = vunpack.c.h.s8.bf16 %v5917_v12  ;;  %v5923_v33 = vld [vmem:[%s9986_s18 + $0x338] sm:$0xff] }
0x10ea   : > { %v5781_v8 = vmul.f32 0.5, %v5757_v34  ;;  %v5759_v13 = vadd.f32 1.0, %v8902_v19  ;;  %v5806_v9 = vmul.f32 %v5782_v40, %v11224_v18  ;;  %v6206_v18 = vunpack.c.l.s8.bf16 %v5942_v54  ;;  %v5963_v40 = vld [vmem:[%s9986_s18 + $0x478] sm:$0xff]  ;;  %v5922_v19 = vld [vmem:[%s9986_s18 + $0x330] sm:$0xff] }
0x10eb   : > { %6408 = vmatpush1.bf16.msra.mxu0 %v6147_v15  ;;  %v11272_v57 = vpack.c.bf16 %v5804_v60, %v5792_v27  ;;  %v5771_v43 = vmul.f32 0.5, %v5747_v46  ;;  %v5793_v36 = vmul.f32 %v5769_v48, %v11212_v6  ;;  %v6163_v29 = vunpack.c.l.s8.bf16 %v5920_v16  ;;  %v5948_v15 = vld [vmem:[%s9986_s18 + $0x400] sm:$0xff]  ;;  %v5951_v46 = vld [vmem:[%s9986_s18 + $0x418] sm:$0xff] }
0x10ec   : > { %6409 = vmatprep.subr.bf16.mxu0 %v6151_v49  ;;  %v5805_v23 = vmul.f32 %v5781_v8, %v11226_v30  ;;  %v5783_v62 = vmul.f32 0.5, %v5759_v13  ;;  %v11277_v59 = vpack.c.bf16 %v5806_v9, %v5794_v41  ;;  %v6157_v30 = vunpack.c.l.s8.bf16 %v5917_v12  ;;  %v5926_v9 = vld [vmem:[%s9986_s18 + $0x350] sm:$0xff] }
0x10ed   : > { %v5795_v61 = vmul.f32 %v5771_v43, %v11216_v7  ;;  %v6209_v7 = vunpack.c.h.s8.bf16 %v5942_v54  ;;  %v6215_v55 = vunpack.c.h.s8.bf16 %v5945_v5  ;;  %v6242_v21 = vunpack.c.l.s8.bf16 %v5960_v28 }
0x10ee   : > { %v5817_v1 = vpack.c.bf16 %v5805_v23, %v5793_v36  ;;  %v5807_v47 = vmul.f32 %v5783_v62, %v11233_v58  ;;  %v6236_v58 = vunpack.c.l.s8.bf16 %v5957_v45  ;;  %v6166_v50 = vunpack.c.h.s8.bf16 %v5920_v16  ;;  %v5928_v45 = vld [vmem:[%s9986_s18 + $0x360] sm:$0xff] }
0x10ef   : > { %6410 = vmatpush1.bf16.msra.mxu0 %v6150_v32  ;;  %v6218_v35 = vunpack.c.l.s8.bf16 %v5948_v15  ;;  %v6245_v49 = vunpack.c.h.s8.bf16 %v5960_v28  ;;  %v6165_v34 = vunpack.c.h.s8.bf16 %v5919_v51  ;;  %v6169_v63 = vunpack.c.l.s8.bf16 %v5923_v33  ;;  %v5934_v28 = vld [vmem:[%s9986_s18 + $0x390] sm:$0xff] }
0x10f0   : > { %6706 = vmatprep.mubr.bf16.mxu1 %v5817_v1  ;;  %v11283_v6 = vpack.c.bf16 %v5807_v47, %v5795_v61  ;;  %6411 = vmatprep.subr.bf16.mxu0 %v6154_v39  ;;  %v6221_v48 = vunpack.c.h.s8.bf16 %v5948_v15  ;;  %v6248_v27 = vunpack.c.l.s8.bf16 %v5963_v40  ;;  %v6168_v60 = vunpack.c.l.s8.bf16 %v5922_v19  ;;  %v5938_v15 = vld [vmem:[%s9986_s18 + $0x3b0] sm:$0xff] }
0x10f1   : > { %6707 = vmatmul.mubr.bf16.vlgmr.msra.gmra.mrb[56].mxu1 %v11272_v57  ;;  %v6172_v13 = vunpack.c.h.s8.bf16 %v5923_v33  ;;  %v6224_v43 = vunpack.c.l.s8.bf16 %v5951_v46  ;;  %v6251_v36 = vunpack.c.h.s8.bf16 %v5963_v40  ;;  %v6171_v23 = vunpack.c.h.s8.bf16 %v5922_v19  ;;  %v5937_v19 = vld [vmem:[%s9986_s18 + $0x3a8] sm:$0xff] }
0x10f2   : > { %7975 = vmatpush3.bf16.msra.mxu1 %v6206_v18  ;;  %6747 = vmatprep.mubr.bf16.mxu1 %v11283_v6  ;;  %v6175_v12 = vunpack.c.l.s8.bf16 %v5926_v9  ;;  %v6227_v18 = vunpack.c.h.s8.bf16 %v5951_v46  ;;  %v6178_v47 = vunpack.c.h.s8.bf16 %v5926_v9  ;;  %v6180_v2 = vunpack.c.l.s8.bf16 %v5928_v45  ;;  %v5941_v46 = vld [vmem:[%s9986_s18 + $0x3c8] sm:$0xff] }
0x10f3   : > { %7976 = vmatprep.subr.bf16.mxu1 %v6233_v17  ;;  %6412 = vmatpush1.bf16.msra.mxu0 %v6153_v42  ;;  %v5929_v17 = vld [vmem:[%s9986_s18 + $0x368] sm:$0xff]  ;;  %v6199_v40 = vunpack.c.l.s8.bf16 %v5938_v15 }
0x10f4   : > { %6424 = vmatprep.subr.bf16.mxu0 %v6157_v30  ;;  %v6181_v30 = vunpack.c.l.s8.bf16 %v5929_v17 }
0x10f6   : > { %7977 = vmatpush3.bf16.msra.mxu1 %v6209_v7  ;;  %6414 = vmatmul.mubr.bf16.vlgmr.msra.gmra.mrb[44].mxu0 %v11132_v20  ;;  %v6162_v20 = vunpack.c.l.s8.bf16 %v5919_v51  ;;  %v6184_v7 = vunpack.c.h.s8.bf16 %v5929_v17  ;;  %v6192_v51 = vunpack.c.l.s8.bf16 %v5934_v28 }
0x10f7   : > { %7978 = vmatprep.subr.bf16.mxu1 %v6236_v58  ;;  %6425 = vmatpush1.bf16.msra.mxu0 %v6156_v25  ;;  %v5932_v58 = vld [vmem:[%s9986_s18 + $0x380] sm:$0xff]  ;;  %v6183_v25 = vunpack.c.h.s8.bf16 %v5928_v45 }
0x10f8   : > { %6456 = vmatprep.mubr.bf16.mxu0 %v5817_v1  ;;  %6426 = vmatprep.subr.bf16.mxu0 %v6160_v24  ;;  %v5925_v1 = vld [vmem:[%s9986_s18 + $0x348] sm:$0xff]  ;;  %v6187_v5 = vunpack.c.l.s8.bf16 %v5932_v58  ;;  %v5931_v24 = vld [vmem:[%s9986_s18 + $0x378] sm:$0xff] }
0x10f9   : > { %v6174_v61 = vunpack.c.l.s8.bf16 %v5925_v1  ;;  %v6177_v42 = vunpack.c.h.s8.bf16 %v5925_v1  ;;  %v6186_v16 = vunpack.c.l.s8.bf16 %v5931_v24 }
0x10fa   : > { %7979 = vmatpush3.bf16.msra.mxu1 %v6212_v14  ;;  %v6190_v14 = vunpack.c.h.s8.bf16 %v5932_v58 }
0x10fb   : > { %7980 = vmatprep.subr.bf16.mxu1 %v6239_v38  ;;  %6427 = vmatpush1.bf16.msra.mxu0 %v6159_v52  ;;  %v5935_v38 = vld [vmem:[%s9986_s18 + $0x398] sm:$0xff]  ;;  %v6189_v52 = vunpack.c.h.s8.bf16 %v5931_v24 }
0x10fc   : > { %6428 = vmatprep.subr.bf16.mxu0 %v6163_v29  ;;  %v6193_v29 = vunpack.c.l.s8.bf16 %v5935_v38 }
0x10fe   : > { %7981 = vmatpush3.bf16.msra.mxu1 %v6215_v55 }
0x10ff   : > { %7982 = vmatprep.subr.bf16.mxu1 %v6242_v21  ;;  %6429 = vmatpush1.bf16.msra.mxu0 %v6162_v20  ;;  %v6196_v21 = vunpack.c.h.s8.bf16 %v5935_v38 }
0x1100   : > { %6430 = vmatprep.subr.bf16.mxu0 %v6166_v50 }
0x1102   : > { %7983 = vmatpush3.bf16.msra.mxu1 %v6218_v35 }
0x1103   : > { %7984 = vmatprep.subr.bf16.mxu1 %v6245_v49  ;;  %6431 = vmatpush1.bf16.msra.mxu0 %v6165_v34  ;;  %v6195_v49 = vunpack.c.h.s8.bf16 %v5934_v28 }
0x1104   : > { %v7880_v8 = vpop.f32.mrb[40].mxu1  ;;  %6432 = vmatprep.subr.bf16.mxu0 %v6169_v63 }
0x1105   : > { %v7881_v41 = vpop.f32.mrb[41].mxu1 }
0x1106   : > { %v7882_v32 = vadd.f32 %v7881_v41, %v7880_v8  ;;  %7985 = vmatpush3.bf16.msra.mxu1 %v6221_v48  ;;  %v7883_v54 = vpop.f32.mrb[42].mxu1  ;;  %v6201_v8 = vunpack.c.h.s8.bf16 %v5937_v19  ;;  %v5940_v41 = vld [vmem:[%s9986_s18 + $0x3c0] sm:$0xff] }
0x1107   : > { %v7884_v39 = vpop.f32.mrb[43].mxu1  ;;  %7986 = vmatprep.subr.bf16.mxu1 %v6248_v27  ;;  %6433 = vmatpush1.bf16.msra.mxu0 %v6168_v60  ;;  %v6198_v27 = vunpack.c.l.s8.bf16 %v5937_v19  ;;  %v6202_v60 = vunpack.c.h.s8.bf16 %v5938_v15  ;;  %v6204_v9 = vunpack.c.l.s8.bf16 %v5940_v41  ;;  %v5958_v15 = vld [vmem:[%s9986_s18 + $0x450] sm:$0xff] }
0x1108   : > { %v7885_v62 = vadd.f32 %v7884_v39, %v7883_v54  ;;  %6434 = vmatprep.subr.bf16.mxu0 %v6172_v13  ;;  %v6205_v13 = vunpack.c.l.s8.bf16 %v5941_v46  ;;  %v5944_v54 = vld [vmem:[%s9986_s18 + $0x3e0] sm:$0xff] }
0x1109   : > { %v6211_v39 = vunpack.c.l.s8.bf16 %v5944_v54 }
0x110a   : > { %7987 = vmatpush3.bf16.msra.mxu1 %v6224_v43  ;;  %v6207_v43 = vunpack.c.h.s8.bf16 %v5940_v41  ;;  %v5961_v41 = vld [vmem:[%s9986_s18 + $0x468] sm:$0xff] }
0x110b   : > { %7988 = vmatprep.subr.bf16.mxu1 %v6251_v36  ;;  %6435 = vmatpush1.bf16.msra.mxu0 %v6171_v23  ;;  %v5943_v36 = vld [vmem:[%s9986_s18 + $0x3d8] sm:$0xff] }
0x110c   : > { %6436 = vmatprep.subr.bf16.mxu0 %v6175_v12  ;;  %v6210_v23 = vunpack.c.l.s8.bf16 %v5943_v36  ;;  %v5947_v12 = vld [vmem:[%s9986_s18 + $0x3f8] sm:$0xff]  ;;  %v6213_v1 = vunpack.c.h.s8.bf16 %v5943_v36 }
0x110e   : > { %7989 = vmatpush3.bf16.msra.mxu1 %v6227_v18  ;;  %v6217_v18 = vunpack.c.l.s8.bf16 %v5947_v12 }
0x110f   : > { %6437 = vmatpush1.bf16.msra.mxu0 %v6174_v61 }
0x1110   : > { %6438 = vmatprep.subr.bf16.mxu0 %v6178_v47  ;;  %v5950_v47 = vld [vmem:[%s9986_s18 + $0x410] sm:$0xff] }
0x1111   : > { %6748 = vmatmul.mubr.bf16.vlgmr.msra.gmra.mrb[60].mxu1 %v11277_v59 }
0x1113   : > { %6439 = vmatpush1.bf16.msra.mxu0 %v6177_v42  ;;  %v6223_v42 = vunpack.c.l.s8.bf16 %v5950_v47 }
0x1114   : > { %6440 = vmatprep.subr.bf16.mxu0 %v6181_v30  ;;  %v5949_v30 = vld [vmem:[%s9986_s18 + $0x408] sm:$0xff] }
0x1115   : > { %v6222_v45 = vunpack.c.l.s8.bf16 %v5949_v30  ;;  %v6225_v58 = vunpack.c.h.s8.bf16 %v5949_v30 }
0x1117   : > { %6441 = vmatpush1.bf16.msra.mxu0 %v6180_v2  ;;  %v6226_v2 = vunpack.c.h.s8.bf16 %v5950_v47 }
0x1118   : > { %6442 = vmatprep.subr.bf16.mxu0 %v6184_v7  ;;  %v5953_v7 = vld [vmem:[%s9986_s18 + $0x428] sm:$0xff] }
0x111b   : > { %6443 = vmatpush1.bf16.msra.mxu0 %v6183_v25  ;;  %v6229_v25 = vunpack.c.l.s8.bf16 %v5953_v7 }
0x111c   : > { %6444 = vmatprep.subr.bf16.mxu0 %v6187_v5  ;;  %v5952_v5 = vld [vmem:[%s9986_s18 + $0x420] sm:$0xff] }
0x111d   : > { %v6228_v24 = vunpack.c.l.s8.bf16 %v5952_v5  ;;  %v6231_v38 = vunpack.c.h.s8.bf16 %v5952_v5 }
0x111f   : > { %6445 = vmatpush1.bf16.msra.mxu0 %v6186_v16  ;;  %v6232_v16 = vunpack.c.h.s8.bf16 %v5953_v7  ;;  %v8916_v7 = vld [vmem:[%s9988_s28 + $0x70] sm:$0xff] }
0x1120   : > { %6446 = vmatprep.subr.bf16.mxu0 %v6190_v14  ;;  %v5956_v14 = vld [vmem:[%s9986_s18 + $0x440] sm:$0xff] }
0x1123   : > { %6447 = vmatpush1.bf16.msra.mxu0 %v6189_v52  ;;  %v6235_v52 = vunpack.c.l.s8.bf16 %v5956_v14 }
0x1124   : > { %v7902_v55 = vpop.f32.mrb[44].mxu1  ;;  %6448 = vmatprep.subr.bf16.mxu0 %v6193_v29  ;;  %v5955_v29 = vld [vmem:[%s9986_s18 + $0x438] sm:$0xff] }
0x1125   : > { %v7903_v20 = vpop.f32.mrb[45].mxu1  ;;  %v6234_v28 = vunpack.c.l.s8.bf16 %v5955_v29 }
0x1126   : > { %v7904_v50 = vadd.f32 %v7903_v20, %v7902_v55  ;;  %v7905_v33 = vpop.f32.mrb[46].mxu1  ;;  %v5959_v55 = vld [vmem:[%s9986_s18 + $0x458] sm:$0xff] }
0x1127   : > { %v7906_v35 = vpop.f32.mrb[47].mxu1  ;;  %6449 = vmatpush1.bf16.msra.mxu0 %v6192_v51  ;;  %v6238_v51 = vunpack.c.h.s8.bf16 %v5956_v14  ;;  %v6241_v20 = vunpack.c.l.s8.bf16 %v5959_v55 }
0x1128   : > { %v11309_v34 = vadd.f32 %v7904_v50, %v7882_v32  ;;  %v7907_v63 = vadd.f32 %v7906_v35, %v7905_v33  ;;  %6450 = vmatprep.subr.bf16.mxu0 %v6196_v21  ;;  %v6208_v32 = vunpack.c.h.s8.bf16 %v5941_v46  ;;  %v6237_v21 = vunpack.c.h.s8.bf16 %v5955_v29 }
0x1129   : > { %v6240_v50 = vunpack.c.l.s8.bf16 %v5958_v15  ;;  %v6244_v35 = vunpack.c.h.s8.bf16 %v5959_v55 }
0x112a   : > { %v11312_v48 = vadd.f32 %v7907_v63, %v7885_v62  ;;  %v6214_v62 = vunpack.c.h.s8.bf16 %v5944_v54  ;;  %v5962_v63 = vld [vmem:[%s9986_s18 + $0x470] sm:$0xff] }
0x112b   : > { %6451 = vmatpush1.bf16.msra.mxu0 %v6195_v49  ;;  %v6250_v54 = vunpack.c.h.s8.bf16 %v5962_v63 }
0x112c   : > { %6452 = vmatprep.subr.bf16.mxu0 %v6199_v40 }
0x112f   : > { %6453 = vmatpush1.bf16.msra.mxu0 %v6198_v27 }
0x1130   : > { %6454 = vmatprep.subr.bf16.mxu0 %v6202_v60  ;;  %v6243_v60 = vunpack.c.h.s8.bf16 %v5958_v15 }
0x1133   : > { %6455 = vmatpush1.bf16.msra.mxu0 %v6201_v8 }
0x1134   : > { %6467 = vmatprep.subr.bf16.mxu0 %v6205_v13  ;;  %v6247_v13 = vunpack.c.l.s8.bf16 %v5962_v63 }
0x1136   : > { %6457 = vmatmul.mubr.bf16.vlgmr.msra.gmra.mrb[44].mxu0 %v11272_v57  ;;  %v5946_v57 = vld [vmem:[%s9986_s18 + $0x3f0] sm:$0xff] }
0x1137   : > { %6468 = vmatpush1.bf16.msra.mxu0 %v6204_v9  ;;  %6499 = vmatprep.mubr.bf16.mxu0 %v11283_v6  ;;  %v6216_v61 = vunpack.c.l.s8.bf16 %v5946_v57  ;;  %v6220_v6 = vunpack.c.h.s8.bf16 %v5947_v12  ;;  %v6219_v17 = vunpack.c.h.s8.bf16 %v5946_v57 }
0x1138   : > { %6469 = vmatprep.subr.bf16.mxu0 %v6208_v32  ;;  %v6246_v32 = vunpack.c.l.s8.bf16 %v5961_v41 }
0x113b   : > { %6470 = vmatpush1.bf16.msra.mxu0 %v6207_v43  ;;  %v6249_v43 = vunpack.c.h.s8.bf16 %v5961_v41 }
0x113c   : > { %6471 = vmatprep.subr.bf16.mxu0 %v6211_v39 }
0x113f   : > { %6472 = vmatpush1.bf16.msra.mxu0 %v6210_v23 }
0x1140   : > { %6473 = vmatprep.subr.bf16.mxu0 %v6214_v62 }
0x1143   : > { %6474 = vmatpush1.bf16.msra.mxu0 %v6213_v1 }
0x1144   : > { %6475 = vmatprep.subr.bf16.mxu0 %v6217_v18 }
0x1147   : > { %6476 = vmatpush1.bf16.msra.mxu0 %v6216_v61 }
0x1148   : > { %6477 = vmatprep.subr.bf16.mxu0 %v6220_v6 }
0x114b   : > { %6478 = vmatpush1.bf16.msra.mxu0 %v6219_v17 }
0x114c   : > { %6479 = vmatprep.subr.bf16.mxu0 %v6223_v42 }
0x114f   : > { %6480 = vmatpush1.bf16.msra.mxu0 %v6222_v45 }
0x1150   : > { %6481 = vmatprep.subr.bf16.mxu0 %v6226_v2 }
0x1153   : > { %6482 = vmatpush1.bf16.msra.mxu0 %v6225_v58  ;;  %v6767_v58 = vrot.slane %v8916_v7, %v10578_v3 }
0x1154   : > { %6483 = vmatprep.subr.bf16.mxu0 %v6229_v25 }
0x1157   : > { %6484 = vmatpush1.bf16.msra.mxu0 %v6228_v24 }
0x1158   : > { %6485 = vmatprep.subr.bf16.mxu0 %v6232_v16  ;;  %v6785_v16 = vrot.slane %v8916_v7, %v10265_v53 }
0x115b   : > { %6486 = vmatpush1.bf16.msra.mxu0 %v6231_v38 }
0x115c   : > { %6487 = vmatprep.subr.bf16.mxu0 %v6235_v52  ;;  %v6803_v52 = vrot.slane %v8916_v7, %v10575_v22 }
0x115f   : > { %6488 = vmatpush1.bf16.msra.mxu0 %v6234_v28 }
0x1160   : > { %6489 = vmatprep.subr.bf16.mxu0 %v6238_v51 }
0x1163   : > { %6490 = vmatpush1.bf16.msra.mxu0 %v6237_v21 }
0x1164   : > { %v7924_v33 = vpop.f32.mrb[48].mxu1  ;;  %6491 = vmatprep.subr.bf16.mxu0 %v6241_v20 }
0x1165   : > { %v7925_v49 = vpop.f32.mrb[49].mxu1 }
0x1166   : > { %v7926_v40 = vadd.f32 %v7925_v49, %v7924_v33  ;;  %v7927_v19 = vpop.f32.mrb[50].mxu1  ;;  %v8917_v33 = vld [vmem:[%s9988_s28 + $0x60] sm:$0xff]  ;;  %v8918_v49 = vld [vmem:[%s9988_s28 + $0x68] sm:$0xff] }
0x1167   : > { %v7928_v27 = vpop.f32.mrb[51].mxu1  ;;  %6492 = vmatpush1.bf16.msra.mxu0 %v6240_v50  ;;  %v6763_v63 = vrot.slane %v8918_v49, %v10578_v3 }
0x1168   : > { %v6627_v46 = vadd.f32 %v7926_v40, %v11309_v34  ;;  %v7929_v8 = vadd.f32 %v7928_v27, %v7927_v19  ;;  %6493 = vmatprep.subr.bf16.mxu0 %v6244_v35  ;;  %v6759_v35 = vrot.slane %v8917_v33, %v10578_v3  ;;  %v6777_v40 = vrot.slane %v8917_v33, %v10265_v53 }
0x1169   : > { %v6781_v27 = vrot.slane %v8918_v49, %v10265_v53 }
0x116a   : > { %v6630_v9 = vadd.f32 %v7929_v8, %v11312_v48 }
0x116b   : > { %6494 = vmatpush1.bf16.msra.mxu0 %v6243_v60 }
0x116c   : > { %6495 = vmatprep.subr.bf16.mxu0 %v6247_v13  ;;  %v6799_v13 = vrot.slane %v8918_v49, %v10575_v22 }
0x116f   : > { %6496 = vmatpush1.bf16.msra.mxu0 %v6246_v32 }
0x1170   : > { %6497 = vmatprep.subr.bf16.mxu0 %v6250_v54 }
0x1173   : > { %6498 = vmatpush1.bf16.msra.mxu0 %v6249_v43 }
0x1176   : > { %6500 = vmatmul.mubr.bf16.vlgmr.msra.gmra.mrb[44].mxu0 %v11277_v59 }
0x1184   : > { %v7946_v39 = vpop.f32.mrb[52].mxu1 }
0x1185   : > { %v7947_v36 = vpop.f32.mrb[53].mxu1 }
0x1186   : > { %v7948_v23 = vadd.f32 %v7947_v36, %v7946_v39  ;;  %v7949_v34 = vpop.f32.mrb[54].mxu1 }
0x1187   : > { %v7950_v62 = vpop.f32.mrb[55].mxu1 }
0x1188   : > { %v6668_v12 = vadd.f32 %v7948_v23, %v6627_v46  ;;  %v7951_v1 = vadd.f32 %v7950_v62, %v7949_v34  ;;  %v6795_v46 = vrot.slane %v8917_v33, %v10575_v22 }
0x118a   : > { %v6671_v18 = vadd.f32 %v7951_v1, %v6630_v9 }
0x11c4   : > { %v7968_v48 = vpop.f32.mrb[56].mxu1 }
0x11c5   : > { %v7969_v57 = vpop.f32.mrb[57].mxu1 }
0x11c6   : > { %v7970_v61 = vadd.f32 %v7969_v57, %v7968_v48  ;;  %v7971_v6 = vpop.f32.mrb[58].mxu1 }
0x11c7   : > { %v7972_v47 = vpop.f32.mrb[59].mxu1 }
0x11c8   : > { %v6709_v17 = vadd.f32 %v7970_v61, %v6668_v12  ;;  %v7973_v42 = vadd.f32 %v7972_v47, %v7971_v6 }
0x11ca   : > { %v6712_v30 = vadd.f32 %v7973_v42, %v6671_v18 }
0x11e4   : > { %v7990_v45 = vpop.f32.mrb[60].mxu1 }
0x11e5   : > { %v7991_v2 = vpop.f32.mrb[61].mxu1 }
0x11e6   : > { %v7992_v59 = vadd.f32 %v7991_v2, %v7990_v45  ;;  %v7993_v25 = vpop.f32.mrb[62].mxu1 }
0x11e7   : > { %v7994_v5 = vpop.f32.mrb[63].mxu1 }
0x11e8   : > { %v6750_v24 = vadd.f32 %v7992_v59, %v6709_v17  ;;  %v7995_v14 = vadd.f32 %v7994_v5, %v7993_v25 }
0x11ea   : > { %v6770_v38 = vmul.f32 %v6767_v58, %v6750_v24  ;;  %v6753_v29 = vadd.f32 %v7995_v14, %v6712_v30 }
0x11ec   : > { %v6788_v28 = vadd.f32 %v6785_v16, %v6770_v38  ;;  %v6773_v51 = vmul.f32 %v6767_v58, %v6753_v29 }
0x11ee   : > { %v6806_v55 = vmul.f32 %v6803_v52, %v6788_v28  ;;  %v6791_v21 = vadd.f32 %v6785_v16, %v6773_v51  ;;  %v6839_v51 = vld [vmem:[#allocation16] sm:$0x7] (!%p7695_p10) }
0x11f0   : > { %v6812_v20 = vadd.f32 %v6806_v55, %v10608_v44  ;;  %v6809_v15 = vmul.f32 %v6803_v52, %v6791_v21  ;;  %v6840_v55 = vld [vmem:[#allocation17] sm:$0x7] (!%p7695_p10)  ;;  %v11361_v21 = vrot.slane (!%p7695_p10), %v6839_v51, %v10123_v4 }
0x11f1   : > { %v11370_v33 = vrot.slane (!%p7695_p10), %v6840_v55, %v10123_v4 }
0x11f2   : > { %6818 = vst [vmem:[#allocation2 + $0x10] sm:$0xff] %v6812_v20  ;;  %v6815_v50 = vadd.f32 %v6809_v15, %v10614_v0  ;;  %v6831_v57 = vrot.slane (!%p7695_p10), %v6812_v20, 4  ;;  %v11367_v15 = vrot.slane (!%p7695_p10), %v6839_v51, %v10270_v56 }
0x11f4   : > { %6821 = vst [vmem:[#allocation2 + $0x28] sm:$0x3] %v6815_v50  ;;  %v6838_v6 = vsel (!%p7695_p10), %vm6835_vm4, %v6812_v20, %v6831_v57  ;;  %v11364_v20 = vrot.slane (!%p7695_p10), %v6839_v51, %v10134_v26 }
0x1249   : > { %v6501_v19 = vpop.f32.mrb[44].mxu0 }
0x124a   : > { %v6768_v60 = vmul.f32 %v6759_v35, %v6501_v19  ;;  %v6503_v44 = vpop.f32.mrb[45].mxu0  ;;  %v11376_v19 = vrot.slane (!%p7695_p10), %v6840_v55, %v10270_v56 }
0x124b   : > { %v6769_v8 = vmul.f32 %v6763_v63, %v6503_v44  ;;  %v6505_v0 = vpop.f32.mrb[46].mxu0 }
0x124c   : > { %v6786_v41 = vadd.f32 %v6777_v40, %v6768_v60  ;;  %v6771_v9 = vmul.f32 %v6759_v35, %v6505_v0  ;;  %v6507_v32 = vpop.f32.mrb[47].mxu0  ;;  %v11373_v35 = vrot.slane (!%p7695_p10), %v6840_v55, %v10134_v26  ;;  %v7007_v55 = vld [vmem:[#allocation18 + $0x220] sm:$0xff] (!%p7695_p10) }
0x124d   : > { %v6787_v54 = vadd.f32 %v6781_v27, %v6769_v8  ;;  %v6772_v43 = vmul.f32 %v6763_v63, %v6507_v32 }
0x124e   : > { %v6804_v39 = vmul.f32 %v6795_v46, %v6786_v41  ;;  %v6789_v3 = vadd.f32 %v6777_v40, %v6771_v9 }
0x124f   : > { %v6805_v36 = vmul.f32 %v6799_v13, %v6787_v54  ;;  %v6790_v23 = vadd.f32 %v6781_v27, %v6772_v43  ;;  %6825 = sbr.rel (%p7695_p10) target bundleno = 5775 (0x168f), region = 148  ;;  %v6940_v54 = vld [vmem:[#allocation18 + $0x8] sm:$0xff] (!%p7695_p10)  ;;  %v6942_v43 = vld [vmem:[#allocation18 + $0x18] sm:$0xff] (!%p7695_p10) }
0x1250   : > { %v6810_v34 = vadd.f32 %v6804_v39, %v10602_v31  ;;  %v6807_v53 = vmul.f32 %v6795_v46, %v6789_v3  ;;  %v6939_v39 = vld [vmem:[#allocation18] sm:$0xff] (!%p7695_p10)  ;;  %v8235_v3 = vpack.c.bf16 (!%p7695_p10), %v6942_v43, %v6940_v54  ;;  %v6966_v54 = vld [vmem:[#allocation18 + $0xd8] sm:$0xff] (!%p7695_p10) }
0x1251   : > { %v6811_v62 = vadd.f32 %v6805_v36, %v10604_v10  ;;  %v6808_v12 = vmul.f32 %v6799_v13, %v6790_v23  ;;  %v6941_v36 = vld [vmem:[#allocation18 + $0x10] sm:$0xff] (!%p7695_p10)  ;;  %v6944_v23 = vld [vmem:[#allocation18 + $0x28] sm:$0xff] (!%p7695_p10) }
0x1252   : > { %6816 = vst [vmem:[#allocation2] sm:$0xff] %v6810_v34  ;;  %v6813_v1 = vadd.f32 %v6807_v53, %v10606_v37  ;;  %v6829_v18 = vrot.slane (!%p7695_p10), %v6810_v34, 4  ;;  %v6844_v37 = vsel (!%p7695_p10), %vm2003_vm3, %v6838_v6, 0.0  ;;  %v8237_v53 = vpack.c.bf16 (!%p7695_p10), %v6941_v36, %v6939_v39  ;;  %8236 = vmatprep.subr.bf16.mxu0 (!%p7695_p10), %v8235_v3  ;;  %v6963_v36 = vld [vmem:[#allocation18 + $0xc0] sm:$0xff] (!%p7695_p10) }
0x1253   : > { %6817 = vst [vmem:[#allocation2 + $0x8] sm:$0xff] %v6811_v62  ;;  %v6814_v22 = vadd.f32 %v6808_v12, %v10610_v11  ;;  %v6830_v48 = vrot.slane (!%p7695_p10), %v6811_v62, 4  ;;  %v6943_v12 = vld [vmem:[#allocation18 + $0x20] sm:$0xff] (!%p7695_p10) }
0x1254   : > { %6819 = vst [vmem:[#allocation2 + $0x18] sm:$0x3] %v6813_v1  ;;  %v6836_v31 = vsel (!%p7695_p10), %vm6835_vm4, %v6810_v34, %v6829_v18  ;;  %v6946_v34 = vld [vmem:[#allocation18 + $0x38] sm:$0xff] (!%p7695_p10)  ;;  %v6945_v1 = vld [vmem:[#allocation18 + $0x30] sm:$0xff] (!%p7695_p10)  ;;  %8238 = vmatpush1.bf16.msra.mxu0 (!%p7695_p10), %v8237_v53 }
0x1255   : > { %6820 = vst [vmem:[#allocation2 + $0x20] sm:$0x3] %v6814_v22  ;;  %v6837_v61 = vsel (!%p7695_p10), %vm6835_vm4, %v6811_v62, %v6830_v48  ;;  %v6841_v10 = vsel (!%p7695_p10), %vm2003_vm3, %v6836_v31, 0.0  ;;  %v8239_v62 = vpack.c.bf16 (!%p7695_p10), %v6946_v34, %v6944_v23  ;;  %v6948_v22 = vld [vmem:[#allocation18 + $0x48] sm:$0xff] (!%p7695_p10)  ;;  %v6950_v18 = vld [vmem:[#allocation18 + $0x58] sm:$0xff] (!%p7695_p10)  ;;  %v8241_v48 = vpack.c.bf16 (!%p7695_p10), %v6945_v1, %v6943_v12  ;;  %v6965_v23 = vld [vmem:[#allocation18 + $0xd0] sm:$0xff] (!%p7695_p10) }
0x1256   : > { %v6842_v47 = vsel %vm2003_vm3, %v6837_v61, 0.0  ;;  %v8243_v57 = vpack.c.bf16 %v6950_v18, %v6948_v22  ;;  %v6968_v34 = vld [vmem:[#allocation18 + $0xe8] sm:$0xff]  ;;  %v6970_v53 = vld [vmem:[#allocation18 + $0xf8] sm:$0xff]  ;;  %v6967_v1 = vld [vmem:[#allocation18 + $0xe0] sm:$0xff] }
0x1257   : > { %v6843_v17 = vadd.f32 %v6842_v47, %v6841_v10  ;;  %8240 = vmatprep.subr.bf16.mxu0 %v8239_v62  ;;  %v6954_v10 = vld [vmem:[#allocation18 + $0x78] sm:$0xff]  ;;  %v8261_v62 = vpack.c.bf16 %v6965_v23, %v6963_v36  ;;  %v8263_v12 = vpack.c.bf16 %v6970_v53, %v6968_v34  ;;  %v6969_v22 = vld [vmem:[#allocation18 + $0xf0] sm:$0xff]  ;;  %v6972_v18 = vld [vmem:[#allocation18 + $0x108] sm:$0xff] }
0x1258   : > { %8242 = vmatpush1.bf16.msra.mxu0 %v8241_v48  ;;  %v6974_v48 = vld [vmem:[#allocation18 + $0x118] sm:$0xff]  ;;  %v7019_v23 = vld [vmem:[#allocation18 + $0x280] sm:$0xff]  ;;  %v7021_v53 = vld [vmem:[#allocation18 + $0x290] sm:$0xff] }
0x1259   : > { %v6845_v11 = vadd.f32 %v6844_v37, %v6843_v17  ;;  %8244 = vmatprep.subr.bf16.mxu0 %v8243_v57  ;;  %v6951_v17 = vld [vmem:[#allocation18 + $0x60] sm:$0xff]  ;;  %v8265_v57 = vpack.c.bf16 %v6969_v22, %v6967_v1  ;;  %v6990_v36 = vld [vmem:[#allocation18 + $0x198] sm:$0xff]  ;;  %v8317_v1 = vpack.c.bf16 %v7021_v53, %v7019_v23  ;;  %v7192_v53 = vld [vmem:[%s11677_s27 + $0x8] sm:$0xff] }
0x125b   : > { %6846 = vadd.xlane.f32.xlu0 %v6845_v11  ;;  %v6953_v11 = vld [vmem:[#allocation18 + $0x70] sm:$0xff] }
0x12e8   : > { %v6847_v42 = vpop.xlane.xlu0 %6846 }
0x12e9   : > { %v6848_v30 = vmul.f32 0.0026041667, %v6847_v42  ;;  %v6956_v42 = vld [vmem:[#allocation18 + $0x88] sm:$0xff] }
0x12eb   : > { %v6849_v45 = vsub.f32 %v6836_v31, %v6848_v30  ;;  %v6850_v2 = vsub.f32 %v6837_v61, %v6848_v30  ;;  %v6851_v59 = vsub.f32 %v6838_v6, %v6848_v30  ;;  %v6947_v31 = vld [vmem:[#allocation18 + $0x40] sm:$0xff]  ;;  %v6949_v61 = vld [vmem:[#allocation18 + $0x50] sm:$0xff]  ;;  %v6952_v6 = vld [vmem:[#allocation18 + $0x68] sm:$0xff] }
0x12ec   : > { %v8245_v47 = vpack.c.bf16 %v6949_v61, %v6947_v31  ;;  %v8247_v37 = vpack.c.bf16 %v6954_v10, %v6952_v6  ;;  %v6958_v30 = vld [vmem:[#allocation18 + $0x98] sm:$0xff]  ;;  %v8267_v31 = vpack.c.bf16 %v6974_v48, %v6972_v18  ;;  %v6971_v61 = vld [vmem:[#allocation18 + $0x100] sm:$0xff]  ;;  %v6973_v6 = vld [vmem:[#allocation18 + $0x110] sm:$0xff] }
0x12ed   : > { %v6852_v7 = vmul.f32 %v6849_v45, %v6849_v45  ;;  %v6853_v58 = vmul.f32 %v6850_v2, %v6850_v2  ;;  %v6854_v25 = vmul.f32 %v6851_v59, %v6851_v59  ;;  %v6976_v10 = vld [vmem:[#allocation18 + $0x128] sm:$0xff]  ;;  %v7026_v48 = vld [vmem:[#allocation18 + $0x2b8] sm:$0xff] }
0x12ee   : > { %8246 = vmatpush1.bf16.msra.mxu0 %v8245_v47  ;;  %v6978_v47 = vld [vmem:[#allocation18 + $0x138] sm:$0xff]  ;;  %v7024_v18 = vld [vmem:[#allocation18 + $0x2a8] sm:$0xff] }
0x12ef   : > { %v6855_v5 = vsel %vm2003_vm3, %v6852_v7, 0.0  ;;  %v6856_v24 = vsel %vm2003_vm3, %v6853_v58, 0.0  ;;  %v6858_v14 = vsel %vm2003_vm3, %v6854_v25, 0.0  ;;  %v6955_v7 = vld [vmem:[#allocation18 + $0x80] sm:$0xff]  ;;  %8248 = vmatprep.subr.bf16.mxu0 %v8247_v37  ;;  %v8269_v37 = vpack.c.bf16 %v6973_v6, %v6971_v61  ;;  %v6994_v6 = vld [vmem:[#allocation18 + $0x1b8] sm:$0xff] }
0x12f0   : > { %v6857_v16 = vadd.f32 %v6856_v24, %v6855_v5  ;;  %v7003_v25 = vld [vmem:[#allocation18 + $0x200] sm:$0xff]  ;;  %v7005_v5 = vld [vmem:[#allocation18 + $0x210] sm:$0xff]  ;;  %v8251_v24 = vpack.c.bf16 %v6958_v30, %v6956_v42  ;;  %v6980_v30 = vld [vmem:[#allocation18 + $0x148] sm:$0xff]  ;;  %v8319_v61 = vpack.c.bf16 %v7026_v48, %v7024_v18 }
0x12f1   : > { %v6977_v42 = vld [vmem:[#allocation18 + $0x130] sm:$0xff] }
0x12f2   : > { %v6859_v38 = vadd.f32 %v6858_v14, %v6857_v16  ;;  %v6957_v16 = vld [vmem:[#allocation18 + $0x90] sm:$0xff]  ;;  %v8301_v14 = vpack.c.bf16 %v7005_v5, %v7003_v25 }
0x12f4   : > { %6860 = vadd.xlane.f32.xlu0 %v6859_v38  ;;  %v7008_v38 = vld [vmem:[#allocation18 + $0x228] sm:$0xff] }
0x1381   : > { %v6861_v52 = vpop.xlane.xlu0 %6860 }
0x1382   : > { %v6862_v29 = vmul.f32 0.0026041667, %v6861_v52  ;;  %v7010_v52 = vld [vmem:[#allocation18 + $0x238] sm:$0xff] }
0x1383   : > { %v8303_v51 = vpack.c.bf16 %v7010_v52, %v7008_v38 }
0x1384   : > { %v6863_v28 = vadd.f32 1e-06, %v6862_v29  ;;  %v6960_v29 = vld [vmem:[#allocation18 + $0xa8] sm:$0xff] }
0x1386   : > { %8919 = vrsqrt.f32 %v6863_v28  ;;  %v6962_v28 = vld [vmem:[#allocation18 + $0xb8] sm:$0xff] }
0x1390   : > { %v8920_v50 = vpop.eup %8919 }
0x1391   : > { %v6865_v49 = vmul.f32 %v8920_v50, %v6849_v45  ;;  %v6866_v63 = vmul.f32 %v8920_v50, %v6850_v2  ;;  %v6867_v40 = vmul.f32 %v8920_v50, %v6851_v59  ;;  %v7004_v45 = vld [vmem:[#allocation18 + $0x208] sm:$0xff]  ;;  %v7006_v2 = vld [vmem:[#allocation18 + $0x218] sm:$0xff]  ;;  %v8249_v59 = vpack.c.bf16 %v6953_v11, %v6951_v17  ;;  %v7009_v50 = vld [vmem:[#allocation18 + $0x230] sm:$0xff] }
0x1392   : > { %v8299_v58 = vpack.c.bf16 %v7006_v2, %v7004_v45  ;;  %v8271_v17 = vpack.c.bf16 %v6978_v47, %v6976_v10  ;;  %v6975_v11 = vld [vmem:[#allocation18 + $0x120] sm:$0xff]  ;;  %v6982_v45 = vld [vmem:[#allocation18 + $0x158] sm:$0xff]  ;;  %v7025_v47 = vld [vmem:[#allocation18 + $0x2b0] sm:$0xff] }
0x1393   : > { %v6884_v27 = vmul.f32 %v11361_v21, %v6865_v49  ;;  %v6885_v60 = vmul.f32 %v11364_v20, %v6866_v63  ;;  %v6886_v46 = vmul.f32 %v11367_v15, %v6867_v40  ;;  %8250 = vmatpush1.bf16.msra.mxu0 %v8249_v59  ;;  %v8253_v49 = vpack.c.bf16 %v6957_v16, %v6955_v7  ;;  %v6959_v63 = vld [vmem:[#allocation18 + $0xa0] sm:$0xff] }
0x1394   : > { %8300 = vmatprep.subr.bf16.mxu1 %v8299_v58  ;;  %v8305_v40 = vpack.c.bf16 %v7009_v50, %v7007_v55  ;;  %8252 = vmatprep.subr.bf16.mxu0 %v8251_v24  ;;  %v8273_v2 = vpack.c.bf16 %v6977_v42, %v6975_v11  ;;  %v8275_v59 = vpack.c.bf16 %v6982_v45, %v6980_v30  ;;  %v6979_v7 = vld [vmem:[#allocation18 + $0x140] sm:$0xff]  ;;  %v6981_v58 = vld [vmem:[#allocation18 + $0x150] sm:$0xff]  ;;  %v7028_v30 = vld [vmem:[#allocation18 + $0x2c8] sm:$0xff] }
0x1395   : > { %v11382_v44 = vadd.f32 %v11370_v33, %v6884_v27  ;;  %v11385_v8 = vadd.f32 %v11373_v35, %v6885_v60  ;;  %v11388_v13 = vadd.f32 %v11376_v19, %v6886_v46  ;;  %8302 = vmatpush1.bf16.msra.mxu1 %v8301_v14  ;;  %v7012_v27 = vld [vmem:[#allocation18 + $0x248] sm:$0xff]  ;;  %v7014_v60 = vld [vmem:[#allocation18 + $0x258] sm:$0xff]  ;;  %v8255_v46 = vpack.c.bf16 %v6962_v28, %v6960_v29  ;;  %v7023_v10 = vld [vmem:[#allocation18 + $0x2a0] sm:$0xff] }
0x1396   : > { %8304 = vmatprep.subr.bf16.mxu1 %v8303_v51  ;;  %v8277_v25 = vpack.c.bf16 %v6981_v58, %v6979_v7  ;;  %v6991_v11 = vld [vmem:[#allocation18 + $0x1a0] sm:$0xff]  ;;  %v6993_v42 = vld [vmem:[#allocation18 + $0x1b0] sm:$0xff]  ;;  %v6998_v7 = vld [vmem:[#allocation18 + $0x1d8] sm:$0xff] }
0x1397   : > { %v6906_v0 = vsel %vm2003_vm3, %v11382_v44, 0.0  ;;  %v6907_v56 = vsel %vm2003_vm3, %v11385_v8, 0.0  ;;  %v6909_v9 = vsel %vm2003_vm3, %v11388_v13, 0.0  ;;  %8254 = vmatpush1.bf16.msra.mxu0 %v8253_v49  ;;  %v7018_v49 = vld [vmem:[#allocation18 + $0x278] sm:$0xff]  ;;  %v8289_v45 = vpack.c.bf16 %v6993_v42, %v6991_v11  ;;  %v7198_v11 = vld [vmem:[%s11677_s27 + $0x38] sm:$0xff]  ;;  %v7215_v42 = vld [vmem:[%s11677_s27 + $0xc0] sm:$0xff] }
0x1398   : > { %v6908_v41 = vadd.f32 %v6907_v56, %v6906_v0  ;;  %v6961_v0 = vld [vmem:[#allocation18 + $0xb0] sm:$0xff]  ;;  %v8307_v56 = vpack.c.bf16 %v7014_v60, %v7012_v27  ;;  %8256 = vmatprep.subr.bf16.mxu0 %v8255_v46  ;;  %v6986_v27 = vld [vmem:[#allocation18 + $0x178] sm:$0xff]  ;;  %v7015_v60 = vld [vmem:[#allocation18 + $0x260] sm:$0xff] }
0x1399   : > { %8306 = vmatpush1.bf16.msra.mxu1 %v8305_v40  ;;  %v8257_v39 = vpack.c.bf16 %v6961_v0, %v6959_v63  ;;  %v6984_v40 = vld [vmem:[#allocation18 + $0x168] sm:$0xff]  ;;  %v7017_v0 = vld [vmem:[#allocation18 + $0x270] sm:$0xff] }
0x139a   : > { %v6910_v32 = vadd.f32 %v6909_v9, %v6908_v41  ;;  %v7011_v41 = vld [vmem:[#allocation18 + $0x240] sm:$0xff]  ;;  %v7013_v9 = vld [vmem:[#allocation18 + $0x250] sm:$0xff]  ;;  %8308 = vmatprep.subr.bf16.mxu1 %v8307_v56  ;;  %v8279_v46 = vpack.c.bf16 %v6986_v27, %v6984_v40 }
0x139b   : > { %v8309_v43 = vpack.c.bf16 %v7013_v9, %v7011_v41  ;;  %8258 = vmatpush1.bf16.msra.mxu0 %v8257_v39  ;;  %v6983_v56 = vld [vmem:[#allocation18 + $0x160] sm:$0xff]  ;;  %v6985_v41 = vld [vmem:[#allocation18 + $0x170] sm:$0xff]  ;;  %v8313_v9 = vpack.c.bf16 %v7017_v0, %v7015_v60 }
0x139c   : > { %6911 = vadd.xlane.f32.xlu1 %v6910_v32  ;;  %v6964_v32 = vld [vmem:[#allocation18 + $0xc8] sm:$0xff]  ;;  %v7033_v40 = vld [vmem:[#allocation18 + $0x2f0] sm:$0xff]  ;;  %v6999_v27 = vld [vmem:[#allocation18 + $0x1e0] sm:$0xff] }
0x139d   : > { %v8259_v3 = vpack.c.bf16 %v6966_v54, %v6964_v32  ;;  %8310 = vmatpush1.bf16.msra.mxu1 %v8309_v43  ;;  %v8281_v32 = vpack.c.bf16 %v6985_v41, %v6983_v56  ;;  %v7020_v54 = vld [vmem:[#allocation18 + $0x288] sm:$0xff]  ;;  %v7022_v43 = vld [vmem:[#allocation18 + $0x298] sm:$0xff]  ;;  %v7001_v60 = vld [vmem:[#allocation18 + $0x1f0] sm:$0xff] }
0x139e   : > { %v8315_v39 = vpack.c.bf16 %v7022_v43, %v7020_v54  ;;  %v8297_v0 = vpack.c.bf16 %v7001_v60, %v6999_v27  ;;  %v7207_v56 = vld [vmem:[%s11677_s27 + $0x80] sm:$0xff]  ;;  %v7208_v41 = vld [vmem:[%s11677_s27 + $0x88] sm:$0xff]  ;;  %v7205_v27 = vld [vmem:[%s11677_s27 + $0x70] sm:$0xff] }
0x139f   : > { %8260 = vmatprep.subr.bf16.mxu0 %v8259_v3  ;;  %v6988_v3 = vld [vmem:[#allocation18 + $0x188] sm:$0xff]  ;;  %v7206_v60 = vld [vmem:[%s11677_s27 + $0x78] sm:$0xff] }
0x13a0   : > { %8262 = vmatpush1.bf16.msra.mxu0 %v8261_v62  ;;  %v8283_v34 = vpack.c.bf16 %v6990_v36, %v6988_v3  ;;  %v6987_v62 = vld [vmem:[#allocation18 + $0x180] sm:$0xff] }
0x13a1   : > { %8264 = vmatprep.subr.bf16.mxu0 %v8263_v12  ;;  %v6989_v12 = vld [vmem:[#allocation18 + $0x190] sm:$0xff] }
0x13a2   : > { %v8285_v22 = vpack.c.bf16 %v6989_v12, %v6987_v62  ;;  %v7209_v62 = vld [vmem:[%s11677_s27 + $0x90] sm:$0xff] }
0x13a4   : > { %8266 = vmatpush1.bf16.msra.mxu0 %v8265_v57  ;;  %v6992_v57 = vld [vmem:[#allocation18 + $0x1a8] sm:$0xff] }
0x13a5   : > { %8268 = vmatprep.subr.bf16.mxu0 %v8267_v31  ;;  %v9450_v31 = vmov 0.0  }
0x13a6   : > { %7182 = vmatprep.mubr.f32.mxu1 %v9450_v31  ;;  %v7193_v31 = vld [vmem:[%s11677_s27 + $0x10] sm:$0xff] }
0x13a8   : > { %8270 = vmatpush1.bf16.msra.mxu0 %v8269_v37  ;;  %v8287_v37 = vpack.c.bf16 %v6994_v6, %v6992_v57  ;;  %v7213_v6 = vld [vmem:[%s11677_s27 + $0xb0] sm:$0xff] }
0x13a9   : > { %8272 = vmatprep.subr.bf16.mxu0 %v8271_v17  ;;  %v8321_v17 = vpack.c.bf16 %v7025_v47, %v7023_v10  ;;  %v7214_v10 = vld [vmem:[%s11677_s27 + $0xb8] sm:$0xff] }
0x13ac   : > { %8274 = vmatpush1.bf16.msra.mxu0 %v8273_v2  ;;  %v7030_v2 = vld [vmem:[#allocation18 + $0x2d8] sm:$0xff] }
0x13ad   : > { %8276 = vmatprep.subr.bf16.mxu0 %v8275_v59  ;;  %v6996_v59 = vld [vmem:[#allocation18 + $0x1c8] sm:$0xff]  ;;  %v8323_v58 = vpack.c.bf16 %v7030_v2, %v7028_v30  ;;  %v7216_v30 = vld [vmem:[%s11677_s27 + $0xc8] sm:$0xff] }
0x13ae   : > { %v8347_v2 = vpack.c.bf16 %v7216_v30, %v7215_v42 }
0x13b0   : > { %8278 = vmatpush1.bf16.msra.mxu0 %v8277_v25  ;;  %v8291_v25 = vpack.c.bf16 %v6998_v7, %v6996_v59  ;;  %v7199_v59 = vld [vmem:[%s11677_s27 + $0x40] sm:$0xff]  ;;  %v7200_v7 = vld [vmem:[%s11677_s27 + $0x48] sm:$0xff] }
0x13b1   : > { %8280 = vmatprep.subr.bf16.mxu0 %v8279_v46 }
0x13b4   : > { %8282 = vmatpush1.bf16.msra.mxu0 %v8281_v32 }
0x13b5   : > { %8284 = vmatprep.subr.bf16.mxu0 %v8283_v34  ;;  %v7191_v34 = vld [vmem:[%s11677_s27] sm:$0xff] }
0x13b8   : > { %8286 = vmatpush1.bf16.msra.mxu0 %v8285_v22 }
0x13b9   : > { %8288 = vmatprep.subr.bf16.mxu0 %v8287_v37  ;;  %v8343_v37 = vpack.c.bf16 %v7214_v10, %v7213_v6 }
0x13bc   : > { %8290 = vmatpush1.bf16.msra.mxu0 %v8289_v45 }
0x13bd   : > { %8292 = vmatprep.subr.bf16.mxu0 %v8291_v25  ;;  %v7218_v25 = vld [vmem:[%s11677_s27 + $0xd8] sm:$0xff] }
0x1429   : > { %v6912_v5 = vpop.xlane.xlu1 %6911 }
0x142a   : > { %v6913_v24 = vmul.f32 0.0026041667, %v6912_v5  ;;  %v7027_v5 = vld [vmem:[#allocation18 + $0x2c0] sm:$0xff] }
0x142c   : > { %v11397_v16 = vsub.f32 %v11382_v44, %v6913_v24  ;;  %v11400_v14 = vsub.f32 %v11385_v8, %v6913_v24  ;;  %v11403_v38 = vsub.f32 %v11388_v13, %v6913_v24  ;;  %v7016_v13 = vld [vmem:[#allocation18 + $0x268] sm:$0xff]  ;;  %v7029_v24 = vld [vmem:[#allocation18 + $0x2d0] sm:$0xff] }
0x142d   : > { %v8311_v63 = vpack.c.bf16 %v7018_v49, %v7016_v13  ;;  %v7031_v13 = vld [vmem:[#allocation18 + $0x2e0] sm:$0xff] }
0x142e   : > { %v6917_v52 = vmul.f32 %v11397_v16, %v11397_v16  ;;  %v6918_v29 = vmul.f32 %v11400_v14, %v11400_v14  ;;  %v6919_v28 = vmul.f32 %v11403_v38, %v11403_v38  ;;  %v8329_v46 = vpack.c.bf16 %v7033_v40, %v7031_v13 }
0x142f   : > { %8312 = vmatprep.subr.bf16.mxu1 %v8311_v63 }
0x1430   : > { %v6920_v51 = vsel %vm2003_vm3, %v6917_v52, 0.0  ;;  %v6921_v44 = vsel %vm2003_vm3, %v6918_v29, 0.0  ;;  %v6923_v8 = vsel %vm2003_vm3, %v6919_v28, 0.0  ;;  %8314 = vmatpush1.bf16.msra.mxu1 %v8313_v9  ;;  %v6995_v52 = vld [vmem:[#allocation18 + $0x1c0] sm:$0xff]  ;;  %v6997_v29 = vld [vmem:[#allocation18 + $0x1d0] sm:$0xff]  ;;  %v7032_v28 = vld [vmem:[#allocation18 + $0x2e8] sm:$0xff]  ;;  %v8331_v9 = vpack.c.bf16 %v7208_v41, %v7207_v56 }
0x1431   : > { %v6922_v55 = vadd.f32 %v6921_v44, %v6920_v51  ;;  %8316 = vmatprep.subr.bf16.mxu1 %v8315_v39  ;;  %v7034_v51 = vld [vmem:[#allocation18 + $0x2f8] sm:$0xff]  ;;  %v8325_v44 = vpack.c.bf16 %v7029_v24, %v7027_v5  ;;  %v8349_v5 = vpack.c.bf16 %v7200_v7, %v7199_v59  ;;  %vm7300_vm3 = vcmask 9216  }
0x1432   : > { %v8327_v49 = vpack.c.bf16 %v7034_v51, %v7032_v28  ;;  %v7219_v51 = vld [vmem:[%s11677_s27 + $0xe0] sm:$0xff] }
0x1433   : > { %v6924_v50 = vadd.f32 %v6923_v8, %v6922_v55  ;;  %v8293_v55 = vpack.c.bf16 %v6997_v29, %v6995_v52  ;;  %v7000_v8 = vld [vmem:[#allocation18 + $0x1e8] sm:$0xff]  ;;  %v7201_v52 = vld [vmem:[%s11677_s27 + $0x50] sm:$0xff]  ;;  %v7202_v29 = vld [vmem:[%s11677_s27 + $0x58] sm:$0xff] }
0x1434   : > { %8318 = vmatpush1.bf16.msra.mxu1 %v8317_v1  ;;  %v8333_v1 = vpack.c.bf16 %v7192_v53, %v7191_v34  ;;  %v8353_v28 = vpack.c.bf16 %v7202_v29, %v7201_v52 }
0x1435   : > { %6925 = vadd.xlane.f32.xlu1 %v6924_v50  ;;  %8320 = vmatprep.subr.bf16.mxu1 %v8319_v61  ;;  %v7002_v50 = vld [vmem:[#allocation18 + $0x1f8] sm:$0xff]  ;;  %v7196_v61 = vld [vmem:[%s11677_s27 + $0x28] sm:$0xff] }
0x1436   : > { %v8295_v63 = vpack.c.bf16 %v7002_v50, %v7000_v8  ;;  %8294 = vmatpush1.bf16.msra.mxu0 %v8293_v55  ;;  %v7203_v8 = vld [vmem:[%s11677_s27 + $0x60] sm:$0xff]  ;;  %v7204_v50 = vld [vmem:[%s11677_s27 + $0x68] sm:$0xff] }
0x1437   : > { %v8357_v13 = vpack.c.bf16 %v7204_v50, %v7203_v8 }
0x1438   : > { %8322 = vmatpush1.bf16.msra.mxu1 %v8321_v17  ;;  %8296 = vmatprep.subr.bf16.mxu0 %v8295_v63  ;;  %v7197_v17 = vld [vmem:[%s11677_s27 + $0x30] sm:$0xff]  ;;  %v7222_v63 = vld [vmem:[%s11677_s27 + $0xf8] sm:$0xff] }
0x1439   : > { %8324 = vmatprep.subr.bf16.mxu1 %v8323_v58  ;;  %v8345_v45 = vpack.c.bf16 %v7198_v11, %v7197_v17  ;;  %v7217_v58 = vld [vmem:[%s11677_s27 + $0xd0] sm:$0xff] }
0x143a   : > { %8298 = vmatpush1.bf16.msra.mxu0 %v8297_v0  ;;  %v8351_v24 = vpack.c.bf16 %v7218_v25, %v7217_v58  ;;  %v7035_v0 = vld [vmem:[#allocation20] sm:$0x3] }
0x143b   : > { %v7040_v56 = vrot.slane %v7035_v0, %v10123_v4  ;;  %v7044_v41 = vrot.slane %v7035_v0, %v10134_v26 }
0x143c   : > { %8326 = vmatpush1.bf16.msra.mxu1 %v8325_v44  ;;  %v7220_v44 = vld [vmem:[%s11677_s27 + $0xe8] sm:$0xff] }
0x143d   : > { %8328 = vmatprep.subr.bf16.mxu1 %v8327_v49  ;;  %v8355_v55 = vpack.c.bf16 %v7220_v44, %v7219_v51  ;;  %v7221_v49 = vld [vmem:[%s11677_s27 + $0xf0] sm:$0xff] }
0x143e   : > { %v8359_v40 = vpack.c.bf16 %v7222_v63, %v7221_v49 }
0x1440   : > { %8330 = vmatpush1.bf16.msra.mxu1 %v8329_v46  ;;  %v8361_v46 = vpack.c.bf16 %v7206_v60, %v7205_v27 }
0x1441   : > { %8332 = vmatprep.subr.bf16.mxu1 %v8331_v9 }
0x14c2   : > { %v6926_v32 = vpop.xlane.xlu1 %6925 }
0x14c3   : > { %v6927_v54 = vmul.f32 0.0026041667, %v6926_v32 }
0x14c5   : > { %v6928_v43 = vadd.f32 1e-06, %v6927_v54 }
0x14c7   : > { %8921 = vrsqrt.f32 %v6928_v43 }
0x14d1   : > { %v8922_v39 = vpop.eup %8921 }
0x14d2   : > { %v6931_v3 = vmul.f32 %v8922_v39, %v11400_v14  ;;  %v6932_v36 = vmul.f32 %v8922_v39, %v11403_v38  ;;  %v6930_v23 = vmul.f32 %v8922_v39, %v11397_v16  ;;  %v7210_v14 = vld [vmem:[%s11677_s27 + $0x98] sm:$0xff] }
0x14d3   : > { %v8335_v57 = vpack.c.bf16 %v7210_v14, %v7209_v62  ;;  %v7696_v14 = vld [vmem:[#allocation21] ss:$0 sm:$0xff] }
0x14d4   : > { %v6934_v38 = vmul.f32 %v6931_v3, %v11364_v20  ;;  %v6935_v16 = vmul.f32 %v6932_v36, %v11367_v15  ;;  %v6933_v12 = vmul.f32 %v6930_v23, %v11361_v21  ;;  %v7194_v20 = vld [vmem:[%s11677_s27 + $0x18] sm:$0xff]  ;;  %v7211_v21 = vld [vmem:[%s11677_s27 + $0xa0] sm:$0xff]  ;;  %v7212_v15 = vld [vmem:[%s11677_s27 + $0xa8] sm:$0xff] }
0x14d6   : > { %v6937_v22 = vadd.f32 %v6934_v38, %v11373_v35  ;;  %v6938_v18 = vadd.f32 %v6935_v16, %v11376_v19  ;;  %v6936_v48 = vadd.f32 %v6933_v12, %v11370_v33  ;;  %v8337_v33 = vpack.c.bf16 %v7194_v20, %v7193_v31  ;;  %v7195_v19 = vld [vmem:[%s11677_s27 + $0x20] sm:$0xff] }
0x14d7   : > { %v8339_v35 = vpack.c.bf16 %v7212_v15, %v7211_v21  ;;  %v8341_v47 = vpack.c.bf16 %v7196_v61, %v7195_v19 }
0x14d8   : > { %7111 = vmatprep.mubr.f32.mxu0 %v6937_v22  ;;  %7183 = vmatmul.mubr.f32.vlgmr.msra.gmra.mrb[0].mxu1 %v6938_v18 }
0x14d9   : > { %7112 = vmatmul.mubr.f32.vlgmr.msra.gmra.mrb[0].mxu0 %v6936_v48  ;;  %8334 = vmatpush3.bf16.msra.mxu1 %v8333_v1 }
0x14da   : > { %8336 = vmatprep.subr.bf16.mxu1 %v8335_v57 }
0x14dd   : > { %8338 = vmatpush3.bf16.msra.mxu1 %v8337_v33 }
0x14de   : > { %8340 = vmatprep.subr.bf16.mxu1 %v8339_v35 }
0x14e1   : > { %8342 = vmatpush3.bf16.msra.mxu1 %v8341_v47 }
0x14e2   : > { %8344 = vmatprep.subr.bf16.mxu1 %v8343_v37 }
0x14e5   : > { %8346 = vmatpush3.bf16.msra.mxu1 %v8345_v45 }
0x14e6   : > { %8348 = vmatprep.subr.bf16.mxu1 %v8347_v2 }
0x14e9   : > { %8350 = vmatpush3.bf16.msra.mxu1 %v8349_v5 }
0x14ea   : > { %8352 = vmatprep.subr.bf16.mxu1 %v8351_v24 }
0x14ed   : > { %8354 = vmatpush3.bf16.msra.mxu1 %v8353_v28 }
0x14ee   : > { %8356 = vmatprep.subr.bf16.mxu1 %v8355_v55 }
0x14f1   : > { %8358 = vmatpush3.bf16.msra.mxu1 %v8357_v13 }
0x14f2   : > { %8360 = vmatprep.subr.bf16.mxu1 %v8359_v40 }
0x14f5   : > { %8362 = vmatpush3.bf16.msra.mxu1 %v8361_v46 }
0x15ab   : > { %v7184_v9 = vpop.f32.mrb[0].mxu1 }
0x15ac   : > { %v7113_v32 = vpop.f32.mrb[0].mxu0  ;;  %v7186_v54 = vpop.f32.mrb[1].mxu1 }
0x15ad   : > { %v7114_v43 = vadd.f32 %v7113_v32, %v7040_v56  ;;  %v7115_v39 = vpop.f32.mrb[1].mxu0 }
0x15ae   : > { %v7116_v3 = vadd.f32 %v7115_v39, %v7044_v41 }
0x15af   : > { %v7185_v36 = vadd.f32 %v7184_v9, %v7114_v43 }
0x15b0   : > { %v7187_v23 = vadd.f32 %v7186_v54, %v7116_v3 }
0x15b1   : > { %v7189_v53 = vmax.f32 %v7185_v36, 0.0 }
0x15b2   : > { %v7190_v34 = vmax.f32 %v7187_v23, 0.0 }
0x15b4   : > { %7294 = vmatprep.mubr.f32.mxu1 %v7190_v34 }
0x15b5   : > { %7295 = vmatmul.mubr.f32.vlgmr.msra.gmra.mrb[2].mxu1 %v7189_v53 }
0x1688   : > { %v8028_v62 = vpop.f32.mrb[2].mxu1 }
0x1689   : > { %v8029_v38 = vpop.f32.mrb[3].mxu1 }
0x168a   : > { %v8030_v16 = vadd.f32 %v8029_v38, %v8028_v62 }
0x168c   : > { %v7297_v4 = vadd.f32 %v8030_v16, %v7696_v14 }
0x168e   : > { %7301 = vst.msk [vmem:[#allocation23] sm:$0x3] %vm7300_vm3, %v7297_v4 }
0x168f PF: > { %s11678_s28 = sld [smem:[#allocation35_spill]]  ;;  %s9451_s15 = smov [#allocation23]  }
0x1690   : > { %s7309_s24 = sshll.u32 %s9451_s15, 4  ;;  %s7310_s24 = int_to_ptr.vmem [resolvable:$true] %s7309_s24 }
0x1691   : > { %s9325_s9 = scalar_lea.vmem %s7310_s24, 32  ;;  %p9332_p12 = scmp.lt.s32.totalorder %s7310_s24, %s7310_s24 }
0x1692   : > { %p9326_p5 = scmp.ne.s32.totalorder %s7310_s24, %s9325_s9  ;;  %p9333_p8 = scmp.lt.s32.totalorder %s9325_s9, %s9325_s9 }
0x1694   : > { %p9334_p9 = por %p9333_p8, %p9332_p12 }
0x1695   : > { %p8572_p0 = scmp.eq.s32.totalorder %s11678_s28, 11 }
0x1697   : > { %p9327_p3 = pnand %p9326_p5, %p8572_p0 }
0x1699   : > { %p9328_p4 = pneg %p9327_p3 }
0x169b   : > { %p9335_p1 = pnand %p9334_p9, %p9328_p4 }
0x169d   : > { %9338 = shalt.err (!%p9335_p1)
}
0x169e   : > { %s11679_s1 = sld [smem:[#allocation47_spill]] }
0x16a4   : > { %s9339_s17 = scalar_lea.hbm %s11679_s1, 32 }
0x16a5   : > { %p9340_p11 = scmp.ne.s32.totalorder %s11679_s1, %s9339_s17  ;;  %p9345_p2 = scmp.lt.u32.totalorder %s9339_s17, %s11679_s1 }
0x16a7   : > { %p9341_p7 = pnand %p9340_p11, %p8572_p0 }
0x16a9   : > { %p9342_p6 = pneg %p9341_p7 }
0x16ab   : > { %p9347_p13 = pnand %p9345_p2, %p9342_p6 }
0x16ad   : > { %9350 = shalt.err (!%p9347_p13)
}
0x16ae   : > { %8506 = dma.vmem_to_hbm [thread:$0]  (%p8572_p0), %s7310_s24, 32, %s11679_s1, [#allocation5]  }
0x16af   : > { %9400 = dma.done.wait (%p8572_p0), [#allocation5], 32  }
0x16b0   : > { %9402 = vsyncadd (%p8572_p0), [#allocation5], 4294967264 }
0x16b1 PF: > { %s11680_s24 = sld [smem:[#allocation37_spill]]  ;;  %s11681_s21 = sld [smem:[#allocation33_spill]] }
0x16b2   : > { %s11682_s22 = sld [smem:[#allocation34_spill]]  ;;  %s11683_s23 = sld [smem:[#allocation38_spill]] }
0x16b7   : > { %p29_p10 = scmp.ge.s32.totalorder %s11680_s24, 14  }
0x16b9   :  { %31 = sbr.rel (!%p29_p10) target bundleno = 16 (0x10), region = 209 }
0x16c0   :  { %7322 = vsyncpa [#allocation4], 1 }
0x16c1   :  { %7324 = vsyncpa [#allocation4 + $0x1], 1 }
0x16c2   :  { %7325 = vsyncpa [#allocation7], 1 }
0x16c3   :  { %7326 = vsyncpa [#allocation10], 1 }
0x16c4   :  { %7327 = vsyncpa [#allocation19], 1 }
0x16c5   :  { %7328 = vsyncpa [#allocation22], 1 }
0x16c6   :  { %7329 = vsyncpa [#allocation5], 1 }
0x16c7   :  { %7331 = vsyncpa [#allocation5 + $0x1], 1 }

</bundles_post_ra>
